<compile_context>
chip_gen: v5e
topology: v5e:2x2
jax: 0.10.0
libtpu: 0.0.40
codegen_flags: <defaults>
</compile_context>

<pallas_src>
import functools

import jax
import jax.numpy as jnp
import numpy as np
from jax.experimental import pallas as pl
from jax.experimental.pallas import tpu as pltpu

EPS = 1e-5
NEG_INF = -1e30  # large finite negative: avoids inf-inf -> NaN in max-subtracted softmax

_BLOCK_PARAM_ORDER = ('g1', 'be1', 'wq', 'wk', 'wv', 'wp', 'bp',
                      'g2', 'be2', 'w1', 'bb1', 'w2', 'bb2')


def _layer_norm(x, g, b):
    mu = jnp.mean(x, axis=-1, keepdims=True)
    var = jnp.mean((x - mu) ** 2, axis=-1, keepdims=True)
    return (x - mu) * jax.lax.rsqrt(var + EPS) * g + b


def _softmax_last(x):
    m = jnp.max(x, axis=-1, keepdims=True)
    p = jnp.exp(x - m)
    return p / jnp.sum(p, axis=-1, keepdims=True)


# ----------------------------------------------------------------------------
# Fully fused forward kernel: n_layer x (x = x + MHA(LN1(x)); x = x + FFN(LN2(x)))
# followed by final LayerNorm + lm_head. Single invocation (no grid).
#
# Ref layout:
#   refs[0]                        : x (B*T, C) input (token + position embeddings)
#   refs[1 : 1 + 13*n_layer]       : per-block params, 13 each, _BLOCK_PARAM_ORDER
#   next 4                         : g_f, be_f, w_lm (C, Vp), b_lm (1, Vp)
#   last 1                         : o_ref (B*T, Vp) output (padded logits)
# ----------------------------------------------------------------------------
def _forward_kernel(*refs, n_layer, n_heads, B, T, C):
    n_bp = len(_BLOCK_PARAM_ORDER)
    x_ref = refs[0]
    blocks = [refs[1 + l * n_bp: 1 + (l + 1) * n_bp] for l in range(n_layer)]
    base = 1 + n_layer * n_bp
    g_f, be_f, w_lm, b_lm = refs[base: base + 4]
    o_ref = refs[base + 4]

    hs = C // n_heads
    x = x_ref[...].astype(jnp.float32)                     # (B*T, C)

    # Causal mask: computed once for the whole forward pass.
    row = jax.lax.broadcasted_iota(jnp.int32, (T, T), 0)
    col = jax.lax.broadcasted_iota(jnp.int32, (T, T), 1)
    causal = col <= row
    scale = jnp.float32(C ** (-0.5))                       # NOTE: n_embed, not head_size
    dn = (((1,), (1,)), ((), ()))                          # contract last dims: q @ k.T

    for (g1, be1, wq, wk, wv, wp, bp, g2, be2, w1, bb1, w2, bb2) in blocks:
        # --- multi-head causal self-attention on LN1(x) ---
        y = _layer_norm(x, g1[...], be1[...])              # (B*T, C)
        # Fused lane-dense projections: one (B*T, C) @ (C, C) matmul per Q/K/V.
        q = jnp.dot(y, wq[...], preferred_element_type=jnp.float32)
        k = jnp.dot(y, wk[...], preferred_element_type=jnp.float32)
        v = jnp.dot(y, wv[...], preferred_element_type=jnp.float32)

        batch_outs = []
        for b in range(B):                                 # static unroll (tiny B)
            rs = b * T
            head_outs = []
            for h in range(n_heads):                       # static unroll over heads
                cs = h * hs
                qh = q[rs:rs + T, cs:cs + hs]
                kh = k[rs:rs + T, cs:cs + hs]
                vh = v[rs:rs + T, cs:cs + hs]
                wei = jax.lax.dot_general(
                    qh, kh, dn, preferred_element_type=jnp.float32) * scale   # (T, T)
                wei = jnp.where(causal, wei, NEG_INF)
                wei = _softmax_last(wei)
                head_outs.append(
                    jnp.dot(wei, vh, preferred_element_type=jnp.float32))     # (T, hs)
            batch_outs.append(jnp.concatenate(head_outs, axis=-1))            # (T, C)

        att = jnp.concatenate(batch_outs, axis=0)          # (B*T, C)
        sa = jnp.dot(att, wp[...], preferred_element_type=jnp.float32) + bp[...]
        x = x + sa

        # --- feed-forward on LN2(x) ---
        y2 = _layer_norm(x, g2[...], be2[...])
        h1 = jnp.maximum(
            jnp.dot(y2, w1[...], preferred_element_type=jnp.float32) + bb1[...], 0.0)
        x = x + jnp.dot(h1, w2[...], preferred_element_type=jnp.float32) + bb2[...]

    # --- final LayerNorm + lm_head (lane-dense padded vocab output) ---
    y = _layer_norm(x, g_f[...], be_f[...])
    o_ref[...] = jnp.dot(y, w_lm[...], preferred_element_type=jnp.float32) + b_lm[...]


# ----------------------------------------------------------------------------
# Wrapper
# ----------------------------------------------------------------------------
def bigram_forward(idx, params, targets=None):
    """Forward pass of BigrammModel. Returns (logits, loss)."""
    B, T = idx.shape
    C = params['tok_emb'].shape[1]
    V = params['w_lm'].shape[1]
    n_heads = params['n_heads']
    n_layer = len(params['blocks'])

    # Embedding gather + positional add stays in plain JAX (glue around the kernel).
    tok = jnp.take(params['tok_emb'], idx, axis=0)          # (B, T, C)
    pos = params['pos_emb'][:T][None, :, :]                  # (1, T, C)
    x = (tok + pos).astype(jnp.float32).reshape(B * T, C)    # fold B into M

    # Pad vocab dim to a lane-dense multiple of 128 for unmasked output stores.
    Vp = ((V + 127) // 128) * 128
    w_lm = jnp.pad(params['w_lm'], ((0, 0), (0, Vp - V)))
    b_lm = jnp.pad(params['b_lm'], ((0, 0), (0, Vp - V)))

    flat = []
    for blk in params['blocks']:
        flat.extend(blk[name] for name in _BLOCK_PARAM_ORDER)
    flat.extend([params['g_f'], params['be_f'], w_lm, b_lm])

    kernel = functools.partial(_forward_kernel, n_layer=n_layer,
                               n_heads=n_heads, B=B, T=T, C=C)
    vmem = pl.BlockSpec(memory_space=pltpu.MemorySpace.VMEM)   # whole array in VMEM
    logits_pad = pl.pallas_call(
        kernel,
        out_shape=jax.ShapeDtypeStruct((B * T, Vp), jnp.float32),
        in_specs=[vmem] * (1 + len(flat)),
        out_specs=vmem,
    )(x, *flat)

    logits = logits_pad[:, :V].reshape(B, T, V)

    if targets is None:
        loss = None
    else:
        logp = jax.nn.log_softmax(logits.reshape(B * T, V), axis=-1)
        loss = -jnp.mean(jnp.take_along_axis(
            logp, targets.reshape(B * T, 1), axis=-1))
    return logits, loss


# ----------------------------------------------------------------------------
# Deterministic parameter init (synthetic weights; shapes follow the module).
# Per-head Q/K/V weights are stored lane-dense: columns h*hs:(h+1)*hs = head h.
# ----------------------------------------------------------------------------
def init_params(key, vocab_size, n_embed, context_length, n_heads, n_layer):
    keys = jax.random.split(key, 6 + n_layer)

    def randn(k, shape, scale=0.02):
        return (scale * jax.random.normal(k, shape)).astype(jnp.float32)

    params = {
        'n_heads': n_heads,
        'tok_emb': randn(keys[0], (vocab_size, n_embed)),
        'pos_emb': randn(keys[1], (context_length, n_embed)),
        'w_lm': randn(keys[2], (n_embed, vocab_size)),
        'b_lm': randn(keys[3], (1, vocab_size)),
        'g_f': 1.0 + randn(keys[4], (1, n_embed)),
        'be_f': randn(keys[5], (1, n_embed)),
        'blocks': [],
    }
    for l in range(n_layer):
        k = jax.random.split(keys[6 + l], 13)
        blk = dict(
            g1=1.0 + randn(k[0], (1, n_embed)),
            be1=randn(k[1], (1, n_embed)),
            wq=randn(k[2], (n_embed, n_embed)),
            wk=randn(k[3], (n_embed, n_embed)),
            wv=randn(k[4], (n_embed, n_embed)),
            wp=randn(k[5], (n_embed, n_embed)),
            bp=randn(k[6], (1, n_embed)),
            g2=1.0 + randn(k[7], (1, n_embed)),
            be2=randn(k[8], (1, n_embed)),
            w1=randn(k[9], (n_embed, 4 * n_embed)),
            bb1=randn(k[10], (1, 4 * n_embed)),
            w2=randn(k[11], (4 * n_embed, n_embed)),
            bb2=randn(k[12], (1, n_embed)),
        )
        params['blocks'].append(blk)
    return params


# ----------------------------------------------------------------------------
# Pure-JAX reference (same math, same weight layout) for a correctness check.
# ----------------------------------------------------------------------------
def reference_forward(idx, params):
    def ln(v, g, b):
        mu = v.mean(-1, keepdims=True)
        var = ((v - mu) ** 2).mean(-1, keepdims=True)
        return (v - mu) / jnp.sqrt(var + EPS) * g + b

    B, T = idx.shape
    x = params['tok_emb'][idx] + params['pos_emb'][:T][None]
    C = x.shape[-1]
    n_heads = params['n_heads']
    hs = C // n_heads
    mask = jnp.tril(jnp.ones((T, T), bool))
    for blk in params['blocks']:
        y = ln(x, blk['g1'], blk['be1'])
        q = y @ blk['wq']
        k = y @ blk['wk']
        v = y @ blk['wv']
        outs = []
        for h in range(n_heads):
            qh = q[..., h * hs:(h + 1) * hs]
            kh = k[..., h * hs:(h + 1) * hs]
            vh = v[..., h * hs:(h + 1) * hs]
            wei = jnp.einsum('btd,bsd->bts', qh, kh) * (C ** -0.5)
            wei = jnp.where(mask, wei, -jnp.inf)
            wei = jax.nn.softmax(wei, axis=-1)
            outs.append(jnp.einsum('bts,bsd->btd', wei, vh))
        att = jnp.concatenate(outs, axis=-1)
        x = x + att @ blk['wp'] + blk['bp']
        y2 = ln(x, blk['g2'], blk['be2'])
        x = x + jnp.maximum(y2 @ blk['w1'] + blk['bb1'], 0.0) @ blk['w2'] + blk['bb2']
    y = ln(x, params['g_f'], params['be_f'])
    return y @ params['w_lm'] + params['b_lm']


if __name__ == "__main__":
    # Small, module-consistent shapes (scaled-down hyperparameters).
    B, T = 2, 16
    vocab_size = 65
    n_embed = 48          # 6 heads * head_size 8
    context_length = 16
    n_heads = 6
    n_layer = 2

    key = jax.random.PRNGKey(0)
    pkey, ikey = jax.random.split(key)
    params = init_params(pkey, vocab_size, n_embed, context_length, n_heads, n_layer)
    idx = jax.random.randint(ikey, (B, T), 0, vocab_size, dtype=jnp.int32)

    logits, loss = bigram_forward(idx, params)
    logits = jax.block_until_ready(logits)
    assert logits.shape == (B, T, vocab_size)
    assert loss is None

    ref = jax.block_until_ready(reference_forward(idx, params))
    np.testing.assert_allclose(np.asarray(logits), np.asarray(ref), atol=1e-3, rtol=1e-3)

    print("KERNEL_OK")
</pallas_src>

<mosaic_0001>
module attributes {stable_mosaic.version = 11 : i64} {
  func.func @_forward_kernel(%arg0: memref<32x48xf32, #tpu.memory_space<vmem>>, %arg1: memref<1x48xf32, #tpu.memory_space<vmem>>, %arg2: memref<1x48xf32, #tpu.memory_space<vmem>>, %arg3: memref<48x48xf32, #tpu.memory_space<vmem>>, %arg4: memref<48x48xf32, #tpu.memory_space<vmem>>, %arg5: memref<48x48xf32, #tpu.memory_space<vmem>>, %arg6: memref<48x48xf32, #tpu.memory_space<vmem>>, %arg7: memref<1x48xf32, #tpu.memory_space<vmem>>, %arg8: memref<1x48xf32, #tpu.memory_space<vmem>>, %arg9: memref<1x48xf32, #tpu.memory_space<vmem>>, %arg10: memref<48x192xf32, #tpu.memory_space<vmem>>, %arg11: memref<1x192xf32, #tpu.memory_space<vmem>>, %arg12: memref<192x48xf32, #tpu.memory_space<vmem>>, %arg13: memref<1x48xf32, #tpu.memory_space<vmem>>, %arg14: memref<1x48xf32, #tpu.memory_space<vmem>>, %arg15: memref<1x48xf32, #tpu.memory_space<vmem>>, %arg16: memref<48x48xf32, #tpu.memory_space<vmem>>, %arg17: memref<48x48xf32, #tpu.memory_space<vmem>>, %arg18: memref<48x48xf32, #tpu.memory_space<vmem>>, %arg19: memref<48x48xf32, #tpu.memory_space<vmem>>, %arg20: memref<1x48xf32, #tpu.memory_space<vmem>>, %arg21: memref<1x48xf32, #tpu.memory_space<vmem>>, %arg22: memref<1x48xf32, #tpu.memory_space<vmem>>, %arg23: memref<48x192xf32, #tpu.memory_space<vmem>>, %arg24: memref<1x192xf32, #tpu.memory_space<vmem>>, %arg25: memref<192x48xf32, #tpu.memory_space<vmem>>, %arg26: memref<1x48xf32, #tpu.memory_space<vmem>>, %arg27: memref<1x48xf32, #tpu.memory_space<vmem>>, %arg28: memref<1x48xf32, #tpu.memory_space<vmem>>, %arg29: memref<48x128xf32, #tpu.memory_space<vmem>>, %arg30: memref<1x128xf32, #tpu.memory_space<vmem>>, %arg31: memref<32x128xf32, #tpu.memory_space<vmem>>) attributes {dimension_semantics = [], scalar_prefetch = 0 : i64, scratch_operands = 0 : i64, tpu.core_type = #tpu.core_type<tc>} {
    %c0 = arith.constant 0 : index
    %c0_0 = arith.constant 0 : index
    %0 = vector.load %arg0[%c0, %c0_0] : memref<32x48xf32, #tpu.memory_space<vmem>>, vector<32x48xf32>
    %1 = tpu.iota {dimensions = array<i32: 0>} : vector<16x16xi32>
    %2 = tpu.iota {dimensions = array<i32: 1>} : vector<16x16xi32>
    %3 = arith.cmpi sle, %2, %1 : vector<16x16xi32>
    %c0_1 = arith.constant 0 : index
    %c0_2 = arith.constant 0 : index
    %4 = vector.load %arg1[%c0_1, %c0_2] : memref<1x48xf32, #tpu.memory_space<vmem>>, vector<1x48xf32>
    %c0_3 = arith.constant 0 : index
    %c0_4 = arith.constant 0 : index
    %5 = vector.load %arg2[%c0_3, %c0_4] : memref<1x48xf32, #tpu.memory_space<vmem>>, vector<1x48xf32>
    %cst = arith.constant dense<0.000000e+00> : vector<32xf32>
    %6 = vector.multi_reduction <add>, %0, %cst [1] : vector<32x48xf32> to vector<32xf32>
    %7 = vector.shape_cast %6 : vector<32xf32> to vector<32x1xf32>
    %cst_5 = arith.constant 4.800000e+01 : f32
    %8 = vector.broadcast %cst_5 : f32 to vector<32x1xf32>
    %9 = arith.divf %7, %8 : vector<32x1xf32>
    %10 = vector.broadcast %9 : vector<32x1xf32> to vector<32x48xf32>
    %11 = arith.subf %0, %10 : vector<32x48xf32>
    %12 = arith.mulf %11, %11 : vector<32x48xf32>
    %cst_6 = arith.constant dense<0.000000e+00> : vector<32xf32>
    %13 = vector.multi_reduction <add>, %12, %cst_6 [1] : vector<32x48xf32> to vector<32xf32>
    %14 = vector.shape_cast %13 : vector<32xf32> to vector<32x1xf32>
    %cst_7 = arith.constant 4.800000e+01 : f32
    %15 = vector.broadcast %cst_7 : f32 to vector<32x1xf32>
    %16 = arith.divf %14, %15 : vector<32x1xf32>
    %17 = vector.broadcast %9 : vector<32x1xf32> to vector<32x48xf32>
    %18 = arith.subf %0, %17 : vector<32x48xf32>
    %cst_8 = arith.constant 9.99999974E-6 : f32
    %19 = vector.broadcast %cst_8 : f32 to vector<32x1xf32>
    %20 = arith.addf %16, %19 : vector<32x1xf32>
    %21 = math.rsqrt %20 : vector<32x1xf32>
    %22 = vector.broadcast %21 : vector<32x1xf32> to vector<32x48xf32>
    %23 = arith.mulf %18, %22 : vector<32x48xf32>
    %24 = vector.broadcast %4 : vector<1x48xf32> to vector<32x48xf32>
    %25 = arith.mulf %23, %24 : vector<32x48xf32>
    %26 = vector.broadcast %5 : vector<1x48xf32> to vector<32x48xf32>
    %27 = arith.addf %25, %26 : vector<32x48xf32>
    %c0_9 = arith.constant 0 : index
    %c0_10 = arith.constant 0 : index
    %28 = vector.load %arg3[%c0_9, %c0_10] : memref<48x48xf32, #tpu.memory_space<vmem>>, vector<48x48xf32>
    %cst_11 = arith.constant dense<0.000000e+00> : vector<32x48xf32>
    %29 = tpu.matmul %27, %28, %cst_11 {dimension_numbers = #tpu.dot_dimension_numbers<[1], [0], [0], [1], [0, 0, 1, 1], [], []>} : vector<32x48xf32>, vector<48x48xf32>, vector<32x48xf32> -> vector<32x48xf32>
    %c0_12 = arith.constant 0 : index
    %c0_13 = arith.constant 0 : index
    %30 = vector.load %arg4[%c0_12, %c0_13] : memref<48x48xf32, #tpu.memory_space<vmem>>, vector<48x48xf32>
    %cst_14 = arith.constant dense<0.000000e+00> : vector<32x48xf32>
    %31 = tpu.matmul %27, %30, %cst_14 {dimension_numbers = #tpu.dot_dimension_numbers<[1], [0], [0], [1], [0, 0, 1, 1], [], []>} : vector<32x48xf32>, vector<48x48xf32>, vector<32x48xf32> -> vector<32x48xf32>
    %c0_15 = arith.constant 0 : index
    %c0_16 = arith.constant 0 : index
    %32 = vector.load %arg5[%c0_15, %c0_16] : memref<48x48xf32, #tpu.memory_space<vmem>>, vector<48x48xf32>
    %cst_17 = arith.constant dense<0.000000e+00> : vector<32x48xf32>
    %33 = tpu.matmul %27, %32, %cst_17 {dimension_numbers = #tpu.dot_dimension_numbers<[1], [0], [0], [1], [0, 0, 1, 1], [], []>} : vector<32x48xf32>, vector<48x48xf32>, vector<32x48xf32> -> vector<32x48xf32>
    %34 = vector.extract_strided_slice %29 {offsets = [0, 0], sizes = [16, 8], strides = [1, 1]} : vector<32x48xf32> to vector<16x8xf32>
    %35 = vector.extract_strided_slice %31 {offsets = [0, 0], sizes = [16, 8], strides = [1, 1]} : vector<32x48xf32> to vector<16x8xf32>
    %36 = vector.extract_strided_slice %33 {offsets = [0, 0], sizes = [16, 8], strides = [1, 1]} : vector<32x48xf32> to vector<16x8xf32>
    %cst_18 = arith.constant dense<0.000000e+00> : vector<16x16xf32>
    %37 = tpu.matmul %34, %35, %cst_18 {dimension_numbers = #tpu.dot_dimension_numbers<[1], [1], [0], [0], [0, 0, 1, 0], [], []>} : vector<16x8xf32>, vector<16x8xf32>, vector<16x16xf32> -> vector<16x16xf32>
    %cst_19 = arith.constant 0.144337565 : f32
    %38 = vector.broadcast %cst_19 : f32 to vector<16x16xf32>
    %39 = arith.mulf %37, %38 : vector<16x16xf32>
    %cst_20 = arith.constant -1.000000e+30 : f32
    %40 = vector.broadcast %cst_20 : f32 to vector<16x16xf32>
    %41 = arith.select %3, %39, %40 : vector<16x16xi1>, vector<16x16xf32>
    %cst_21 = arith.constant dense<0xFF800000> : vector<16xf32>
    %42 = vector.multi_reduction <maximumf>, %41, %cst_21 [1] : vector<16x16xf32> to vector<16xf32>
    %43 = vector.shape_cast %42 : vector<16xf32> to vector<16x1xf32>
    %44 = vector.broadcast %43 : vector<16x1xf32> to vector<16x16xf32>
    %45 = arith.subf %41, %44 : vector<16x16xf32>
    %46 = math.exp %45 : vector<16x16xf32>
    %cst_22 = arith.constant dense<0.000000e+00> : vector<16xf32>
    %47 = vector.multi_reduction <add>, %46, %cst_22 [1] : vector<16x16xf32> to vector<16xf32>
    %48 = vector.shape_cast %47 : vector<16xf32> to vector<16x1xf32>
    %49 = vector.broadcast %48 : vector<16x1xf32> to vector<16x16xf32>
    %50 = arith.divf %46, %49 : vector<16x16xf32>
    %cst_23 = arith.constant dense<0.000000e+00> : vector<16x8xf32>
    %51 = tpu.matmul %50, %36, %cst_23 {dimension_numbers = #tpu.dot_dimension_numbers<[1], [0], [0], [1], [0, 0, 1, 1], [], []>} : vector<16x16xf32>, vector<16x8xf32>, vector<16x8xf32> -> vector<16x8xf32>
    %52 = vector.extract_strided_slice %29 {offsets = [0, 8], sizes = [16, 8], strides = [1, 1]} : vector<32x48xf32> to vector<16x8xf32>
    %53 = vector.extract_strided_slice %31 {offsets = [0, 8], sizes = [16, 8], strides = [1, 1]} : vector<32x48xf32> to vector<16x8xf32>
    %54 = vector.extract_strided_slice %33 {offsets = [0, 8], sizes = [16, 8], strides = [1, 1]} : vector<32x48xf32> to vector<16x8xf32>
    %cst_24 = arith.constant dense<0.000000e+00> : vector<16x16xf32>
    %55 = tpu.matmul %52, %53, %cst_24 {dimension_numbers = #tpu.dot_dimension_numbers<[1], [1], [0], [0], [0, 0, 1, 0], [], []>} : vector<16x8xf32>, vector<16x8xf32>, vector<16x16xf32> -> vector<16x16xf32>
    %cst_25 = arith.constant 0.144337565 : f32
    %56 = vector.broadcast %cst_25 : f32 to vector<16x16xf32>
    %57 = arith.mulf %55, %56 : vector<16x16xf32>
    %cst_26 = arith.constant -1.000000e+30 : f32
    %58 = vector.broadcast %cst_26 : f32 to vector<16x16xf32>
    %59 = arith.select %3, %57, %58 : vector<16x16xi1>, vector<16x16xf32>
    %cst_27 = arith.constant dense<0xFF800000> : vector<16xf32>
    %60 = vector.multi_reduction <maximumf>, %59, %cst_27 [1] : vector<16x16xf32> to vector<16xf32>
    %61 = vector.shape_cast %60 : vector<16xf32> to vector<16x1xf32>
    %62 = vector.broadcast %61 : vector<16x1xf32> to vector<16x16xf32>
    %63 = arith.subf %59, %62 : vector<16x16xf32>
    %64 = math.exp %63 : vector<16x16xf32>
    %cst_28 = arith.constant dense<0.000000e+00> : vector<16xf32>
    %65 = vector.multi_reduction <add>, %64, %cst_28 [1] : vector<16x16xf32> to vector<16xf32>
    %66 = vector.shape_cast %65 : vector<16xf32> to vector<16x1xf32>
    %67 = vector.broadcast %66 : vector<16x1xf32> to vector<16x16xf32>
    %68 = arith.divf %64, %67 : vector<16x16xf32>
    %cst_29 = arith.constant dense<0.000000e+00> : vector<16x8xf32>
    %69 = tpu.matmul %68, %54, %cst_29 {dimension_numbers = #tpu.dot_dimension_numbers<[1], [0], [0], [1], [0, 0, 1, 1], [], []>} : vector<16x16xf32>, vector<16x8xf32>, vector<16x8xf32> -> vector<16x8xf32>
    %70 = vector.extract_strided_slice %29 {offsets = [0, 16], sizes = [16, 8], strides = [1, 1]} : vector<32x48xf32> to vector<16x8xf32>
    %71 = vector.extract_strided_slice %31 {offsets = [0, 16], sizes = [16, 8], strides = [1, 1]} : vector<32x48xf32> to vector<16x8xf32>
    %72 = vector.extract_strided_slice %33 {offsets = [0, 16], sizes = [16, 8], strides = [1, 1]} : vector<32x48xf32> to vector<16x8xf32>
    %cst_30 = arith.constant dense<0.000000e+00> : vector<16x16xf32>
    %73 = tpu.matmul %70, %71, %cst_30 {dimension_numbers = #tpu.dot_dimension_numbers<[1], [1], [0], [0], [0, 0, 1, 0], [], []>} : vector<16x8xf32>, vector<16x8xf32>, vector<16x16xf32> -> vector<16x16xf32>
    %cst_31 = arith.constant 0.144337565 : f32
    %74 = vector.broadcast %cst_31 : f32 to vector<16x16xf32>
    %75 = arith.mulf %73, %74 : vector<16x16xf32>
    %cst_32 = arith.constant -1.000000e+30 : f32
    %76 = vector.broadcast %cst_32 : f32 to vector<16x16xf32>
    %77 = arith.select %3, %75, %76 : vector<16x16xi1>, vector<16x16xf32>
    %cst_33 = arith.constant dense<0xFF800000> : vector<16xf32>
    %78 = vector.multi_reduction <maximumf>, %77, %cst_33 [1] : vector<16x16xf32> to vector<16xf32>
    %79 = vector.shape_cast %78 : vector<16xf32> to vector<16x1xf32>
    %80 = vector.broadcast %79 : vector<16x1xf32> to vector<16x16xf32>
    %81 = arith.subf %77, %80 : vector<16x16xf32>
    %82 = math.exp %81 : vector<16x16xf32>
    %cst_34 = arith.constant dense<0.000000e+00> : vector<16xf32>
    %83 = vector.multi_reduction <add>, %82, %cst_34 [1] : vector<16x16xf32> to vector<16xf32>
    %84 = vector.shape_cast %83 : vector<16xf32> to vector<16x1xf32>
    %85 = vector.broadcast %84 : vector<16x1xf32> to vector<16x16xf32>
    %86 = arith.divf %82, %85 : vector<16x16xf32>
    %cst_35 = arith.constant dense<0.000000e+00> : vector<16x8xf32>
    %87 = tpu.matmul %86, %72, %cst_35 {dimension_numbers = #tpu.dot_dimension_numbers<[1], [0], [0], [1], [0, 0, 1, 1], [], []>} : vector<16x16xf32>, vector<16x8xf32>, vector<16x8xf32> -> vector<16x8xf32>
    %88 = vector.extract_strided_slice %29 {offsets = [0, 24], sizes = [16, 8], strides = [1, 1]} : vector<32x48xf32> to vector<16x8xf32>
    %89 = vector.extract_strided_slice %31 {offsets = [0, 24], sizes = [16, 8], strides = [1, 1]} : vector<32x48xf32> to vector<16x8xf32>
    %90 = vector.extract_strided_slice %33 {offsets = [0, 24], sizes = [16, 8], strides = [1, 1]} : vector<32x48xf32> to vector<16x8xf32>
    %cst_36 = arith.constant dense<0.000000e+00> : vector<16x16xf32>
    %91 = tpu.matmul %88, %89, %cst_36 {dimension_numbers = #tpu.dot_dimension_numbers<[1], [1], [0], [0], [0, 0, 1, 0], [], []>} : vector<16x8xf32>, vector<16x8xf32>, vector<16x16xf32> -> vector<16x16xf32>
    %cst_37 = arith.constant 0.144337565 : f32
    %92 = vector.broadcast %cst_37 : f32 to vector<16x16xf32>
    %93 = arith.mulf %91, %92 : vector<16x16xf32>
    %cst_38 = arith.constant -1.000000e+30 : f32
    %94 = vector.broadcast %cst_38 : f32 to vector<16x16xf32>
    %95 = arith.select %3, %93, %94 : vector<16x16xi1>, vector<16x16xf32>
    %cst_39 = arith.constant dense<0xFF800000> : vector<16xf32>
    %96 = vector.multi_reduction <maximumf>, %95, %cst_39 [1] : vector<16x16xf32> to vector<16xf32>
    %97 = vector.shape_cast %96 : vector<16xf32> to vector<16x1xf32>
    %98 = vector.broadcast %97 : vector<16x1xf32> to vector<16x16xf32>
    %99 = arith.subf %95, %98 : vector<16x16xf32>
    %100 = math.exp %99 : vector<16x16xf32>
    %cst_40 = arith.constant dense<0.000000e+00> : vector<16xf32>
    %101 = vector.multi_reduction <add>, %100, %cst_40 [1] : vector<16x16xf32> to vector<16xf32>
    %102 = vector.shape_cast %101 : vector<16xf32> to vector<16x1xf32>
    %103 = vector.broadcast %102 : vector<16x1xf32> to vector<16x16xf32>
    %104 = arith.divf %100, %103 : vector<16x16xf32>
    %cst_41 = arith.constant dense<0.000000e+00> : vector<16x8xf32>
    %105 = tpu.matmul %104, %90, %cst_41 {dimension_numbers = #tpu.dot_dimension_numbers<[1], [0], [0], [1], [0, 0, 1, 1], [], []>} : vector<16x16xf32>, vector<16x8xf32>, vector<16x8xf32> -> vector<16x8xf32>
    %106 = vector.extract_strided_slice %29 {offsets = [0, 32], sizes = [16, 8], strides = [1, 1]} : vector<32x48xf32> to vector<16x8xf32>
    %107 = vector.extract_strided_slice %31 {offsets = [0, 32], sizes = [16, 8], strides = [1, 1]} : vector<32x48xf32> to vector<16x8xf32>
    %108 = vector.extract_strided_slice %33 {offsets = [0, 32], sizes = [16, 8], strides = [1, 1]} : vector<32x48xf32> to vector<16x8xf32>
    %cst_42 = arith.constant dense<0.000000e+00> : vector<16x16xf32>
    %109 = tpu.matmul %106, %107, %cst_42 {dimension_numbers = #tpu.dot_dimension_numbers<[1], [1], [0], [0], [0, 0, 1, 0], [], []>} : vector<16x8xf32>, vector<16x8xf32>, vector<16x16xf32> -> vector<16x16xf32>
    %cst_43 = arith.constant 0.144337565 : f32
    %110 = vector.broadcast %cst_43 : f32 to vector<16x16xf32>
    %111 = arith.mulf %109, %110 : vector<16x16xf32>
    %cst_44 = arith.constant -1.000000e+30 : f32
    %112 = vector.broadcast %cst_44 : f32 to vector<16x16xf32>
    %113 = arith.select %3, %111, %112 : vector<16x16xi1>, vector<16x16xf32>
    %cst_45 = arith.constant dense<0xFF800000> : vector<16xf32>
    %114 = vector.multi_reduction <maximumf>, %113, %cst_45 [1] : vector<16x16xf32> to vector<16xf32>
    %115 = vector.shape_cast %114 : vector<16xf32> to vector<16x1xf32>
    %116 = vector.broadcast %115 : vector<16x1xf32> to vector<16x16xf32>
    %117 = arith.subf %113, %116 : vector<16x16xf32>
    %118 = math.exp %117 : vector<16x16xf32>
    %cst_46 = arith.constant dense<0.000000e+00> : vector<16xf32>
    %119 = vector.multi_reduction <add>, %118, %cst_46 [1] : vector<16x16xf32> to vector<16xf32>
    %120 = vector.shape_cast %119 : vector<16xf32> to vector<16x1xf32>
    %121 = vector.broadcast %120 : vector<16x1xf32> to vector<16x16xf32>
    %122 = arith.divf %118, %121 : vector<16x16xf32>
    %cst_47 = arith.constant dense<0.000000e+00> : vector<16x8xf32>
    %123 = tpu.matmul %122, %108, %cst_47 {dimension_numbers = #tpu.dot_dimension_numbers<[1], [0], [0], [1], [0, 0, 1, 1], [], []>} : vector<16x16xf32>, vector<16x8xf32>, vector<16x8xf32> -> vector<16x8xf32>
    %124 = vector.extract_strided_slice %29 {offsets = [0, 40], sizes = [16, 8], strides = [1, 1]} : vector<32x48xf32> to vector<16x8xf32>
    %125 = vector.extract_strided_slice %31 {offsets = [0, 40], sizes = [16, 8], strides = [1, 1]} : vector<32x48xf32> to vector<16x8xf32>
    %126 = vector.extract_strided_slice %33 {offsets = [0, 40], sizes = [16, 8], strides = [1, 1]} : vector<32x48xf32> to vector<16x8xf32>
    %cst_48 = arith.constant dense<0.000000e+00> : vector<16x16xf32>
    %127 = tpu.matmul %124, %125, %cst_48 {dimension_numbers = #tpu.dot_dimension_numbers<[1], [1], [0], [0], [0, 0, 1, 0], [], []>} : vector<16x8xf32>, vector<16x8xf32>, vector<16x16xf32> -> vector<16x16xf32>
    %cst_49 = arith.constant 0.144337565 : f32
    %128 = vector.broadcast %cst_49 : f32 to vector<16x16xf32>
    %129 = arith.mulf %127, %128 : vector<16x16xf32>
    %cst_50 = arith.constant -1.000000e+30 : f32
    %130 = vector.broadcast %cst_50 : f32 to vector<16x16xf32>
    %131 = arith.select %3, %129, %130 : vector<16x16xi1>, vector<16x16xf32>
    %cst_51 = arith.constant dense<0xFF800000> : vector<16xf32>
    %132 = vector.multi_reduction <maximumf>, %131, %cst_51 [1] : vector<16x16xf32> to vector<16xf32>
    %133 = vector.shape_cast %132 : vector<16xf32> to vector<16x1xf32>
    %134 = vector.broadcast %133 : vector<16x1xf32> to vector<16x16xf32>
    %135 = arith.subf %131, %134 : vector<16x16xf32>
    %136 = math.exp %135 : vector<16x16xf32>
    %cst_52 = arith.constant dense<0.000000e+00> : vector<16xf32>
    %137 = vector.multi_reduction <add>, %136, %cst_52 [1] : vector<16x16xf32> to vector<16xf32>
    %138 = vector.shape_cast %137 : vector<16xf32> to vector<16x1xf32>
    %139 = vector.broadcast %138 : vector<16x1xf32> to vector<16x16xf32>
    %140 = arith.divf %136, %139 : vector<16x16xf32>
    %cst_53 = arith.constant dense<0.000000e+00> : vector<16x8xf32>
    %141 = tpu.matmul %140, %126, %cst_53 {dimension_numbers = #tpu.dot_dimension_numbers<[1], [0], [0], [1], [0, 0, 1, 1], [], []>} : vector<16x16xf32>, vector<16x8xf32>, vector<16x8xf32> -> vector<16x8xf32>
    %142 = tpu.concatenate %51, %69, %87, %105, %123, %141 in 1 : vector<16x8xf32>, vector<16x8xf32>, vector<16x8xf32>, vector<16x8xf32>, vector<16x8xf32>, vector<16x8xf32> -> vector<16x48xf32>
    %143 = vector.extract_strided_slice %29 {offsets = [16, 0], sizes = [16, 8], strides = [1, 1]} : vector<32x48xf32> to vector<16x8xf32>
    %144 = vector.extract_strided_slice %31 {offsets = [16, 0], sizes = [16, 8], strides = [1, 1]} : vector<32x48xf32> to vector<16x8xf32>
    %145 = vector.extract_strided_slice %33 {offsets = [16, 0], sizes = [16, 8], strides = [1, 1]} : vector<32x48xf32> to vector<16x8xf32>
    %cst_54 = arith.constant dense<0.000000e+00> : vector<16x16xf32>
    %146 = tpu.matmul %143, %144, %cst_54 {dimension_numbers = #tpu.dot_dimension_numbers<[1], [1], [0], [0], [0, 0, 1, 0], [], []>} : vector<16x8xf32>, vector<16x8xf32>, vector<16x16xf32> -> vector<16x16xf32>
    %cst_55 = arith.constant 0.144337565 : f32
    %147 = vector.broadcast %cst_55 : f32 to vector<16x16xf32>
    %148 = arith.mulf %146, %147 : vector<16x16xf32>
    %cst_56 = arith.constant -1.000000e+30 : f32
    %149 = vector.broadcast %cst_56 : f32 to vector<16x16xf32>
    %150 = arith.select %3, %148, %149 : vector<16x16xi1>, vector<16x16xf32>
    %cst_57 = arith.constant dense<0xFF800000> : vector<16xf32>
    %151 = vector.multi_reduction <maximumf>, %150, %cst_57 [1] : vector<16x16xf32> to vector<16xf32>
    %152 = vector.shape_cast %151 : vector<16xf32> to vector<16x1xf32>
    %153 = vector.broadcast %152 : vector<16x1xf32> to vector<16x16xf32>
    %154 = arith.subf %150, %153 : vector<16x16xf32>
    %155 = math.exp %154 : vector<16x16xf32>
    %cst_58 = arith.constant dense<0.000000e+00> : vector<16xf32>
    %156 = vector.multi_reduction <add>, %155, %cst_58 [1] : vector<16x16xf32> to vector<16xf32>
    %157 = vector.shape_cast %156 : vector<16xf32> to vector<16x1xf32>
    %158 = vector.broadcast %157 : vector<16x1xf32> to vector<16x16xf32>
    %159 = arith.divf %155, %158 : vector<16x16xf32>
    %cst_59 = arith.constant dense<0.000000e+00> : vector<16x8xf32>
    %160 = tpu.matmul %159, %145, %cst_59 {dimension_numbers = #tpu.dot_dimension_numbers<[1], [0], [0], [1], [0, 0, 1, 1], [], []>} : vector<16x16xf32>, vector<16x8xf32>, vector<16x8xf32> -> vector<16x8xf32>
    %161 = vector.extract_strided_slice %29 {offsets = [16, 8], sizes = [16, 8], strides = [1, 1]} : vector<32x48xf32> to vector<16x8xf32>
    %162 = vector.extract_strided_slice %31 {offsets = [16, 8], sizes = [16, 8], strides = [1, 1]} : vector<32x48xf32> to vector<16x8xf32>
    %163 = vector.extract_strided_slice %33 {offsets = [16, 8], sizes = [16, 8], strides = [1, 1]} : vector<32x48xf32> to vector<16x8xf32>
    %cst_60 = arith.constant dense<0.000000e+00> : vector<16x16xf32>
    %164 = tpu.matmul %161, %162, %cst_60 {dimension_numbers = #tpu.dot_dimension_numbers<[1], [1], [0], [0], [0, 0, 1, 0], [], []>} : vector<16x8xf32>, vector<16x8xf32>, vector<16x16xf32> -> vector<16x16xf32>
    %cst_61 = arith.constant 0.144337565 : f32
    %165 = vector.broadcast %cst_61 : f32 to vector<16x16xf32>
    %166 = arith.mulf %164, %165 : vector<16x16xf32>
    %cst_62 = arith.constant -1.000000e+30 : f32
    %167 = vector.broadcast %cst_62 : f32 to vector<16x16xf32>
    %168 = arith.select %3, %166, %167 : vector<16x16xi1>, vector<16x16xf32>
    %cst_63 = arith.constant dense<0xFF800000> : vector<16xf32>
    %169 = vector.multi_reduction <maximumf>, %168, %cst_63 [1] : vector<16x16xf32> to vector<16xf32>
    %170 = vector.shape_cast %169 : vector<16xf32> to vector<16x1xf32>
    %171 = vector.broadcast %170 : vector<16x1xf32> to vector<16x16xf32>
    %172 = arith.subf %168, %171 : vector<16x16xf32>
    %173 = math.exp %172 : vector<16x16xf32>
    %cst_64 = arith.constant dense<0.000000e+00> : vector<16xf32>
    %174 = vector.multi_reduction <add>, %173, %cst_64 [1] : vector<16x16xf32> to vector<16xf32>
    %175 = vector.shape_cast %174 : vector<16xf32> to vector<16x1xf32>
    %176 = vector.broadcast %175 : vector<16x1xf32> to vector<16x16xf32>
    %177 = arith.divf %173, %176 : vector<16x16xf32>
    %cst_65 = arith.constant dense<0.000000e+00> : vector<16x8xf32>
    %178 = tpu.matmul %177, %163, %cst_65 {dimension_numbers = #tpu.dot_dimension_numbers<[1], [0], [0], [1], [0, 0, 1, 1], [], []>} : vector<16x16xf32>, vector<16x8xf32>, vector<16x8xf32> -> vector<16x8xf32>
    %179 = vector.extract_strided_slice %29 {offsets = [16, 16], sizes = [16, 8], strides = [1, 1]} : vector<32x48xf32> to vector<16x8xf32>
    %180 = vector.extract_strided_slice %31 {offsets = [16, 16], sizes = [16, 8], strides = [1, 1]} : vector<32x48xf32> to vector<16x8xf32>
    %181 = vector.extract_strided_slice %33 {offsets = [16, 16], sizes = [16, 8], strides = [1, 1]} : vector<32x48xf32> to vector<16x8xf32>
    %cst_66 = arith.constant dense<0.000000e+00> : vector<16x16xf32>
    %182 = tpu.matmul %179, %180, %cst_66 {dimension_numbers = #tpu.dot_dimension_numbers<[1], [1], [0], [0], [0, 0, 1, 0], [], []>} : vector<16x8xf32>, vector<16x8xf32>, vector<16x16xf32> -> vector<16x16xf32>
    %cst_67 = arith.constant 0.144337565 : f32
    %183 = vector.broadcast %cst_67 : f32 to vector<16x16xf32>
    %184 = arith.mulf %182, %183 : vector<16x16xf32>
    %cst_68 = arith.constant -1.000000e+30 : f32
    %185 = vector.broadcast %cst_68 : f32 to vector<16x16xf32>
    %186 = arith.select %3, %184, %185 : vector<16x16xi1>, vector<16x16xf32>
    %cst_69 = arith.constant dense<0xFF800000> : vector<16xf32>
    %187 = vector.multi_reduction <maximumf>, %186, %cst_69 [1] : vector<16x16xf32> to vector<16xf32>
    %188 = vector.shape_cast %187 : vector<16xf32> to vector<16x1xf32>
    %189 = vector.broadcast %188 : vector<16x1xf32> to vector<16x16xf32>
    %190 = arith.subf %186, %189 : vector<16x16xf32>
    %191 = math.exp %190 : vector<16x16xf32>
    %cst_70 = arith.constant dense<0.000000e+00> : vector<16xf32>
    %192 = vector.multi_reduction <add>, %191, %cst_70 [1] : vector<16x16xf32> to vector<16xf32>
    %193 = vector.shape_cast %192 : vector<16xf32> to vector<16x1xf32>
    %194 = vector.broadcast %193 : vector<16x1xf32> to vector<16x16xf32>
    %195 = arith.divf %191, %194 : vector<16x16xf32>
    %cst_71 = arith.constant dense<0.000000e+00> : vector<16x8xf32>
    %196 = tpu.matmul %195, %181, %cst_71 {dimension_numbers = #tpu.dot_dimension_numbers<[1], [0], [0], [1], [0, 0, 1, 1], [], []>} : vector<16x16xf32>, vector<16x8xf32>, vector<16x8xf32> -> vector<16x8xf32>
    %197 = vector.extract_strided_slice %29 {offsets = [16, 24], sizes = [16, 8], strides = [1, 1]} : vector<32x48xf32> to vector<16x8xf32>
    %198 = vector.extract_strided_slice %31 {offsets = [16, 24], sizes = [16, 8], strides = [1, 1]} : vector<32x48xf32> to vector<16x8xf32>
    %199 = vector.extract_strided_slice %33 {offsets = [16, 24], sizes = [16, 8], strides = [1, 1]} : vector<32x48xf32> to vector<16x8xf32>
    %cst_72 = arith.constant dense<0.000000e+00> : vector<16x16xf32>
    %200 = tpu.matmul %197, %198, %cst_72 {dimension_numbers = #tpu.dot_dimension_numbers<[1], [1], [0], [0], [0, 0, 1, 0], [], []>} : vector<16x8xf32>, vector<16x8xf32>, vector<16x16xf32> -> vector<16x16xf32>
    %cst_73 = arith.constant 0.144337565 : f32
    %201 = vector.broadcast %cst_73 : f32 to vector<16x16xf32>
    %202 = arith.mulf %200, %201 : vector<16x16xf32>
    %cst_74 = arith.constant -1.000000e+30 : f32
    %203 = vector.broadcast %cst_74 : f32 to vector<16x16xf32>
    %204 = arith.select %3, %202, %203 : vector<16x16xi1>, vector<16x16xf32>
    %cst_75 = arith.constant dense<0xFF800000> : vector<16xf32>
    %205 = vector.multi_reduction <maximumf>, %204, %cst_75 [1] : vector<16x16xf32> to vector<16xf32>
    %206 = vector.shape_cast %205 : vector<16xf32> to vector<16x1xf32>
    %207 = vector.broadcast %206 : vector<16x1xf32> to vector<16x16xf32>
    %208 = arith.subf %204, %207 : vector<16x16xf32>
    %209 = math.exp %208 : vector<16x16xf32>
    %cst_76 = arith.constant dense<0.000000e+00> : vector<16xf32>
    %210 = vector.multi_reduction <add>, %209, %cst_76 [1] : vector<16x16xf32> to vector<16xf32>
    %211 = vector.shape_cast %210 : vector<16xf32> to vector<16x1xf32>
    %212 = vector.broadcast %211 : vector<16x1xf32> to vector<16x16xf32>
    %213 = arith.divf %209, %212 : vector<16x16xf32>
    %cst_77 = arith.constant dense<0.000000e+00> : vector<16x8xf32>
    %214 = tpu.matmul %213, %199, %cst_77 {dimension_numbers = #tpu.dot_dimension_numbers<[1], [0], [0], [1], [0, 0, 1, 1], [], []>} : vector<16x16xf32>, vector<16x8xf32>, vector<16x8xf32> -> vector<16x8xf32>
    %215 = vector.extract_strided_slice %29 {offsets = [16, 32], sizes = [16, 8], strides = [1, 1]} : vector<32x48xf32> to vector<16x8xf32>
    %216 = vector.extract_strided_slice %31 {offsets = [16, 32], sizes = [16, 8], strides = [1, 1]} : vector<32x48xf32> to vector<16x8xf32>
    %217 = vector.extract_strided_slice %33 {offsets = [16, 32], sizes = [16, 8], strides = [1, 1]} : vector<32x48xf32> to vector<16x8xf32>
    %cst_78 = arith.constant dense<0.000000e+00> : vector<16x16xf32>
    %218 = tpu.matmul %215, %216, %cst_78 {dimension_numbers = #tpu.dot_dimension_numbers<[1], [1], [0], [0], [0, 0, 1, 0], [], []>} : vector<16x8xf32>, vector<16x8xf32>, vector<16x16xf32> -> vector<16x16xf32>
    %cst_79 = arith.constant 0.144337565 : f32
    %219 = vector.broadcast %cst_79 : f32 to vector<16x16xf32>
    %220 = arith.mulf %218, %219 : vector<16x16xf32>
    %cst_80 = arith.constant -1.000000e+30 : f32
    %221 = vector.broadcast %cst_80 : f32 to vector<16x16xf32>
    %222 = arith.select %3, %220, %221 : vector<16x16xi1>, vector<16x16xf32>
    %cst_81 = arith.constant dense<0xFF800000> : vector<16xf32>
    %223 = vector.multi_reduction <maximumf>, %222, %cst_81 [1] : vector<16x16xf32> to vector<16xf32>
    %224 = vector.shape_cast %223 : vector<16xf32> to vector<16x1xf32>
    %225 = vector.broadcast %224 : vector<16x1xf32> to vector<16x16xf32>
    %226 = arith.subf %222, %225 : vector<16x16xf32>
    %227 = math.exp %226 : vector<16x16xf32>
    %cst_82 = arith.constant dense<0.000000e+00> : vector<16xf32>
    %228 = vector.multi_reduction <add>, %227, %cst_82 [1] : vector<16x16xf32> to vector<16xf32>
    %229 = vector.shape_cast %228 : vector<16xf32> to vector<16x1xf32>
    %230 = vector.broadcast %229 : vector<16x1xf32> to vector<16x16xf32>
    %231 = arith.divf %227, %230 : vector<16x16xf32>
    %cst_83 = arith.constant dense<0.000000e+00> : vector<16x8xf32>
    %232 = tpu.matmul %231, %217, %cst_83 {dimension_numbers = #tpu.dot_dimension_numbers<[1], [0], [0], [1], [0, 0, 1, 1], [], []>} : vector<16x16xf32>, vector<16x8xf32>, vector<16x8xf32> -> vector<16x8xf32>
    %233 = vector.extract_strided_slice %29 {offsets = [16, 40], sizes = [16, 8], strides = [1, 1]} : vector<32x48xf32> to vector<16x8xf32>
    %234 = vector.extract_strided_slice %31 {offsets = [16, 40], sizes = [16, 8], strides = [1, 1]} : vector<32x48xf32> to vector<16x8xf32>
    %235 = vector.extract_strided_slice %33 {offsets = [16, 40], sizes = [16, 8], strides = [1, 1]} : vector<32x48xf32> to vector<16x8xf32>
    %cst_84 = arith.constant dense<0.000000e+00> : vector<16x16xf32>
    %236 = tpu.matmul %233, %234, %cst_84 {dimension_numbers = #tpu.dot_dimension_numbers<[1], [1], [0], [0], [0, 0, 1, 0], [], []>} : vector<16x8xf32>, vector<16x8xf32>, vector<16x16xf32> -> vector<16x16xf32>
    %cst_85 = arith.constant 0.144337565 : f32
    %237 = vector.broadcast %cst_85 : f32 to vector<16x16xf32>
    %238 = arith.mulf %236, %237 : vector<16x16xf32>
    %cst_86 = arith.constant -1.000000e+30 : f32
    %239 = vector.broadcast %cst_86 : f32 to vector<16x16xf32>
    %240 = arith.select %3, %238, %239 : vector<16x16xi1>, vector<16x16xf32>
    %cst_87 = arith.constant dense<0xFF800000> : vector<16xf32>
    %241 = vector.multi_reduction <maximumf>, %240, %cst_87 [1] : vector<16x16xf32> to vector<16xf32>
    %242 = vector.shape_cast %241 : vector<16xf32> to vector<16x1xf32>
    %243 = vector.broadcast %242 : vector<16x1xf32> to vector<16x16xf32>
    %244 = arith.subf %240, %243 : vector<16x16xf32>
    %245 = math.exp %244 : vector<16x16xf32>
    %cst_88 = arith.constant dense<0.000000e+00> : vector<16xf32>
    %246 = vector.multi_reduction <add>, %245, %cst_88 [1] : vector<16x16xf32> to vector<16xf32>
    %247 = vector.shape_cast %246 : vector<16xf32> to vector<16x1xf32>
    %248 = vector.broadcast %247 : vector<16x1xf32> to vector<16x16xf32>
    %249 = arith.divf %245, %248 : vector<16x16xf32>
    %cst_89 = arith.constant dense<0.000000e+00> : vector<16x8xf32>
    %250 = tpu.matmul %249, %235, %cst_89 {dimension_numbers = #tpu.dot_dimension_numbers<[1], [0], [0], [1], [0, 0, 1, 1], [], []>} : vector<16x16xf32>, vector<16x8xf32>, vector<16x8xf32> -> vector<16x8xf32>
    %251 = tpu.concatenate %160, %178, %196, %214, %232, %250 in 1 : vector<16x8xf32>, vector<16x8xf32>, vector<16x8xf32>, vector<16x8xf32>, vector<16x8xf32>, vector<16x8xf32> -> vector<16x48xf32>
    %252 = tpu.concatenate %142, %251 in 0 : vector<16x48xf32>, vector<16x48xf32> -> vector<32x48xf32>
    %c0_90 = arith.constant 0 : index
    %c0_91 = arith.constant 0 : index
    %253 = vector.load %arg6[%c0_90, %c0_91] : memref<48x48xf32, #tpu.memory_space<vmem>>, vector<48x48xf32>
    %cst_92 = arith.constant dense<0.000000e+00> : vector<32x48xf32>
    %254 = tpu.matmul %252, %253, %cst_92 {dimension_numbers = #tpu.dot_dimension_numbers<[1], [0], [0], [1], [0, 0, 1, 1], [], []>} : vector<32x48xf32>, vector<48x48xf32>, vector<32x48xf32> -> vector<32x48xf32>
    %c0_93 = arith.constant 0 : index
    %c0_94 = arith.constant 0 : index
    %255 = vector.load %arg7[%c0_93, %c0_94] : memref<1x48xf32, #tpu.memory_space<vmem>>, vector<1x48xf32>
    %256 = vector.broadcast %255 : vector<1x48xf32> to vector<32x48xf32>
    %257 = arith.addf %254, %256 : vector<32x48xf32>
    %258 = arith.addf %0, %257 : vector<32x48xf32>
    %c0_95 = arith.constant 0 : index
    %c0_96 = arith.constant 0 : index
    %259 = vector.load %arg8[%c0_95, %c0_96] : memref<1x48xf32, #tpu.memory_space<vmem>>, vector<1x48xf32>
    %c0_97 = arith.constant 0 : index
    %c0_98 = arith.constant 0 : index
    %260 = vector.load %arg9[%c0_97, %c0_98] : memref<1x48xf32, #tpu.memory_space<vmem>>, vector<1x48xf32>
    %cst_99 = arith.constant dense<0.000000e+00> : vector<32xf32>
    %261 = vector.multi_reduction <add>, %258, %cst_99 [1] : vector<32x48xf32> to vector<32xf32>
    %262 = vector.shape_cast %261 : vector<32xf32> to vector<32x1xf32>
    %cst_100 = arith.constant 4.800000e+01 : f32
    %263 = vector.broadcast %cst_100 : f32 to vector<32x1xf32>
    %264 = arith.divf %262, %263 : vector<32x1xf32>
    %265 = vector.broadcast %264 : vector<32x1xf32> to vector<32x48xf32>
    %266 = arith.subf %258, %265 : vector<32x48xf32>
    %267 = arith.mulf %266, %266 : vector<32x48xf32>
    %cst_101 = arith.constant dense<0.000000e+00> : vector<32xf32>
    %268 = vector.multi_reduction <add>, %267, %cst_101 [1] : vector<32x48xf32> to vector<32xf32>
    %269 = vector.shape_cast %268 : vector<32xf32> to vector<32x1xf32>
    %cst_102 = arith.constant 4.800000e+01 : f32
    %270 = vector.broadcast %cst_102 : f32 to vector<32x1xf32>
    %271 = arith.divf %269, %270 : vector<32x1xf32>
    %272 = vector.broadcast %264 : vector<32x1xf32> to vector<32x48xf32>
    %273 = arith.subf %258, %272 : vector<32x48xf32>
    %cst_103 = arith.constant 9.99999974E-6 : f32
    %274 = vector.broadcast %cst_103 : f32 to vector<32x1xf32>
    %275 = arith.addf %271, %274 : vector<32x1xf32>
    %276 = math.rsqrt %275 : vector<32x1xf32>
    %277 = vector.broadcast %276 : vector<32x1xf32> to vector<32x48xf32>
    %278 = arith.mulf %273, %277 : vector<32x48xf32>
    %279 = vector.broadcast %259 : vector<1x48xf32> to vector<32x48xf32>
    %280 = arith.mulf %278, %279 : vector<32x48xf32>
    %281 = vector.broadcast %260 : vector<1x48xf32> to vector<32x48xf32>
    %282 = arith.addf %280, %281 : vector<32x48xf32>
    %c0_104 = arith.constant 0 : index
    %c0_105 = arith.constant 0 : index
    %283 = vector.load %arg10[%c0_104, %c0_105] : memref<48x192xf32, #tpu.memory_space<vmem>>, vector<48x192xf32>
    %cst_106 = arith.constant dense<0.000000e+00> : vector<32x192xf32>
    %284 = tpu.matmul %282, %283, %cst_106 {dimension_numbers = #tpu.dot_dimension_numbers<[1], [0], [0], [1], [0, 0, 1, 1], [], []>} : vector<32x48xf32>, vector<48x192xf32>, vector<32x192xf32> -> vector<32x192xf32>
    %c0_107 = arith.constant 0 : index
    %c0_108 = arith.constant 0 : index
    %285 = vector.load %arg11[%c0_107, %c0_108] : memref<1x192xf32, #tpu.memory_space<vmem>>, vector<1x192xf32>
    %286 = vector.broadcast %285 : vector<1x192xf32> to vector<32x192xf32>
    %287 = arith.addf %284, %286 : vector<32x192xf32>
    %cst_109 = arith.constant 0.000000e+00 : f32
    %288 = vector.broadcast %cst_109 : f32 to vector<32x192xf32>
    %289 = arith.maximumf %287, %288 : vector<32x192xf32>
    %c0_110 = arith.constant 0 : index
    %c0_111 = arith.constant 0 : index
    %290 = vector.load %arg12[%c0_110, %c0_111] : memref<192x48xf32, #tpu.memory_space<vmem>>, vector<192x48xf32>
    %cst_112 = arith.constant dense<0.000000e+00> : vector<32x48xf32>
    %291 = tpu.matmul %289, %290, %cst_112 {dimension_numbers = #tpu.dot_dimension_numbers<[1], [0], [0], [1], [0, 0, 1, 1], [], []>} : vector<32x192xf32>, vector<192x48xf32>, vector<32x48xf32> -> vector<32x48xf32>
    %292 = arith.addf %258, %291 : vector<32x48xf32>
    %c0_113 = arith.constant 0 : index
    %c0_114 = arith.constant 0 : index
    %293 = vector.load %arg13[%c0_113, %c0_114] : memref<1x48xf32, #tpu.memory_space<vmem>>, vector<1x48xf32>
    %294 = vector.broadcast %293 : vector<1x48xf32> to vector<32x48xf32>
    %295 = arith.addf %292, %294 : vector<32x48xf32>
    %c0_115 = arith.constant 0 : index
    %c0_116 = arith.constant 0 : index
    %296 = vector.load %arg14[%c0_115, %c0_116] : memref<1x48xf32, #tpu.memory_space<vmem>>, vector<1x48xf32>
    %c0_117 = arith.constant 0 : index
    %c0_118 = arith.constant 0 : index
    %297 = vector.load %arg15[%c0_117, %c0_118] : memref<1x48xf32, #tpu.memory_space<vmem>>, vector<1x48xf32>
    %cst_119 = arith.constant dense<0.000000e+00> : vector<32xf32>
    %298 = vector.multi_reduction <add>, %295, %cst_119 [1] : vector<32x48xf32> to vector<32xf32>
    %299 = vector.shape_cast %298 : vector<32xf32> to vector<32x1xf32>
    %cst_120 = arith.constant 4.800000e+01 : f32
    %300 = vector.broadcast %cst_120 : f32 to vector<32x1xf32>
    %301 = arith.divf %299, %300 : vector<32x1xf32>
    %302 = vector.broadcast %301 : vector<32x1xf32> to vector<32x48xf32>
    %303 = arith.subf %295, %302 : vector<32x48xf32>
    %304 = arith.mulf %303, %303 : vector<32x48xf32>
    %cst_121 = arith.constant dense<0.000000e+00> : vector<32xf32>
    %305 = vector.multi_reduction <add>, %304, %cst_121 [1] : vector<32x48xf32> to vector<32xf32>
    %306 = vector.shape_cast %305 : vector<32xf32> to vector<32x1xf32>
    %cst_122 = arith.constant 4.800000e+01 : f32
    %307 = vector.broadcast %cst_122 : f32 to vector<32x1xf32>
    %308 = arith.divf %306, %307 : vector<32x1xf32>
    %309 = vector.broadcast %301 : vector<32x1xf32> to vector<32x48xf32>
    %310 = arith.subf %295, %309 : vector<32x48xf32>
    %cst_123 = arith.constant 9.99999974E-6 : f32
    %311 = vector.broadcast %cst_123 : f32 to vector<32x1xf32>
    %312 = arith.addf %308, %311 : vector<32x1xf32>
    %313 = math.rsqrt %312 : vector<32x1xf32>
    %314 = vector.broadcast %313 : vector<32x1xf32> to vector<32x48xf32>
    %315 = arith.mulf %310, %314 : vector<32x48xf32>
    %316 = vector.broadcast %296 : vector<1x48xf32> to vector<32x48xf32>
    %317 = arith.mulf %315, %316 : vector<32x48xf32>
    %318 = vector.broadcast %297 : vector<1x48xf32> to vector<32x48xf32>
    %319 = arith.addf %317, %318 : vector<32x48xf32>
    %c0_124 = arith.constant 0 : index
    %c0_125 = arith.constant 0 : index
    %320 = vector.load %arg16[%c0_124, %c0_125] : memref<48x48xf32, #tpu.memory_space<vmem>>, vector<48x48xf32>
    %cst_126 = arith.constant dense<0.000000e+00> : vector<32x48xf32>
    %321 = tpu.matmul %319, %320, %cst_126 {dimension_numbers = #tpu.dot_dimension_numbers<[1], [0], [0], [1], [0, 0, 1, 1], [], []>} : vector<32x48xf32>, vector<48x48xf32>, vector<32x48xf32> -> vector<32x48xf32>
    %c0_127 = arith.constant 0 : index
    %c0_128 = arith.constant 0 : index
    %322 = vector.load %arg17[%c0_127, %c0_128] : memref<48x48xf32, #tpu.memory_space<vmem>>, vector<48x48xf32>
    %cst_129 = arith.constant dense<0.000000e+00> : vector<32x48xf32>
    %323 = tpu.matmul %319, %322, %cst_129 {dimension_numbers = #tpu.dot_dimension_numbers<[1], [0], [0], [1], [0, 0, 1, 1], [], []>} : vector<32x48xf32>, vector<48x48xf32>, vector<32x48xf32> -> vector<32x48xf32>
    %c0_130 = arith.constant 0 : index
    %c0_131 = arith.constant 0 : index
    %324 = vector.load %arg18[%c0_130, %c0_131] : memref<48x48xf32, #tpu.memory_space<vmem>>, vector<48x48xf32>
    %cst_132 = arith.constant dense<0.000000e+00> : vector<32x48xf32>
    %325 = tpu.matmul %319, %324, %cst_132 {dimension_numbers = #tpu.dot_dimension_numbers<[1], [0], [0], [1], [0, 0, 1, 1], [], []>} : vector<32x48xf32>, vector<48x48xf32>, vector<32x48xf32> -> vector<32x48xf32>
    %326 = vector.extract_strided_slice %321 {offsets = [0, 0], sizes = [16, 8], strides = [1, 1]} : vector<32x48xf32> to vector<16x8xf32>
    %327 = vector.extract_strided_slice %323 {offsets = [0, 0], sizes = [16, 8], strides = [1, 1]} : vector<32x48xf32> to vector<16x8xf32>
    %328 = vector.extract_strided_slice %325 {offsets = [0, 0], sizes = [16, 8], strides = [1, 1]} : vector<32x48xf32> to vector<16x8xf32>
    %cst_133 = arith.constant dense<0.000000e+00> : vector<16x16xf32>
    %329 = tpu.matmul %326, %327, %cst_133 {dimension_numbers = #tpu.dot_dimension_numbers<[1], [1], [0], [0], [0, 0, 1, 0], [], []>} : vector<16x8xf32>, vector<16x8xf32>, vector<16x16xf32> -> vector<16x16xf32>
    %cst_134 = arith.constant 0.144337565 : f32
    %330 = vector.broadcast %cst_134 : f32 to vector<16x16xf32>
    %331 = arith.mulf %329, %330 : vector<16x16xf32>
    %cst_135 = arith.constant -1.000000e+30 : f32
    %332 = vector.broadcast %cst_135 : f32 to vector<16x16xf32>
    %333 = arith.select %3, %331, %332 : vector<16x16xi1>, vector<16x16xf32>
    %cst_136 = arith.constant dense<0xFF800000> : vector<16xf32>
    %334 = vector.multi_reduction <maximumf>, %333, %cst_136 [1] : vector<16x16xf32> to vector<16xf32>
    %335 = vector.shape_cast %334 : vector<16xf32> to vector<16x1xf32>
    %336 = vector.broadcast %335 : vector<16x1xf32> to vector<16x16xf32>
    %337 = arith.subf %333, %336 : vector<16x16xf32>
    %338 = math.exp %337 : vector<16x16xf32>
    %cst_137 = arith.constant dense<0.000000e+00> : vector<16xf32>
    %339 = vector.multi_reduction <add>, %338, %cst_137 [1] : vector<16x16xf32> to vector<16xf32>
    %340 = vector.shape_cast %339 : vector<16xf32> to vector<16x1xf32>
    %341 = vector.broadcast %340 : vector<16x1xf32> to vector<16x16xf32>
    %342 = arith.divf %338, %341 : vector<16x16xf32>
    %cst_138 = arith.constant dense<0.000000e+00> : vector<16x8xf32>
    %343 = tpu.matmul %342, %328, %cst_138 {dimension_numbers = #tpu.dot_dimension_numbers<[1], [0], [0], [1], [0, 0, 1, 1], [], []>} : vector<16x16xf32>, vector<16x8xf32>, vector<16x8xf32> -> vector<16x8xf32>
    %344 = vector.extract_strided_slice %321 {offsets = [0, 8], sizes = [16, 8], strides = [1, 1]} : vector<32x48xf32> to vector<16x8xf32>
    %345 = vector.extract_strided_slice %323 {offsets = [0, 8], sizes = [16, 8], strides = [1, 1]} : vector<32x48xf32> to vector<16x8xf32>
    %346 = vector.extract_strided_slice %325 {offsets = [0, 8], sizes = [16, 8], strides = [1, 1]} : vector<32x48xf32> to vector<16x8xf32>
    %cst_139 = arith.constant dense<0.000000e+00> : vector<16x16xf32>
    %347 = tpu.matmul %344, %345, %cst_139 {dimension_numbers = #tpu.dot_dimension_numbers<[1], [1], [0], [0], [0, 0, 1, 0], [], []>} : vector<16x8xf32>, vector<16x8xf32>, vector<16x16xf32> -> vector<16x16xf32>
    %cst_140 = arith.constant 0.144337565 : f32
    %348 = vector.broadcast %cst_140 : f32 to vector<16x16xf32>
    %349 = arith.mulf %347, %348 : vector<16x16xf32>
    %cst_141 = arith.constant -1.000000e+30 : f32
    %350 = vector.broadcast %cst_141 : f32 to vector<16x16xf32>
    %351 = arith.select %3, %349, %350 : vector<16x16xi1>, vector<16x16xf32>
    %cst_142 = arith.constant dense<0xFF800000> : vector<16xf32>
    %352 = vector.multi_reduction <maximumf>, %351, %cst_142 [1] : vector<16x16xf32> to vector<16xf32>
    %353 = vector.shape_cast %352 : vector<16xf32> to vector<16x1xf32>
    %354 = vector.broadcast %353 : vector<16x1xf32> to vector<16x16xf32>
    %355 = arith.subf %351, %354 : vector<16x16xf32>
    %356 = math.exp %355 : vector<16x16xf32>
    %cst_143 = arith.constant dense<0.000000e+00> : vector<16xf32>
    %357 = vector.multi_reduction <add>, %356, %cst_143 [1] : vector<16x16xf32> to vector<16xf32>
    %358 = vector.shape_cast %357 : vector<16xf32> to vector<16x1xf32>
    %359 = vector.broadcast %358 : vector<16x1xf32> to vector<16x16xf32>
    %360 = arith.divf %356, %359 : vector<16x16xf32>
    %cst_144 = arith.constant dense<0.000000e+00> : vector<16x8xf32>
    %361 = tpu.matmul %360, %346, %cst_144 {dimension_numbers = #tpu.dot_dimension_numbers<[1], [0], [0], [1], [0, 0, 1, 1], [], []>} : vector<16x16xf32>, vector<16x8xf32>, vector<16x8xf32> -> vector<16x8xf32>
    %362 = vector.extract_strided_slice %321 {offsets = [0, 16], sizes = [16, 8], strides = [1, 1]} : vector<32x48xf32> to vector<16x8xf32>
    %363 = vector.extract_strided_slice %323 {offsets = [0, 16], sizes = [16, 8], strides = [1, 1]} : vector<32x48xf32> to vector<16x8xf32>
    %364 = vector.extract_strided_slice %325 {offsets = [0, 16], sizes = [16, 8], strides = [1, 1]} : vector<32x48xf32> to vector<16x8xf32>
    %cst_145 = arith.constant dense<0.000000e+00> : vector<16x16xf32>
    %365 = tpu.matmul %362, %363, %cst_145 {dimension_numbers = #tpu.dot_dimension_numbers<[1], [1], [0], [0], [0, 0, 1, 0], [], []>} : vector<16x8xf32>, vector<16x8xf32>, vector<16x16xf32> -> vector<16x16xf32>
    %cst_146 = arith.constant 0.144337565 : f32
    %366 = vector.broadcast %cst_146 : f32 to vector<16x16xf32>
    %367 = arith.mulf %365, %366 : vector<16x16xf32>
    %cst_147 = arith.constant -1.000000e+30 : f32
    %368 = vector.broadcast %cst_147 : f32 to vector<16x16xf32>
    %369 = arith.select %3, %367, %368 : vector<16x16xi1>, vector<16x16xf32>
    %cst_148 = arith.constant dense<0xFF800000> : vector<16xf32>
    %370 = vector.multi_reduction <maximumf>, %369, %cst_148 [1] : vector<16x16xf32> to vector<16xf32>
    %371 = vector.shape_cast %370 : vector<16xf32> to vector<16x1xf32>
    %372 = vector.broadcast %371 : vector<16x1xf32> to vector<16x16xf32>
    %373 = arith.subf %369, %372 : vector<16x16xf32>
    %374 = math.exp %373 : vector<16x16xf32>
    %cst_149 = arith.constant dense<0.000000e+00> : vector<16xf32>
    %375 = vector.multi_reduction <add>, %374, %cst_149 [1] : vector<16x16xf32> to vector<16xf32>
    %376 = vector.shape_cast %375 : vector<16xf32> to vector<16x1xf32>
    %377 = vector.broadcast %376 : vector<16x1xf32> to vector<16x16xf32>
    %378 = arith.divf %374, %377 : vector<16x16xf32>
    %cst_150 = arith.constant dense<0.000000e+00> : vector<16x8xf32>
    %379 = tpu.matmul %378, %364, %cst_150 {dimension_numbers = #tpu.dot_dimension_numbers<[1], [0], [0], [1], [0, 0, 1, 1], [], []>} : vector<16x16xf32>, vector<16x8xf32>, vector<16x8xf32> -> vector<16x8xf32>
    %380 = vector.extract_strided_slice %321 {offsets = [0, 24], sizes = [16, 8], strides = [1, 1]} : vector<32x48xf32> to vector<16x8xf32>
    %381 = vector.extract_strided_slice %323 {offsets = [0, 24], sizes = [16, 8], strides = [1, 1]} : vector<32x48xf32> to vector<16x8xf32>
    %382 = vector.extract_strided_slice %325 {offsets = [0, 24], sizes = [16, 8], strides = [1, 1]} : vector<32x48xf32> to vector<16x8xf32>
    %cst_151 = arith.constant dense<0.000000e+00> : vector<16x16xf32>
    %383 = tpu.matmul %380, %381, %cst_151 {dimension_numbers = #tpu.dot_dimension_numbers<[1], [1], [0], [0], [0, 0, 1, 0], [], []>} : vector<16x8xf32>, vector<16x8xf32>, vector<16x16xf32> -> vector<16x16xf32>
    %cst_152 = arith.constant 0.144337565 : f32
    %384 = vector.broadcast %cst_152 : f32 to vector<16x16xf32>
    %385 = arith.mulf %383, %384 : vector<16x16xf32>
    %cst_153 = arith.constant -1.000000e+30 : f32
    %386 = vector.broadcast %cst_153 : f32 to vector<16x16xf32>
    %387 = arith.select %3, %385, %386 : vector<16x16xi1>, vector<16x16xf32>
    %cst_154 = arith.constant dense<0xFF800000> : vector<16xf32>
    %388 = vector.multi_reduction <maximumf>, %387, %cst_154 [1] : vector<16x16xf32> to vector<16xf32>
    %389 = vector.shape_cast %388 : vector<16xf32> to vector<16x1xf32>
    %390 = vector.broadcast %389 : vector<16x1xf32> to vector<16x16xf32>
    %391 = arith.subf %387, %390 : vector<16x16xf32>
    %392 = math.exp %391 : vector<16x16xf32>
    %cst_155 = arith.constant dense<0.000000e+00> : vector<16xf32>
    %393 = vector.multi_reduction <add>, %392, %cst_155 [1] : vector<16x16xf32> to vector<16xf32>
    %394 = vector.shape_cast %393 : vector<16xf32> to vector<16x1xf32>
    %395 = vector.broadcast %394 : vector<16x1xf32> to vector<16x16xf32>
    %396 = arith.divf %392, %395 : vector<16x16xf32>
    %cst_156 = arith.constant dense<0.000000e+00> : vector<16x8xf32>
    %397 = tpu.matmul %396, %382, %cst_156 {dimension_numbers = #tpu.dot_dimension_numbers<[1], [0], [0], [1], [0, 0, 1, 1], [], []>} : vector<16x16xf32>, vector<16x8xf32>, vector<16x8xf32> -> vector<16x8xf32>
    %398 = vector.extract_strided_slice %321 {offsets = [0, 32], sizes = [16, 8], strides = [1, 1]} : vector<32x48xf32> to vector<16x8xf32>
    %399 = vector.extract_strided_slice %323 {offsets = [0, 32], sizes = [16, 8], strides = [1, 1]} : vector<32x48xf32> to vector<16x8xf32>
    %400 = vector.extract_strided_slice %325 {offsets = [0, 32], sizes = [16, 8], strides = [1, 1]} : vector<32x48xf32> to vector<16x8xf32>
    %cst_157 = arith.constant dense<0.000000e+00> : vector<16x16xf32>
    %401 = tpu.matmul %398, %399, %cst_157 {dimension_numbers = #tpu.dot_dimension_numbers<[1], [1], [0], [0], [0, 0, 1, 0], [], []>} : vector<16x8xf32>, vector<16x8xf32>, vector<16x16xf32> -> vector<16x16xf32>
    %cst_158 = arith.constant 0.144337565 : f32
    %402 = vector.broadcast %cst_158 : f32 to vector<16x16xf32>
    %403 = arith.mulf %401, %402 : vector<16x16xf32>
    %cst_159 = arith.constant -1.000000e+30 : f32
    %404 = vector.broadcast %cst_159 : f32 to vector<16x16xf32>
    %405 = arith.select %3, %403, %404 : vector<16x16xi1>, vector<16x16xf32>
    %cst_160 = arith.constant dense<0xFF800000> : vector<16xf32>
    %406 = vector.multi_reduction <maximumf>, %405, %cst_160 [1] : vector<16x16xf32> to vector<16xf32>
    %407 = vector.shape_cast %406 : vector<16xf32> to vector<16x1xf32>
    %408 = vector.broadcast %407 : vector<16x1xf32> to vector<16x16xf32>
    %409 = arith.subf %405, %408 : vector<16x16xf32>
    %410 = math.exp %409 : vector<16x16xf32>
    %cst_161 = arith.constant dense<0.000000e+00> : vector<16xf32>
    %411 = vector.multi_reduction <add>, %410, %cst_161 [1] : vector<16x16xf32> to vector<16xf32>
    %412 = vector.shape_cast %411 : vector<16xf32> to vector<16x1xf32>
    %413 = vector.broadcast %412 : vector<16x1xf32> to vector<16x16xf32>
    %414 = arith.divf %410, %413 : vector<16x16xf32>
    %cst_162 = arith.constant dense<0.000000e+00> : vector<16x8xf32>
    %415 = tpu.matmul %414, %400, %cst_162 {dimension_numbers = #tpu.dot_dimension_numbers<[1], [0], [0], [1], [0, 0, 1, 1], [], []>} : vector<16x16xf32>, vector<16x8xf32>, vector<16x8xf32> -> vector<16x8xf32>
    %416 = vector.extract_strided_slice %321 {offsets = [0, 40], sizes = [16, 8], strides = [1, 1]} : vector<32x48xf32> to vector<16x8xf32>
    %417 = vector.extract_strided_slice %323 {offsets = [0, 40], sizes = [16, 8], strides = [1, 1]} : vector<32x48xf32> to vector<16x8xf32>
    %418 = vector.extract_strided_slice %325 {offsets = [0, 40], sizes = [16, 8], strides = [1, 1]} : vector<32x48xf32> to vector<16x8xf32>
    %cst_163 = arith.constant dense<0.000000e+00> : vector<16x16xf32>
    %419 = tpu.matmul %416, %417, %cst_163 {dimension_numbers = #tpu.dot_dimension_numbers<[1], [1], [0], [0], [0, 0, 1, 0], [], []>} : vector<16x8xf32>, vector<16x8xf32>, vector<16x16xf32> -> vector<16x16xf32>
    %cst_164 = arith.constant 0.144337565 : f32
    %420 = vector.broadcast %cst_164 : f32 to vector<16x16xf32>
    %421 = arith.mulf %419, %420 : vector<16x16xf32>
    %cst_165 = arith.constant -1.000000e+30 : f32
    %422 = vector.broadcast %cst_165 : f32 to vector<16x16xf32>
    %423 = arith.select %3, %421, %422 : vector<16x16xi1>, vector<16x16xf32>
    %cst_166 = arith.constant dense<0xFF800000> : vector<16xf32>
    %424 = vector.multi_reduction <maximumf>, %423, %cst_166 [1] : vector<16x16xf32> to vector<16xf32>
    %425 = vector.shape_cast %424 : vector<16xf32> to vector<16x1xf32>
    %426 = vector.broadcast %425 : vector<16x1xf32> to vector<16x16xf32>
    %427 = arith.subf %423, %426 : vector<16x16xf32>
    %428 = math.exp %427 : vector<16x16xf32>
    %cst_167 = arith.constant dense<0.000000e+00> : vector<16xf32>
    %429 = vector.multi_reduction <add>, %428, %cst_167 [1] : vector<16x16xf32> to vector<16xf32>
    %430 = vector.shape_cast %429 : vector<16xf32> to vector<16x1xf32>
    %431 = vector.broadcast %430 : vector<16x1xf32> to vector<16x16xf32>
    %432 = arith.divf %428, %431 : vector<16x16xf32>
    %cst_168 = arith.constant dense<0.000000e+00> : vector<16x8xf32>
    %433 = tpu.matmul %432, %418, %cst_168 {dimension_numbers = #tpu.dot_dimension_numbers<[1], [0], [0], [1], [0, 0, 1, 1], [], []>} : vector<16x16xf32>, vector<16x8xf32>, vector<16x8xf32> -> vector<16x8xf32>
    %434 = tpu.concatenate %343, %361, %379, %397, %415, %433 in 1 : vector<16x8xf32>, vector<16x8xf32>, vector<16x8xf32>, vector<16x8xf32>, vector<16x8xf32>, vector<16x8xf32> -> vector<16x48xf32>
    %435 = vector.extract_strided_slice %321 {offsets = [16, 0], sizes = [16, 8], strides = [1, 1]} : vector<32x48xf32> to vector<16x8xf32>
    %436 = vector.extract_strided_slice %323 {offsets = [16, 0], sizes = [16, 8], strides = [1, 1]} : vector<32x48xf32> to vector<16x8xf32>
    %437 = vector.extract_strided_slice %325 {offsets = [16, 0], sizes = [16, 8], strides = [1, 1]} : vector<32x48xf32> to vector<16x8xf32>
    %cst_169 = arith.constant dense<0.000000e+00> : vector<16x16xf32>
    %438 = tpu.matmul %435, %436, %cst_169 {dimension_numbers = #tpu.dot_dimension_numbers<[1], [1], [0], [0], [0, 0, 1, 0], [], []>} : vector<16x8xf32>, vector<16x8xf32>, vector<16x16xf32> -> vector<16x16xf32>
    %cst_170 = arith.constant 0.144337565 : f32
    %439 = vector.broadcast %cst_170 : f32 to vector<16x16xf32>
    %440 = arith.mulf %438, %439 : vector<16x16xf32>
    %cst_171 = arith.constant -1.000000e+30 : f32
    %441 = vector.broadcast %cst_171 : f32 to vector<16x16xf32>
    %442 = arith.select %3, %440, %441 : vector<16x16xi1>, vector<16x16xf32>
    %cst_172 = arith.constant dense<0xFF800000> : vector<16xf32>
    %443 = vector.multi_reduction <maximumf>, %442, %cst_172 [1] : vector<16x16xf32> to vector<16xf32>
    %444 = vector.shape_cast %443 : vector<16xf32> to vector<16x1xf32>
    %445 = vector.broadcast %444 : vector<16x1xf32> to vector<16x16xf32>
    %446 = arith.subf %442, %445 : vector<16x16xf32>
    %447 = math.exp %446 : vector<16x16xf32>
    %cst_173 = arith.constant dense<0.000000e+00> : vector<16xf32>
    %448 = vector.multi_reduction <add>, %447, %cst_173 [1] : vector<16x16xf32> to vector<16xf32>
    %449 = vector.shape_cast %448 : vector<16xf32> to vector<16x1xf32>
    %450 = vector.broadcast %449 : vector<16x1xf32> to vector<16x16xf32>
    %451 = arith.divf %447, %450 : vector<16x16xf32>
    %cst_174 = arith.constant dense<0.000000e+00> : vector<16x8xf32>
    %452 = tpu.matmul %451, %437, %cst_174 {dimension_numbers = #tpu.dot_dimension_numbers<[1], [0], [0], [1], [0, 0, 1, 1], [], []>} : vector<16x16xf32>, vector<16x8xf32>, vector<16x8xf32> -> vector<16x8xf32>
    %453 = vector.extract_strided_slice %321 {offsets = [16, 8], sizes = [16, 8], strides = [1, 1]} : vector<32x48xf32> to vector<16x8xf32>
    %454 = vector.extract_strided_slice %323 {offsets = [16, 8], sizes = [16, 8], strides = [1, 1]} : vector<32x48xf32> to vector<16x8xf32>
    %455 = vector.extract_strided_slice %325 {offsets = [16, 8], sizes = [16, 8], strides = [1, 1]} : vector<32x48xf32> to vector<16x8xf32>
    %cst_175 = arith.constant dense<0.000000e+00> : vector<16x16xf32>
    %456 = tpu.matmul %453, %454, %cst_175 {dimension_numbers = #tpu.dot_dimension_numbers<[1], [1], [0], [0], [0, 0, 1, 0], [], []>} : vector<16x8xf32>, vector<16x8xf32>, vector<16x16xf32> -> vector<16x16xf32>
    %cst_176 = arith.constant 0.144337565 : f32
    %457 = vector.broadcast %cst_176 : f32 to vector<16x16xf32>
    %458 = arith.mulf %456, %457 : vector<16x16xf32>
    %cst_177 = arith.constant -1.000000e+30 : f32
    %459 = vector.broadcast %cst_177 : f32 to vector<16x16xf32>
    %460 = arith.select %3, %458, %459 : vector<16x16xi1>, vector<16x16xf32>
    %cst_178 = arith.constant dense<0xFF800000> : vector<16xf32>
    %461 = vector.multi_reduction <maximumf>, %460, %cst_178 [1] : vector<16x16xf32> to vector<16xf32>
    %462 = vector.shape_cast %461 : vector<16xf32> to vector<16x1xf32>
    %463 = vector.broadcast %462 : vector<16x1xf32> to vector<16x16xf32>
    %464 = arith.subf %460, %463 : vector<16x16xf32>
    %465 = math.exp %464 : vector<16x16xf32>
    %cst_179 = arith.constant dense<0.000000e+00> : vector<16xf32>
    %466 = vector.multi_reduction <add>, %465, %cst_179 [1] : vector<16x16xf32> to vector<16xf32>
    %467 = vector.shape_cast %466 : vector<16xf32> to vector<16x1xf32>
    %468 = vector.broadcast %467 : vector<16x1xf32> to vector<16x16xf32>
    %469 = arith.divf %465, %468 : vector<16x16xf32>
    %cst_180 = arith.constant dense<0.000000e+00> : vector<16x8xf32>
    %470 = tpu.matmul %469, %455, %cst_180 {dimension_numbers = #tpu.dot_dimension_numbers<[1], [0], [0], [1], [0, 0, 1, 1], [], []>} : vector<16x16xf32>, vector<16x8xf32>, vector<16x8xf32> -> vector<16x8xf32>
    %471 = vector.extract_strided_slice %321 {offsets = [16, 16], sizes = [16, 8], strides = [1, 1]} : vector<32x48xf32> to vector<16x8xf32>
    %472 = vector.extract_strided_slice %323 {offsets = [16, 16], sizes = [16, 8], strides = [1, 1]} : vector<32x48xf32> to vector<16x8xf32>
    %473 = vector.extract_strided_slice %325 {offsets = [16, 16], sizes = [16, 8], strides = [1, 1]} : vector<32x48xf32> to vector<16x8xf32>
    %cst_181 = arith.constant dense<0.000000e+00> : vector<16x16xf32>
    %474 = tpu.matmul %471, %472, %cst_181 {dimension_numbers = #tpu.dot_dimension_numbers<[1], [1], [0], [0], [0, 0, 1, 0], [], []>} : vector<16x8xf32>, vector<16x8xf32>, vector<16x16xf32> -> vector<16x16xf32>
    %cst_182 = arith.constant 0.144337565 : f32
    %475 = vector.broadcast %cst_182 : f32 to vector<16x16xf32>
    %476 = arith.mulf %474, %475 : vector<16x16xf32>
    %cst_183 = arith.constant -1.000000e+30 : f32
    %477 = vector.broadcast %cst_183 : f32 to vector<16x16xf32>
    %478 = arith.select %3, %476, %477 : vector<16x16xi1>, vector<16x16xf32>
    %cst_184 = arith.constant dense<0xFF800000> : vector<16xf32>
    %479 = vector.multi_reduction <maximumf>, %478, %cst_184 [1] : vector<16x16xf32> to vector<16xf32>
    %480 = vector.shape_cast %479 : vector<16xf32> to vector<16x1xf32>
    %481 = vector.broadcast %480 : vector<16x1xf32> to vector<16x16xf32>
    %482 = arith.subf %478, %481 : vector<16x16xf32>
    %483 = math.exp %482 : vector<16x16xf32>
    %cst_185 = arith.constant dense<0.000000e+00> : vector<16xf32>
    %484 = vector.multi_reduction <add>, %483, %cst_185 [1] : vector<16x16xf32> to vector<16xf32>
    %485 = vector.shape_cast %484 : vector<16xf32> to vector<16x1xf32>
    %486 = vector.broadcast %485 : vector<16x1xf32> to vector<16x16xf32>
    %487 = arith.divf %483, %486 : vector<16x16xf32>
    %cst_186 = arith.constant dense<0.000000e+00> : vector<16x8xf32>
    %488 = tpu.matmul %487, %473, %cst_186 {dimension_numbers = #tpu.dot_dimension_numbers<[1], [0], [0], [1], [0, 0, 1, 1], [], []>} : vector<16x16xf32>, vector<16x8xf32>, vector<16x8xf32> -> vector<16x8xf32>
    %489 = vector.extract_strided_slice %321 {offsets = [16, 24], sizes = [16, 8], strides = [1, 1]} : vector<32x48xf32> to vector<16x8xf32>
    %490 = vector.extract_strided_slice %323 {offsets = [16, 24], sizes = [16, 8], strides = [1, 1]} : vector<32x48xf32> to vector<16x8xf32>
    %491 = vector.extract_strided_slice %325 {offsets = [16, 24], sizes = [16, 8], strides = [1, 1]} : vector<32x48xf32> to vector<16x8xf32>
    %cst_187 = arith.constant dense<0.000000e+00> : vector<16x16xf32>
    %492 = tpu.matmul %489, %490, %cst_187 {dimension_numbers = #tpu.dot_dimension_numbers<[1], [1], [0], [0], [0, 0, 1, 0], [], []>} : vector<16x8xf32>, vector<16x8xf32>, vector<16x16xf32> -> vector<16x16xf32>
    %cst_188 = arith.constant 0.144337565 : f32
    %493 = vector.broadcast %cst_188 : f32 to vector<16x16xf32>
    %494 = arith.mulf %492, %493 : vector<16x16xf32>
    %cst_189 = arith.constant -1.000000e+30 : f32
    %495 = vector.broadcast %cst_189 : f32 to vector<16x16xf32>
    %496 = arith.select %3, %494, %495 : vector<16x16xi1>, vector<16x16xf32>
    %cst_190 = arith.constant dense<0xFF800000> : vector<16xf32>
    %497 = vector.multi_reduction <maximumf>, %496, %cst_190 [1] : vector<16x16xf32> to vector<16xf32>
    %498 = vector.shape_cast %497 : vector<16xf32> to vector<16x1xf32>
    %499 = vector.broadcast %498 : vector<16x1xf32> to vector<16x16xf32>
    %500 = arith.subf %496, %499 : vector<16x16xf32>
    %501 = math.exp %500 : vector<16x16xf32>
    %cst_191 = arith.constant dense<0.000000e+00> : vector<16xf32>
    %502 = vector.multi_reduction <add>, %501, %cst_191 [1] : vector<16x16xf32> to vector<16xf32>
    %503 = vector.shape_cast %502 : vector<16xf32> to vector<16x1xf32>
    %504 = vector.broadcast %503 : vector<16x1xf32> to vector<16x16xf32>
    %505 = arith.divf %501, %504 : vector<16x16xf32>
    %cst_192 = arith.constant dense<0.000000e+00> : vector<16x8xf32>
    %506 = tpu.matmul %505, %491, %cst_192 {dimension_numbers = #tpu.dot_dimension_numbers<[1], [0], [0], [1], [0, 0, 1, 1], [], []>} : vector<16x16xf32>, vector<16x8xf32>, vector<16x8xf32> -> vector<16x8xf32>
    %507 = vector.extract_strided_slice %321 {offsets = [16, 32], sizes = [16, 8], strides = [1, 1]} : vector<32x48xf32> to vector<16x8xf32>
    %508 = vector.extract_strided_slice %323 {offsets = [16, 32], sizes = [16, 8], strides = [1, 1]} : vector<32x48xf32> to vector<16x8xf32>
    %509 = vector.extract_strided_slice %325 {offsets = [16, 32], sizes = [16, 8], strides = [1, 1]} : vector<32x48xf32> to vector<16x8xf32>
    %cst_193 = arith.constant dense<0.000000e+00> : vector<16x16xf32>
    %510 = tpu.matmul %507, %508, %cst_193 {dimension_numbers = #tpu.dot_dimension_numbers<[1], [1], [0], [0], [0, 0, 1, 0], [], []>} : vector<16x8xf32>, vector<16x8xf32>, vector<16x16xf32> -> vector<16x16xf32>
    %cst_194 = arith.constant 0.144337565 : f32
    %511 = vector.broadcast %cst_194 : f32 to vector<16x16xf32>
    %512 = arith.mulf %510, %511 : vector<16x16xf32>
    %cst_195 = arith.constant -1.000000e+30 : f32
    %513 = vector.broadcast %cst_195 : f32 to vector<16x16xf32>
    %514 = arith.select %3, %512, %513 : vector<16x16xi1>, vector<16x16xf32>
    %cst_196 = arith.constant dense<0xFF800000> : vector<16xf32>
    %515 = vector.multi_reduction <maximumf>, %514, %cst_196 [1] : vector<16x16xf32> to vector<16xf32>
    %516 = vector.shape_cast %515 : vector<16xf32> to vector<16x1xf32>
    %517 = vector.broadcast %516 : vector<16x1xf32> to vector<16x16xf32>
    %518 = arith.subf %514, %517 : vector<16x16xf32>
    %519 = math.exp %518 : vector<16x16xf32>
    %cst_197 = arith.constant dense<0.000000e+00> : vector<16xf32>
    %520 = vector.multi_reduction <add>, %519, %cst_197 [1] : vector<16x16xf32> to vector<16xf32>
    %521 = vector.shape_cast %520 : vector<16xf32> to vector<16x1xf32>
    %522 = vector.broadcast %521 : vector<16x1xf32> to vector<16x16xf32>
    %523 = arith.divf %519, %522 : vector<16x16xf32>
    %cst_198 = arith.constant dense<0.000000e+00> : vector<16x8xf32>
    %524 = tpu.matmul %523, %509, %cst_198 {dimension_numbers = #tpu.dot_dimension_numbers<[1], [0], [0], [1], [0, 0, 1, 1], [], []>} : vector<16x16xf32>, vector<16x8xf32>, vector<16x8xf32> -> vector<16x8xf32>
    %525 = vector.extract_strided_slice %321 {offsets = [16, 40], sizes = [16, 8], strides = [1, 1]} : vector<32x48xf32> to vector<16x8xf32>
    %526 = vector.extract_strided_slice %323 {offsets = [16, 40], sizes = [16, 8], strides = [1, 1]} : vector<32x48xf32> to vector<16x8xf32>
    %527 = vector.extract_strided_slice %325 {offsets = [16, 40], sizes = [16, 8], strides = [1, 1]} : vector<32x48xf32> to vector<16x8xf32>
    %cst_199 = arith.constant dense<0.000000e+00> : vector<16x16xf32>
    %528 = tpu.matmul %525, %526, %cst_199 {dimension_numbers = #tpu.dot_dimension_numbers<[1], [1], [0], [0], [0, 0, 1, 0], [], []>} : vector<16x8xf32>, vector<16x8xf32>, vector<16x16xf32> -> vector<16x16xf32>
    %cst_200 = arith.constant 0.144337565 : f32
    %529 = vector.broadcast %cst_200 : f32 to vector<16x16xf32>
    %530 = arith.mulf %528, %529 : vector<16x16xf32>
    %cst_201 = arith.constant -1.000000e+30 : f32
    %531 = vector.broadcast %cst_201 : f32 to vector<16x16xf32>
    %532 = arith.select %3, %530, %531 : vector<16x16xi1>, vector<16x16xf32>
    %cst_202 = arith.constant dense<0xFF800000> : vector<16xf32>
    %533 = vector.multi_reduction <maximumf>, %532, %cst_202 [1] : vector<16x16xf32> to vector<16xf32>
    %534 = vector.shape_cast %533 : vector<16xf32> to vector<16x1xf32>
    %535 = vector.broadcast %534 : vector<16x1xf32> to vector<16x16xf32>
    %536 = arith.subf %532, %535 : vector<16x16xf32>
    %537 = math.exp %536 : vector<16x16xf32>
    %cst_203 = arith.constant dense<0.000000e+00> : vector<16xf32>
    %538 = vector.multi_reduction <add>, %537, %cst_203 [1] : vector<16x16xf32> to vector<16xf32>
    %539 = vector.shape_cast %538 : vector<16xf32> to vector<16x1xf32>
    %540 = vector.broadcast %539 : vector<16x1xf32> to vector<16x16xf32>
    %541 = arith.divf %537, %540 : vector<16x16xf32>
    %cst_204 = arith.constant dense<0.000000e+00> : vector<16x8xf32>
    %542 = tpu.matmul %541, %527, %cst_204 {dimension_numbers = #tpu.dot_dimension_numbers<[1], [0], [0], [1], [0, 0, 1, 1], [], []>} : vector<16x16xf32>, vector<16x8xf32>, vector<16x8xf32> -> vector<16x8xf32>
    %543 = tpu.concatenate %452, %470, %488, %506, %524, %542 in 1 : vector<16x8xf32>, vector<16x8xf32>, vector<16x8xf32>, vector<16x8xf32>, vector<16x8xf32>, vector<16x8xf32> -> vector<16x48xf32>
    %544 = tpu.concatenate %434, %543 in 0 : vector<16x48xf32>, vector<16x48xf32> -> vector<32x48xf32>
    %c0_205 = arith.constant 0 : index
    %c0_206 = arith.constant 0 : index
    %545 = vector.load %arg19[%c0_205, %c0_206] : memref<48x48xf32, #tpu.memory_space<vmem>>, vector<48x48xf32>
    %cst_207 = arith.constant dense<0.000000e+00> : vector<32x48xf32>
    %546 = tpu.matmul %544, %545, %cst_207 {dimension_numbers = #tpu.dot_dimension_numbers<[1], [0], [0], [1], [0, 0, 1, 1], [], []>} : vector<32x48xf32>, vector<48x48xf32>, vector<32x48xf32> -> vector<32x48xf32>
    %c0_208 = arith.constant 0 : index
    %c0_209 = arith.constant 0 : index
    %547 = vector.load %arg20[%c0_208, %c0_209] : memref<1x48xf32, #tpu.memory_space<vmem>>, vector<1x48xf32>
    %548 = vector.broadcast %547 : vector<1x48xf32> to vector<32x48xf32>
    %549 = arith.addf %546, %548 : vector<32x48xf32>
    %550 = arith.addf %295, %549 : vector<32x48xf32>
    %c0_210 = arith.constant 0 : index
    %c0_211 = arith.constant 0 : index
    %551 = vector.load %arg21[%c0_210, %c0_211] : memref<1x48xf32, #tpu.memory_space<vmem>>, vector<1x48xf32>
    %c0_212 = arith.constant 0 : index
    %c0_213 = arith.constant 0 : index
    %552 = vector.load %arg22[%c0_212, %c0_213] : memref<1x48xf32, #tpu.memory_space<vmem>>, vector<1x48xf32>
    %cst_214 = arith.constant dense<0.000000e+00> : vector<32xf32>
    %553 = vector.multi_reduction <add>, %550, %cst_214 [1] : vector<32x48xf32> to vector<32xf32>
    %554 = vector.shape_cast %553 : vector<32xf32> to vector<32x1xf32>
    %cst_215 = arith.constant 4.800000e+01 : f32
    %555 = vector.broadcast %cst_215 : f32 to vector<32x1xf32>
    %556 = arith.divf %554, %555 : vector<32x1xf32>
    %557 = vector.broadcast %556 : vector<32x1xf32> to vector<32x48xf32>
    %558 = arith.subf %550, %557 : vector<32x48xf32>
    %559 = arith.mulf %558, %558 : vector<32x48xf32>
    %cst_216 = arith.constant dense<0.000000e+00> : vector<32xf32>
    %560 = vector.multi_reduction <add>, %559, %cst_216 [1] : vector<32x48xf32> to vector<32xf32>
    %561 = vector.shape_cast %560 : vector<32xf32> to vector<32x1xf32>
    %cst_217 = arith.constant 4.800000e+01 : f32
    %562 = vector.broadcast %cst_217 : f32 to vector<32x1xf32>
    %563 = arith.divf %561, %562 : vector<32x1xf32>
    %564 = vector.broadcast %556 : vector<32x1xf32> to vector<32x48xf32>
    %565 = arith.subf %550, %564 : vector<32x48xf32>
    %cst_218 = arith.constant 9.99999974E-6 : f32
    %566 = vector.broadcast %cst_218 : f32 to vector<32x1xf32>
    %567 = arith.addf %563, %566 : vector<32x1xf32>
    %568 = math.rsqrt %567 : vector<32x1xf32>
    %569 = vector.broadcast %568 : vector<32x1xf32> to vector<32x48xf32>
    %570 = arith.mulf %565, %569 : vector<32x48xf32>
    %571 = vector.broadcast %551 : vector<1x48xf32> to vector<32x48xf32>
    %572 = arith.mulf %570, %571 : vector<32x48xf32>
    %573 = vector.broadcast %552 : vector<1x48xf32> to vector<32x48xf32>
    %574 = arith.addf %572, %573 : vector<32x48xf32>
    %c0_219 = arith.constant 0 : index
    %c0_220 = arith.constant 0 : index
    %575 = vector.load %arg23[%c0_219, %c0_220] : memref<48x192xf32, #tpu.memory_space<vmem>>, vector<48x192xf32>
    %cst_221 = arith.constant dense<0.000000e+00> : vector<32x192xf32>
    %576 = tpu.matmul %574, %575, %cst_221 {dimension_numbers = #tpu.dot_dimension_numbers<[1], [0], [0], [1], [0, 0, 1, 1], [], []>} : vector<32x48xf32>, vector<48x192xf32>, vector<32x192xf32> -> vector<32x192xf32>
    %c0_222 = arith.constant 0 : index
    %c0_223 = arith.constant 0 : index
    %577 = vector.load %arg24[%c0_222, %c0_223] : memref<1x192xf32, #tpu.memory_space<vmem>>, vector<1x192xf32>
    %578 = vector.broadcast %577 : vector<1x192xf32> to vector<32x192xf32>
    %579 = arith.addf %576, %578 : vector<32x192xf32>
    %cst_224 = arith.constant 0.000000e+00 : f32
    %580 = vector.broadcast %cst_224 : f32 to vector<32x192xf32>
    %581 = arith.maximumf %579, %580 : vector<32x192xf32>
    %c0_225 = arith.constant 0 : index
    %c0_226 = arith.constant 0 : index
    %582 = vector.load %arg25[%c0_225, %c0_226] : memref<192x48xf32, #tpu.memory_space<vmem>>, vector<192x48xf32>
    %cst_227 = arith.constant dense<0.000000e+00> : vector<32x48xf32>
    %583 = tpu.matmul %581, %582, %cst_227 {dimension_numbers = #tpu.dot_dimension_numbers<[1], [0], [0], [1], [0, 0, 1, 1], [], []>} : vector<32x192xf32>, vector<192x48xf32>, vector<32x48xf32> -> vector<32x48xf32>
    %584 = arith.addf %550, %583 : vector<32x48xf32>
    %c0_228 = arith.constant 0 : index
    %c0_229 = arith.constant 0 : index
    %585 = vector.load %arg26[%c0_228, %c0_229] : memref<1x48xf32, #tpu.memory_space<vmem>>, vector<1x48xf32>
    %586 = vector.broadcast %585 : vector<1x48xf32> to vector<32x48xf32>
    %587 = arith.addf %584, %586 : vector<32x48xf32>
    %c0_230 = arith.constant 0 : index
    %c0_231 = arith.constant 0 : index
    %588 = vector.load %arg27[%c0_230, %c0_231] : memref<1x48xf32, #tpu.memory_space<vmem>>, vector<1x48xf32>
    %c0_232 = arith.constant 0 : index
    %c0_233 = arith.constant 0 : index
    %589 = vector.load %arg28[%c0_232, %c0_233] : memref<1x48xf32, #tpu.memory_space<vmem>>, vector<1x48xf32>
    %cst_234 = arith.constant dense<0.000000e+00> : vector<32xf32>
    %590 = vector.multi_reduction <add>, %587, %cst_234 [1] : vector<32x48xf32> to vector<32xf32>
    %591 = vector.shape_cast %590 : vector<32xf32> to vector<32x1xf32>
    %cst_235 = arith.constant 4.800000e+01 : f32
    %592 = vector.broadcast %cst_235 : f32 to vector<32x1xf32>
    %593 = arith.divf %591, %592 : vector<32x1xf32>
    %594 = vector.broadcast %593 : vector<32x1xf32> to vector<32x48xf32>
    %595 = arith.subf %587, %594 : vector<32x48xf32>
    %596 = arith.mulf %595, %595 : vector<32x48xf32>
    %cst_236 = arith.constant dense<0.000000e+00> : vector<32xf32>
    %597 = vector.multi_reduction <add>, %596, %cst_236 [1] : vector<32x48xf32> to vector<32xf32>
    %598 = vector.shape_cast %597 : vector<32xf32> to vector<32x1xf32>
    %cst_237 = arith.constant 4.800000e+01 : f32
    %599 = vector.broadcast %cst_237 : f32 to vector<32x1xf32>
    %600 = arith.divf %598, %599 : vector<32x1xf32>
    %601 = vector.broadcast %593 : vector<32x1xf32> to vector<32x48xf32>
    %602 = arith.subf %587, %601 : vector<32x48xf32>
    %cst_238 = arith.constant 9.99999974E-6 : f32
    %603 = vector.broadcast %cst_238 : f32 to vector<32x1xf32>
    %604 = arith.addf %600, %603 : vector<32x1xf32>
    %605 = math.rsqrt %604 : vector<32x1xf32>
    %606 = vector.broadcast %605 : vector<32x1xf32> to vector<32x48xf32>
    %607 = arith.mulf %602, %606 : vector<32x48xf32>
    %608 = vector.broadcast %588 : vector<1x48xf32> to vector<32x48xf32>
    %609 = arith.mulf %607, %608 : vector<32x48xf32>
    %610 = vector.broadcast %589 : vector<1x48xf32> to vector<32x48xf32>
    %611 = arith.addf %609, %610 : vector<32x48xf32>
    %c0_239 = arith.constant 0 : index
    %c0_240 = arith.constant 0 : index
    %612 = vector.load %arg29[%c0_239, %c0_240] : memref<48x128xf32, #tpu.memory_space<vmem>>, vector<48x128xf32>
    %cst_241 = arith.constant dense<0.000000e+00> : vector<32x128xf32>
    %613 = tpu.matmul %611, %612, %cst_241 {dimension_numbers = #tpu.dot_dimension_numbers<[1], [0], [0], [1], [0, 0, 1, 1], [], []>} : vector<32x48xf32>, vector<48x128xf32>, vector<32x128xf32> -> vector<32x128xf32>
    %c0_242 = arith.constant 0 : index
    %c0_243 = arith.constant 0 : index
    %614 = vector.load %arg30[%c0_242, %c0_243] : memref<1x128xf32, #tpu.memory_space<vmem>>, vector<1x128xf32>
    %615 = vector.broadcast %614 : vector<1x128xf32> to vector<32x128xf32>
    %616 = arith.addf %613, %615 : vector<32x128xf32>
    %c0_244 = arith.constant 0 : index
    %c0_245 = arith.constant 0 : index
    %617 = vector.load %arg31[%c0_244, %c0_245] : memref<32x128xf32, #tpu.memory_space<vmem>>, vector<32x128xf32>
    tpu.vector_store %arg31[%c0_244, %c0_245], %616 {strides = array<i32>} : memref<32x128xf32, #tpu.memory_space<vmem>>, vector<32x128xf32>,
    return
  }
}

</mosaic_0001>

<bundles_post_ra>
// kernel: tpu_custom_call.1
= control target key start
LH: loop header
LB: loop body
LE: loop exit
PB: predicated region body
PF: predicated region fallthrough
CT: control target
= control target key end

     0   :  { %s5679_s6 = smov 1   ;;  %s5680_s10 = smov 2   ;;  %s7752_s0 = inlined_call_operand.smem [shape: u32[32], index: -1, kind: input, shape index: {}] }
   0x1   :  { %s5739_s5 = sld [smem:[%s7752_s0]]   ;;  %s5681_s14 = smov 3  }
   0x2   :  { %s5744_s9 = sld [smem:[%s7752_s0 + %s5679_s6]]   ;;  %s5682_s18 = smov 4  }
   0x3   :  { %s5749_s13 = sld [smem:[%s7752_s0 + %s5680_s10]]   ;;  %s5683_s22 = smov 5  }
   0x4   :  { %s5754_s17 = sld [smem:[%s7752_s0 + %s5681_s14]]   ;;  %s5684_s26 = smov 6  }
   0x5   :  { %s5759_s21 = sld [smem:[%s7752_s0 + %s5682_s18]]   ;;  %s5685_s30 = smov 7  }
   0x6   :  { %s5764_s25 = sld [smem:[%s7752_s0 + %s5683_s22]]   ;;  %s5686_s4 = smov 8  }
   0x7   :  { %s5769_s29 = sld [smem:[%s7752_s0 + %s5684_s26]]   ;;  %s5687_s10 = smov 9  }
   0x8   :  { %s5774_s3 = sld [smem:[%s7752_s0 + %s5685_s30]]   ;;  %s5688_s15 = smov 10  }
   0x9   :  { %s5779_s8 = sld [smem:[%s7752_s0 + %s5686_s4]]   ;;  %s5689_s20 = smov 11  }
   0xa   :  { %s5784_s14 = sld [smem:[%s7752_s0 + %s5687_s10]]   ;;  %s5690_s26 = smov 12  }
   0xb   :  { %s5789_s19 = sld [smem:[%s7752_s0 + %s5688_s15]]   ;;  %s5691_s1 = smov 13  }
   0xc   :  { %s5794_s24 = sld [smem:[%s7752_s0 + %s5689_s20]]   ;;  %s5692_s7 = smov 14  }
   0xd   :  { %s5799_s30 = sld [smem:[%s7752_s0 + %s5690_s26]]   ;;  %s5693_s15 = smov 15  }
   0xe   :  { %s5804_s6 = sld [smem:[%s7752_s0 + %s5691_s1]]   ;;  %s5694_s22 = smov 16  }
   0xf   :  { %s5809_s12 = sld [smem:[%s7752_s0 + %s5692_s7]]   ;;  %s5695_s28 = smov 17  }
  0x10   :  { %s5814_s20 = sld [smem:[%s7752_s0 + %s5693_s15]]   ;;  %s5696_s7 = smov 18  }
  0x11   :  { %s5819_s27 = sld [smem:[%s7752_s0 + %s5694_s22]]   ;;  %s5697_s15 = smov 19  }
  0x12   :  { %7758 = sst [smem:[#allocation23_spill]] %s5794_s24  ;;  %s5698_s22 = smov 20  }
  0x13   :  { %7759 = sst [smem:[#allocation24_spill]] %s5799_s30 }
  0x14   :  { %s5824_s4 = sld [smem:[%s7752_s0 + %s5695_s28]]   ;;  %s5699_s28 = smov 21  }
  0x15   :  { %7760 = sst [smem:[#allocation25_spill]] %s5809_s12 }
  0x16   :  { %7761 = sst [smem:[#allocation26_spill]] %s5814_s20 }
  0x17   :  { %7762 = sst [smem:[#allocation27_spill]] %s5819_s27 }
  0x18   :  { %s5829_s12 = sld [smem:[%s7752_s0 + %s5696_s7]]   ;;  %s5700_s7 = smov 22  }
  0x19   :  { %s5834_s20 = sld [smem:[%s7752_s0 + %s5697_s15]]   ;;  %s5701_s15 = smov 23  }
  0x1a   :  { %7763 = sst [smem:[#allocation28_spill]] %s5824_s4 }
  0x1b   :  { %s5839_s27 = sld [smem:[%s7752_s0 + %s5698_s22]]   ;;  %s5702_s22 = smov 24  }
  0x1c   :  { %s5844_s4 = sld [smem:[%s7752_s0 + %s5699_s28]]   ;;  %s5703_s28 = smov 25  }
  0x1d   :  { %s5849_s24 = sld [smem:[%s7752_s0 + %s5700_s7]]   ;;  %s5704_s7 = smov 26  }
  0x1e   :  { %s5854_s30 = sld [smem:[%s7752_s0 + %s5701_s15]]   ;;  %s5705_s15 = smov 27  }
  0x21   :  { %7764 = sst [smem:[#allocation29_spill]] %s5839_s27 }
  0x22   :  { %7765 = sst [smem:[#allocation30_spill]] %s5844_s4 }
  0x23   :  { %7766 = sst [smem:[#allocation31_spill]] %s5849_s24 }
  0x24   :  { %7767 = sst [smem:[#allocation32_spill]] %s5854_s30 }
  0x25   :  { %s5859_s27 = sld [smem:[%s7752_s0 + %s5702_s22]]   ;;  %s5706_s22 = smov 28  }
  0x26   :  { %s5864_s4 = sld [smem:[%s7752_s0 + %s5703_s28]]   ;;  %s5707_s28 = smov 29  }
  0x27   :  { %s5869_s24 = sld [smem:[%s7752_s0 + %s5704_s7]]   ;;  %s5708_s7 = smov 30  }
  0x28   :  { %s5874_s30 = sld [smem:[%s7752_s0 + %s5705_s15]]   ;;  %s5709_s15 = smov 31  }
  0x2b   :  { %7768 = sst [smem:[#allocation33_spill]] %s5859_s27 }
  0x2c   :  { %7769 = sst [smem:[#allocation34_spill]] %s5864_s4 }
  0x2d   :  { %7770 = sst [smem:[#allocation35_spill]] %s5869_s24 }
  0x2e   :  { %7771 = sst [smem:[#allocation36_spill]] %s5874_s30 }
  0x2f   :  { %s5879_s27 = sld [smem:[%s7752_s0 + %s5706_s22]]  }
  0x30   :  { %s5884_s4 = sld [smem:[%s7752_s0 + %s5707_s28]]  }
  0x31   :  { %s5889_s24 = sld [smem:[%s7752_s0 + %s5708_s7]]  }
  0x32   :  { %s5894_s30 = sld [smem:[%s7752_s0 + %s5709_s15]]  }
  0x33   :  { %68 = vsyncpa [#allocation3], 0 }
  0x34   :  { %69 = vsyncpa [#allocation6], 0 }
  0x35   :  { %70 = vsyncpa [#allocation9], 0 }
  0x36   :  { %71 = vsyncpa [#allocation12], 0 }
  0x37   :  { %72 = vsyncpa [#allocation15], 0  ;;  %s92_s22 = sshll.u32 %s5744_s9, 4  ;;  %s93_s22 = int_to_ptr.hbm [resolvable:$true] %s92_s22 }
  0x38   :  { %73 = vsyncpa [#allocation4], 0  ;;  %s5710_s23 = smov [#allocation5]   ;;  %s126_s28 = sshll.u32 %s5784_s14, 4  ;;  %s127_s28 = int_to_ptr.hbm [resolvable:$true] %s126_s28 }
  0x39   :  { %s94_s26 = sshll.u32 %s5710_s23, 4  ;;  %s5451_s1 = sshra.s32 %s93_s22, 4  ;;  %s95_s26 = int_to_ptr.vmem [resolvable:$true] %s94_s26  ;;  %s5452_s1 = int_to_ptr.hbm [resolvable:$true] %s5451_s1 }
  0x3a   :  { %s5453_s0 = scalar_lea.hbm %s5452_s1, 1  ;;  %s5455_s2 = scalar_lea.hbm %s5744_s9, 1 }
  0x3b   :  { %p5454_p0 = scmp.ne.s32.totalorder %s5452_s1, %s5453_s0  ;;  %p5456_p1 = scmp.lt.s32.totalorder %s5452_s1, %s5744_s9 }
  0x3c   :  { %p5457_p2 = scmp.lt.s32.totalorder %s5455_s2, %s5453_s0 }
  0x3e   :  { %p5458_p3 = por %p5457_p2, %p5456_p1 }
  0x40   :  { %p5459_p4 = pnand %p5458_p3, %p5454_p0 }
  0x42   :  { %5462 = shalt.err (!%p5459_p4)
}
  0x43   :  { %97 = dma.hbm_to_vmem [thread:$0]  %s93_s22, 16, %s95_s26, [#allocation6]  }
  0x44   :  { %s5711_s7 = smov [#allocation8]   ;;  %s5475_s11 = sshra.s32 %s127_s28, 4  ;;  %s5476_s11 = int_to_ptr.hbm [resolvable:$true] %s5475_s11 }
  0x45   :  { %s128_s10 = sshll.u32 %s5711_s7, 4  ;;  %s5477_s15 = scalar_lea.hbm %s5476_s11, 1  ;;  %s129_s10 = int_to_ptr.vmem [resolvable:$true] %s128_s10 }
  0x46   :  { %p5478_p5 = scmp.ne.s32.totalorder %s5476_s11, %s5477_s15  ;;  %s5479_s16 = scalar_lea.hbm %s5784_s14, 1 }
  0x47   :  { %p5480_p6 = scmp.lt.s32.totalorder %s5476_s11, %s5784_s14  ;;  %p5481_p7 = scmp.lt.s32.totalorder %s5479_s16, %s5477_s15 }
  0x49   :  { %p5482_p8 = por %p5481_p7, %p5480_p6 }
  0x4b   :  { %p5483_p9 = pnand %p5482_p8, %p5478_p5 }
  0x4d   :  { %5486 = shalt.err (!%p5483_p9)
}
  0x4e   :  { %131 = dma.hbm_to_vmem [thread:$0]  %s127_s28, 16, %s129_s10, [#allocation9]  }
  0x4f   :  { %s161_s9 = sshll.u32 %s5829_s12, 4  ;;  %s5712_s18 = smov [#allocation11]   ;;  %s162_s9 = int_to_ptr.hbm [resolvable:$true] %s161_s9 }
  0x50   :  { %s163_s22 = sshll.u32 %s5712_s18, 4  ;;  %s78_s23 = sshll.u32 %s5739_s5, 4  ;;  %s164_s22 = int_to_ptr.vmem [resolvable:$true] %s163_s22  ;;  %s79_s23 = int_to_ptr.hbm [resolvable:$true] %s78_s23 }
  0x51   :  { %s5499_s26 = sshra.s32 %s162_s9, 4  ;;  %s5503_s14 = scalar_lea.hbm %s5829_s12, 48  ;;  %s5500_s26 = int_to_ptr.hbm [resolvable:$true] %s5499_s26 }
  0x52   :  { %s5501_s1 = scalar_lea.hbm %s5500_s26, 48  ;;  %p5504_p11 = scmp.lt.s32.totalorder %s5500_s26, %s5829_s12 }
  0x53   :  { %p5502_p10 = scmp.ne.s32.totalorder %s5500_s26, %s5501_s1  ;;  %p5505_p12 = scmp.lt.s32.totalorder %s5503_s14, %s5501_s1 }
  0x55   :  { %p5506_p13 = por %p5505_p12, %p5504_p11 }
  0x57   :  { %p5507_p0 = pnand %p5506_p13, %p5502_p10 }
  0x59   :  { %5510 = shalt.err (!%p5507_p0)
}
  0x5a   :  { %s5713_s28 = smov 128   ;;  %s5714_s0 = smov 8  }
  0x5b   :  { %169 = dma.hbm_to_vmem [thread:$0]  %s162_s9, 768, %s164_s22, [#allocation12], %s5713_s28, %s5713_s28, %s5714_s0  }
  0x5c   :  { %s5715_s2 = smov [#allocation2]   ;;  %s103_s10 = sshll.u32 %s5749_s13, 4  ;;  %s104_s10 = int_to_ptr.hbm [resolvable:$true] %s103_s10 }
  0x5d   :  { %s80_s7 = sshll.u32 %s5715_s2, 4  ;;  %s5523_s12 = sshra.s32 %s79_s23, 4  ;;  %s81_s7 = int_to_ptr.vmem [resolvable:$true] %s80_s7  ;;  %s5524_s12 = int_to_ptr.hbm [resolvable:$true] %s5523_s12 }
  0x5e   :  { %s5525_s11 = scalar_lea.hbm %s5524_s12, 32  ;;  %s5527_s15 = scalar_lea.hbm %s5739_s5, 32 }
  0x5f   :  { %p5526_p1 = scmp.ne.s32.totalorder %s5524_s12, %s5525_s11  ;;  %p5528_p2 = scmp.lt.s32.totalorder %s5524_s12, %s5739_s5 }
  0x60   :  { %p5529_p3 = scmp.lt.s32.totalorder %s5527_s15, %s5525_s11 }
  0x62   :  { %p5530_p4 = por %p5529_p3, %p5528_p2 }
  0x64   :  { %p5531_p5 = pnand %p5530_p4, %p5526_p1 }
  0x66   :  { %5534 = shalt.err (!%p5531_p5)
}
  0x67   :  { %86 = dma.hbm_to_vmem [thread:$0]  %s79_s23, 512, %s81_s7, [#allocation3], %s5713_s28, %s5713_s28, %s5714_s0  }
  0x68   :  { %s143_s16 = sshll.u32 %s5804_s6, 4  ;;  %s5716_s9 = smov [#allocation7]   ;;  %s144_s16 = int_to_ptr.hbm [resolvable:$true] %s143_s16 }
  0x69   :  { %s105_s18 = sshll.u32 %s5716_s9, 4  ;;  %s5547_s22 = sshra.s32 %s104_s10, 4  ;;  %s106_s18 = int_to_ptr.vmem [resolvable:$true] %s105_s18  ;;  %s5548_s22 = int_to_ptr.hbm [resolvable:$true] %s5547_s22 }
  0x6a   :  { %s5549_s26 = scalar_lea.hbm %s5548_s22, 1  ;;  %s5551_s5 = scalar_lea.hbm %s5749_s13, 1 }
  0x6b   :  { %p5550_p6 = scmp.ne.s32.totalorder %s5548_s22, %s5549_s26  ;;  %p5552_p7 = scmp.lt.s32.totalorder %s5548_s22, %s5749_s13 }
  0x6c   :  { %p5553_p8 = scmp.lt.s32.totalorder %s5551_s5, %s5549_s26 }
  0x6e   :  { %p5554_p9 = por %p5553_p8, %p5552_p7 }
  0x70   :  { %p5555_p10 = pnand %p5554_p9, %p5550_p6 }
  0x72   :  { %5558 = shalt.err (!%p5555_p10)
}
  0x73   :  { %108 = dma.hbm_to_vmem [thread:$0]  %s104_s10, 16, %s106_s18, [#allocation6]  }
  0x74   :  { %s5717_s23 = smov [#allocation10]   ;;  %s174_s14 = sshll.u32 %s5834_s20, 4  ;;  %s5919_s14 = int_to_ptr.hbm [resolvable:$true] %s174_s14 }
  0x75   :  { %s145_s1 = sshll.u32 %s5717_s23, 4  ;;  %s5571_s2 = sshra.s32 %s144_s16, 4  ;;  %s146_s1 = int_to_ptr.vmem [resolvable:$true] %s145_s1  ;;  %s5572_s2 = int_to_ptr.hbm [resolvable:$true] %s5571_s2 }
  0x76   :  { %s5573_s7 = scalar_lea.hbm %s5572_s2, 1  ;;  %s5575_s12 = scalar_lea.hbm %s5804_s6, 1 }
  0x77   :  { %p5574_p11 = scmp.ne.s32.totalorder %s5572_s2, %s5573_s7  ;;  %p5576_p12 = scmp.lt.s32.totalorder %s5572_s2, %s5804_s6 }
  0x78   :  { %p5577_p13 = scmp.lt.s32.totalorder %s5575_s12, %s5573_s7 }
  0x7a   :  { %p5578_p0 = por %p5577_p13, %p5576_p12 }
  0x7c   :  { %p5579_p1 = pnand %p5578_p0, %p5574_p11 }
  0x7e   :  { %5582 = shalt.err (!%p5579_p1)
}
  0x7f   :  { %148 = dma.hbm_to_vmem [thread:$0]  %s144_s16, 16, %s146_s1, [#allocation9]  }
  0x80   :  { %s205_s13 = sshll.u32 %s5884_s4, 4  ;;  %s5718_s10 = smov [#allocation13]   ;;  %s5924_s13 = int_to_ptr.hbm [resolvable:$true] %s205_s13 }
  0x81   :  { %s176_s11 = sshll.u32 %s5718_s10, 4  ;;  %s5595_s15 = sshra.s32 %s5919_s14, 4  ;;  %s177_s11 = int_to_ptr.vmem [resolvable:$true] %s176_s11  ;;  %s5596_s15 = int_to_ptr.hbm [resolvable:$true] %s5595_s15 }
  0x82   :  { %s5597_s9 = scalar_lea.hbm %s5596_s15, 48  ;;  %s5599_s6 = scalar_lea.hbm %s5834_s20, 48 }
  0x83   :  { %p5598_p2 = scmp.ne.s32.totalorder %s5596_s15, %s5597_s9  ;;  %p5600_p3 = scmp.lt.s32.totalorder %s5596_s15, %s5834_s20 }
  0x84   :  { %p5601_p4 = scmp.lt.s32.totalorder %s5599_s6, %s5597_s9 }
  0x86   :  { %p5602_p5 = por %p5601_p4, %p5600_p3 }
  0x88   :  { %p5603_p6 = pnand %p5602_p5, %p5598_p2 }
  0x8a   :  { %5606 = shalt.err (!%p5603_p6)
}
  0x8b   :  { %182 = dma.hbm_to_vmem [thread:$0]  %s5919_s14, 768, %s177_s11, [#allocation12], %s5713_s28, %s5713_s28, %s5714_s0  }
  0x8c   :  { %s5719_s16 = smov [#allocation14]   ;;  %s5619_s22 = sshra.s32 %s5924_s13, 4  ;;  %s5620_s22 = int_to_ptr.hbm [resolvable:$true] %s5619_s22 }
  0x8d   :  { %s207_s18 = sshll.u32 %s5719_s16, 4  ;;  %s5621_s26 = scalar_lea.hbm %s5620_s22, 48  ;;  %s208_s18 = int_to_ptr.vmem [resolvable:$true] %s207_s18 }
  0x8e   :  { %p5622_p7 = scmp.ne.s32.totalorder %s5620_s22, %s5621_s26  ;;  %s5623_s20 = scalar_lea.hbm %s5884_s4, 48 }
  0x8f   :  { %p5624_p8 = scmp.lt.s32.totalorder %s5620_s22, %s5884_s4  ;;  %p5625_p9 = scmp.lt.s32.totalorder %s5623_s20, %s5621_s26 }
  0x91   :  { %p5626_p10 = por %p5625_p9, %p5624_p8 }
  0x93   :  { %p5627_p11 = pnand %p5626_p10, %p5622_p7 }
  0x95   :  { %5630 = shalt.err (!%p5627_p11)
}
  0x96   :  { %213 = dma.hbm_to_vmem [thread:$0]  %s5924_s13, 768, %s208_s18, [#allocation15], %s5713_s28, %s5713_s28, %s5714_s0  }
  0x97   :  { %5667 = dma.done.wait [#allocation3], 512  }
  0x98   :  { %5668 = vsyncadd [#allocation3], 4294966784 }
  0x99   :  { %5669 = dma.done.wait [#allocation6], 32  }
  0x9a   :  { %5670 = vsyncadd [#allocation6], 4294967264 }
  0x9b   :  { %5671 = dma.done.wait [#allocation9], 32  }
  0x9c   :  { %5672 = vsyncadd [#allocation9], 4294967264 }
  0x9d   :  { %5673 = dma.done.wait [#allocation12], 1536  }
  0x9e   :  { %5674 = vsyncadd [#allocation12], 4294965760 }
  0x9f   :  { %5675 = dma.done.wait [#allocation15], 768  }
  0xa0   :  { %5676 = vsyncadd [#allocation15], 4294966528  ;;  %vm261_vm0 = vcmask 392192   ;;  %v248_v0 = vld [vmem:[#allocation2] sm:$0xff]  ;;  %v250_v1 = vld [vmem:[#allocation2 + $0x10] sm:$0xff]  ;;  %v5720_v8 = vmov 48.0  }
  0xa1   :  { %v262_v2 = vsel %vm261_vm0, %v248_v0, 0.0  ;;  %v268_v3 = vsel %vm261_vm0, %v250_v1, 0.0  ;;  %v249_v4 = vld [vmem:[#allocation2 + $0x8] sm:$0xff]  ;;  %v251_v5 = vld [vmem:[#allocation2 + $0x18] sm:$0xff]  ;;  %5213 = vrcp.f32 %v5720_v8  ;;  %v375_v38 = vld [vmem:[%s5754_s17 + $0x20] sm:$0xff]  ;;  %vm488_vm14 = vcmask 64512  }
  0xa2   :  { %263 = vadd.xlane.f32.xlu0 %v262_v2  ;;  %269 = vadd.xlane.f32.xlu2 %v268_v3  ;;  %v265_v6 = vsel %vm261_vm0, %v249_v4, 0.0  ;;  %v271_v7 = vsel %vm261_vm0, %v251_v5, 0.0  ;;  %v376_v35 = vld [vmem:[%s5754_s17 + $0x28] sm:$0xff]  ;;  %v422_v39 = vld [vmem:[%s5759_s21 + $0x20] sm:$0xff]  ;;  %v374_v41 = vld [vmem:[%s5754_s17 + $0x18] sm:$0xff]  ;;  %s5724_s4 = smov 88  }
  0xa3   :  { %v423_v36 = vld [vmem:[%s5759_s21 + $0x28] sm:$0xff]  ;;  %399 = vmatpush.msra.mxu0 %v376_v35  ;;  %v457_v40 = vld [vmem:[%s5764_s25 + $0x20] sm:$0xff]  ;;  %v421_v42 = vld [vmem:[%s5759_s21 + $0x18] sm:$0xff]  ;;  %s5725_s5 = smov 96   ;;  %s5726_s23 = smov 16  }
  0xa4   :  { %v458_v37 = vld [vmem:[%s5764_s25 + $0x28] sm:$0xff]  ;;  %434 = vmatpush.msra.mxu1 %v423_v36  ;;  %v456_v43 = vld [vmem:[%s5764_s25 + $0x18] sm:$0xff]  ;;  %v373_v44 = vld [vmem:[%s5754_s17 + $0x10] sm:$0xff]  ;;  %s5727_s1 = smov 32   ;;  %s5728_s14 = smov 24  }
  0xa5   :  { %469 = vmatpush.msra.mxu2 %v458_v37  ;;  %400 = vmatpush.msra.mxu0 %v375_v38  ;;  %v420_v45 = vld [vmem:[%s5759_s21 + $0x10] sm:$0xff]  ;;  %v372_v47 = vld [vmem:[%s5754_s17 + $0x8] sm:$0xff]  ;;  %v371_v50 = vld [vmem:[%s5754_s17] sm:$0xff]  ;;  %s5721_s17 = smov 120   ;;  %s5729_s2 = smov 40  }
  0xa6   :  { %435 = vmatpush.msra.mxu1 %v422_v39  ;;  %v455_v46 = vld [vmem:[%s5764_s25 + $0x10] sm:$0xff]  ;;  %v419_v48 = vld [vmem:[%s5759_s21 + $0x8] sm:$0xff]  ;;  %v418_v51 = vld [vmem:[%s5759_s21] sm:$0xff]  ;;  %s5722_s21 = smov 104   ;;  %s7784_s7 = sld [smem:[#allocation25_spill]] }
  0xa7   :  { %v5214_v9 = vpop.eup %5213  ;;  %470 = vmatpush.msra.mxu2 %v457_v40  ;;  %401 = vmatpush.msra.mxu0 %v374_v41  ;;  %v454_v49 = vld [vmem:[%s5764_s25 + $0x8] sm:$0xff]  ;;  %v453_v52 = vld [vmem:[%s5764_s25] sm:$0xff]  ;;  %s5723_s25 = smov 112   ;;  %s7785_s12 = sld [smem:[#allocation26_spill]] }
  0xa8   :  { %v275_v10 = vmul.f32 48.0, %v5214_v9  ;;  %vm279_vm1 = vweird.f32 %v5214_v9  ;;  %436 = vmatpush.msra.mxu1 %v421_v42  ;;  %s7792_s13 = sld [smem:[#allocation29_spill]]  ;;  %s4794_s26 = sshll.u32 %s5894_s30, 4  ;;  %s4795_s26 = int_to_ptr.hbm [resolvable:$true] %s4794_s26 }
  0xa9   :  { %471 = vmatpush.msra.mxu2 %v456_v43  ;;  %402 = vmatpush.msra.mxu0 %v373_v44  ;;  %s7793_s10 = sld [smem:[#allocation32_spill]] }
  0xaa   :  { %266 = vadd.xlane.f32.xlu0 %v265_v6  ;;  %272 = vadd.xlane.f32.xlu2 %v271_v7  ;;  %v276_v11 = vsub.f32 1.0, %v275_v10  ;;  %s7794_s11 = sld [smem:[#allocation30_spill]] }
  0xab   :  { %437 = vmatpush.msra.mxu1 %v420_v45  ;;  %472 = vmatpush.msra.mxu2 %v455_v46  ;;  %s7795_s15 = sld [smem:[#allocation31_spill]] }
  0xac   :  { %v277_v12 = vmul.f32 %v5214_v9, %v276_v11  ;;  %403 = vmatpush.msra.mxu0 %v372_v47  ;;  %s7796_s9 = sld [smem:[#allocation34_spill]] }
  0xad   :  { %438 = vmatpush.msra.mxu1 %v419_v48  ;;  %473 = vmatpush.msra.mxu2 %v454_v49  ;;  %s7797_s6 = sld [smem:[#allocation33_spill]] }
  0xae   :  { %v278_v13 = vadd.f32 %v5214_v9, %v277_v12  ;;  %404 = vmatpush.msra.mxu0 %v371_v50  ;;  %s7798_s16 = sld [smem:[#allocation35_spill]] }
  0xaf   :  { %439 = vmatpush.msra.mxu1 %v418_v51  ;;  %474 = vmatpush.msra.mxu2 %v453_v52  ;;  %s7799_s18 = sld [smem:[#allocation36_spill]] }
  0xb0   :  { %v5944_v14 = vsel %vm279_vm1, %v5214_v9, %v278_v13  ;;  %v5198_v13 = vld [vmem:[#allocation5] ss:$0 sm:$0xff]  ;;  %vm528_vm1 = vcmask 130048  }
 0x115   :  { %v264_v15 = vpop.xlane.xlu0 %263  ;;  %v270_v16 = vpop.xlane.xlu2 %269 }
 0x116   :  { %v281_v17 = vmul.f32 %v5944_v14, %v264_v15  ;;  %v283_v18 = vmul.f32 %v5944_v14, %v270_v16 }
 0x118   :  { %v5948_v19 = vsub.f32 %v250_v1, %v283_v18  ;;  %v5950_v20 = vsub.f32 %v248_v0, %v281_v17  ;;  %v5199_v18 = vld [vmem:[#allocation7] ss:$0 sm:$0xff] }
 0x11a   :  { %v289_v21 = vmul.f32 %v5950_v20, %v5950_v20  ;;  %v291_v22 = vmul.f32 %v5948_v19, %v5948_v19 }
 0x11c   :  { %v293_v23 = vsel %vm261_vm0, %v289_v21, 0.0  ;;  %v299_v24 = vsel %vm261_vm0, %v291_v22, 0.0 }
 0x11d   :  { %294 = vadd.xlane.f32.xlu1 %v293_v23  ;;  %v267_v25 = vpop.xlane.xlu0 %266  ;;  %300 = vadd.xlane.f32.xlu0 %v299_v24  ;;  %v273_v26 = vpop.xlane.xlu2 %272 }
 0x11e   :  { %v282_v27 = vmul.f32 %v5944_v14, %v267_v25  ;;  %v284_v28 = vmul.f32 %v5944_v14, %v273_v26 }
 0x120   :  { %v5960_v29 = vsub.f32 %v249_v4, %v282_v27  ;;  %v5962_v30 = vsub.f32 %v251_v5, %v284_v28 }
 0x122   :  { %v290_v31 = vmul.f32 %v5960_v29, %v5960_v29  ;;  %v292_v33 = vmul.f32 %v5962_v30, %v5962_v30 }
 0x124   :  { %v296_v32 = vsel %vm261_vm0, %v290_v31, 0.0  ;;  %v302_v34 = vsel %vm261_vm0, %v292_v33, 0.0 }
 0x125   :  { %297 = vadd.xlane.f32.xlu1 %v296_v32 }
 0x12d   :  { %303 = vadd.xlane.f32.xlu1 %v302_v34 }
 0x190   :  { %v295_v53 = vpop.xlane.xlu1 %294  ;;  %v301_v54 = vpop.xlane.xlu0 %300 }
 0x191   :  { %v305_v55 = vmul.f32 %v295_v53, %v5944_v14  ;;  %v307_v56 = vmul.f32 %v301_v54, %v5944_v14  ;;  %v252_v53 = vlaneseq }
 0x193   :  { %v309_v57 = vadd.f32 1e-05, %v305_v55  ;;  %v311_v58 = vadd.f32 1e-05, %v307_v56  ;;  %v253_v54 = vshrl.u32 %v252_v53, 7  ;;  %v256_v55 = vand.u32 127, %v252_v53 }
 0x195   :  { %5215 = vrsqrt.f32 %v309_v57  ;;  %vm319_vm3 = vweird.f32 %v309_v57  ;;  %vm339_vm5 = vweird.f32 %v311_v58  ;;  %vm6037_vm15 = vcmp.le.s32.totalorder %v256_v55, %v253_v54 }
 0x196   :  { %5217 = vrsqrt.f32 %v311_v58 }
 0x198   :  { %v298_v59 = vpop.xlane.xlu1 %297 }
 0x199   :  { %v306_v60 = vmul.f32 %v298_v59, %v5944_v14 }
 0x19b   :  { %v5216_v61 = vpop.eup %5215  ;;  %v310_v62 = vadd.f32 1e-05, %v306_v60 }
 0x19c   :  { %v5218_v63 = vpop.eup %5217  ;;  %v314_v0 = vmul.f32 %v5216_v61, %v309_v57  ;;  %vm320_vm2 = vweird.f32 %v5216_v61 }
 0x19d   :  { %v334_v1 = vmul.f32 %v5218_v63, %v311_v58  ;;  %5219 = vrsqrt.f32 %v310_v62  ;;  %vm321_vm4 = vmor %vm319_vm3, %vm320_vm2  ;;  %vm340_vm6 = vweird.f32 %v5218_v63  ;;  %vm329_vm9 = vweird.f32 %v310_v62 }
 0x19e   :  { %v315_v2 = vmul.f32 %v5216_v61, %v314_v0  ;;  %vm5993_vm8 = vmor %vm339_vm5, %vm340_vm6 }
 0x19f   :  { %v335_v4 = vmul.f32 %v5218_v63, %v334_v1 }
 0x1a0   :  { %v316_v3 = vmul.f32 0.5, %v315_v2  ;;  %v304_v5 = vpop.xlane.xlu1 %303 }
 0x1a1   :  { %v308_v6 = vmul.f32 %v304_v5, %v5944_v14  ;;  %v336_v11 = vmul.f32 0.5, %v335_v4 }
 0x1a2   :  { %v317_v7 = vsub.f32 1.5, %v316_v3 }
 0x1a3   :  { %v5220_v8 = vpop.eup %5219  ;;  %v312_v9 = vadd.f32 1e-05, %v308_v6  ;;  %v337_v21 = vsub.f32 1.5, %v336_v11 }
 0x1a4   :  { %v318_v10 = vmul.f32 %v5216_v61, %v317_v7  ;;  %v324_v12 = vmul.f32 %v5220_v8, %v310_v62  ;;  %vm330_vm7 = vweird.f32 %v5220_v8 }
 0x1a5   :  { %5221 = vrsqrt.f32 %v312_v9  ;;  %v338_v27 = vmul.f32 %v5218_v63, %v337_v21  ;;  %vm331_vm10 = vmor %vm329_vm9, %vm330_vm7  ;;  %vm349_vm11 = vweird.f32 %v312_v9 }
 0x1a6   :  { %v325_v15 = vmul.f32 %v5220_v8, %v324_v12  ;;  %v322_v16 = vsel %vm321_vm4, %v5216_v61, %v318_v10  ;;  %v254_v61 = vadd.s32 8, %v253_v54 }
 0x1a7   :  { %v353_v17 = vmul.f32 %v322_v16, %v5950_v20  ;;  %v342_v36 = vsel %vm5993_vm8, %v5218_v63, %v338_v27 }
 0x1a8   :  { %v326_v22 = vmul.f32 0.5, %v325_v15  ;;  %v355_v40 = vmul.f32 %v342_v36, %v5948_v19  ;;  %vm6044_vm2 = vcmp.le.s32.totalorder %v256_v55, %v254_v61 }
 0x1a9   :  { %v360_v23 = vmul.f32 %v5198_v13, %v353_v17 }
 0x1aa   :  { %v327_v24 = vsub.f32 1.5, %v326_v22 }
 0x1ab   :  { %v5222_v25 = vpop.eup %5221  ;;  %v367_v26 = vadd.f32 %v5199_v18, %v360_v23 }
 0x1ac   :  { %v328_v31 = vmul.f32 %v5220_v8, %v327_v24  ;;  %v344_v32 = vmul.f32 %v5222_v25, %v312_v9  ;;  %vm350_vm12 = vweird.f32 %v5222_v25 }
 0x1ad   :  { %4842 = vmatmul.msk.f32.vlgmr.msra.gmra.mxu0 %vm261_vm0, %v367_v26  ;;  %4846 = vmatmul.msk.f32.vlgmr.msra.gmra.mxu1 %vm261_vm0, %v367_v26  ;;  %vm351_vm13 = vmor %vm349_vm11, %vm350_vm12 }
 0x1ae   :  { %v345_v20 = vmul.f32 %v5222_v25, %v344_v32  ;;  %4850 = vmatmul.msk.f32.vlgmr.msra.gmra.mxu2 %vm261_vm0, %v367_v26  ;;  %v332_v33 = vsel %vm331_vm10, %v5220_v8, %v328_v31 }
 0x1af   :  { %v354_v34 = vmul.f32 %v332_v33, %v5960_v29  ;;  %v362_v29 = vmul.f32 %v5198_v13, %v355_v40 }
 0x1b0   :  { %v346_v35 = vmul.f32 0.5, %v345_v20 }
 0x1b1   :  { %v361_v37 = vmul.f32 %v5198_v13, %v354_v34  ;;  %v369_v43 = vadd.f32 %v5199_v18, %v362_v29 }
 0x1b2   :  { %v347_v38 = vsub.f32 1.5, %v346_v35 }
 0x1b3   :  { %v368_v39 = vadd.f32 %v5199_v18, %v361_v37 }
 0x1b4   :  { %v348_v41 = vmul.f32 %v5222_v25, %v347_v38 }
 0x1b5   :  { %4843 = vmatmul.msk.f32.gmra.mxu0 %vm261_vm0, %v368_v39  ;;  %4847 = vmatmul.msk.f32.gmra.mxu1 %vm261_vm0, %v368_v39 }
 0x1b6   :  { %4851 = vmatmul.msk.f32.gmra.mxu2 %vm261_vm0, %v368_v39  ;;  %v352_v42 = vsel %vm351_vm13, %v5222_v25, %v348_v41 }
 0x1b7   :  { %v356_v44 = vmul.f32 %v352_v42, %v5962_v30 }
 0x1b9   :  { %v363_v19 = vmul.f32 %v5198_v13, %v356_v44 }
 0x1bb   :  { %v370_v45 = vadd.f32 %v5199_v18, %v363_v19 }
 0x1bd   :  { %4844 = vmatmul.msk.f32.gmra.mxu0 %vm261_vm0, %v369_v43  ;;  %4848 = vmatmul.msk.f32.gmra.mxu1 %vm261_vm0, %v369_v43 }
 0x1be   :  { %4852 = vmatmul.msk.f32.gmra.mxu2 %vm261_vm0, %v369_v43 }
 0x1c5   :  { %4845 = vmatmul.msk.f32.gmra.mxu0 %vm261_vm0, %v370_v45  ;;  %4849 = vmatmul.msk.f32.gmra.mxu1 %vm261_vm0, %v370_v45 }
 0x1c6   :  { %4853 = vmatmul.msk.f32.gmra.mxu2 %vm261_vm0, %v370_v45 }
 0x22a   :  { %v6014_v46 = vpop.f32.mrf.mxu1  ;;  %v6022_v48 = vpop.f32.mrf.mxu0 }
 0x22b   :  { %610 = vrot.lane.b32.xlu1 %v6014_v46, %s5721_s17 }
 0x231   :  { %v6018_v30 = vpop.f32.mrf.mxu2 }
 0x232   :  { %v444_v47 = vpop.f32.mrf.mxu1  ;;  %v409_v50 = vpop.f32.mrf.mxu0 }
 0x233   :  { %866 = vrot.lane.b32.xlu1 %v444_v47, %s5722_s21  ;;  %4854 = vmatpush.xpose.msk.msrb.mxu0 %vm488_vm14, %v444_v47 }
 0x237   :  { %4855 = vmatpush.xpose.msk.msrb.mxu0 %vm488_vm14, %v6014_v46 }
 0x239   :  { %v6026_v49 = vpop.f32.mrf.mxu2 }
 0x23a   :  { %597 = vmatpush.msra.mxu3 %v6026_v49  ;;  %4856 = vmatmul.msk.f32.vlgmr.msrb.gmra.mxu0 %vm488_vm14, %v6022_v48  ;;  %v6033_v51 = vpop.f32.mrf.mxu0 }
 0x23c   :  { %598 = vmatpush.msra.mxu3 %v6018_v30 }
 0x242   :  { %4857 = vmatmul.msk.f32.gmra.mxu0 %vm488_vm14, %v409_v50  ;;  %v6035_v52 = vpop.f32.mrf.mxu0 }
 0x29d   :  { %v611_v17 = vpop.permute.xlu1 %610 }
 0x2a5   :  { %v867_v27 = vpop.permute.xlu1 %866 }
 0x2b7   :  { %v518_v56 = vpop.f32.mrf.mxu0 }
 0x2b8   :  { %v524_v58 = vmul.f32 0.14433756, %v518_v56  ;;  %v6096_v56 = vpop.f32.mrf.mxu1 }
 0x2ba   :  { %v526_v59 = vsel %vm6037_vm15, %v524_v58, -1e+30 }
 0x2bb   :  { %v529_v60 = vsel %vm528_vm1, %v526_v59, -inf }
 0x2bc   :  { %530 = vmax.xlane.f32.xlu2 %v529_v60 }
 0x2bf   :  { %v521_v62 = vpop.f32.mrf.mxu0 }
 0x2c0   :  { %v525_v0 = vmul.f32 0.14433756, %v521_v62  ;;  %v6102_v61 = vpop.f32.mrf.mxu1 }
 0x2c2   :  { %v527_v1 = vsel %vm6044_vm2, %v525_v0, -1e+30 }
 0x2c3   :  { %v532_v2 = vsel %vm528_vm1, %v527_v1, -inf }
 0x2c4   :  { %533 = vmax.xlane.f32.xlu0 %v532_v2 }
 0x2d4   :  { %606 = vrot.lane.b32.xlu2 %v6022_v48, %s5721_s17 }
 0x2d8   :  { %612 = vrot.lane.b32.xlu0 %v444_v47, %s5721_s17 }
 0x2dc   :  { %740 = vrot.lane.b32.xlu2 %v444_v47, %s5723_s25 }
 0x2e0   :  { %608 = vrot.lane.b32.xlu0 %v409_v50, %s5721_s17 }
 0x2e4   :  { %864 = vrot.lane.b32.xlu2 %v6014_v46, %s5722_s21 }
 0x2e8   :  { %738 = vrot.lane.b32.xlu0 %v6014_v46, %s5723_s25 }
 0x2ec   :  { %736 = vrot.lane.b32.xlu2 %v409_v50, %s5723_s25 }
 0x2f0   :  { %860 = vrot.lane.b32.xlu0 %v6022_v48, %s5722_s21 }
 0x2f4   :  { %1118 = vrot.lane.b32.xlu2 %v444_v47, %s5724_s4 }
 0x2f8   :  { %992 = vrot.lane.b32.xlu0 %v444_v47, %s5725_s5 }
 0x2fc   :  { %986 = vrot.lane.b32.xlu2 %v6022_v48, %s5725_s5 }
 0x300   :  { %1116 = vrot.lane.b32.xlu0 %v6014_v46, %s5724_s4 }
 0x308   :  { %988 = vrot.lane.b32.xlu0 %v409_v50, %s5725_s5 }
 0x32f   :  { %v531_v3 = vpop.xlane.xlu2 %530 }
 0x330   :  { %v535_v4 = vsub.f32 %v526_v59, %v531_v3 }
 0x332   :  { %v537_v5 = vmul.f32 1.442695, %v535_v4 }
 0x334   :  { %5223 = vpow2.f32 %v537_v5 }
 0x337   :  { %v6070_v6 = vpop.permute.xlu2 %606  ;;  %v534_v7 = vpop.xlane.xlu0 %533 }
 0x338   :  { %v536_v8 = vsub.f32 %v527_v1, %v534_v7 }
 0x33a   :  { %v5224_v9 = vpop.eup %5223  ;;  %v539_v10 = vmul.f32 1.442695, %v536_v8 }
 0x33b   :  { %v541_v11 = vsel %vm528_vm1, %v5224_v9, 0.0 }
 0x33c   :  { %5225 = vpow2.f32 %v539_v10  ;;  %542 = vadd.xlane.f32.xlu1 %v541_v11 }
 0x33f   :  { %v741_v12 = vpop.permute.xlu2 %740 }
 0x340   :  { %4866 = vmatpush.xpose.msk.msrb.mxu1 %vm488_vm14, %v741_v12 }
 0x342   :  { %v5226_v13 = vpop.eup %5225 }
 0x343   :  { %v544_v15 = vsel %vm528_vm1, %v5226_v13, 0.0 }
 0x344   :  { %545 = vadd.xlane.f32.xlu2 %v544_v15  ;;  %v5098_v15 = vpack.i.bf16 %v6018_v30, %v6026_v49 }
 0x347   :  { %v865_v24 = vpop.permute.xlu2 %864 }
 0x34a   :  { %v613_v16 = vpop.permute.xlu0 %612 }
 0x34b   :  { %4860 = vmatpush.xpose.msk.msrb.mxu3 %vm488_vm14, %v613_v16 }
 0x34f   :  { %4861 = vmatpush.xpose.msk.msrb.mxu3 %vm488_vm14, %v611_v17  ;;  %v737_v25 = vpop.permute.xlu2 %736 }
 0x352   :  { %v6077_v18 = vpop.permute.xlu0 %608 }
 0x355   :  { %734 = vrot.lane.b32.xlu1 %v6022_v48, %s5723_s25 }
 0x357   :  { %v1119_v26 = vpop.permute.xlu2 %1118 }
 0x35a   :  { %v739_v21 = vpop.permute.xlu0 %738 }
 0x35b   :  { %4867 = vmatpush.xpose.msk.msrb.mxu1 %vm488_vm14, %v739_v21 }
 0x35c   :  { %1114 = vrot.lane.b32.xlu2 %v409_v50, %s5724_s4 }
 0x35d   :  { %862 = vrot.lane.b32.xlu1 %v409_v50, %s5722_s21 }
 0x35f   :  { %v987_v28 = vpop.permute.xlu2 %986 }
 0x362   :  { %v6084_v22 = vpop.permute.xlu0 %860 }
 0x365   :  { %990 = vrot.lane.b32.xlu1 %v6014_v46, %s5725_s5 }
 0x36a   :  { %v993_v23 = vpop.permute.xlu0 %992 }
 0x36b   :  { %4878 = vmatpush.xpose.msk.msra.mxu1 %vm488_vm14, %v993_v23 }
 0x36d   :  { %1112 = vrot.lane.b32.xlu1 %v6022_v48, %s5724_s4 }
 0x372   :  { %v1117_v59 = vpop.permute.xlu0 %1116 }
 0x37a   :  { %v989_v62 = vpop.permute.xlu0 %988 }
 0x3af   :  { %v543_v31 = vpop.xlane.xlu1 %542 }
 0x3b0   :  { %5227 = vrcp.f32 %v543_v31  ;;  %v558_v35 = vand.u32 2147483648, %v543_v31  ;;  %v556_v37 = vand.u32 2147483647, %v543_v31  ;;  %vm552_vm4 = vweird.f32 %v543_v31 }
 0x3b2   :  { %v559_v40 = vor.u32 1.1754944e-38, %v558_v35  ;;  %vm557_vm6 = vcmp.eq.f32.partialorder %v556_v37, 8.507059e+37 }
 0x3b6   :  { %v5228_v32 = vpop.eup %5227 }
 0x3b7   :  { %v548_v20 = vmul.f32 %v5228_v32, %v543_v31  ;;  %v546_v33 = vpop.xlane.xlu2 %545  ;;  %vm553_vm3 = vweird.f32 %v5228_v32 }
 0x3b8   :  { %5229 = vrcp.f32 %v546_v33  ;;  %vm554_vm5 = vmor %vm552_vm4, %vm553_vm3  ;;  %v573_v19 = vand.u32 2147483648, %v546_v33  ;;  %v571_v46 = vand.u32 2147483647, %v546_v33  ;;  %vm567_vm8 = vweird.f32 %v546_v33 }
 0x3b9   :  { %v549_v34 = vsub.f32 1.0, %v548_v20 }
 0x3ba   :  { %v574_v48 = vor.u32 1.1754944e-38, %v573_v19  ;;  %vm572_vm10 = vcmp.eq.f32.partialorder %v571_v46, 8.507059e+37 }
 0x3bb   :  { %v550_v36 = vmul.f32 %v5228_v32, %v549_v34 }
 0x3bd   :  { %v551_v38 = vadd.f32 %v5228_v32, %v550_v36 }
 0x3be   :  { %v5230_v39 = vpop.eup %5229 }
 0x3bf   :  { %v563_v41 = vmul.f32 %v5230_v39, %v546_v33  ;;  %v555_v29 = vsel %vm554_vm5, %v5228_v32, %v551_v38  ;;  %vm568_vm7 = vweird.f32 %v5230_v39  ;;  %v1115_v1 = vpop.permute.xlu2 %1114 }
 0x3c0   :  { %v560_v42 = vsel %vm557_vm6, %v559_v40, %v555_v29  ;;  %vm569_vm9 = vmor %vm567_vm8, %vm568_vm7 }
 0x3c1   :  { %v564_v43 = vsub.f32 1.0, %v563_v41  ;;  %v561_v44 = vmul.f32 %v5224_v9, %v560_v42 }
 0x3c3   :  { %4858 = vmatmul.msk.f32.vlgmr.msra.gmra.mxu3 %vm528_vm1, %v561_v44  ;;  %v565_v45 = vmul.f32 %v5230_v39, %v564_v43 }
 0x3c4   :  { %4872 = vmatpush.xpose.msk.msra.mxu3 %vm488_vm14, %v867_v27 }
 0x3c5   :  { %v566_v47 = vadd.f32 %v5230_v39, %v565_v45 }
 0x3c7   :  { %v735_v50 = vpop.permute.xlu1 %734  ;;  %v570_v53 = vsel %vm569_vm9, %v5230_v39, %v566_v47 }
 0x3c8   :  { %4873 = vmatpush.xpose.msk.msra.mxu3 %vm488_vm14, %v865_v24  ;;  %4868 = vmatmul.msk.f32.vlgmr.msrb.gmra.mxu1 %vm488_vm14, %v735_v50  ;;  %v575_v54 = vsel %vm572_vm10, %v574_v48, %v570_v53 }
 0x3c9   :  { %v576_v55 = vmul.f32 %v5226_v13, %v575_v54 }
 0x3cb   :  { %4859 = vmatmul.msk.f32.gmra.mxu3 %vm528_vm1, %v576_v55 }
 0x3cf   :  { %v863_v58 = vpop.permute.xlu1 %862 }
 0x3d0   :  { %4869 = vmatmul.msk.f32.gmra.mxu1 %vm488_vm14, %v737_v25 }
 0x3d3   :  { %4862 = vmatmul.msk.f32.vlgmr.msrb.gmra.mxu3 %vm488_vm14, %v6070_v6 }
 0x3d4   :  { %4884 = vmatpush.xpose.msk.msrb.mxu3 %vm488_vm14, %v1119_v26 }
 0x3d7   :  { %v991_v60 = vpop.permute.xlu1 %990 }
 0x3d8   :  { %4885 = vmatpush.xpose.msk.msrb.mxu3 %vm488_vm14, %v1117_v59  ;;  %4879 = vmatpush.xpose.msk.msra.mxu1 %vm488_vm14, %v991_v60 }
 0x3db   :  { %4863 = vmatmul.msk.f32.gmra.mxu3 %vm488_vm14, %v6077_v18  ;;  %4880 = vmatmul.msk.f32.vlgmr.msra.gmra.mxu1 %vm488_vm14, %v987_v28 }
 0x3dc   :  { %4890 = vmatpush.xpose.msk.msrb.mxu1 %vm488_vm14, %v6102_v61 }
 0x3df   :  { %v1113_v0 = vpop.permute.xlu1 %1112 }
 0x3e0   :  { %4891 = vmatpush.xpose.msk.msrb.mxu1 %vm488_vm14, %v6096_v56 }
 0x3e3   :  { %4874 = vmatmul.msk.f32.vlgmr.msra.gmra.mxu3 %vm488_vm14, %v6084_v22  ;;  %4881 = vmatmul.msk.f32.gmra.mxu1 %vm488_vm14, %v989_v62 }
 0x3eb   :  { %4875 = vmatmul.msk.f32.gmra.mxu3 %vm488_vm14, %v863_v58  ;;  %4892 = vmatmul.msk.f32.vlgmr.msrb.gmra.mxu1 %vm488_vm14, %v6033_v51 }
 0x3f3   :  { %4886 = vmatmul.msk.f32.vlgmr.msrb.gmra.mxu3 %vm488_vm14, %v1113_v0  ;;  %4893 = vmatmul.msk.f32.gmra.mxu1 %vm488_vm14, %v6035_v52 }
 0x3fb   :  { %4887 = vmatmul.msk.f32.gmra.mxu3 %vm488_vm14, %v1115_v1 }
 0x445   :  { %v767_v2 = vpop.f32.mrf.mxu1 }
 0x446   :  { %v773_v3 = vmul.f32 0.14433756, %v767_v2  ;;  %v6151_v30 = vpop.f32.mrf.mxu3 }
 0x448   :  { %v775_v4 = vsel %vm6037_vm15, %v773_v3, -1e+30 }
 0x449   :  { %v777_v5 = vsel %vm528_vm1, %v775_v4, -inf }
 0x44a   :  { %778 = vmax.xlane.f32.xlu2 %v777_v5 }
 0x44d   :  { %v770_v6 = vpop.f32.mrf.mxu1 }
 0x44e   :  { %v774_v7 = vmul.f32 0.14433756, %v770_v6  ;;  %v6163_v49 = vpop.f32.mrf.mxu3 }
 0x450   :  { %v776_v8 = vsel %vm6044_vm2, %v774_v7, -1e+30 }
 0x451   :  { %v780_v9 = vsel %vm528_vm1, %v776_v8, -inf }
 0x452   :  { %781 = vmax.xlane.f32.xlu0 %v780_v9 }
 0x456   :  { %v639_v16 = vpop.f32.mrf.mxu3 }
 0x457   :  { %v645_v55 = vmul.f32 0.14433756, %v639_v16 }
 0x458   :  { %v1019_v10 = vpop.f32.mrf.mxu1 }
 0x459   :  { %v1025_v11 = vmul.f32 0.14433756, %v1019_v10  ;;  %v6200_v0 = vsel %vm6037_vm15, %v645_v55, -1e+30 }
 0x45a   :  { %v649_v2 = vsel %vm528_vm1, %v6200_v0, -inf }
 0x45b   :  { %v1027_v12 = vsel %vm6037_vm15, %v1025_v11, -1e+30 }
 0x45c   :  { %v1029_v13 = vsel %vm528_vm1, %v1027_v12, -inf }
 0x45d   :  { %1030 = vmax.xlane.f32.xlu1 %v1029_v13 }
 0x45e   :  { %v6169_v17 = vpop.f32.mrf.mxu3 }
 0x460   :  { %v1022_v21 = vpop.f32.mrf.mxu1 }
 0x461   :  { %v1026_v22 = vmul.f32 0.14433756, %v1022_v21 }
 0x462   :  { %5099 = vrot.lane.b32.xlu2 %v5098_v15, %s5721_s17 }
 0x463   :  { %v6173_v23 = vsel %vm6044_vm2, %v1026_v22, -1e+30 }
 0x464   :  { %v1032_v25 = vsel %vm528_vm1, %v6173_v23, -inf }
 0x466   :  { %5104 = vrot.lane.b32.xlu0 %v5098_v15, %s5723_s25  ;;  %v893_v18 = vpop.f32.mrf.mxu3 }
 0x467   :  { %v899_v3 = vmul.f32 0.14433756, %v893_v18 }
 0x469   :  { %v6207_v5 = vsel %vm6037_vm15, %v899_v3, -1e+30 }
 0x46a   :  { %5114 = vrot.lane.b32.xlu2 %v5098_v15, %s5725_s5 }
 0x46e   :  { %5109 = vrot.lane.b32.xlu0 %v5098_v15, %s5722_s21  ;;  %v896_v24 = vpop.f32.mrf.mxu3 }
 0x46f   :  { %v900_v26 = vmul.f32 0.14433756, %v896_v24 }
 0x471   :  { %v6179_v31 = vsel %vm6044_vm2, %v900_v26, -1e+30 }
 0x472   :  { %1541 = vrot.lane.b32.xlu2 %v6102_v61, %s5723_s25  ;;  %v906_v20 = vsel %vm528_vm1, %v6179_v31, -inf }
 0x476   :  { %1409 = vrot.lane.b32.xlu0 %v6035_v52, %s5721_s17  ;;  %1413 = vrot.lane.b32.xlu1 %v6102_v61, %s5721_s17  ;;  %v1145_v59 = vpop.f32.mrf.mxu3 }
 0x47a   :  { %1667 = vrot.lane.b32.xlu2 %v6102_v61, %s5722_s21 }
 0x47e   :  { %5119 = vrot.lane.b32.xlu0 %v5098_v15, %s5724_s4  ;;  %1411 = vrot.lane.b32.xlu1 %v6096_v56, %s5721_s17  ;;  %v1148_v6 = vpop.f32.mrf.mxu3 }
 0x47f   :  { %v1152_v9 = vmul.f32 0.14433756, %v1148_v6 }
 0x482   :  { %1665 = vrot.lane.b32.xlu2 %v6096_v56, %s5722_s21 }
 0x486   :  { %1535 = vrot.lane.b32.xlu0 %v6033_v51, %s5723_s25  ;;  %1407 = vrot.lane.b32.xlu1 %v6033_v51, %s5721_s17 }
 0x48a   :  { %1661 = vrot.lane.b32.xlu2 %v6033_v51, %s5722_s21 }
 0x48e   :  { %1537 = vrot.lane.b32.xlu0 %v6035_v52, %s5723_s25  ;;  %1539 = vrot.lane.b32.xlu1 %v6096_v56, %s5723_s25 }
 0x492   :  { %1663 = vrot.lane.b32.xlu2 %v6035_v52, %s5722_s21 }
 0x496   :  { %1793 = vrot.lane.b32.xlu1 %v6102_v61, %s5725_s5 }
 0x4bb   :  { %1033 = vmax.xlane.f32.xlu2 %v1032_v25 }
 0x4bd   :  { %v779_v27 = vpop.xlane.xlu2 %778 }
 0x4be   :  { %v783_v28 = vsub.f32 %v775_v4, %v779_v27 }
 0x4c0   :  { %v785_v32 = vmul.f32 1.442695, %v783_v28 }
 0x4c2   :  { %5231 = vpow2.f32 %v785_v32 }
 0x4c3   :  { %907 = vmax.xlane.f32.xlu2 %v906_v20 }
 0x4c5   :  { %v5100_v33 = vpop.permute.xlu2 %5099  ;;  %v782_v34 = vpop.xlane.xlu0 %781 }
 0x4c6   :  { %v5101_v35 = vunpack.i.l.bf16 %v5100_v33  ;;  %v784_v36 = vsub.f32 %v776_v8, %v782_v34  ;;  %v5102_v38 = vunpack.i.h.bf16 %v5100_v33  ;;  %v903_v8 = vsel %vm528_vm1, %v6207_v5, -inf }
 0x4c8   :  { %v6183_v37 = vpop.eup %5231  ;;  %v787_v39 = vmul.f32 1.442695, %v784_v36  ;;  %725 = vmatpush.msra.mxu0 %v5101_v35  ;;  %v646_v36 = vmul.f32 0.14433756, %v6169_v17  ;;  %v6247_v17 = vpop.f32.mrf.mxu2 }
 0x4c9   :  { %v789_v40 = vsel %vm528_vm1, %v6183_v37, 0.0 }
 0x4ca   :  { %5233 = vpow2.f32 %v787_v39  ;;  %726 = vmatpush.msra.mxu0 %v5102_v38  ;;  %790 = vadd.xlane.f32.xlu1 %v789_v40  ;;  %v1151_v40 = vmul.f32 0.14433756, %v1145_v59 }
 0x4cd   :  { %v5115_v41 = vpop.permute.xlu2 %5114 }
 0x4ce   :  { %v5116_v53 = vunpack.i.l.bf16 %v5115_v41  ;;  %v5117_v58 = vunpack.i.h.bf16 %v5115_v41 }
 0x4d0   :  { %v6187_v29 = vpop.eup %5233  ;;  %v1031_v42 = vpop.xlane.xlu1 %1030 }
 0x4d1   :  { %v1035_v43 = vsub.f32 %v1027_v12, %v1031_v42  ;;  %v792_v44 = vsel %vm528_vm1, %v6187_v29, 0.0  ;;  %v6214_v12 = vsel %vm6044_vm2, %v1152_v9, -1e+30  ;;  %v6256_v3 = vpop.f32.mrf.mxu2 }
 0x4d2   :  { %793 = vadd.xlane.f32.xlu1 %v792_v44  ;;  %v1158_v13 = vsel %vm528_vm1, %v6214_v12, -inf }
 0x4d3   :  { %v1037_v19 = vmul.f32 1.442695, %v1035_v43 }
 0x4d5   :  { %5235 = vpow2.f32 %v1037_v19  ;;  %v1542_v45 = vpop.permute.xlu2 %1541  ;;  %v6251_v19 = vsel %vm6037_vm15, %v1151_v40, -1e+30 }
 0x4d6   :  { %4902 = vmatpush.xpose.msk.msra.mxu1 %vm488_vm14, %v1542_v45 }
 0x4d8   :  { %v5105_v46 = vpop.permute.xlu0 %5104 }
 0x4d9   :  { %v5106_v47 = vunpack.i.l.bf16 %v5105_v46  ;;  %v5107_v50 = vunpack.i.h.bf16 %v5105_v46 }
 0x4db   :  { %v6192_v48 = vpop.eup %5235  ;;  %1791 = vrot.lane.b32.xlu2 %v6096_v56, %s5725_s5  ;;  %851 = vmatpush.msrb.mxu2 %v5106_v47 }
 0x4dc   :  { %v1041_v54 = vsel %vm528_vm1, %v6192_v48, 0.0 }
 0x4dd   :  { %1042 = vadd.xlane.f32.xlu1 %v1041_v54  ;;  %852 = vmatpush.msrb.mxu2 %v5107_v50  ;;  %v1668_v7 = vpop.permute.xlu2 %1667  ;;  %v1155_v50 = vsel %vm528_vm1, %v6251_v19, -inf }
 0x4df   :  { %1103 = vmatpush.msra.mxu2 %v5116_v53 }
 0x4e0   :  { %v5110_v60 = vpop.permute.xlu0 %5109 }
 0x4e1   :  { %1104 = vmatpush.msra.mxu2 %v5117_v58  ;;  %v5111_v62 = vunpack.i.l.bf16 %v5110_v60  ;;  %v5112_v1 = vunpack.i.h.bf16 %v5110_v60 }
 0x4e3   :  { %977 = vmatpush.msrb.mxu0 %v5111_v62 }
 0x4e5   :  { %650 = vmax.xlane.f32.xlu1 %v649_v2  ;;  %978 = vmatpush.msrb.mxu0 %v5112_v1  ;;  %v1666_v15 = vpop.permute.xlu2 %1665 }
 0x4e8   :  { %v1414_v4 = vpop.permute.xlu1 %1413  ;;  %v1410_v10 = vpop.permute.xlu0 %1409 }
 0x4e9   :  { %4896 = vmatpush.xpose.msk.msra.mxu3 %vm488_vm14, %v1414_v4 }
 0x4ed   :  { %904 = vmax.xlane.f32.xlu1 %v903_v8  ;;  %v1662_v24 = vpop.permute.xlu2 %1661 }
 0x4f0   :  { %v1412_v11 = vpop.permute.xlu1 %1411  ;;  %v6220_v16 = vpop.permute.xlu0 %5119 }
 0x4f1   :  { %4897 = vmatpush.xpose.msk.msra.mxu3 %vm488_vm14, %v1412_v11 }
 0x4f5   :  { %4908 = vmatpush.xpose.msk.msrb.mxu3 %vm488_vm14, %v1668_v7  ;;  %1159 = vmax.xlane.f32.xlu1 %v1158_v13  ;;  %v1664_v27 = vpop.permute.xlu2 %1663 }
 0x4f8   :  { %v1408_v18 = vpop.permute.xlu1 %1407  ;;  %v1536_v22 = vpop.permute.xlu0 %1535 }
 0x4f9   :  { %4909 = vmatpush.xpose.msk.msrb.mxu3 %vm488_vm14, %v1666_v15 }
 0x4fa   :  { %4898 = vmatmul.msk.f32.vlgmr.msra.gmra.mxu3 %vm488_vm14, %v1408_v18 }
 0x500   :  { %v1540_v21 = vpop.permute.xlu1 %1539  ;;  %v1538_v26 = vpop.permute.xlu0 %1537 }
 0x501   :  { %4903 = vmatpush.xpose.msk.msra.mxu1 %vm488_vm14, %v1540_v21 }
 0x502   :  { %4899 = vmatmul.msk.f32.gmra.mxu3 %vm488_vm14, %v1410_v10 }
 0x504   :  { %4904 = vmatmul.msk.f32.vlgmr.msra.gmra.mxu1 %vm488_vm14, %v1536_v22 }
 0x508   :  { %v1794_v25 = vpop.permute.xlu1 %1793 }
 0x509   :  { %4914 = vmatpush.xpose.msk.msrb.mxu1 %vm488_vm14, %v1794_v25 }
 0x50a   :  { %4910 = vmatmul.msk.f32.vlgmr.msrb.gmra.mxu3 %vm488_vm14, %v1662_v24 }
 0x50c   :  { %4905 = vmatmul.msk.f32.gmra.mxu1 %vm488_vm14, %v1538_v26 }
 0x50e   :  { %1917 = vrot.lane.b32.xlu1 %v6096_v56, %s5724_s4 }
 0x512   :  { %4911 = vmatmul.msk.f32.gmra.mxu3 %vm488_vm14, %v1664_v27 }
 0x52e   :  { %v1034_v28 = vpop.xlane.xlu2 %1033 }
 0x52f   :  { %v1036_v32 = vsub.f32 %v6173_v23, %v1034_v28  ;;  %v6243_v23 = vsel %vm6044_vm2, %v646_v36, -1e+30 }
 0x530   :  { %v652_v39 = vsel %vm528_vm1, %v6243_v23, -inf }
 0x531   :  { %v1039_v20 = vmul.f32 1.442695, %v1036_v32 }
 0x533   :  { %5237 = vpow2.f32 %v1039_v20 }
 0x536   :  { %v6233_v33 = vpop.xlane.xlu2 %907 }
 0x539   :  { %v6235_v34 = vpop.eup %5237 }
 0x53a   :  { %v1044_v35 = vsel %vm528_vm1, %v6235_v34, 0.0 }
 0x53b   :  { %1045 = vadd.xlane.f32.xlu0 %v1044_v35 }
 0x53d   :  { %v791_v38 = vpop.xlane.xlu1 %790 }
 0x53e   :  { %5239 = vrcp.f32 %v791_v38  ;;  %v1792_v56 = vpop.permute.xlu2 %1791  ;;  %v806_v45 = vand.u32 2147483648, %v791_v38  ;;  %v804_v47 = vand.u32 2147483647, %v791_v38  ;;  %vm800_vm12 = vweird.f32 %v791_v38 }
 0x53f   :  { %4915 = vmatpush.xpose.msk.msrb.mxu1 %vm488_vm14, %v1792_v56 }
 0x540   :  { %v807_v55 = vor.u32 1.1754944e-38, %v806_v45  ;;  %vm805_vm3 = vcmp.eq.f32.partialorder %v804_v47, 8.507059e+37 }
 0x543   :  { %653 = vmax.xlane.f32.xlu0 %v652_v39 }
 0x544   :  { %v5240_v41 = vpop.eup %5239 }
 0x545   :  { %v796_v42 = vmul.f32 %v5240_v41, %v791_v38  ;;  %v794_v43 = vpop.xlane.xlu1 %793  ;;  %vm801_vm11 = vweird.f32 %v5240_v41 }
 0x546   :  { %5241 = vrcp.f32 %v794_v43  ;;  %vm802_vm13 = vmor %vm800_vm12, %vm801_vm11  ;;  %v821_v4 = vand.u32 2147483648, %v794_v43  ;;  %v819_v7 = vand.u32 2147483647, %v794_v43  ;;  %vm815_vm5 = vweird.f32 %v794_v43 }
 0x547   :  { %v797_v44 = vsub.f32 1.0, %v796_v42 }
 0x548   :  { %v822_v9 = vor.u32 1.1754944e-38, %v821_v4  ;;  %vm820_vm7 = vcmp.eq.f32.partialorder %v819_v7, 8.507059e+37 }
 0x549   :  { %v798_v46 = vmul.f32 %v5240_v41, %v797_v44 }
 0x54b   :  { %1156 = vmax.xlane.f32.xlu0 %v1155_v50  ;;  %v799_v53 = vadd.f32 %v5240_v41, %v798_v46 }
 0x54c   :  { %v5242_v54 = vpop.eup %5241 }
 0x54d   :  { %v811_v58 = vmul.f32 %v5242_v54, %v794_v43  ;;  %v803_v59 = vsel %vm802_vm13, %v5240_v41, %v799_v53  ;;  %vm816_vm4 = vweird.f32 %v5242_v54 }
 0x54e   :  { %v808_v60 = vsel %vm805_vm3, %v807_v55, %v803_v59  ;;  %vm817_vm6 = vmor %vm815_vm5, %vm816_vm4 }
 0x54f   :  { %v812_v62 = vsub.f32 1.0, %v811_v58  ;;  %v809_v1 = vmul.f32 %v6183_v37, %v808_v60 }
 0x550   :  { %v1043_v2 = vpop.xlane.xlu1 %1042 }
 0x551   :  { %5243 = vrcp.f32 %v1043_v2  ;;  %4870 = vmatmul.msk.f32.vlgmr.msrb.gmra.mxu2 %vm528_vm1, %v809_v1  ;;  %v813_v6 = vmul.f32 %v5242_v54, %v812_v62  ;;  %v1058_v24 = vand.u32 2147483648, %v1043_v2  ;;  %v1056_v27 = vand.u32 2147483647, %v1043_v2 }
 0x552   :  { %1398 = vmatpush.msrb.mxu2 %v6256_v3  ;;  %vm1052_vm9 = vweird.f32 %v1043_v2 }
 0x553   :  { %v814_v8 = vadd.f32 %v5242_v54, %v813_v6  ;;  %v1059_v32 = vor.u32 1.1754944e-38, %v1058_v24  ;;  %vm1057_vm11 = vcmp.eq.f32.partialorder %v1056_v27, 8.507059e+37 }
 0x554   :  { %1399 = vmatpush.msrb.mxu2 %v6247_v17 }
 0x555   :  { %v818_v10 = vsel %vm817_vm6, %v5242_v54, %v814_v8 }
 0x556   :  { %v823_v11 = vsel %vm820_vm7, %v822_v9, %v818_v10 }
 0x557   :  { %v5244_v37 = vpop.eup %5243  ;;  %v824_v18 = vmul.f32 %v6187_v29, %v823_v11 }
 0x558   :  { %v1048_v13 = vmul.f32 %v5244_v37, %v1043_v2  ;;  %v651_v15 = vpop.xlane.xlu1 %650  ;;  %vm1053_vm8 = vweird.f32 %v5244_v37 }
 0x559   :  { %v655_v21 = vsub.f32 %v6200_v0, %v651_v15  ;;  %4871 = vmatmul.msk.f32.gmra.mxu2 %vm528_vm1, %v824_v18  ;;  %vm1054_vm10 = vmor %vm1052_vm9, %vm1053_vm8 }
 0x55a   :  { %v1049_v22 = vsub.f32 1.0, %v1048_v13 }
 0x55b   :  { %v657_v25 = vmul.f32 1.442695, %v655_v21 }
 0x55c   :  { %v1050_v26 = vmul.f32 %v5244_v37, %v1049_v22 }
 0x55d   :  { %5245 = vpow2.f32 %v657_v25 }
 0x55e   :  { %v1051_v28 = vadd.f32 %v5244_v37, %v1050_v26 }
 0x560   :  { %v1055_v20 = vsel %vm1054_vm10, %v5244_v37, %v1051_v28  ;;  %v905_v35 = vpop.xlane.xlu1 %904 }
 0x561   :  { %v1060_v36 = vsel %vm1057_vm11, %v1059_v32, %v1055_v20 }
 0x562   :  { %v1061_v29 = vmul.f32 %v6192_v48, %v1060_v36  ;;  %v909_v48 = vsub.f32 %v6207_v5, %v905_v35 }
 0x563   :  { %v6265_v0 = vpop.eup %5245 }
 0x564   :  { %4882 = vmatmul.msk.f32.vlgmr.msra.gmra.mxu2 %vm528_vm1, %v1061_v29  ;;  %v661_v38 = vsel %vm528_vm1, %v6265_v0, 0.0  ;;  %v911_v43 = vmul.f32 1.442695, %v909_v48 }
 0x565   :  { %662 = vadd.xlane.f32.xlu0 %v661_v38  ;;  %v5122_v38 = vunpack.i.h.bf16 %v6220_v16 }
 0x568   :  { %v1160_v56 = vpop.xlane.xlu1 %1159 }
 0x569   :  { %v1162_v39 = vsub.f32 %v6214_v12, %v1160_v56  ;;  %v910_v12 = vsub.f32 %v6179_v31, %v6233_v33 }
 0x56b   :  { %v1165_v40 = vmul.f32 1.442695, %v1162_v39  ;;  %v913_v44 = vmul.f32 1.442695, %v910_v12 }
 0x56d   :  { %5247 = vpow2.f32 %v1165_v40 }
 0x56e   :  { %5249 = vpow2.f32 %v911_v43 }
 0x56f   :  { %5251 = vpow2.f32 %v913_v44 }
 0x573   :  { %v6271_v41 = vpop.eup %5247 }
 0x574   :  { %v1170_v42 = vsel %vm528_vm1, %v6271_v41, 0.0  ;;  %v6282_v45 = vpop.eup %5249 }
 0x575   :  { %1171 = vadd.xlane.f32.xlu1 %v1170_v42  ;;  %v915_v46 = vsel %vm528_vm1, %v6282_v45, 0.0  ;;  %v6286_v47 = vpop.eup %5251 }
 0x579   :  { %1919 = vrot.lane.b32.xlu0 %v6102_v61, %s5724_s4  ;;  %v918_v61 = vsel %vm528_vm1, %v6286_v47, 0.0 }
 0x57d   :  { %v1440_v5 = vpop.f32.mrf.mxu3 }
 0x57e   :  { %v1446_v53 = vmul.f32 0.14433756, %v1440_v5 }
 0x580   :  { %v6292_v31 = vsel %vm6037_vm15, %v1446_v53, -1e+30  ;;  %v1918_v39 = vpop.permute.xlu1 %1917 }
 0x581   :  { %v1450_v59 = vsel %vm528_vm1, %v6292_v31, -inf }
 0x585   :  { %v1443_v40 = vpop.f32.mrf.mxu3 }
 0x586   :  { %v1447_v43 = vmul.f32 0.14433756, %v1443_v40 }
 0x58d   :  { %v1694_v12 = vpop.f32.mrf.mxu3 }
 0x58e   :  { %1789 = vrot.lane.b32.xlu1 %v6035_v52, %s5725_s5 }
 0x5a3   :  { %916 = vadd.xlane.f32.xlu0 %v915_v46  ;;  %v1700_v46 = vmul.f32 0.14433756, %v1694_v12 }
 0x5ab   :  { %919 = vadd.xlane.f32.xlu0 %v918_v61 }
 0x5ae   :  { %v1046_v50 = vpop.xlane.xlu0 %1045 }
 0x5af   :  { %5253 = vrcp.f32 %v1046_v50  ;;  %v1073_v1 = vand.u32 2147483648, %v1046_v50  ;;  %v1071_v4 = vand.u32 2147483647, %v1046_v50  ;;  %vm1067_vm13 = vweird.f32 %v1046_v50 }
 0x5b1   :  { %v1074_v7 = vor.u32 1.1754944e-38, %v1073_v1  ;;  %vm1072_vm4 = vcmp.eq.f32.partialorder %v1071_v4, 8.507059e+37 }
 0x5b5   :  { %v5254_v33 = vpop.eup %5253 }
 0x5b6   :  { %v1063_v54 = vmul.f32 %v5254_v33, %v1046_v50  ;;  %v654_v55 = vpop.xlane.xlu0 %653  ;;  %vm1068_vm12 = vweird.f32 %v5254_v33 }
 0x5b7   :  { %v656_v58 = vsub.f32 %v6243_v23, %v654_v55  ;;  %vm1069_vm3 = vmor %vm1067_vm13, %vm1068_vm12 }
 0x5b8   :  { %v1064_v60 = vsub.f32 1.0, %v1063_v54  ;;  %1451 = vmax.xlane.f32.xlu1 %v1450_v59 }
 0x5b9   :  { %v659_v62 = vmul.f32 1.442695, %v656_v58 }
 0x5ba   :  { %v1065_v2 = vmul.f32 %v5254_v33, %v1064_v60 }
 0x5bb   :  { %5255 = vpow2.f32 %v659_v62 }
 0x5bc   :  { %v1066_v6 = vadd.f32 %v5254_v33, %v1065_v2 }
 0x5be   :  { %v1070_v8 = vsel %vm1069_vm3, %v5254_v33, %v1066_v6  ;;  %v1157_v11 = vpop.xlane.xlu0 %1156 }
 0x5bf   :  { %1787 = vrot.lane.b32.xlu0 %v6033_v51, %s5725_s5  ;;  %v1075_v23 = vsel %vm1072_vm4, %v1074_v7, %v1070_v8  ;;  %v1161_v42 = vsub.f32 %v6251_v19, %v1157_v11  ;;  %v6335_v19 = vsel %vm6037_vm15, %v1700_v46, -1e+30 }
 0x5c0   :  { %v1076_v9 = vmul.f32 %v6235_v34, %v1075_v23  ;;  %v1320_v34 = vpop.f32.mrf.mxu1  ;;  %v1704_v33 = vsel %vm528_vm1, %v6335_v19, -inf }
 0x5c1   :  { %v6300_v10 = vpop.eup %5255  ;;  %v1163_v48 = vmul.f32 1.442695, %v1161_v42  ;;  %v1326_v50 = vmul.f32 0.14433756, %v1320_v34 }
 0x5c2   :  { %4883 = vmatmul.msk.f32.gmra.mxu2 %vm528_vm1, %v1076_v9  ;;  %v664_v37 = vsel %vm528_vm1, %v6300_v10, 0.0 }
 0x5c3   :  { %665 = vadd.xlane.f32.xlu2 %v664_v37  ;;  %v6342_v54 = vsel %vm6037_vm15, %v1326_v50, -1e+30 }
 0x5c4   :  { %v1330_v55 = vsel %vm528_vm1, %v6342_v54, -inf }
 0x5c7   :  { %1915 = vrot.lane.b32.xlu0 %v6035_v52, %s5724_s4 }
 0x5c8   :  { %v1323_v27 = vpop.f32.mrf.mxu1 }
 0x5c9   :  { %v1327_v20 = vmul.f32 0.14433756, %v1323_v27 }
 0x5cb   :  { %v6317_v56 = vsel %vm6044_vm2, %v1327_v20, -1e+30 }
 0x5d4   :  { %v854_v13 = vpop.f32.mrf.mxu2 }
 0x5d5   :  { %1248 = vrot.lane.b32.xlu1 %v854_v13, %s5726_s23  ;;  %v1568_v13 = vpop.f32.mrf.mxu1 }
 0x5d8   :  { %v663_v15 = vpop.xlane.xlu0 %662 }
 0x5d9   :  { %5257 = vrcp.f32 %v663_v15  ;;  %v678_v24 = vand.u32 2147483648, %v663_v15  ;;  %v676_v26 = vand.u32 2147483647, %v663_v15  ;;  %vm672_vm6 = vweird.f32 %v663_v15 }
 0x5da   :  { %5259 = vpow2.f32 %v1163_v48 }
 0x5db   :  { %1913 = vrot.lane.b32.xlu2 %v6033_v51, %s5724_s4  ;;  %v679_v28 = vor.u32 1.1754944e-38, %v678_v24  ;;  %vm677_vm8 = vcmp.eq.f32.partialorder %v676_v26, 8.507059e+37  ;;  %v5121_v51 = vunpack.i.l.bf16 %v6220_v16  ;;  %v6325_v16 = vsel %vm6044_vm2, %v1447_v43, -1e+30 }
 0x5dc   :  { %v1453_v44 = vsel %vm528_vm1, %v6325_v16, -inf  ;;  %v857_v53 = vpop.f32.mrf.mxu2  ;;  %v1574_v26 = vmul.f32 0.14433756, %v1568_v13 }
 0x5df   :  { %v5258_v18 = vpop.eup %5257 }
 0x5e0   :  { %v668_v21 = vmul.f32 %v5258_v18, %v663_v15  ;;  %vm673_vm5 = vweird.f32 %v5258_v18  ;;  %v6329_v61 = vpop.eup %5259 }
 0x5e1   :  { %vm674_vm7 = vmor %vm672_vm6, %vm673_vm5  ;;  %v1167_v5 = vsel %vm528_vm1, %v6329_v61, 0.0 }
 0x5e2   :  { %v669_v22 = vsub.f32 1.0, %v668_v21 }
 0x5e4   :  { %v670_v25 = vmul.f32 %v5258_v18, %v669_v22 }
 0x5e6   :  { %v671_v52 = vadd.f32 %v5258_v18, %v670_v25 }
 0x5e7   :  { %v1106_v59 = vpop.f32.mrf.mxu2 }
 0x5e8   :  { %v675_v32 = vsel %vm674_vm7, %v5258_v18, %v671_v52  ;;  %v6349_v62 = vpop.xlane.xlu1 %1171 }
 0x5e9   :  { %v680_v35 = vsel %vm677_vm8, %v679_v28, %v675_v32 }
 0x5ea   :  { %v681_v36 = vmul.f32 %v6265_v0, %v680_v35  ;;  %v1333_v0 = vsel %vm528_vm1, %v6317_v56, -inf }
 0x5eb   :  { %v1920_v29 = vpop.permute.xlu0 %1919 }
 0x5ec   :  { %4864 = vmatmul.msk.f32.vlgmr.msra.gmra.mxu0 %vm528_vm1, %v681_v36  ;;  %4920 = vmatpush.xpose.msk.msra.mxu3 %vm488_vm14, %v1920_v29 }
 0x5ed   :  { %1229 = vmatpush.msra.mxu0 %v5121_v51 }
 0x5ef   :  { %1230 = vmatpush.msra.mxu0 %v5122_v38 }
 0x5f0   :  { %4921 = vmatpush.xpose.msk.msra.mxu3 %vm488_vm14, %v1918_v39  ;;  %v6362_v39 = vsel %vm6037_vm15, %v1574_v26, -1e+30 }
 0x5f1   :  { %1334 = vmax.xlane.f32.xlu0 %v1333_v0  ;;  %v1571_v0 = vpop.f32.mrf.mxu1  ;;  %v1578_v43 = vsel %vm528_vm1, %v6362_v39, -inf }
 0x5f2   :  { %v1575_v12 = vmul.f32 0.14433756, %v1571_v0 }
 0x5ff   :  { %1454 = vmax.xlane.f32.xlu1 %v1453_v44 }
 0x600   :  { %v1790_v6 = vpop.permute.xlu1 %1789 }
 0x604   :  { %1168 = vadd.xlane.f32.xlu2 %v1167_v5 }
 0x605   :  { %1250 = vrot.lane.b32.xlu0 %v857_v53, %s5726_s23  ;;  %v6373_v53 = vsel %vm6044_vm2, %v1575_v12, -1e+30 }
 0x607   :  { %1705 = vmax.xlane.f32.xlu1 %v1704_v33 }
 0x60c   :  { %1331 = vmax.xlane.f32.xlu2 %v1330_v55 }
 0x616   :  { %v917_v58 = vpop.xlane.xlu0 %916 }
 0x617   :  { %5261 = vrcp.f32 %v917_v58  ;;  %v932_v36 = vand.u32 2147483648, %v917_v58  ;;  %vm926_vm3 = vweird.f32 %v917_v58  ;;  %v930_v29 = vand.u32 2147483647, %v917_v58 }
 0x619   :  { %v933_v48 = vor.u32 1.1754944e-38, %v932_v36  ;;  %vm931_vm5 = vcmp.eq.f32.partialorder %v930_v29, 8.507059e+37 }
 0x61d   :  { %v5262_v2 = vpop.eup %5261 }
 0x61e   :  { %v6347_v60 = vpop.xlane.xlu0 %919  ;;  %v922_v7 = vmul.f32 %v5262_v2, %v917_v58  ;;  %vm927_vm11 = vweird.f32 %v5262_v2  ;;  %v1581_v58 = vsel %vm528_vm1, %v6373_v53, -inf }
 0x61f   :  { %vm928_vm4 = vmor %vm926_vm3, %vm927_vm11  ;;  %v947_v46 = vand.u32 2147483648, %v6347_v60  ;;  %vm941_vm7 = vweird.f32 %v6347_v60  ;;  %v945_v50 = vand.u32 2147483647, %v6347_v60 }
 0x620   :  { %v923_v23 = vsub.f32 1.0, %v922_v7 }
 0x621   :  { %v948_v55 = vor.u32 1.1754944e-38, %v947_v46 }
 0x622   :  { %v924_v34 = vmul.f32 %v5262_v2, %v923_v23 }
 0x624   :  { %1264 = vrot.lane.b32.xlu2 %v1106_v59, %s5727_s1  ;;  %v925_v28 = vadd.f32 %v5262_v2, %v924_v34 }
 0x626   :  { %v929_v40 = vsel %vm928_vm4, %v5262_v2, %v925_v28  ;;  %vm1193_vm4 = vweird.f32 %v6349_v62 }
 0x627   :  { %v934_v44 = vsel %vm931_vm5, %v933_v48, %v929_v40 }
 0x628   :  { %v935_v5 = vmul.f32 %v6282_v45, %v934_v44 }
 0x62b   :  { %v1452_v0 = vpop.xlane.xlu1 %1451 }
 0x631   :  { %v1788_v1 = vpop.permute.xlu0 %1787 }
 0x632   :  { %4916 = vmatmul.msk.f32.vlgmr.msrb.gmra.mxu1 %vm488_vm14, %v1788_v1 }
 0x636   :  { %v666_v4 = vpop.xlane.xlu2 %665 }
 0x637   :  { %5263 = vrcp.f32 %v666_v4  ;;  %v693_v18 = vand.u32 2147483648, %v666_v4  ;;  %v691_v24 = vand.u32 2147483647, %v666_v4  ;;  %vm687_vm10 = vweird.f32 %v666_v4 }
 0x638   :  { %5265 = vrcp.f32 %v6347_v60 }
 0x639   :  { %v694_v52 = vor.u32 1.1754944e-38, %v693_v18  ;;  %v1916_v20 = vpop.permute.xlu0 %1915  ;;  %vm692_vm13 = vcmp.eq.f32.partialorder %v691_v24, 8.507059e+37  ;;  %5267 = vrcp.f32 %v6349_v62 }
 0x63a   :  { %4917 = vmatmul.msk.f32.gmra.mxu1 %vm488_vm14, %v1790_v6 }
 0x63d   :  { %v5264_v8 = vpop.eup %5263 }
 0x63e   :  { %v683_v9 = vmul.f32 %v5264_v8, %v666_v4  ;;  %v1914_v37 = vpop.permute.xlu2 %1913  ;;  %v5266_v11 = vpop.eup %5265  ;;  %vm688_vm9 = vweird.f32 %v5264_v8 }
 0x63f   :  { %4922 = vmatmul.msk.f32.vlgmr.msra.gmra.mxu3 %vm488_vm14, %v1914_v37  ;;  %v937_v21 = vmul.f32 %v5266_v11, %v6347_v60  ;;  %vm689_vm12 = vmor %vm687_vm10, %vm688_vm9  ;;  %vm942_vm6 = vweird.f32 %v5266_v11  ;;  %vm946_vm9 = vcmp.eq.f32.partialorder %v945_v50, 8.507059e+37  ;;  %v5268_v2 = vpop.eup %5267 }
 0x640   :  { %v684_v15 = vsub.f32 1.0, %v683_v9  ;;  %vm943_vm8 = vmor %vm941_vm7, %vm942_vm6  ;;  %v1189_v4 = vmul.f32 %v5268_v2, %v6349_v62  ;;  %vm1194_vm3 = vweird.f32 %v5268_v2 }
 0x641   :  { %v938_v32 = vsub.f32 1.0, %v937_v21  ;;  %vm1195_vm5 = vmor %vm1193_vm4, %vm1194_vm3  ;;  %vm1282_vm4 = vcmask 195584  }
 0x642   :  { %v685_v22 = vmul.f32 %v5264_v8, %v684_v15  ;;  %v1190_v7 = vsub.f32 1.0, %v1189_v4 }
 0x643   :  { %v939_v42 = vmul.f32 %v5266_v11, %v938_v32 }
 0x644   :  { %v686_v25 = vadd.f32 %v5264_v8, %v685_v22  ;;  %v1199_v22 = vand.u32 2147483648, %v6349_v62 }
 0x645   :  { %v1109_v27 = vpop.f32.mrf.mxu2 }
 0x646   :  { %1266 = vrot.lane.b32.xlu0 %v1109_v27, %s5727_s1  ;;  %v690_v35 = vsel %vm689_vm12, %v5264_v8, %v686_v25  ;;  %v1197_v25 = vand.u32 2147483647, %v6349_v62  ;;  %v1200_v27 = vor.u32 1.1754944e-38, %v1199_v22 }
 0x647   :  { %4923 = vmatmul.msk.f32.gmra.mxu3 %vm488_vm14, %v1916_v20  ;;  %v695_v51 = vsel %vm692_vm13, %v694_v52, %v690_v35 }
 0x648   :  { %v696_v38 = vmul.f32 %v6300_v10, %v695_v51  ;;  %v940_v10 = vadd.f32 %v5266_v11, %v939_v42  ;;  %vm1198_vm6 = vcmp.eq.f32.partialorder %v1197_v25, 8.507059e+37  ;;  %v6399_v42 = vpop.f32.mrf.mxu3 }
 0x64a   :  { %4865 = vmatmul.msk.f32.gmra.mxu0 %vm528_vm1, %v696_v38  ;;  %v944_v33 = vsel %vm943_vm8, %v5266_v11, %v940_v10  ;;  %v1191_v11 = vmul.f32 %v5268_v2, %v1190_v7  ;;  %v6410_v10 = vpop.permute.xlu1 %1248 }
 0x64b   :  { %v949_v59 = vsel %vm946_vm9, %v948_v55, %v944_v33  ;;  %v1456_v55 = vsub.f32 %v6292_v31, %v1452_v0 }
 0x64c   :  { %v950_v45 = vmul.f32 %v6286_v47, %v949_v59  ;;  %v1192_v18 = vadd.f32 %v5268_v2, %v1191_v11 }
 0x64d   :  { %1579 = vmax.xlane.f32.xlu2 %v1578_v43  ;;  %v1458_v4 = vmul.f32 1.442695, %v1456_v55 }
 0x64e   :  { %v1196_v26 = vsel %vm1195_vm5, %v5268_v2, %v1192_v18  ;;  %vm1285_vm5 = vcmask 261120  }
 0x64f   :  { %v1201_v52 = vsel %vm1198_vm6, %v1200_v27, %v1196_v26  ;;  %vm1288_vm6 = vcmask 326656  }
 0x650   :  { %v1202_v28 = vmul.f32 %v6271_v41, %v1201_v52 }
 0x652   :  { %4876 = vmatmul.msk.f32.vlgmr.msrb.gmra.mxu0 %vm528_vm1, %v935_v5 }
 0x655   :  { %1582 = vmax.xlane.f32.xlu2 %v1581_v58 }
 0x65a   :  { %4877 = vmatmul.msk.f32.gmra.mxu0 %vm528_vm1, %v950_v45 }
 0x664   :  { %v1335_v29 = vpop.xlane.xlu0 %1334 }
 0x665   :  { %v1337_v48 = vsub.f32 %v6317_v56, %v1335_v29 }
 0x667   :  { %v1340_v12 = vmul.f32 1.442695, %v1337_v48 }
 0x669   :  { %v728_v60 = vpop.f32.mrf.mxu0 }
 0x66d   :  { %1240 = vrot.lane.b32.xlu2 %v728_v60, %s5714_s0 }
 0x677   :  { %v1169_v1 = vpop.xlane.xlu2 %1168 }
 0x678   :  { %5269 = vrcp.f32 %v1169_v1  ;;  %v1184_v9 = vand.u32 2147483648, %v1169_v1  ;;  %v1182_v47 = vand.u32 2147483647, %v1169_v1  ;;  %vm1178_vm11 = vweird.f32 %v1169_v1 }
 0x67a   :  { %v1185_v15 = vor.u32 1.1754944e-38, %v1184_v9  ;;  %vm1183_vm13 = vcmp.eq.f32.partialorder %v1182_v47, 8.507059e+37 }
 0x67e   :  { %v5270_v6 = vpop.eup %5269 }
 0x67f   :  { %v1174_v8 = vmul.f32 %v5270_v6, %v1169_v1  ;;  %vm1179_vm10 = vweird.f32 %v5270_v6  ;;  %v1332_v32 = vpop.xlane.xlu2 %1331 }
 0x680   :  { %vm1180_vm12 = vmor %vm1178_vm11, %vm1179_vm10 }
 0x681   :  { %v1175_v23 = vsub.f32 1.0, %v1174_v8 }
 0x683   :  { %v1176_v37 = vmul.f32 %v5270_v6, %v1175_v23 }
 0x685   :  { %v1177_v13 = vadd.f32 %v5270_v6, %v1176_v37 }
 0x687   :  { %v1181_v34 = vsel %vm1180_vm12, %v5270_v6, %v1177_v13  ;;  %v6397_v41 = vpop.permute.xlu2 %1264 }
 0x688   :  { %v1186_v21 = vsel %vm1183_vm13, %v1185_v15, %v1181_v34 }
 0x689   :  { %v1187_v24 = vmul.f32 %v6329_v61, %v1186_v21  ;;  %v1336_v61 = vsub.f32 %v6342_v54, %v1332_v32 }
 0x68b   :  { %4888 = vmatmul.msk.f32.vlgmr.msra.gmra.mxu0 %vm528_vm1, %v1187_v24  ;;  %v1338_v51 = vmul.f32 1.442695, %v1336_v61 }
 0x68d   :  { %5271 = vpow2.f32 %v1338_v51 }
 0x68e   :  { %5273 = vpow2.f32 %v1340_v12 }
 0x693   :  { %4889 = vmatmul.msk.f32.gmra.mxu0 %vm528_vm1, %v1202_v28  ;;  %v6408_v44 = vpop.eup %5271 }
 0x694   :  { %v1342_v33 = vsel %vm528_vm1, %v6408_v44, 0.0  ;;  %v6422_v1 = vpop.eup %5273 }
 0x695   :  { %v1345_v8 = vsel %vm528_vm1, %v6422_v1, 0.0 }
 0x6af   :  { %v1820_v20 = vpop.f32.mrf.mxu1 }
 0x6b0   :  { %v1826_v35 = vmul.f32 0.14433756, %v1820_v20 }
 0x6b2   :  { %v6393_v36 = vsel %vm6037_vm15, %v1826_v35, -1e+30 }
 0x6b3   :  { %v1830_v62 = vsel %vm528_vm1, %v6393_v36, -inf }
 0x6b4   :  { %1831 = vmax.xlane.f32.xlu1 %v1830_v62 }
 0x6b7   :  { %v1823_v38 = vpop.f32.mrf.mxu1 }
 0x6b8   :  { %v1827_v40 = vmul.f32 0.14433756, %v1823_v38  ;;  %v1701_v38 = vmul.f32 0.14433756, %v6399_v42 }
 0x6ba   :  { %v6404_v54 = vsel %vm6044_vm2, %v1827_v40, -1e+30  ;;  %v6470_v48 = vsel %vm6044_vm2, %v1701_v38, -1e+30 }
 0x6bb   :  { %v1833_v43 = vsel %vm528_vm1, %v6404_v54, -inf }
 0x6bc   :  { %1834 = vmax.xlane.f32.xlu1 %v1833_v43 }
 0x6c0   :  { %v1580_v46 = vpop.xlane.xlu2 %1579 }
 0x6c1   :  { %v1584_v5 = vsub.f32 %v6362_v39, %v1580_v46  ;;  %v1455_v39 = vpop.xlane.xlu1 %1454 }
 0x6c2   :  { %v1946_v50 = vpop.f32.mrf.mxu3  ;;  %v1457_v23 = vsub.f32 %v6325_v16, %v1455_v39 }
 0x6c3   :  { %v1952_v56 = vmul.f32 0.14433756, %v1946_v50  ;;  %v1586_v59 = vmul.f32 1.442695, %v1584_v5 }
 0x6c4   :  { %1343 = vadd.xlane.f32.xlu1 %v1342_v33  ;;  %v1460_v13 = vmul.f32 1.442695, %v1457_v23 }
 0x6c5   :  { %v6418_v58 = vsel %vm6037_vm15, %v1952_v56, -1e+30  ;;  %5275 = vpow2.f32 %v1586_v59 }
 0x6c6   :  { %v1956_v45 = vsel %vm528_vm1, %v6418_v58, -inf  ;;  %5277 = vpow2.f32 %v1458_v4 }
 0x6c7   :  { %v731_v60 = vpop.f32.mrf.mxu0  ;;  %1957 = vmax.xlane.f32.xlu2 %v1956_v45 }
 0x6c8   :  { %v1583_v2 = vpop.xlane.xlu2 %1582  ;;  %1242 = vrot.lane.b32.xlu0 %v731_v60, %s5714_s0 }
 0x6c9   :  { %v1585_v31 = vsub.f32 %v6373_v53, %v1583_v2  ;;  %v1706_v15 = vpop.xlane.xlu1 %1705 }
 0x6ca   :  { %v1949_v6 = vpop.f32.mrf.mxu3  ;;  %v1710_v18 = vsub.f32 %v6335_v19, %v1706_v15 }
 0x6cb   :  { %v1953_v7 = vmul.f32 0.14433756, %v1949_v6  ;;  %v1588_v37 = vmul.f32 1.442695, %v1585_v31  ;;  %v6435_v53 = vpop.eup %5275  ;;  %v2094_v31 = vld [vmem:[%s5769_s29 + $0x28] sm:$0xff]  ;;  %v2093_v6 = vld [vmem:[%s5769_s29 + $0x20] sm:$0xff] }
 0x6cc   :  { %1346 = vadd.xlane.f32.xlu1 %v1345_v8  ;;  %v6438_v34 = vpop.eup %5277  ;;  %v1590_v16 = vsel %vm528_vm1, %v6435_v53, 0.0  ;;  %v1712_v25 = vmul.f32 1.442695, %v1710_v18  ;;  %2121 = vmatpush.msra.mxu1 %v2094_v31 }
 0x6cd   :  { %v6431_v9 = vsel %vm6044_vm2, %v1953_v7, -1e+30  ;;  %5279 = vpow2.f32 %v1588_v37  ;;  %v1462_v21 = vsel %vm528_vm1, %v6438_v34, 0.0  ;;  %v6479_v7 = vpack.i.bf16 %v6247_v17, %v6256_v3 }
 0x6ce   :  { %v1959_v47 = vsel %vm528_vm1, %v6431_v9, -inf  ;;  %5281 = vpow2.f32 %v1460_v13  ;;  %2122 = vmatpush.msra.mxu1 %v2093_v6 }
 0x6cf   :  { %v980_v11 = vpop.f32.mrf.mxu0  ;;  %1960 = vmax.xlane.f32.xlu2 %v1959_v47  ;;  %5283 = vpow2.f32 %v1712_v25  ;;  %v2092_v47 = vld [vmem:[%s5769_s29 + $0x18] sm:$0xff]  ;;  %v2090_v25 = vld [vmem:[%s5769_s29 + $0x8] sm:$0xff] }
 0x6d0   :  { %1256 = vrot.lane.b32.xlu0 %v980_v11, %s5728_s14  ;;  %v1251_v11 = vpop.permute.xlu0 %1250  ;;  %2123 = vmatpush.msra.mxu1 %v2092_v47  ;;  %v1241_v3 = vpop.permute.xlu2 %1240 }
 0x6d3   :  { %v6445_v24 = vpop.eup %5279 }
 0x6d4   :  { %1591 = vadd.xlane.f32.xlu1 %v1590_v16  ;;  %v6448_v26 = vpop.eup %5281  ;;  %v1593_v27 = vsel %vm528_vm1, %v6445_v24, 0.0 }
 0x6d5   :  { %v1465_v19 = vsel %vm528_vm1, %v6448_v26, 0.0  ;;  %v6454_v52 = vpop.eup %5283 }
 0x6d6   :  { %v1716_v28 = vsel %vm528_vm1, %v6454_v52, 0.0 }
 0x6d7   :  { %v983_v22 = vpop.f32.mrf.mxu0  ;;  %1463 = vadd.xlane.f32.xlu2 %v1462_v21  ;;  %v2091_v21 = vld [vmem:[%s5769_s29 + $0x10] sm:$0xff] }
 0x6d8   :  { %1258 = vrot.lane.b32.xlu0 %v983_v22, %s5728_s14  ;;  %v1267_v18 = vpop.permute.xlu0 %1266  ;;  %2124 = vmatpush.msra.mxu1 %v2091_v21 }
 0x6da   :  { %2125 = vmatpush.msra.mxu1 %v2090_v25 }
 0x6dc   :  { %1594 = vadd.xlane.f32.xlu1 %v1593_v27  ;;  %v2089_v27 = vld [vmem:[%s5769_s29] sm:$0xff]  ;;  %s7780_s29 = sld [smem:[#allocation24_spill]] }
 0x6dd   :  { %2126 = vmatpush.msra.mxu1 %v2089_v27 }
 0x6df   :  { %1466 = vadd.xlane.f32.xlu2 %v1465_v19 }
 0x6e7   :  { %1717 = vadd.xlane.f32.xlu2 %v1716_v28 }
 0x708   :  { %v1232_v32 = vpop.f32.mrf.mxu0 }
 0x709   :  { %1272 = vrot.lane.b32.xlu0 %v1232_v32, %s5729_s2 }
 0x710   :  { %v1235_v20 = vpop.f32.mrf.mxu0 }
 0x711   :  { %1274 = vrot.lane.b32.xlu0 %v1235_v20, %s5729_s2 }
 0x727   :  { %v1832_v35 = vpop.xlane.xlu1 %1831 }
 0x728   :  { %v1836_v61 = vsub.f32 %v6393_v36, %v1832_v35  ;;  %v1707_v36 = vsel %vm528_vm1, %v6470_v48, -inf }
 0x72a   :  { %v1838_v62 = vmul.f32 1.442695, %v1836_v61 }
 0x72c   :  { %5285 = vpow2.f32 %v1838_v62 }
 0x72f   :  { %v6461_v51 = vpop.xlane.xlu1 %1834 }
 0x732   :  { %v6463_v29 = vpop.eup %5285 }
 0x733   :  { %v1842_v0 = vsel %vm528_vm1, %v6463_v29, 0.0 }
 0x734   :  { %1843 = vadd.xlane.f32.xlu1 %v1842_v0  ;;  %v1278_v0 = vsel %vm488_vm14, %v6151_v30, %v1241_v3 }
 0x737   :  { %v1344_v40 = vpop.xlane.xlu1 %1343 }
 0x738   :  { %5287 = vrcp.f32 %v1344_v40  ;;  %v1359_v50 = vand.u32 2147483648, %v1344_v40  ;;  %v1357_v56 = vand.u32 2147483647, %v1344_v40  ;;  %vm1353_vm8 = vweird.f32 %v1344_v40 }
 0x73a   :  { %v1360_v45 = vor.u32 1.1754944e-38, %v1359_v50  ;;  %vm1358_vm10 = vcmp.eq.f32.partialorder %v1357_v56, 8.507059e+37  ;;  %v1958_v22 = vpop.xlane.xlu2 %1957  ;;  %v1243_v19 = vpop.permute.xlu0 %1242 }
 0x73b   :  { %1708 = vmax.xlane.f32.xlu0 %v1707_v36  ;;  %v1962_v20 = vsub.f32 %v6418_v58, %v1958_v22  ;;  %v1280_v58 = vsel %vm528_vm1, %v1278_v0, %v6410_v10 }
 0x73d   :  { %v1964_v62 = vmul.f32 1.442695, %v1962_v20 }
 0x73e   :  { %v5288_v43 = vpop.eup %5287 }
 0x73f   :  { %v1349_v12 = vmul.f32 %v5288_v43, %v1344_v40  ;;  %v1347_v46 = vpop.xlane.xlu1 %1346  ;;  %vm1354_vm7 = vweird.f32 %v5288_v43 }
 0x740   :  { %5289 = vrcp.f32 %v1347_v46  ;;  %vm1355_vm9 = vmor %vm1353_vm8, %vm1354_vm7  ;;  %v1374_v8 = vand.u32 2147483648, %v1347_v46  ;;  %v1372_v37 = vand.u32 2147483647, %v1347_v46  ;;  %vm1368_vm12 = vweird.f32 %v1347_v46 }
 0x741   :  { %v1350_v5 = vsub.f32 1.0, %v1349_v12 }
 0x742   :  { %v1375_v17 = vor.u32 1.1754944e-38, %v1374_v8  ;;  %vm1373_vm3 = vcmp.eq.f32.partialorder %v1372_v37, 8.507059e+37  ;;  %v1961_v28 = vpop.xlane.xlu2 %1960  ;;  %v1257_v61 = vpop.permute.xlu0 %1256 }
 0x743   :  { %v1351_v42 = vmul.f32 %v5288_v43, %v1350_v5  ;;  %v1963_v32 = vsub.f32 %v6431_v9, %v1961_v28  ;;  %v1283_v9 = vsel %vm1282_vm4, %v1280_v58, %v1257_v61 }
 0x744   :  { %v1286_v30 = vsel %vm1285_vm5, %v1283_v9, %v6397_v41 }
 0x745   :  { %v1352_v33 = vadd.f32 %v5288_v43, %v1351_v42  ;;  %v1966_v35 = vmul.f32 1.442695, %v1963_v32 }
 0x746   :  { %v5290_v55 = vpop.eup %5289 }
 0x747   :  { %v1356_v59 = vsel %vm1355_vm9, %v5288_v43, %v1352_v33  ;;  %v1364_v60 = vmul.f32 %v5290_v55, %v1347_v46  ;;  %vm1369_vm11 = vweird.f32 %v5290_v55  ;;  %5291 = vpow2.f32 %v1966_v35 }
 0x748   :  { %v1361_v2 = vsel %vm1358_vm10, %v1360_v45, %v1356_v59  ;;  %vm1370_vm13 = vmor %vm1368_vm12, %vm1369_vm11  ;;  %5293 = vpow2.f32 %v1964_v62  ;;  %v1279_v46 = vsel %vm488_vm14, %v6163_v49, %v1243_v19  ;;  %v6520_v49 = vpop.xlane.xlu1 %1591 }
 0x749   :  { %v1365_v39 = vsub.f32 1.0, %v1364_v60  ;;  %v1362_v4 = vmul.f32 %v6408_v44, %v1361_v2  ;;  %v1281_v10 = vsel %vm528_vm1, %v1279_v46, %v1251_v11 }
 0x74a   :  { %v1259_v38 = vpop.permute.xlu0 %1258  ;;  %v1464_v41 = vpop.xlane.xlu2 %1463 }
 0x74b   :  { %4894 = vmatmul.msk.f32.vlgmr.msrb.gmra.mxu2 %vm528_vm1, %v1362_v4  ;;  %v1366_v23 = vmul.f32 %v5290_v55, %v1365_v39  ;;  %v1284_v42 = vsel %vm1282_vm4, %v1281_v10, %v1259_v38  ;;  %5295 = vrcp.f32 %v1464_v41  ;;  %vm1473_vm8 = vweird.f32 %v1464_v41 }
 0x74c   :  { %v1287_v56 = vsel %vm1285_vm5, %v1284_v42, %v1267_v18 }
 0x74d   :  { %5134 = vrot.lane.b32.xlu1 %v6479_v7, %s5722_s21  ;;  %v1367_v44 = vadd.f32 %v5290_v55, %v1366_v23 }
 0x74f   :  { %5124 = vrot.lane.b32.xlu0 %v6479_v7, %s5721_s17  ;;  %v1371_v13 = vsel %vm1370_vm13, %v5290_v55, %v1367_v44 }
 0x750   :  { %v1376_v15 = vsel %vm1373_vm3, %v1375_v17, %v1371_v13  ;;  %v6523_v31 = vpop.xlane.xlu1 %1594  ;;  %v1479_v13 = vand.u32 2147483648, %v1464_v41 }
 0x751   :  { %v1377_v16 = vmul.f32 %v6422_v1, %v1376_v15  ;;  %v6494_v1 = vpop.eup %5291  ;;  %v1477_v15 = vand.u32 2147483647, %v1464_v41 }
 0x752   :  { %v6498_v40 = vpop.eup %5293  ;;  %v1971_v36 = vsel %vm528_vm1, %v6494_v1, 0.0  ;;  %v1467_v55 = vpop.xlane.xlu2 %1466  ;;  %v1480_v22 = vor.u32 1.1754944e-38, %v1479_v13  ;;  %v1605_v13 = vand.u32 2147483647, %v6520_v49 }
 0x753   :  { %4895 = vmatmul.msk.f32.gmra.mxu2 %vm528_vm1, %v1377_v16  ;;  %v1968_v43 = vsel %vm528_vm1, %v6498_v40, 0.0  ;;  %v5296_v59 = vpop.eup %5295  ;;  %5297 = vrcp.f32 %v1467_v55  ;;  %vm1478_vm10 = vcmp.eq.f32.partialorder %v1477_v15, 8.507059e+37  ;;  %v1494_v61 = vand.u32 2147483648, %v1467_v55 }
 0x754   :  { %v1469_v60 = vmul.f32 %v5296_v59, %v1464_v41  ;;  %vm1474_vm7 = vweird.f32 %v5296_v59  ;;  %vm1488_vm12 = vweird.f32 %v1467_v55  ;;  %v1492_v38 = vand.u32 2147483647, %v1467_v55 }
 0x755   :  { %vm1475_vm9 = vmor %vm1473_vm8, %vm1474_vm7 }
 0x756   :  { %v1470_v4 = vsub.f32 1.0, %v1469_v60  ;;  %vm1493_vm3 = vcmp.eq.f32.partialorder %v1492_v38, 8.507059e+37  ;;  %v1620_v38 = vand.u32 2147483647, %v6523_v31 }
 0x758   :  { %v1471_v23 = vmul.f32 %v5296_v59, %v1470_v4 }
 0x759   :  { %v5298_v8 = vpop.eup %5297 }
 0x75a   :  { %v1718_v6 = vpop.xlane.xlu2 %1717  ;;  %v1484_v37 = vmul.f32 %v5298_v8, %v1467_v55  ;;  %v1472_v11 = vadd.f32 %v5296_v59, %v1471_v23  ;;  %vm1489_vm11 = vweird.f32 %v5298_v8 }
 0x75b   :  { %vm1490_vm13 = vmor %vm1488_vm12, %vm1489_vm11  ;;  %v1733_v46 = vand.u32 2147483648, %v1718_v6  ;;  %vm1727_vm8 = vweird.f32 %v1718_v6  ;;  %vm1601_vm12 = vweird.f32 %v6520_v49 }
 0x75c   :  { %v1485_v17 = vsub.f32 1.0, %v1484_v37  ;;  %v1476_v16 = vsel %vm1475_vm9, %v5296_v59, %v1472_v11 }
 0x75d   :  { %v1481_v19 = vsel %vm1478_vm10, %v1480_v22, %v1476_v16  ;;  %v1734_v42 = vor.u32 1.1754944e-38, %v1733_v46 }
 0x75e   :  { %v1486_v21 = vmul.f32 %v5298_v8, %v1485_v17  ;;  %v1482_v62 = vmul.f32 %v6438_v34, %v1481_v19  ;;  %v1731_v34 = vand.u32 2147483647, %v1718_v6 }
 0x760   :  { %v1487_v20 = vadd.f32 %v5298_v8, %v1486_v21  ;;  %vm1732_vm10 = vcmp.eq.f32.partialorder %v1731_v34, 8.507059e+37 }
 0x762   :  { %v1491_v58 = vsel %vm1490_vm13, %v5298_v8, %v1487_v20 }
 0x777   :  { %1972 = vadd.xlane.f32.xlu1 %v1971_v36 }
 0x779   :  { %1969 = vadd.xlane.f32.xlu0 %v1968_v43  ;;  %v1495_v43 = vor.u32 1.1754944e-38, %v1494_v61 }
 0x77b   :  { %v1273_v12 = vpop.permute.xlu0 %1272 }
 0x77c   :  { %v1289_v5 = vsel %vm1288_vm6, %v1286_v30, %v1273_v12  ;;  %v1496_v30 = vsel %vm1493_vm3, %v1495_v43, %v1491_v58  ;;  %vm1606_vm3 = vcmp.eq.f32.partialorder %v1605_v13, 8.507059e+37 }
 0x77d   :  { %4926 = vmatmul.msk.f32.vlgmr.msra.gmra.mxu1 %vm261_vm0, %v1289_v5  ;;  %v1497_v5 = vmul.f32 %v6448_v26, %v1496_v30  ;;  %v6542_v26 = vld [vmem:[%s5774_s3] ss:$0 sm:$0xff]  ;;  %s7781_s3 = sld [smem:[#allocation23_spill]] }
 0x783   :  { %v1275_v50 = vpop.permute.xlu0 %1274 }
 0x784   :  { %v1290_v33 = vsel %vm1288_vm6, %v1287_v56, %v1275_v50 }
 0x785   :  { %4927 = vmatmul.msk.f32.gmra.mxu1 %vm261_vm0, %v1290_v33  ;;  %v1837_v33 = vsub.f32 %v6404_v54, %v6461_v51 }
 0x787   :  { %v1840_v41 = vmul.f32 1.442695, %v1837_v33 }
 0x78d   :  { %5139 = vrot.lane.b32.xlu0 %v6479_v7, %s5725_s5 }
 0x7a7   :  { %v6529_v3 = vpop.xlane.xlu1 %1843 }
 0x7ae   :  { %v1709_v45 = vpop.xlane.xlu0 %1708 }
 0x7af   :  { %v1711_v39 = vsub.f32 %v6470_v48, %v1709_v45 }
 0x7b1   :  { %v1714_v2 = vmul.f32 1.442695, %v1711_v39  ;;  %v5447_v39 = vld [vmem:[#allocation2] sm:$0xff] }
 0x7b3   :  { %5299 = vpow2.f32 %v1714_v2 }
 0x7b4   :  { %5301 = vrcp.f32 %v1718_v6 }
 0x7b5   :  { %5303 = vpow2.f32 %v1840_v41  ;;  %v1859_v41 = vand.u32 2147483648, %v6529_v3 }
 0x7b6   :  { %5305 = vrcp.f32 %v6520_v49 }
 0x7b7   :  { %5307 = vrcp.f32 %v6523_v31 }
 0x7b8   :  { %5309 = vrcp.f32 %v6529_v3 }
 0x7b9   :  { %v6525_v47 = vpop.eup %5299 }
 0x7ba   :  { %v1719_v44 = vsel %vm528_vm1, %v6525_v47, 0.0  ;;  %v5302_v48 = vpop.eup %5301 }
 0x7bb   :  { %1720 = vadd.xlane.f32.xlu2 %v1719_v44  ;;  %v1723_v18 = vmul.f32 %v5302_v48, %v1718_v6  ;;  %vm1728_vm7 = vweird.f32 %v5302_v48  ;;  %v6544_v55 = vpop.eup %5303 }
 0x7bc   :  { %vm1729_vm9 = vmor %vm1727_vm8, %vm1728_vm7  ;;  %v1845_v60 = vsel %vm528_vm1, %v6544_v55, 0.0  ;;  %v5306_v54 = vpop.eup %5305  ;;  %vm1616_vm7 = vweird.f32 %v6523_v31 }
 0x7bd   :  { %v1724_v28 = vsub.f32 1.0, %v1723_v18  ;;  %v1597_v51 = vmul.f32 %v5306_v54, %v6520_v49  ;;  %v5308_v6 = vpop.eup %5307  ;;  %vm1602_vm11 = vweird.f32 %v5306_v54 }
 0x7be   :  { %v1612_v23 = vmul.f32 %v5308_v6, %v6523_v31  ;;  %v6562_v17 = vpop.eup %5309  ;;  %vm1603_vm13 = vmor %vm1601_vm12, %vm1602_vm11  ;;  %vm1617_vm8 = vweird.f32 %v5308_v6 }
 0x7bf   :  { %v5135_v32 = vpop.permute.xlu1 %5134  ;;  %v1725_v36 = vmul.f32 %v5302_v48, %v1724_v28  ;;  %v1598_v4 = vsub.f32 1.0, %v1597_v51  ;;  %v1849_v16 = vmul.f32 %v6562_v17, %v6529_v3 }
 0x7c0   :  { %v5136_v0 = vunpack.i.l.bf16 %v5135_v32  ;;  %v5137_v9 = vunpack.i.h.bf16 %v5135_v32  ;;  %v1613_v11 = vsub.f32 1.0, %v1612_v23 }
 0x7c1   :  { %v5125_v25 = vpop.permute.xlu0 %5124  ;;  %v1726_v12 = vadd.f32 %v5302_v48, %v1725_v36  ;;  %v1599_v8 = vmul.f32 %v5306_v54, %v1598_v4  ;;  %v1850_v32 = vsub.f32 1.0, %v1849_v16 }
 0x7c2   :  { %v5126_v27 = vunpack.i.l.bf16 %v5125_v25  ;;  %v5127_v35 = vunpack.i.h.bf16 %v5125_v25  ;;  %v1614_v18 = vmul.f32 %v5308_v6, %v1613_v11 }
 0x7c3   :  { %v1730_v10 = vsel %vm1729_vm9, %v5302_v48, %v1726_v12  ;;  %v1600_v44 = vadd.f32 %v5306_v54, %v1599_v8  ;;  %v1607_v48 = vand.u32 2147483648, %v6520_v49  ;;  %v1851_v12 = vmul.f32 %v6562_v17, %v1850_v32 }
 0x7c4   :  { %1526 = vmatpush.msrb.mxu0 %v5126_v27  ;;  %v1735_v50 = vsel %vm1732_vm10, %v1734_v42, %v1730_v10  ;;  %v1615_v61 = vadd.f32 %v5308_v6, %v1614_v18  ;;  %vm6575_vm10 = vmor %vm1616_vm7, %vm1617_vm8  ;;  %vm1854_vm7 = vweird.f32 %v6562_v17  ;;  %vm1853_vm8 = vweird.f32 %v6529_v3 }
 0x7c5   :  { %v1736_v56 = vmul.f32 %v6454_v52, %v1735_v50  ;;  %v1604_v15 = vsel %vm1603_vm13, %v5306_v54, %v1600_v44  ;;  %v1608_v22 = vor.u32 1.1754944e-38, %v1607_v48 }
 0x7c6   :  { %1527 = vmatpush.msrb.mxu0 %v5127_v35 }
 0x7c7   :  { %4900 = vmatmul.msk.f32.vlgmr.msrb.gmra.mxu0 %vm528_vm1, %v1482_v62  ;;  %v1609_v28 = vsel %vm1606_vm3, %v1608_v22, %v1604_v15  ;;  %vm1621_vm3 = vcmp.eq.f32.partialorder %v1620_v38, 8.507059e+37 }
 0x7c8   :  { %1778 = vmatpush.msra.mxu0 %v5136_v0  ;;  %v1622_v0 = vand.u32 2147483648, %v6523_v31  ;;  %v1610_v36 = vmul.f32 %v6435_v53, %v1609_v28  ;;  %v1619_v53 = vsel %vm6575_vm10, %v5308_v6, %v1615_v61 }
 0x7ca   :  { %1779 = vmatpush.msra.mxu0 %v5137_v9  ;;  %v1623_v10 = vor.u32 1.1754944e-38, %v1622_v0 }
 0x7cc   :  { %v1624_v50 = vsel %vm1621_vm3, %v1623_v10, %v1619_v53 }
 0x7cf   :  { %4901 = vmatmul.msk.f32.gmra.mxu0 %vm528_vm1, %v1497_v5 }
 0x7d3   :  { %5129 = vrot.lane.b32.xlu2 %v6479_v7, %s5723_s25 }
 0x7d7   :  { %4912 = vmatmul.msk.f32.vlgmr.msra.gmra.mxu0 %vm528_vm1, %v1736_v56  ;;  %v1852_v56 = vadd.f32 %v6562_v17, %v1851_v12 }
 0x7fa   :  { %v2128_v59 = vpop.f32.mrf.mxu1 }
 0x7fb   :  { %v2129_v45 = vadd.f32 %v6542_v26, %v2128_v59  ;;  %v1857_v59 = vand.u32 2147483647, %v6529_v3  ;;  %v1973_v3 = vpop.xlane.xlu1 %1972 }
 0x7fc   :  { %1846 = vadd.xlane.f32.xlu2 %v1845_v60  ;;  %v1998_v38 = vand.u32 2147483647, %v1973_v3  ;;  %v2000_v0 = vand.u32 2147483648, %v1973_v3 }
 0x7fd   :  { %v6549_v52 = vadd.f32 %v5447_v39, %v2129_v45  ;;  %v1625_v45 = vmul.f32 %v6445_v24, %v1624_v50  ;;  %vm1858_vm10 = vcmp.eq.f32.partialorder %v1857_v59, 8.507059e+37 }
 0x7ff   :  { %v2146_v2 = vsel %vm261_vm0, %v6549_v52, 0.0 }
 0x800   :  { %2147 = vadd.xlane.f32.xlu0 %v2146_v2  ;;  %v1860_v2 = vor.u32 1.1754944e-38, %v1859_v41 }
 0x802   :  { %v2131_v24 = vpop.f32.mrf.mxu1 }
 0x803   :  { %v2132_v6 = vadd.f32 %v6542_v26, %v2131_v24 }
 0x814   :  { %5144 = vrot.lane.b32.xlu2 %v6479_v7, %s5724_s4  ;;  %v6560_v7 = vpop.xlane.xlu0 %1969 }
 0x815   :  { %v1985_v16 = vand.u32 2147483648, %v6560_v7  ;;  %v1983_v18 = vand.u32 2147483647, %v6560_v7 }
 0x817   :  { %vm1984_vm3 = vcmp.eq.f32.partialorder %v1983_v18, 8.507059e+37  ;;  %v2250_v18 = vld [vmem:[%s5789_s19 + $0x10] sm:$0xff] }
 0x81c   :  { %v5140_v20 = vpop.permute.xlu0 %5139 }
 0x81d   :  { %v5141_v43 = vunpack.i.l.bf16 %v5140_v20  ;;  %v5142_v34 = vunpack.i.h.bf16 %v5140_v20 }
 0x82e   :  { %v1721_v37 = vpop.xlane.xlu2 %1720 }
 0x82f   :  { %5311 = vrcp.f32 %v1721_v37  ;;  %v1748_v62 = vand.u32 2147483648, %v1721_v37  ;;  %v1746_v9 = vand.u32 2147483647, %v1721_v37  ;;  %vm1742_vm11 = vweird.f32 %v1721_v37 }
 0x830   :  { %5313 = vrcp.f32 %v6560_v7 }
 0x831   :  { %v1749_v5 = vor.u32 1.1754944e-38, %v1748_v62  ;;  %vm1747_vm13 = vcmp.eq.f32.partialorder %v1746_v9, 8.507059e+37  ;;  %5315 = vrcp.f32 %v1973_v3 }
 0x835   :  { %v5312_v21 = vpop.eup %5311 }
 0x836   :  { %v1738_v25 = vmul.f32 %v5312_v21, %v1721_v37  ;;  %v5130_v27 = vpop.permute.xlu2 %5129  ;;  %vm1743_vm9 = vweird.f32 %v5312_v21  ;;  %v5314_v51 = vpop.eup %5313  ;;  %v5448_v37 = vld [vmem:[#allocation2 + $0x8] sm:$0xff] }
 0x837   :  { %v5131_v19 = vunpack.i.l.bf16 %v5130_v27  ;;  %v5132_v49 = vunpack.i.h.bf16 %v5130_v27  ;;  %vm1744_vm12 = vmor %vm1742_vm11, %vm1743_vm9  ;;  %v1975_v4 = vmul.f32 %v5314_v51, %v6560_v7  ;;  %v5316_v23 = vpop.eup %5315  ;;  %v6599_v44 = vadd.f32 %v5448_v37, %v2132_v6  ;;  %v2259_v37 = vld [vmem:[%s5789_s19 + $0x58] sm:$0xff] }
 0x838   :  { %v1739_v35 = vsub.f32 1.0, %v1738_v25  ;;  %vm1855_vm9 = vmor %vm1853_vm8, %vm1854_vm7  ;;  %v1990_v11 = vmul.f32 %v5316_v23, %v1973_v3  ;;  %vm1980_vm11 = vweird.f32 %v5314_v51  ;;  %v1986_v27 = vor.u32 1.1754944e-38, %v1985_v16  ;;  %2317 = vmatpush.msrb.mxu3 %v2259_v37  ;;  %v2253_v16 = vld [vmem:[%s5789_s19 + $0x28] sm:$0xff]  ;;  %v2350_v37 = vld [vmem:[%s7780_s29 + $0x30] sm:$0xff] }
 0x839   :  { %1652 = vmatpush.msra.mxu2 %v5131_v19  ;;  %v1856_v60 = vsel %vm1855_vm9, %v6562_v17, %v1852_v56  ;;  %v1976_v8 = vsub.f32 1.0, %v1975_v4  ;;  %vm1994_vm7 = vweird.f32 %v1973_v3  ;;  %vm1995_vm8 = vweird.f32 %v5316_v23 }
 0x83a   :  { %v1740_v58 = vmul.f32 %v5312_v21, %v1739_v35  ;;  %v1991_v13 = vsub.f32 1.0, %v1990_v11  ;;  %v2256_v11 = vld [vmem:[%s5789_s19 + $0x40] sm:$0xff] }
 0x83b   :  { %1653 = vmatpush.msra.mxu2 %v5132_v49  ;;  %v1977_v17 = vmul.f32 %v5314_v51, %v1976_v8 }
 0x83c   :  { %4906 = vmatmul.msk.f32.vlgmr.msra.gmra.mxu2 %vm528_vm1, %v1610_v36  ;;  %v1741_v46 = vadd.f32 %v5312_v21, %v1740_v58  ;;  %v1992_v22 = vmul.f32 %v5316_v23, %v1991_v13 }
 0x83d   :  { %1904 = vmatpush.msrb.mxu2 %v5141_v43  ;;  %v1978_v15 = vadd.f32 %v5314_v51, %v1977_v17  ;;  %v2257_v17 = vld [vmem:[%s5789_s19 + $0x48] sm:$0xff] }
 0x83e   :  { %v1745_v42 = vsel %vm1744_vm12, %v5312_v21, %v1741_v46  ;;  %vm1979_vm12 = vweird.f32 %v6560_v7  ;;  %v1993_v61 = vadd.f32 %v5316_v23, %v1992_v22  ;;  %v2001_v46 = vor.u32 1.1754944e-38, %v2000_v0  ;;  %2318 = vmatpush.msrb.mxu3 %v2257_v17  ;;  %v2248_v22 = vld [vmem:[%s5789_s19] sm:$0xff]  ;;  %v2349_v17 = vld [vmem:[%s7780_s29 + $0x28] sm:$0xff] }
 0x83f   :  { %1905 = vmatpush.msrb.mxu2 %v5142_v34  ;;  %v1750_v31 = vsel %vm1747_vm13, %v1749_v5, %v1745_v42  ;;  %vm1981_vm13 = vmor %vm1979_vm12, %vm1980_vm11 }
 0x840   :  { %v1751_v33 = vmul.f32 %v6525_v47, %v1750_v31  ;;  %v1861_v47 = vsel %vm1858_vm10, %v1860_v2, %v1856_v60  ;;  %v1982_v21 = vsel %vm1981_vm13, %v5314_v51, %v1978_v15  ;;  %vm1996_vm10 = vmor %vm1994_vm7, %vm1995_vm8  ;;  %v2252_v15 = vld [vmem:[%s5789_s19 + $0x20] sm:$0xff] }
 0x841   :  { %v1862_v54 = vmul.f32 %v6463_v29, %v1861_v47  ;;  %v2149_v29 = vsel %vm261_vm0, %v6599_v44, 0.0  ;;  %v1987_v20 = vsel %vm1984_vm3, %v1986_v27, %v1982_v21  ;;  %v1997_v30 = vsel %vm1996_vm10, %v5316_v23, %v1993_v61  ;;  %v2258_v23 = vld [vmem:[%s5789_s19 + $0x50] sm:$0xff]  ;;  %v2251_v21 = vld [vmem:[%s5789_s19 + $0x18] sm:$0xff] }
 0x842   :  { %4913 = vmatmul.msk.f32.gmra.mxu0 %vm528_vm1, %v1751_v33  ;;  %v1988_v7 = vmul.f32 %v6498_v40, %v1987_v20  ;;  %vm1999_vm3 = vcmp.eq.f32.partialorder %v1998_v38, 8.507059e+37  ;;  %v6617_v33 = vpop.f32.mrf.mxu2  ;;  %2288 = vmatpush.msra.mxu2 %v2258_v23  ;;  %v6655_v38 = vld [vmem:[%s5779_s8] ss:$0 sm:$0xff]  ;;  %s7782_s8 = sld [smem:[#allocation27_spill]] }
 0x843   :  { %v2002_v5 = vsel %vm1999_vm3, %v2001_v46, %v1997_v30  ;;  %v2358_v30 = vld [vmem:[%s7780_s29 + $0x70] sm:$0xff] }
 0x844   :  { %v1529_v39 = vpop.f32.mrf.mxu0  ;;  %4907 = vmatmul.msk.f32.gmra.mxu2 %vm528_vm1, %v1625_v45  ;;  %v2003_v10 = vmul.f32 %v6494_v1, %v2002_v5  ;;  %v2367_v5 = vld [vmem:[%s7780_s29 + $0xb8] sm:$0xff] }
 0x845   :  { %2041 = vrot.lane.b32.xlu1 %v1529_v39, %s5714_s0  ;;  %2289 = vmatpush.msra.mxu2 %v2256_v11 }
 0x846   :  { %2418 = vmatpush.msrb.mxu1 %v2367_v5 }
 0x84a   :  { %v6622_v1 = vpop.f32.mrf.mxu2 }
 0x84c   :  { %4918 = vmatmul.msk.f32.vlgmr.msrb.gmra.mxu2 %vm528_vm1, %v1862_v54  ;;  %v1532_v9 = vpop.f32.mrf.mxu0 }
 0x854   :  { %v1781_v42 = vpop.f32.mrf.mxu0 }
 0x86f   :  { %v1847_v48 = vpop.xlane.xlu2 %1846  ;;  %2150 = vadd.xlane.f32.xlu1 %v2149_v29  ;;  %v2254_v29 = vld [vmem:[%s5789_s19 + $0x30] sm:$0xff] }
 0x870   :  { %5317 = vrcp.f32 %v1847_v48  ;;  %v1874_v62 = vand.u32 2147483648, %v1847_v48  ;;  %v1872_v58 = vand.u32 2147483647, %v1847_v48  ;;  %vm1868_vm11 = vweird.f32 %v1847_v48  ;;  %2290 = vmatpush.msra.mxu2 %v2254_v29 }
 0x872   :  { %v1875_v12 = vor.u32 1.1754944e-38, %v1874_v62  ;;  %vm1873_vm13 = vcmp.eq.f32.partialorder %v1872_v58, 8.507059e+37  ;;  %2291 = vmatpush.msra.mxu2 %v2252_v15 }
 0x873   :  { %v2148_v31 = vpop.xlane.xlu0 %2147 }
 0x874   :  { %v2158_v50 = vmul.f32 %v2148_v31, %v5944_v14  ;;  %2292 = vmatpush.msra.mxu2 %v2250_v18  ;;  %v2356_v31 = vld [vmem:[%s7780_s29 + $0x60] sm:$0xff]  ;;  %v2347_v18 = vld [vmem:[%s7780_s29 + $0x18] sm:$0xff] }
 0x876   :  { %v5318_v25 = vpop.eup %5317  ;;  %v6615_v56 = vsub.f32 %v6549_v52, %v2158_v50  ;;  %2293 = vmatpush.msra.mxu2 %v2248_v22 }
 0x877   :  { %v1864_v19 = vmul.f32 %v5318_v25, %v1847_v48  ;;  %v5145_v28 = vpop.permute.xlu2 %5144  ;;  %vm1869_vm9 = vweird.f32 %v5318_v25  ;;  %v2255_v48 = vld [vmem:[%s5789_s19 + $0x38] sm:$0xff] }
 0x878   :  { %v5146_v32 = vunpack.i.l.bf16 %v5145_v28  ;;  %v5147_v49 = vunpack.i.h.bf16 %v5145_v28  ;;  %vm1870_vm12 = vmor %vm1868_vm11, %vm1869_vm9  ;;  %2319 = vmatpush.msrb.mxu3 %v2255_v48  ;;  %v2348_v48 = vld [vmem:[%s7780_s29 + $0x20] sm:$0xff] }
 0x879   :  { %v1865_v35 = vsub.f32 1.0, %v1864_v19 }
 0x87a   :  { %2030 = vmatpush.msrb.mxu0 %v5146_v32  ;;  %2320 = vmatpush.msrb.mxu3 %v2253_v16 }
 0x87b   :  { %v1866_v36 = vmul.f32 %v5318_v25, %v1865_v35 }
 0x87c   :  { %2031 = vmatpush.msrb.mxu0 %v5147_v49  ;;  %2321 = vmatpush.msrb.mxu3 %v2251_v21 }
 0x87d   :  { %4924 = vmatmul.msk.f32.vlgmr.msrb.gmra.mxu0 %vm528_vm1, %v1988_v7  ;;  %v1867_v43 = vadd.f32 %v5318_v25, %v1866_v36  ;;  %v6658_v36 = vld [vmem:[#allocation8] ss:$0 sm:$0xff] }
 0x87f   :  { %v1871_v53 = vsel %vm1870_vm12, %v5318_v25, %v1867_v43  ;;  %v2249_v25 = vld [vmem:[%s5789_s19 + $0x8] sm:$0xff]  ;;  %v2359_v43 = vld [vmem:[%s7780_s29 + $0x78] sm:$0xff]  ;;  %s7783_s19 = sld [smem:[#allocation28_spill]] }
 0x880   :  { %v1876_v34 = vsel %vm1873_vm13, %v1875_v12, %v1871_v53  ;;  %2322 = vmatpush.msrb.mxu3 %v2249_v25  ;;  %2381 = vmatpush.msra.mxu0 %v2359_v43  ;;  %vm2368_vm13 = vcmask 523264  }
 0x881   :  { %v1877_v40 = vmul.f32 %v6544_v55, %v1876_v34  ;;  %v2166_v55 = vmul.f32 %v6615_v56, %v6615_v56  ;;  %v2357_v34 = vld [vmem:[%s7780_s29 + $0x68] sm:$0xff] }
 0x882   :  { %2382 = vmatpush.msra.mxu0 %v2358_v30 }
 0x883   :  { %4919 = vmatmul.msk.f32.gmra.mxu2 %vm528_vm1, %v1877_v40  ;;  %v2170_v41 = vsel %vm261_vm0, %v2166_v55, 0.0  ;;  %v2366_v40 = vld [vmem:[%s7780_s29 + $0xb0] sm:$0xff] }
 0x884   :  { %2383 = vmatpush.msra.mxu0 %v2357_v34  ;;  %2419 = vmatpush.msrb.mxu1 %v2366_v40 }
 0x885   :  { %4925 = vmatmul.msk.f32.gmra.mxu0 %vm528_vm1, %v2003_v10 }
 0x886   :  { %2384 = vmatpush.msra.mxu0 %v2356_v31  ;;  %v5449_v31 = vld [vmem:[#allocation2 + $0x10] sm:$0xff] }
 0x888   :  { %2057 = vrot.lane.b32.xlu1 %v1781_v42, %s5728_s14 }
 0x8b2   :  { %2171 = vadd.xlane.f32.xlu1 %v2170_v41  ;;  %v2355_v41 = vld [vmem:[%s7780_s29 + $0x58] sm:$0xff] }
 0x8b3   :  { %2385 = vmatpush.msra.mxu0 %v2355_v41 }
 0x8b7   :  { %v6629_v2 = vpop.permute.xlu1 %2041 }
 0x8b8   :  { %v2079_v10 = vsel %vm488_vm14, %v6617_v33, %v6629_v2  ;;  %v2363_v2 = vld [vmem:[%s7780_s29 + $0x98] sm:$0xff] }
 0x8bf   :  { %v1655_v59 = vpop.f32.mrf.mxu2  ;;  %v1784_v60 = vpop.f32.mrf.mxu0 }
 0x8c0   :  { %2049 = vrot.lane.b32.xlu0 %v1655_v59, %s5726_s23  ;;  %v2364_v59 = vld [vmem:[%s7780_s29 + $0xa0] sm:$0xff] }
 0x8c7   :  { %v1658_v45 = vpop.f32.mrf.mxu2 }
 0x8c8   :  { %2043 = vrot.lane.b32.xlu0 %v1532_v9, %s5714_s0 }
 0x8cf   :  { %v1907_v39 = vpop.f32.mrf.mxu2 }
 0x8d0   :  { %2059 = vrot.lane.b32.xlu0 %v1784_v60, %s5728_s14  ;;  %2065 = vrot.lane.b32.xlu1 %v1907_v39, %s5727_s1  ;;  %v2354_v60 = vld [vmem:[%s7780_s29 + $0x50] sm:$0xff] }
 0x8d1   :  { %2386 = vmatpush.msra.mxu0 %v2354_v60 }
 0x8d8   :  { %2051 = vrot.lane.b32.xlu1 %v1658_v45, %s5726_s23 }
 0x8e2   :  { %v2151_v47 = vpop.xlane.xlu1 %2150 }
 0x8e3   :  { %v2159_v54 = vmul.f32 %v2151_v47, %v5944_v14 }
 0x8e5   :  { %v6633_v3 = vsub.f32 %v6599_v44, %v2159_v54  ;;  %v2353_v54 = vld [vmem:[%s7780_s29 + $0x48] sm:$0xff] }
 0x8e6   :  { %2387 = vmatpush.msra.mxu0 %v2353_v54 }
 0x8e7   :  { %v2167_v51 = vmul.f32 %v6633_v3, %v6633_v3 }
 0x8e9   :  { %v2173_v24 = vsel %vm261_vm0, %v2167_v51, 0.0 }
 0x8ea   :  { %2174 = vadd.xlane.f32.xlu2 %v2173_v24 }
 0x8fa   :  { %v2033_v4 = vpop.f32.mrf.mxu0  ;;  %v2058_v13 = vpop.permute.xlu1 %2057 }
 0x902   :  { %2073 = vrot.lane.b32.xlu2 %v2033_v4, %s5729_s2  ;;  %v2036_v6 = vpop.f32.mrf.mxu0  ;;  %v2352_v4 = vld [vmem:[%s7780_s29 + $0x40] sm:$0xff] }
 0x903   :  { %2075 = vrot.lane.b32.xlu0 %v2036_v6, %s5729_s2  ;;  %2388 = vmatpush.msra.mxu0 %v2352_v4 }
 0x906   :  { %v1910_v8 = vpop.f32.mrf.mxu2 }
 0x907   :  { %2067 = vrot.lane.b32.xlu1 %v1910_v8, %s5727_s1  ;;  %v2351_v8 = vld [vmem:[%s7780_s29 + $0x38] sm:$0xff] }
 0x908   :  { %2389 = vmatpush.msra.mxu0 %v2351_v8 }
 0x90a   :  { %2390 = vmatpush.msra.mxu0 %v2350_v37 }
 0x90c   :  { %2391 = vmatpush.msra.mxu0 %v2349_v17 }
 0x90e   :  { %2392 = vmatpush.msra.mxu0 %v2348_v48 }
 0x910   :  { %2393 = vmatpush.msra.mxu0 %v2347_v18 }
 0x925   :  { %v2172_v27 = vpop.xlane.xlu1 %2171 }
 0x926   :  { %v2182_v19 = vmul.f32 %v2172_v27, %v5944_v14 }
 0x928   :  { %v2186_v28 = vadd.f32 1e-05, %v2182_v19 }
 0x92a   :  { %5319 = vrsqrt.f32 %v2186_v28  ;;  %vm2196_vm8 = vweird.f32 %v2186_v28 }
 0x930   :  { %v5320_v32 = vpop.eup %5319 }
 0x931   :  { %v2191_v20 = vmul.f32 %v5320_v32, %v2186_v28  ;;  %vm2197_vm7 = vweird.f32 %v5320_v32 }
 0x932   :  { %vm2198_vm9 = vmor %vm2196_vm8, %vm2197_vm7  ;;  %v2050_v46 = vpop.permute.xlu0 %2049 }
 0x933   :  { %v2192_v35 = vmul.f32 %v5320_v32, %v2191_v20  ;;  %v2081_v50 = vsel %vm528_vm1, %v2079_v10, %v2050_v46 }
 0x934   :  { %v2083_v45 = vsel %vm1282_vm4, %v2081_v50, %v2058_v13 }
 0x935   :  { %v2193_v61 = vmul.f32 0.5, %v2192_v35 }
 0x937   :  { %v2194_v49 = vsub.f32 1.5, %v2193_v61  ;;  %v2346_v61 = vld [vmem:[%s7780_s29 + $0x10] sm:$0xff] }
 0x938   :  { %2394 = vmatpush.msra.mxu0 %v2346_v61 }
 0x939   :  { %v2195_v62 = vmul.f32 %v5320_v32, %v2194_v49  ;;  %v2362_v49 = vld [vmem:[%s7780_s29 + $0x90] sm:$0xff] }
 0x93a   :  { %v2044_v24 = vpop.permute.xlu0 %2043 }
 0x93b   :  { %v2199_v0 = vsel %vm2198_vm9, %v5320_v32, %v2195_v62  ;;  %v2080_v25 = vsel %vm488_vm14, %v6622_v1, %v2044_v24  ;;  %v2345_v62 = vld [vmem:[%s7780_s29 + $0x8] sm:$0xff] }
 0x93c   :  { %v2230_v7 = vmul.f32 %v2199_v0, %v6615_v56  ;;  %v2365_v56 = vld [vmem:[%s7780_s29 + $0xa8] sm:$0xff]  ;;  %2395 = vmatpush.msra.mxu0 %v2345_v62 }
 0x93d   :  { %2420 = vmatpush.msrb.mxu1 %v2365_v56  ;;  %v2361_v0 = vld [vmem:[%s7780_s29 + $0x88] sm:$0xff] }
 0x93e   :  { %v2237_v58 = vmul.f32 %v6655_v38, %v2230_v7  ;;  %v2344_v7 = vld [vmem:[%s7780_s29] sm:$0xff] }
 0x93f   :  { %2421 = vmatpush.msrb.mxu1 %v2364_v59  ;;  %2396 = vmatpush.msra.mxu0 %v2344_v7  ;;  %v5450_v59 = vld [vmem:[#allocation2 + $0x18] sm:$0xff] }
 0x940   :  { %v2244_v9 = vadd.f32 %v6658_v36, %v2237_v58  ;;  %v2360_v58 = vld [vmem:[%s7780_s29 + $0x80] sm:$0xff] }
 0x941   :  { %2422 = vmatpush.msrb.mxu1 %v2363_v2 }
 0x942   :  { %4930 = vmatmul.msk.f32.vlgmr.msra.gmra.mxu2 %vm261_vm0, %v2244_v9  ;;  %4934 = vmatmul.msk.f32.vlgmr.msrb.gmra.mxu3 %vm261_vm0, %v2244_v9  ;;  %v2066_v55 = vpop.permute.xlu1 %2065  ;;  %v2060_v16 = vpop.permute.xlu0 %2059  ;;  %v2260_v9 = vld [vmem:[%s7781_s3] sm:$0x3] }
 0x943   :  { %v2085_v33 = vsel %vm1285_vm5, %v2083_v45, %v2066_v55  ;;  %2423 = vmatpush.msrb.mxu1 %v2362_v49  ;;  %v6710_v43 = vperm.slane %v2260_v9, 0  ;;  %v6712_v30 = vperm.slane %v2260_v9, 1 }
 0x945   :  { %2424 = vmatpush.msrb.mxu1 %v2361_v0 }
 0x947   :  { %2425 = vmatpush.msrb.mxu1 %v2360_v58 }
 0x94a   :  { %v2052_v13 = vpop.permute.xlu1 %2051 }
 0x94b   :  { %v2082_v27 = vsel %vm528_vm1, %v2080_v25, %v2052_v13 }
 0x94c   :  { %v2084_v32 = vsel %vm1282_vm4, %v2082_v27, %v2060_v16 }
 0x95d   :  { %v2175_v12 = vpop.xlane.xlu2 %2174 }
 0x95e   :  { %v2183_v53 = vmul.f32 %v2175_v12, %v5944_v14 }
 0x960   :  { %v2187_v42 = vadd.f32 1e-05, %v2183_v53 }
 0x962   :  { %5321 = vrsqrt.f32 %v2187_v42  ;;  %vm2206_vm11 = vweird.f32 %v2187_v42 }
 0x965   :  { %v2074_v39 = vpop.permute.xlu2 %2073 }
 0x966   :  { %v2087_v47 = vsel %vm1288_vm6, %v2085_v33, %v2074_v39 }
 0x967   :  { %4928 = vmatmul.msk.f32.gmra.mxu1 %vm261_vm0, %v2087_v47 }
 0x968   :  { %v5322_v51 = vpop.eup %5321 }
 0x969   :  { %v2201_v6 = vmul.f32 %v5322_v51, %v2187_v42  ;;  %vm2207_vm10 = vweird.f32 %v5322_v51 }
 0x96a   :  { %vm2208_vm12 = vmor %vm2206_vm11, %vm2207_vm10 }
 0x96b   :  { %v2202_v23 = vmul.f32 %v5322_v51, %v2201_v6  ;;  %v6730_v6 = vld [vmem:[#allocation10] ss:$0 sm:$0xff] }
 0x96d   :  { %v2203_v11 = vmul.f32 0.5, %v2202_v23 }
 0x96f   :  { %v2204_v29 = vsub.f32 1.5, %v2203_v11 }
 0x971   :  { %v2205_v15 = vmul.f32 %v5322_v51, %v2204_v29 }
 0x973   :  { %v2209_v21 = vsel %vm2208_vm12, %v5322_v51, %v2205_v15 }
 0x974   :  { %v2231_v22 = vmul.f32 %v2209_v21, %v6633_v3 }
 0x975   :  { %v2076_v35 = vpop.permute.xlu0 %2075 }
 0x976   :  { %v2238_v19 = vmul.f32 %v6655_v38, %v2231_v22 }
 0x978   :  { %v2245_v28 = vadd.f32 %v6658_v36, %v2238_v19 }
 0x979   :  { %v2068_v20 = vpop.permute.xlu1 %2067 }
 0x97a   :  { %v2086_v3 = vsel %vm1285_vm5, %v2084_v32, %v2068_v20  ;;  %4931 = vmatmul.msk.f32.gmra.mxu2 %vm261_vm0, %v2245_v28  ;;  %4935 = vmatmul.msk.f32.gmra.mxu3 %vm261_vm0, %v2245_v28 }
 0x97b   :  { %v2088_v1 = vsel %vm1288_vm6, %v2086_v3, %v2076_v35 }
 0x97c   :  { %4929 = vmatmul.msk.f32.gmra.mxu1 %vm261_vm0, %v2088_v1 }
 0x9c5   :  { %v2295_v12 = vpop.f32.mrf.mxu2  ;;  %v2324_v46 = vpop.f32.mrf.mxu3 }
 0x9c6   :  { %v2296_v53 = vadd.f32 %v2295_v12, %v6710_v43  ;;  %v2325_v34 = vadd.f32 %v2324_v46, %v6712_v30 }
 0x9c8   :  { %v2336_v5 = vmax.f32 %v2296_v53, 0.0  ;;  %v2337_v40 = vmax.f32 %v2325_v34, 0.0 }
 0x9ca   :  { %2397 = vmatmul.f32.vlgmr.msra.gmra.mxu0 %v2336_v5  ;;  %4938 = vmatmul.msk.f32.vlgmr.msrb.gmra.mxu1 %vm2368_vm13, %v2337_v40 }
 0x9e4   :  { %v2134_v10 = vpop.f32.mrf.mxu1 }
 0x9e5   :  { %v2135_v42 = vadd.f32 %v6542_v26, %v2134_v10 }
 0x9e7   :  { %v6718_v50 = vadd.f32 %v5449_v31, %v2135_v42 }
 0x9e9   :  { %v2152_v56 = vsel %vm261_vm0, %v6718_v50, 0.0 }
 0x9ea   :  { %2153 = vadd.xlane.f32.xlu1 %v2152_v56 }
 0x9f9   :  { %v2137_v55 = vpop.f32.mrf.mxu1 }
 0x9fa   :  { %v2138_v41 = vadd.f32 %v6542_v26, %v2137_v55 }
 0x9fc   :  { %v6723_v45 = vadd.f32 %v5450_v59, %v2138_v41 }
 0x9fd   :  { %v2298_v60 = vpop.f32.mrf.mxu2  ;;  %v2327_v33 = vpop.f32.mrf.mxu3 }
 0x9fe   :  { %v2299_v39 = vadd.f32 %v2298_v60, %v6710_v43  ;;  %v2328_v2 = vadd.f32 %v2327_v33, %v6712_v30  ;;  %v2155_v47 = vsel %vm261_vm0, %v6723_v45, 0.0 }
 0x9ff   :  { %2156 = vadd.xlane.f32.xlu2 %v2155_v47 }
 0xa00   :  { %v2339_v54 = vmax.f32 %v2328_v2, 0.0  ;;  %v2338_v51 = vmax.f32 %v2299_v39, 0.0 }
 0xa02   :  { %2400 = vmatmul.f32.gmra.mxu0 %v2338_v51  ;;  %4939 = vmatmul.msk.f32.gmra.mxu1 %vm2368_vm13, %v2339_v54 }
 0xa47   :  { %v2398_v24 = vpop.f32.mrf.mxu0  ;;  %v2427_v26 = vpop.f32.mrf.mxu1 }
 0xa48   :  { %v2428_v4 = vadd.f32 %v2427_v26, %v2398_v24 }
 0xa4a   :  { %v2439_v8 = vadd.f32 %v2428_v4, %v6549_v52 }
 0xa4c   :  { %v6734_v23 = vadd.f32 %v6730_v6, %v2439_v8 }
 0xa4e   :  { %v2453_v37 = vsel %vm261_vm0, %v6734_v23, 0.0 }
 0xa4f   :  { %2454 = vadd.xlane.f32.xlu2 %v2453_v37  ;;  %v2560_v37 = vld [vmem:[%s7782_s8 + $0x28] sm:$0xff] }
 0xa50   :  { %2583 = vmatpush.msrb.mxu2 %v2560_v37 }
 0xa5d   :  { %v2154_v11 = vpop.xlane.xlu1 %2153 }
 0xa5e   :  { %v2160_v17 = vmul.f32 %v2154_v11, %v5944_v14  ;;  %v2607_v11 = vld [vmem:[%s7783_s19 + $0x28] sm:$0xff] }
 0xa5f   :  { %2618 = vmatpush.msra.mxu3 %v2607_v11 }
 0xa60   :  { %v2164_v29 = vsub.f32 %v6718_v50, %v2160_v17  ;;  %v2559_v17 = vld [vmem:[%s7782_s8 + $0x20] sm:$0xff] }
 0xa61   :  { %2584 = vmatpush.msrb.mxu2 %v2559_v17 }
 0xa62   :  { %v2168_v48 = vmul.f32 %v2164_v29, %v2164_v29 }
 0xa64   :  { %v2176_v13 = vsel %vm261_vm0, %v2168_v48, 0.0  ;;  %v2605_v48 = vld [vmem:[%s7783_s19 + $0x18] sm:$0xff] }
 0xa65   :  { %2177 = vadd.xlane.f32.xlu0 %v2176_v13  ;;  %v2604_v13 = vld [vmem:[%s7783_s19 + $0x10] sm:$0xff] }
 0xa72   :  { %v2157_v15 = vpop.xlane.xlu2 %2156 }
 0xa73   :  { %v2161_v16 = vmul.f32 %v2157_v15, %v5944_v14  ;;  %v2556_v15 = vld [vmem:[%s7782_s8 + $0x8] sm:$0xff] }
 0xa75   :  { %v2165_v52 = vsub.f32 %v6723_v45, %v2161_v16  ;;  %v2603_v16 = vld [vmem:[%s7783_s19 + $0x8] sm:$0xff] }
 0xa77   :  { %v2169_v18 = vmul.f32 %v2165_v52, %v2165_v52 }
 0xa79   :  { %v2179_v21 = vsel %vm261_vm0, %v2169_v18, 0.0  ;;  %v2602_v18 = vld [vmem:[%s7783_s19] sm:$0xff] }
 0xa7a   :  { %2180 = vadd.xlane.f32.xlu1 %v2179_v21 }
 0xa7f   :  { %v2401_v22 = vpop.f32.mrf.mxu0  ;;  %v2430_v25 = vpop.f32.mrf.mxu1 }
 0xa80   :  { %v2431_v27 = vadd.f32 %v2430_v25, %v2401_v22 }
 0xa82   :  { %v2440_v19 = vadd.f32 %v2431_v27, %v6599_v44 }
 0xa84   :  { %v6746_v28 = vadd.f32 %v6730_v6, %v2440_v19 }
 0xa86   :  { %v2456_v32 = vsel %vm261_vm0, %v6746_v28, 0.0 }
 0xa87   :  { %2457 = vadd.xlane.f32.xlu0 %v2456_v32 }
 0xac2   :  { %v2455_v20 = vpop.xlane.xlu2 %2454 }
 0xac3   :  { %v2465_v35 = vmul.f32 %v2455_v20, %v5944_v14 }
 0xac5   :  { %v6752_v3 = vsub.f32 %v6734_v23, %v2465_v35 }
 0xac7   :  { %v2473_v1 = vmul.f32 %v6752_v3, %v6752_v3 }
 0xac9   :  { %v2477_v61 = vsel %vm261_vm0, %v2473_v1, 0.0 }
 0xaca   :  { %2478 = vadd.xlane.f32.xlu1 %v2477_v61  ;;  %v6788_v61 = vld [vmem:[%s7784_s7] ss:$0 sm:$0xff] }
 0xad8   :  { %v2178_v44 = vpop.xlane.xlu0 %2177 }
 0xad9   :  { %v2184_v49 = vmul.f32 %v2178_v44, %v5944_v14 }
 0xadb   :  { %v2188_v62 = vadd.f32 1e-05, %v2184_v49 }
 0xadd   :  { %5323 = vrsqrt.f32 %v2188_v62  ;;  %vm2216_vm7 = vweird.f32 %v2188_v62 }
 0xae3   :  { %v5324_v0 = vpop.eup %5323 }
 0xae4   :  { %v2211_v7 = vmul.f32 %v5324_v0, %v2188_v62  ;;  %vm2217_vm3 = vweird.f32 %v5324_v0  ;;  %v6792_v62 = vld [vmem:[%s7785_s12] ss:$0 sm:$0xff] }
 0xae5   :  { %vm2218_vm8 = vmor %vm2216_vm7, %vm2217_vm3 }
 0xae6   :  { %v2212_v58 = vmul.f32 %v5324_v0, %v2211_v7 }
 0xae8   :  { %v2213_v9 = vmul.f32 0.5, %v2212_v58  ;;  %v2642_v58 = vld [vmem:[#allocation11 + $0x28] sm:$0xff] }
 0xae9   :  { %2653 = vmatpush.msrb.mxu0 %v2642_v58 }
 0xaea   :  { %v2214_v12 = vsub.f32 1.5, %v2213_v9  ;;  %v2641_v9 = vld [vmem:[#allocation11 + $0x20] sm:$0xff] }
 0xaeb   :  { %2654 = vmatpush.msrb.mxu0 %v2641_v9 }
 0xaec   :  { %v2215_v46 = vmul.f32 %v5324_v0, %v2214_v12  ;;  %v2640_v12 = vld [vmem:[#allocation11 + $0x18] sm:$0xff] }
 0xaed   :  { %v2181_v53 = vpop.xlane.xlu1 %2180  ;;  %2655 = vmatpush.msrb.mxu0 %v2640_v12 }
 0xaee   :  { %v2185_v34 = vmul.f32 %v2181_v53, %v5944_v14  ;;  %v2219_v5 = vsel %vm2218_vm8, %v5324_v0, %v2215_v46  ;;  %v2639_v46 = vld [vmem:[#allocation11 + $0x10] sm:$0xff] }
 0xaef   :  { %v2232_v40 = vmul.f32 %v2219_v5, %v2164_v29  ;;  %v2606_v29 = vld [vmem:[%s7783_s19 + $0x20] sm:$0xff]  ;;  %2656 = vmatpush.msrb.mxu0 %v2639_v46 }
 0xaf0   :  { %v2189_v10 = vadd.f32 1e-05, %v2185_v34  ;;  %2619 = vmatpush.msra.mxu3 %v2606_v29  ;;  %v2638_v34 = vld [vmem:[#allocation11 + $0x8] sm:$0xff] }
 0xaf1   :  { %v2239_v42 = vmul.f32 %v6655_v38, %v2232_v40  ;;  %2657 = vmatpush.msrb.mxu0 %v2638_v34 }
 0xaf2   :  { %5325 = vrsqrt.f32 %v2189_v10  ;;  %vm2226_vm10 = vweird.f32 %v2189_v10  ;;  %2620 = vmatpush.msra.mxu3 %v2605_v48 }
 0xaf3   :  { %v2246_v31 = vadd.f32 %v6658_v36, %v2239_v42  ;;  %v2637_v42 = vld [vmem:[#allocation11] sm:$0xff] }
 0xaf4   :  { %2621 = vmatpush.msra.mxu3 %v2604_v13  ;;  %2658 = vmatpush.msrb.mxu0 %v2637_v42 }
 0xaf5   :  { %4932 = vmatmul.msk.f32.gmra.mxu2 %vm261_vm0, %v2246_v31  ;;  %4936 = vmatmul.msk.f32.gmra.mxu3 %vm261_vm0, %v2246_v31 }
 0xaf6   :  { %2622 = vmatpush.msra.mxu3 %v2603_v16 }
 0xaf8   :  { %v5326_v56 = vpop.eup %5325  ;;  %2623 = vmatpush.msra.mxu3 %v2602_v18 }
 0xaf9   :  { %v2221_v55 = vmul.f32 %v5326_v56, %v2189_v10  ;;  %vm2227_vm9 = vweird.f32 %v5326_v56 }
 0xafa   :  { %v2458_v41 = vpop.xlane.xlu0 %2457  ;;  %vm2228_vm11 = vmor %vm2226_vm10, %vm2227_vm9 }
 0xafb   :  { %v2222_v59 = vmul.f32 %v5326_v56, %v2221_v55  ;;  %v2466_v60 = vmul.f32 %v2458_v41, %v5944_v14 }
 0xafd   :  { %v2223_v33 = vmul.f32 0.5, %v2222_v59  ;;  %v6765_v39 = vsub.f32 %v6746_v28, %v2466_v60 }
 0xaff   :  { %v2224_v2 = vsub.f32 1.5, %v2223_v33  ;;  %v2474_v47 = vmul.f32 %v6765_v39, %v6765_v39 }
 0xb01   :  { %v2225_v54 = vmul.f32 %v5326_v56, %v2224_v2  ;;  %v2480_v51 = vsel %vm261_vm0, %v2474_v47, 0.0 }
 0xb02   :  { %2481 = vadd.xlane.f32.xlu2 %v2480_v51 }
 0xb03   :  { %v2229_v24 = vsel %vm2228_vm11, %v5326_v56, %v2225_v54 }
 0xb04   :  { %v2233_v26 = vmul.f32 %v2229_v24, %v2165_v52  ;;  %v2555_v52 = vld [vmem:[%s7782_s8] sm:$0xff] }
 0xb06   :  { %v2240_v4 = vmul.f32 %v6655_v38, %v2233_v26  ;;  %v2558_v38 = vld [vmem:[%s7782_s8 + $0x18] sm:$0xff] }
 0xb07   :  { %2585 = vmatpush.msrb.mxu2 %v2558_v38 }
 0xb08   :  { %v2247_v8 = vadd.f32 %v6658_v36, %v2240_v4  ;;  %v2557_v36 = vld [vmem:[%s7782_s8 + $0x10] sm:$0xff] }
 0xb09   :  { %2586 = vmatpush.msrb.mxu2 %v2557_v36 }
 0xb0a   :  { %4933 = vmatmul.msk.f32.gmra.mxu2 %vm261_vm0, %v2247_v8  ;;  %4937 = vmatmul.msk.f32.gmra.mxu3 %vm261_vm0, %v2247_v8 }
 0xb0b   :  { %2587 = vmatpush.msrb.mxu2 %v2556_v15 }
 0xb0d   :  { %2588 = vmatpush.msrb.mxu2 %v2555_v52 }
 0xb3d   :  { %v2479_v21 = vpop.xlane.xlu1 %2478 }
 0xb3e   :  { %v2489_v22 = vmul.f32 %v2479_v21, %v5944_v14 }
 0xb40   :  { %v2493_v25 = vadd.f32 1e-05, %v2489_v22 }
 0xb42   :  { %5327 = vrsqrt.f32 %v2493_v25  ;;  %vm2503_vm3 = vweird.f32 %v2493_v25 }
 0xb48   :  { %v5328_v27 = vpop.eup %5327 }
 0xb49   :  { %v2498_v19 = vmul.f32 %v5328_v27, %v2493_v25  ;;  %vm2504_vm12 = vweird.f32 %v5328_v27 }
 0xb4a   :  { %vm2505_vm7 = vmor %vm2503_vm3, %vm2504_vm12 }
 0xb4b   :  { %v2499_v32 = vmul.f32 %v5328_v27, %v2498_v19 }
 0xb4d   :  { %v2500_v20 = vmul.f32 0.5, %v2499_v32 }
 0xb4f   :  { %v2501_v35 = vsub.f32 1.5, %v2500_v20 }
 0xb51   :  { %v2502_v1 = vmul.f32 %v5328_v27, %v2501_v35 }
 0xb53   :  { %v2506_v44 = vsel %vm2505_vm7, %v5328_v27, %v2502_v1 }
 0xb54   :  { %v2537_v49 = vmul.f32 %v2506_v44, %v6752_v3 }
 0xb56   :  { %v2544_v0 = vmul.f32 %v6788_v61, %v2537_v49 }
 0xb58   :  { %v2551_v7 = vadd.f32 %v6792_v62, %v2544_v0 }
 0xb5a   :  { %4942 = vmatmul.msk.f32.vlgmr.msrb.gmra.mxu2 %vm261_vm0, %v2551_v7  ;;  %4946 = vmatmul.msk.f32.vlgmr.msra.gmra.mxu3 %vm261_vm0, %v2551_v7 }
 0xb75   :  { %v2482_v53 = vpop.xlane.xlu2 %2481 }
 0xb76   :  { %v2490_v3 = vmul.f32 %v2482_v53, %v5944_v14 }
 0xb78   :  { %v2494_v5 = vadd.f32 1e-05, %v2490_v3  ;;  %v2301_v40 = vpop.f32.mrf.mxu2  ;;  %v2330_v10 = vpop.f32.mrf.mxu3 }
 0xb79   :  { %v2302_v31 = vadd.f32 %v2301_v40, %v6710_v43  ;;  %v2331_v56 = vadd.f32 %v2330_v10, %v6712_v30 }
 0xb7a   :  { %5329 = vrsqrt.f32 %v2494_v5  ;;  %vm2513_vm9 = vweird.f32 %v2494_v5 }
 0xb7b   :  { %v2341_v55 = vmax.f32 %v2331_v56, 0.0  ;;  %v2340_v41 = vmax.f32 %v2302_v31, 0.0 }
 0xb7d   :  { %2403 = vmatmul.f32.gmra.mxu0 %v2340_v41  ;;  %4940 = vmatmul.msk.f32.gmra.mxu1 %vm2368_vm13, %v2341_v55 }
 0xb80   :  { %v5330_v59 = vpop.eup %5329 }
 0xb81   :  { %v2508_v60 = vmul.f32 %v5330_v59, %v2494_v5  ;;  %vm2514_vm8 = vweird.f32 %v5330_v59 }
 0xb82   :  { %vm2515_vm10 = vmor %vm2513_vm9, %vm2514_vm8 }
 0xb83   :  { %v2509_v33 = vmul.f32 %v5330_v59, %v2508_v60 }
 0xb85   :  { %v2510_v2 = vmul.f32 0.5, %v2509_v33 }
 0xb87   :  { %v2511_v47 = vsub.f32 1.5, %v2510_v2 }
 0xb89   :  { %v2512_v54 = vmul.f32 %v5330_v59, %v2511_v47 }
 0xb8b   :  { %v2516_v51 = vsel %vm2515_vm10, %v5330_v59, %v2512_v54 }
 0xb8c   :  { %v2538_v24 = vmul.f32 %v2516_v51, %v6765_v39 }
 0xb8d   :  { %v2304_v26 = vpop.f32.mrf.mxu2  ;;  %v2333_v4 = vpop.f32.mrf.mxu3 }
 0xb8e   :  { %v2305_v8 = vadd.f32 %v2304_v26, %v6710_v43  ;;  %v2334_v37 = vadd.f32 %v2333_v4, %v6712_v30  ;;  %v2545_v11 = vmul.f32 %v6788_v61, %v2538_v24 }
 0xb90   :  { %v2343_v17 = vmax.f32 %v2334_v37, 0.0  ;;  %v2342_v29 = vmax.f32 %v2305_v8, 0.0  ;;  %v2552_v38 = vadd.f32 %v6792_v62, %v2545_v11 }
 0xb92   :  { %2406 = vmatmul.f32.gmra.mxu0 %v2342_v29  ;;  %4941 = vmatmul.msk.f32.gmra.mxu1 %vm2368_vm13, %v2343_v17 }
 0xb93   :  { %4943 = vmatmul.msk.f32.gmra.mxu2 %vm261_vm0, %v2552_v38  ;;  %4947 = vmatmul.msk.f32.gmra.mxu3 %vm261_vm0, %v2552_v38 }
 0xb9a   :  { %4950 = vmatmul.msk.f32.vlgmr.msrb.gmra.mxu0 %vm261_vm0, %v2551_v7 }
 0xba2   :  { %4951 = vmatmul.msk.f32.gmra.mxu0 %vm261_vm0, %v2552_v38 }
 0xbdd   :  { %v2625_v15 = vpop.f32.mrf.mxu3  ;;  %v2590_v19 = vpop.f32.mrf.mxu2 }
 0xbfa   :  { %v2404_v43 = vpop.f32.mrf.mxu0  ;;  %v2433_v39 = vpop.f32.mrf.mxu1 }
 0xbfb   :  { %v2434_v30 = vadd.f32 %v2433_v39, %v2404_v43 }
 0xbfd   :  { %v2441_v48 = vadd.f32 %v2434_v30, %v6718_v50 }
 0xbff   :  { %v6814_v36 = vadd.f32 %v6730_v6, %v2441_v48 }
 0xc01   :  { %v2459_v13 = vsel %vm261_vm0, %v6814_v36, 0.0 }
 0xc02   :  { %2460 = vadd.xlane.f32.xlu0 %v2459_v13 }
 0xc0f   :  { %v2407_v16 = vpop.f32.mrf.mxu0  ;;  %v2436_v52 = vpop.f32.mrf.mxu1 }
 0xc10   :  { %v2437_v18 = vadd.f32 %v2436_v52, %v2407_v16 }
 0xc12   :  { %v2442_v21 = vadd.f32 %v2437_v18, %v6723_v45 }
 0xc14   :  { %v6820_v22 = vadd.f32 %v6730_v6, %v2442_v21 }
 0xc16   :  { %v2628_v25 = vpop.f32.mrf.mxu3  ;;  %v2462_v50 = vsel %vm261_vm0, %v6820_v22, 0.0  ;;  %v2593_v45 = vpop.f32.mrf.mxu2 }
 0xc17   :  { %4954 = vmatpush.xpose.msk.msra.mxu1 %vm488_vm14, %v2628_v25  ;;  %v6825_v27 = vpop.f32.mrf.mxu0  ;;  %2463 = vadd.xlane.f32.xlu1 %v2462_v50 }
 0xc1b   :  { %4955 = vmatpush.xpose.msk.msra.mxu1 %vm488_vm14, %v2625_v15 }
 0xc1e   :  { %4956 = vmatmul.msk.f32.vlgmr.msra.gmra.mxu1 %vm488_vm14, %v2590_v19 }
 0xc1f   :  { %v6829_v32 = vpop.f32.mrf.mxu0 }
 0xc20   :  { %2779 = vmatpush.msra.mxu2 %v6829_v32 }
 0xc22   :  { %2780 = vmatpush.msra.mxu2 %v6825_v27 }
 0xc26   :  { %4957 = vmatmul.msk.f32.gmra.mxu1 %vm488_vm14, %v2593_v45 }
 0xc30   :  { %2788 = vrot.lane.b32.xlu1 %v2590_v19, %s5721_s17 }
 0xc38   :  { %2790 = vrot.lane.b32.xlu1 %v2593_v45, %s5721_s17 }
 0xc40   :  { %2918 = vrot.lane.b32.xlu1 %v2593_v45, %s5723_s25 }
 0xc75   :  { %v2461_v6 = vpop.xlane.xlu0 %2460 }
 0xc76   :  { %v2467_v20 = vmul.f32 %v2461_v6, %v5944_v14 }
 0xc78   :  { %v2471_v35 = vsub.f32 %v6814_v36, %v2467_v20 }
 0xc7a   :  { %v2475_v1 = vmul.f32 %v2471_v35, %v2471_v35 }
 0xc7c   :  { %v2483_v44 = vsel %vm261_vm0, %v2475_v1, 0.0 }
 0xc7d   :  { %2484 = vadd.xlane.f32.xlu2 %v2483_v44 }
 0xc8a   :  { %v2464_v49 = vpop.xlane.xlu1 %2463 }
 0xc8b   :  { %v2468_v0 = vmul.f32 %v2464_v49, %v5944_v14 }
 0xc8d   :  { %v6842_v7 = vsub.f32 %v6820_v22, %v2468_v0 }
 0xc8f   :  { %v2476_v58 = vmul.f32 %v6842_v7, %v6842_v7 }
 0xc91   :  { %v2486_v9 = vsel %vm261_vm0, %v2476_v58, 0.0 }
 0xc92   :  { %2487 = vadd.xlane.f32.xlu0 %v2486_v9 }
 0xc95   :  { %2920 = vrot.lane.b32.xlu2 %v2625_v15, %s5723_s25 }
 0xc9b   :  { %v2701_v12 = vpop.f32.mrf.mxu1 }
 0xc9c   :  { %v2707_v46 = vmul.f32 0.14433756, %v2701_v12 }
 0xc9d   :  { %2794 = vrot.lane.b32.xlu2 %v2628_v25, %s5721_s17 }
 0xc9e   :  { %v6851_v53 = vsel %vm6037_vm15, %v2707_v46, -1e+30 }
 0xc9f   :  { %v2711_v3 = vsel %vm528_vm1, %v6851_v53, -inf }
 0xca0   :  { %2712 = vmax.xlane.f32.xlu1 %v2711_v3 }
 0xca2   :  { %v2789_v30 = vpop.permute.xlu1 %2788 }
 0xca3   :  { %v2704_v34 = vpop.f32.mrf.mxu1 }
 0xca4   :  { %v2708_v5 = vmul.f32 0.14433756, %v2704_v34 }
 0xca5   :  { %3048 = vrot.lane.b32.xlu2 %v2628_v25, %s5722_s21 }
 0xca6   :  { %2792 = vrot.lane.b32.xlu0 %v2625_v15, %s5721_s17  ;;  %v6866_v40 = vsel %vm6044_vm2, %v2708_v5, -1e+30 }
 0xca7   :  { %v2714_v10 = vsel %vm528_vm1, %v6866_v40, -inf }
 0xcaa   :  { %v2791_v21 = vpop.permute.xlu1 %2790 }
 0xcae   :  { %2916 = vrot.lane.b32.xlu0 %v2590_v19, %s5723_s25 }
 0xcb6   :  { %2922 = vrot.lane.b32.xlu0 %v2628_v25, %s5723_s25 }
 0xcb9   :  { %3042 = vrot.lane.b32.xlu1 %v2590_v19, %s5722_s21 }
 0xcbe   :  { %3174 = vrot.lane.b32.xlu0 %v2628_v25, %s5725_s5 }
 0xcc1   :  { %3044 = vrot.lane.b32.xlu1 %v2593_v45, %s5722_s21 }
 0xcc6   :  { %3172 = vrot.lane.b32.xlu0 %v2625_v15, %s5725_s5 }
 0xcc9   :  { %3298 = vrot.lane.b32.xlu1 %v2625_v15, %s5724_s4 }
 0xcce   :  { %2715 = vmax.xlane.f32.xlu2 %v2714_v10  ;;  %3300 = vrot.lane.b32.xlu0 %v2628_v25, %s5724_s4 }
 0xcd6   :  { %3294 = vrot.lane.b32.xlu0 %v2590_v19, %s5724_s4 }
 0xce6   :  { %3046 = vrot.lane.b32.xlu2 %v2625_v15, %s5722_s21 }
 0xcee   :  { %3168 = vrot.lane.b32.xlu2 %v2590_v19, %s5725_s5 }
 0xcf0   :  { %v2485_v42 = vpop.xlane.xlu2 %2484 }
 0xcf1   :  { %v2491_v31 = vmul.f32 %v2485_v42, %v5944_v14 }
 0xcf3   :  { %v2495_v56 = vadd.f32 1e-05, %v2491_v31 }
 0xcf5   :  { %5331 = vrsqrt.f32 %v2495_v56  ;;  %vm2523_vm12 = vweird.f32 %v2495_v56 }
 0xcf6   :  { %3170 = vrot.lane.b32.xlu2 %v2593_v45, %s5725_s5 }
 0xcf8   :  { %v2921_v55 = vpop.permute.xlu2 %2920 }
 0xcfb   :  { %v5332_v41 = vpop.eup %5331 }
 0xcfc   :  { %v2518_v59 = vmul.f32 %v5332_v41, %v2495_v56  ;;  %vm2524_vm11 = vweird.f32 %v5332_v41 }
 0xcfd   :  { %vm2525_vm3 = vmor %vm2523_vm12, %vm2524_vm11 }
 0xcfe   :  { %v2519_v60 = vmul.f32 %v5332_v41, %v2518_v59  ;;  %3296 = vrot.lane.b32.xlu2 %v2593_v45, %s5724_s4  ;;  %v6895_v45 = vpop.permute.xlu1 %2918 }
 0xd00   :  { %v2520_v33 = vmul.f32 0.5, %v2519_v60  ;;  %v2795_v2 = vpop.permute.xlu2 %2794 }
 0xd01   :  { %4960 = vmatpush.xpose.msk.msrb.mxu3 %vm488_vm14, %v2795_v2 }
 0xd02   :  { %v2521_v47 = vsub.f32 1.5, %v2520_v33 }
 0xd04   :  { %v2522_v54 = vmul.f32 %v5332_v41, %v2521_v47 }
 0xd05   :  { %v2488_v51 = vpop.xlane.xlu0 %2487 }
 0xd06   :  { %v2526_v24 = vsel %vm2525_vm3, %v5332_v41, %v2522_v54  ;;  %v2492_v26 = vmul.f32 %v2488_v51, %v5944_v14 }
 0xd07   :  { %v2539_v4 = vmul.f32 %v2526_v24, %v2471_v35 }
 0xd08   :  { %v2496_v8 = vadd.f32 1e-05, %v2492_v26  ;;  %v3049_v37 = vpop.permute.xlu2 %3048 }
 0xd09   :  { %4972 = vmatpush.xpose.msk.msra.mxu0 %vm488_vm14, %v3049_v37  ;;  %v2546_v11 = vmul.f32 %v6788_v61, %v2539_v4 }
 0xd0a   :  { %5333 = vrsqrt.f32 %v2496_v8  ;;  %vm2533_vm8 = vweird.f32 %v2496_v8 }
 0xd0b   :  { %v2553_v17 = vadd.f32 %v6792_v62, %v2546_v11 }
 0xd0d   :  { %4944 = vmatmul.msk.f32.gmra.mxu2 %vm261_vm0, %v2553_v17  ;;  %4948 = vmatmul.msk.f32.gmra.mxu3 %vm261_vm0, %v2553_v17 }
 0xd0e   :  { %4952 = vmatmul.msk.f32.gmra.mxu0 %vm261_vm0, %v2553_v17 }
 0xd10   :  { %v5334_v29 = vpop.eup %5333 }
 0xd11   :  { %v2528_v38 = vmul.f32 %v5334_v29, %v2496_v8  ;;  %vm2534_vm7 = vweird.f32 %v5334_v29  ;;  %v6985_v8 = vpack.i.bf16 %v6825_v27, %v6829_v32 }
 0xd12   :  { %vm2535_vm9 = vmor %vm2533_vm8, %vm2534_vm7 }
 0xd13   :  { %v2529_v43 = vmul.f32 %v5334_v29, %v2528_v38 }
 0xd15   :  { %v2530_v39 = vmul.f32 0.5, %v2529_v43 }
 0xd17   :  { %v2531_v48 = vsub.f32 1.5, %v2530_v39 }
 0xd18   :  { %v2793_v13 = vpop.permute.xlu0 %2792 }
 0xd19   :  { %v2532_v15 = vmul.f32 %v5334_v29, %v2531_v48  ;;  %4961 = vmatpush.xpose.msk.msrb.mxu3 %vm488_vm14, %v2793_v13 }
 0xd1b   :  { %v2536_v16 = vsel %vm2535_vm9, %v5334_v29, %v2532_v15 }
 0xd1c   :  { %v2540_v52 = vmul.f32 %v2536_v16, %v6842_v7 }
 0xd1e   :  { %v2547_v18 = vmul.f32 %v6788_v61, %v2540_v52  ;;  %v2713_v61 = vpop.xlane.xlu1 %2712 }
 0xd1f   :  { %v2717_v10 = vsub.f32 %v6851_v53, %v2713_v61 }
 0xd20   :  { %v6888_v25 = vpop.permute.xlu0 %2916  ;;  %v2554_v50 = vadd.f32 %v6792_v62, %v2547_v18 }
 0xd21   :  { %v2719_v42 = vmul.f32 1.442695, %v2717_v10 }
 0xd22   :  { %4945 = vmatmul.msk.f32.gmra.mxu2 %vm261_vm0, %v2554_v50  ;;  %4949 = vmatmul.msk.f32.gmra.mxu3 %vm261_vm0, %v2554_v50 }
 0xd23   :  { %4953 = vmatmul.msk.f32.gmra.mxu0 %vm261_vm0, %v2554_v50  ;;  %5335 = vpow2.f32 %v2719_v42 }
 0xd28   :  { %v2923_v19 = vpop.permute.xlu0 %2922 }
 0xd29   :  { %4966 = vmatpush.xpose.msk.msrb.mxu2 %vm488_vm14, %v2923_v19  ;;  %v6950_v31 = vpop.eup %5335 }
 0xd2a   :  { %4962 = vmatmul.msk.f32.vlgmr.msrb.gmra.mxu3 %vm488_vm14, %v2789_v30 }
 0xd2b   :  { %v3043_v62 = vpop.permute.xlu1 %3042 }
 0xd2d   :  { %4967 = vmatpush.xpose.msk.msrb.mxu2 %vm488_vm14, %v2921_v55  ;;  %v2723_v55 = vsel %vm528_vm1, %v6950_v31, 0.0 }
 0xd30   :  { %v6900_v6 = vpop.permute.xlu0 %3174 }
 0xd32   :  { %4963 = vmatmul.msk.f32.gmra.mxu3 %vm488_vm14, %v2791_v21 }
 0xd33   :  { %v3045_v1 = vpop.permute.xlu1 %3044 }
 0xd38   :  { %v6902_v20 = vpop.permute.xlu0 %3172 }
 0xd3b   :  { %v3299_v0 = vpop.permute.xlu1 %3298 }
 0xd40   :  { %v3301_v49 = vpop.permute.xlu0 %3300 }
 0xd41   :  { %v2716_v35 = vpop.xlane.xlu2 %2715 }
 0xd42   :  { %v2718_v60 = vsub.f32 %v6866_v40, %v2716_v35 }
 0xd44   :  { %v2721_v53 = vmul.f32 1.442695, %v2718_v60 }
 0xd46   :  { %5337 = vpow2.f32 %v2721_v53 }
 0xd48   :  { %v3295_v9 = vpop.permute.xlu0 %3294 }
 0xd49   :  { %v3047_v44 = vpop.permute.xlu2 %3046 }
 0xd4a   :  { %4973 = vmatpush.xpose.msk.msra.mxu0 %vm488_vm14, %v3047_v44 }
 0xd4c   :  { %v6965_v24 = vpop.eup %5337 }
 0xd4d   :  { %4974 = vmatmul.msk.f32.vlgmr.msra.gmra.mxu0 %vm488_vm14, %v3043_v62  ;;  %v2726_v4 = vsel %vm528_vm1, %v6965_v24, 0.0 }
 0xd4e   :  { %4984 = vmatpush.xpose.msk.msrb.mxu0 %vm488_vm14, %v3301_v49 }
 0xd51   :  { %v6908_v7 = vpop.permute.xlu2 %3168 }
 0xd52   :  { %4985 = vmatpush.xpose.msk.msrb.mxu0 %vm488_vm14, %v3299_v0 }
 0xd55   :  { %4975 = vmatmul.msk.f32.gmra.mxu0 %vm488_vm14, %v3045_v1 }
 0xd59   :  { %v6911_v58 = vpop.permute.xlu2 %3170 }
 0xd5d   :  { %4986 = vmatmul.msk.f32.vlgmr.msrb.gmra.mxu0 %vm488_vm14, %v3295_v9 }
 0xd61   :  { %v3297_v12 = vpop.permute.xlu2 %3296 }
 0xd65   :  { %4987 = vmatmul.msk.f32.gmra.mxu0 %vm488_vm14, %v3297_v12 }
 0xd8b   :  { %v6952_v56 = vpop.f32.mrf.mxu0 }
 0xd90   :  { %v6915_v46 = vpop.f32.mrf.mxu3  ;;  %v6919_v3 = vpop.f32.mrf.mxu2 }
 0xd91   :  { %3590 = vrot.lane.b32.xlu2 %v6915_v46, %s5721_s17 }
 0xd99   :  { %3714 = vrot.lane.b32.xlu2 %v6919_v3, %s5723_s25 }
 0xda0   :  { %v6956_v41 = vpop.f32.mrf.mxu0 }
 0xda5   :  { %v6923_v34 = vpop.f32.mrf.mxu2  ;;  %v6925_v5 = vpop.f32.mrf.mxu3 }
 0xda6   :  { %3720 = vrot.lane.b32.xlu0 %v6925_v5, %s5723_s25  ;;  %3592 = vrot.lane.b32.xlu1 %v6925_v5, %s5721_s17 }
 0xda7   :  { %3716 = vrot.lane.b32.xlu2 %v6923_v34, %s5723_s25 }
 0xdad   :  { %v2821_v59 = vpop.f32.mrf.mxu3 }
 0xdae   :  { %3718 = vrot.lane.b32.xlu0 %v6915_v46, %s5723_s25  ;;  %3586 = vrot.lane.b32.xlu1 %v6919_v3, %s5721_s17  ;;  %v2827_v33 = vmul.f32 0.14433756, %v2821_v59 }
 0xdaf   :  { %3840 = vrot.lane.b32.xlu2 %v6919_v3, %s5722_s21 }
 0xdb0   :  { %v6961_v2 = vsel %vm6037_vm15, %v2827_v33, -1e+30 }
 0xdb1   :  { %v2831_v54 = vsel %vm528_vm1, %v6961_v2, -inf }
 0xdb5   :  { %v2824_v30 = vpop.f32.mrf.mxu3 }
 0xdb6   :  { %3588 = vrot.lane.b32.xlu1 %v6923_v34, %s5721_s17  ;;  %v2828_v15 = vmul.f32 0.14433756, %v2824_v30 }
 0xdb7   :  { %3842 = vrot.lane.b32.xlu2 %v6923_v34, %s5722_s21 }
 0xdb8   :  { %v7017_v21 = vsel %vm6044_vm2, %v2828_v15, -1e+30 }
 0xdb9   :  { %v2834_v61 = vsel %vm528_vm1, %v7017_v21, -inf }
 0xdbe   :  { %3972 = vrot.lane.b32.xlu1 %v6925_v5, %s5725_s5 }
 0xdbf   :  { %4096 = vrot.lane.b32.xlu2 %v6915_v46, %s5724_s4 }
 0xdc6   :  { %3970 = vrot.lane.b32.xlu1 %v6915_v46, %s5725_s5 }
 0xdca   :  { %v3075_v47 = vpop.f32.mrf.mxu0 }
 0xdcb   :  { %v3081_v51 = vmul.f32 0.14433756, %v3075_v47 }
 0xdcd   :  { %v6969_v26 = vsel %vm6037_vm15, %v3081_v51, -1e+30 }
 0xdce   :  { %v3085_v40 = vsel %vm528_vm1, %v6969_v26, -inf }
 0xdd2   :  { %v3078_v27 = vpop.f32.mrf.mxu0 }
 0xdd3   :  { %v3082_v43 = vmul.f32 0.14433756, %v3078_v27 }
 0xdd5   :  { %v7005_v13 = vsel %vm6044_vm2, %v3082_v43, -1e+30 }
 0xdd6   :  { %v3088_v18 = vsel %vm528_vm1, %v7005_v13, -inf }
 0xdd8   :  { %2724 = vadd.xlane.f32.xlu0 %v2723_v55 }
 0xdda   :  { %v3327_v17 = vpop.f32.mrf.mxu0 }
 0xddb   :  { %v3333_v62 = vmul.f32 0.14433756, %v3327_v17 }
 0xddd   :  { %v7027_v35 = vsel %vm6037_vm15, %v3333_v62, -1e+30 }
 0xdde   :  { %v3337_v44 = vsel %vm528_vm1, %v7027_v35, -inf }
 0xde2   :  { %v3330_v39 = vpop.f32.mrf.mxu0 }
 0xde3   :  { %v3334_v48 = vmul.f32 0.14433756, %v3330_v39 }
 0xde5   :  { %v7009_v16 = vsel %vm6044_vm2, %v3334_v48, -1e+30 }
 0xde6   :  { %v3340_v50 = vsel %vm528_vm1, %v7009_v16, -inf }
 0xde8   :  { %2832 = vmax.xlane.f32.xlu2 %v2831_v54 }
 0xdeb   :  { %v3591_v32 = vpop.permute.xlu2 %3590 }
 0xdec   :  { %3846 = vrot.lane.b32.xlu0 %v6925_v5, %s5722_s21 }
 0xdf0   :  { %3086 = vmax.xlane.f32.xlu2 %v3085_v40  ;;  %2727 = vadd.xlane.f32.xlu1 %v2726_v4 }
 0xdf3   :  { %v7001_v38 = vpop.permute.xlu2 %3714 }
 0xdf4   :  { %3844 = vrot.lane.b32.xlu0 %v6915_v46, %s5722_s21 }
 0xdfc   :  { %3966 = vrot.lane.b32.xlu0 %v6919_v3, %s5725_s5 }
 0xe01   :  { %v7011_v52 = vpop.permute.xlu2 %3716 }
 0xe04   :  { %3968 = vrot.lane.b32.xlu0 %v6923_v34, %s5725_s5 }
 0xe08   :  { %5149 = vrot.lane.b32.xlu2 %v6985_v8, %s5721_s17 }
 0xe09   :  { %4098 = vrot.lane.b32.xlu1 %v6925_v5, %s5724_s4  ;;  %v3841_v1 = vpop.permute.xlu2 %3840 }
 0xe0c   :  { %4094 = vrot.lane.b32.xlu0 %v6923_v34, %s5724_s4 }
 0xe10   :  { %5164 = vrot.lane.b32.xlu2 %v6985_v8, %s5725_s5 }
 0xe11   :  { %4092 = vrot.lane.b32.xlu1 %v6919_v3, %s5724_s4  ;;  %v3843_v0 = vpop.permute.xlu2 %3842 }
 0xe18   :  { %v3593_v37 = vpop.permute.xlu1 %3592  ;;  %v7021_v19 = vpop.permute.xlu0 %3720 }
 0xe19   :  { %4996 = vmatpush.xpose.msk.msra.mxu0 %vm488_vm14, %v3593_v37  ;;  %v4097_v42 = vpop.permute.xlu2 %4096 }
 0xe1d   :  { %4997 = vmatpush.xpose.msk.msra.mxu0 %vm488_vm14, %v3591_v32 }
 0xe20   :  { %v3587_v11 = vpop.permute.xlu1 %3586  ;;  %v7031_v49 = vpop.permute.xlu0 %3718 }
 0xe21   :  { %4998 = vmatmul.msk.f32.vlgmr.msra.gmra.mxu0 %vm488_vm14, %v3587_v11 }
 0xe28   :  { %v3589_v29 = vpop.permute.xlu1 %3588 }
 0xe29   :  { %4999 = vmatmul.msk.f32.gmra.mxu0 %vm488_vm14, %v3589_v29 }
 0xe30   :  { %v7035_v12 = vpop.permute.xlu1 %3972 }
 0xe36   :  { %3089 = vmax.xlane.f32.xlu0 %v3088_v18 }
 0xe38   :  { %v7039_v51 = vpop.permute.xlu1 %3970 }
 0xe39   :  { %3341 = vmax.xlane.f32.xlu2 %v3340_v50 }
 0xe3b   :  { %2835 = vmax.xlane.f32.xlu1 %v2834_v61 }
 0xe43   :  { %3338 = vmax.xlane.f32.xlu1 %v3337_v44 }
 0xe4a   :  { %5154 = vrot.lane.b32.xlu0 %v6985_v8, %s5723_s25 }
 0xe4b   :  { %v2725_v9 = vpop.xlane.xlu0 %2724 }
 0xe4c   :  { %5339 = vrcp.f32 %v2725_v9  ;;  %v2740_v60 = vand.u32 2147483648, %v2725_v9  ;;  %v2738_v53 = vand.u32 2147483647, %v2725_v9  ;;  %vm2734_vm11 = vweird.f32 %v2725_v9 }
 0xe4e   :  { %v2741_v54 = vor.u32 1.1754944e-38, %v2740_v60  ;;  %vm2739_vm3 = vcmp.eq.f32.partialorder %v2738_v53, 8.507059e+37 }
 0xe52   :  { %v5340_v10 = vpop.eup %5339  ;;  %5159 = vrot.lane.b32.xlu0 %v6985_v8, %s5722_s21 }
 0xe53   :  { %v2730_v55 = vmul.f32 %v5340_v10, %v2725_v9  ;;  %vm2735_vm10 = vweird.f32 %v5340_v10 }
 0xe54   :  { %vm2736_vm12 = vmor %vm2734_vm11, %vm2735_vm10 }
 0xe55   :  { %v2731_v59 = vsub.f32 1.0, %v2730_v55 }
 0xe57   :  { %v2732_v33 = vmul.f32 %v5340_v10, %v2731_v59 }
 0xe59   :  { %v2733_v47 = vadd.f32 %v5340_v10, %v2732_v33 }
 0xe5b   :  { %v2737_v40 = vsel %vm2736_vm12, %v5340_v10, %v2733_v47  ;;  %v2833_v4 = vpop.xlane.xlu2 %2832 }
 0xe5c   :  { %v2742_v37 = vsel %vm2739_vm3, %v2741_v54, %v2737_v40  ;;  %5169 = vrot.lane.b32.xlu1 %v6985_v8, %s5724_s4  ;;  %v2837_v62 = vsub.f32 %v6961_v2, %v2833_v4 }
 0xe5d   :  { %v2743_v27 = vmul.f32 %v6950_v31, %v2742_v37 }
 0xe5e   :  { %v3847_v32 = vpop.permute.xlu0 %3846  ;;  %v2839_v10 = vmul.f32 1.442695, %v2837_v62 }
 0xe5f   :  { %4958 = vmatmul.msk.f32.vlgmr.msra.gmra.mxu2 %vm528_vm1, %v2743_v27  ;;  %5008 = vmatpush.xpose.msk.msrb.mxu0 %vm488_vm14, %v3847_v32 }
 0xe60   :  { %4978 = vmatpush.xpose.msk.msra.mxu2 %vm488_vm14, %v6900_v6 }
 0xe63   :  { %v7048_v11 = vpop.xlane.xlu2 %3086  ;;  %v2728_v17 = vpop.xlane.xlu1 %2727 }
 0xe64   :  { %4979 = vmatpush.xpose.msk.msra.mxu2 %vm488_vm14, %v6902_v20  ;;  %5341 = vrcp.f32 %v2728_v17  ;;  %v2755_v48 = vand.u32 2147483648, %v2728_v17  ;;  %v2753_v18 = vand.u32 2147483647, %v2728_v17  ;;  %vm2749_vm8 = vweird.f32 %v2728_v17 }
 0xe65   :  { %5343 = vpow2.f32 %v2839_v10 }
 0xe66   :  { %v3845_v29 = vpop.permute.xlu0 %3844  ;;  %v2756_v50 = vor.u32 1.1754944e-38, %v2755_v48  ;;  %vm2754_vm10 = vcmp.eq.f32.partialorder %v2753_v18, 8.507059e+37 }
 0xe67   :  { %5009 = vmatpush.xpose.msk.msrb.mxu0 %vm488_vm14, %v3845_v29 }
 0xe6a   :  { %v5342_v8 = vpop.eup %5341  ;;  %5010 = vmatmul.msk.f32.vlgmr.msrb.gmra.mxu0 %vm488_vm14, %v3841_v1 }
 0xe6b   :  { %v2745_v31 = vmul.f32 %v5342_v8, %v2728_v17  ;;  %v5150_v43 = vpop.permute.xlu2 %5149  ;;  %vm2750_vm7 = vweird.f32 %v5342_v8 }
 0xe6c   :  { %v5151_v39 = vunpack.i.l.bf16 %v5150_v43  ;;  %v5152_v15 = vunpack.i.h.bf16 %v5150_v43  ;;  %vm2751_vm9 = vmor %vm2749_vm8, %vm2750_vm7 }
 0xe6d   :  { %v2746_v30 = vsub.f32 1.0, %v2745_v31 }
 0xe6e   :  { %2907 = vmatpush.msrb.mxu1 %v5151_v39  ;;  %v3967_v9 = vpop.permute.xlu0 %3966 }
 0xe6f   :  { %v2747_v6 = vmul.f32 %v5342_v8, %v2746_v30 }
 0xe70   :  { %2908 = vmatpush.msrb.mxu1 %v5152_v15 }
 0xe71   :  { %v2748_v20 = vadd.f32 %v5342_v8, %v2747_v6 }
 0xe72   :  { %5011 = vmatmul.msk.f32.gmra.mxu0 %vm488_vm14, %v3843_v0  ;;  %v7066_v0 = vpop.eup %5343 }
 0xe73   :  { %v2752_v61 = vsel %vm2751_vm9, %v5342_v8, %v2748_v20  ;;  %v2843_v59 = vsel %vm528_vm1, %v7066_v0, 0.0 }
 0xe74   :  { %v2757_v1 = vsel %vm2754_vm10, %v2756_v50, %v2752_v61 }
 0xe75   :  { %v2758_v44 = vmul.f32 %v6965_v24, %v2757_v1 }
 0xe76   :  { %v7064_v2 = vpop.permute.xlu0 %3968 }
 0xe77   :  { %4959 = vmatmul.msk.f32.gmra.mxu2 %vm528_vm1, %v2758_v44 }
 0xe7b   :  { %v4099_v55 = vpop.permute.xlu1 %4098 }
 0xe7c   :  { %5020 = vmatpush.xpose.msk.msra.mxu0 %vm488_vm14, %v4099_v55 }
 0xe7f   :  { %4968 = vmatmul.msk.f32.vlgmr.msrb.gmra.mxu2 %vm488_vm14, %v6888_v25  ;;  %v4095_v25 = vpop.permute.xlu0 %4094 }
 0xe80   :  { %4990 = vmatpush.xpose.msk.msrb.mxu2 %vm488_vm14, %v6925_v5  ;;  %5021 = vmatpush.xpose.msk.msra.mxu0 %vm488_vm14, %v4097_v42 }
 0xe83   :  { %v4093_v24 = vpop.permute.xlu1 %4092 }
 0xe84   :  { %4991 = vmatpush.xpose.msk.msrb.mxu2 %vm488_vm14, %v6915_v46  ;;  %5022 = vmatmul.msk.f32.vlgmr.msra.gmra.mxu0 %vm488_vm14, %v4093_v24 }
 0xe86   :  { %2844 = vadd.xlane.f32.xlu1 %v2843_v59 }
 0xe87   :  { %4969 = vmatmul.msk.f32.gmra.mxu2 %vm488_vm14, %v6895_v45 }
 0xe8c   :  { %5023 = vmatmul.msk.f32.gmra.mxu0 %vm488_vm14, %v4095_v25 }
 0xe8f   :  { %4980 = vmatmul.msk.f32.vlgmr.msra.gmra.mxu2 %vm488_vm14, %v6908_v7 }
 0xe90   :  { %5002 = vmatpush.xpose.msk.msra.mxu2 %vm488_vm14, %v7021_v19 }
 0xe94   :  { %5003 = vmatpush.xpose.msk.msra.mxu2 %vm488_vm14, %v7031_v49 }
 0xe97   :  { %4981 = vmatmul.msk.f32.gmra.mxu2 %vm488_vm14, %v6911_v58 }
 0xe9e   :  { %v3619_v46 = vpop.f32.mrf.mxu0 }
 0xe9f   :  { %v3625_v5 = vmul.f32 0.14433756, %v3619_v46  ;;  %4992 = vmatmul.msk.f32.vlgmr.msrb.gmra.mxu2 %vm488_vm14, %v6919_v3  ;;  %v3091_v46 = vsub.f32 %v6969_v26, %v7048_v11 }
 0xea0   :  { %5014 = vmatpush.xpose.msk.msrb.mxu2 %vm488_vm14, %v7035_v12  ;;  %v5165_v12 = vpop.permute.xlu2 %5164 }
 0xea1   :  { %v7090_v45 = vsel %vm6037_vm15, %v3625_v5, -1e+30 }
 0xea2   :  { %v3629_v7 = vsel %vm528_vm1, %v7090_v45, -inf }
 0xea3   :  { %3630 = vmax.xlane.f32.xlu0 %v3629_v7 }
 0xea4   :  { %5015 = vmatpush.xpose.msk.msrb.mxu2 %vm488_vm14, %v7039_v51 }
 0xea6   :  { %v3622_v58 = vpop.f32.mrf.mxu0 }
 0xea7   :  { %v3626_v19 = vmul.f32 0.14433756, %v3622_v58  ;;  %4993 = vmatmul.msk.f32.gmra.mxu2 %vm488_vm14, %v6923_v34 }
 0xea9   :  { %v7100_v3 = vsel %vm6044_vm2, %v3626_v19, -1e+30  ;;  %v7107_v53 = vpop.xlane.xlu0 %3089 }
 0xeaa   :  { %v3632_v49 = vsel %vm528_vm1, %v7100_v3, -inf }
 0xeab   :  { %3633 = vmax.xlane.f32.xlu0 %v3632_v49 }
 0xeac   :  { %v3342_v34 = vpop.xlane.xlu2 %3341 }
 0xead   :  { %v3344_v40 = vsub.f32 %v7009_v16, %v3342_v34 }
 0xeae   :  { %v2836_v42 = vpop.xlane.xlu1 %2835 }
 0xeaf   :  { %v2838_v60 = vsub.f32 %v7017_v21, %v2836_v42  ;;  %5004 = vmatmul.msk.f32.vlgmr.msra.gmra.mxu2 %vm488_vm14, %v7001_v38  ;;  %v3347_v37 = vmul.f32 1.442695, %v3344_v40  ;;  %v3093_v42 = vmul.f32 1.442695, %v3091_v46  ;;  %v3092_v40 = vsub.f32 %v7005_v13, %v7107_v53 }
 0xeb1   :  { %v2841_v33 = vmul.f32 1.442695, %v2838_v60 }
 0xeb3   :  { %5345 = vpow2.f32 %v2841_v33 }
 0xeb6   :  { %v3339_v47 = vpop.xlane.xlu1 %3338 }
 0xeb7   :  { %v3343_v54 = vsub.f32 %v7027_v35, %v3339_v47  ;;  %5005 = vmatmul.msk.f32.gmra.mxu2 %vm488_vm14, %v7011_v52  ;;  %v5166_v35 = vunpack.i.l.bf16 %v5165_v12  ;;  %v5167_v52 = vunpack.i.h.bf16 %v5165_v12 }
 0xeb9   :  { %v7112_v51 = vpop.eup %5345  ;;  %v3345_v4 = vmul.f32 1.442695, %v3343_v54 }
 0xeba   :  { %v2846_v21 = vsel %vm528_vm1, %v7112_v51, 0.0 }
 0xebb   :  { %5347 = vpow2.f32 %v3345_v4  ;;  %2847 = vadd.xlane.f32.xlu1 %v2846_v21 }
 0xebc   :  { %v5155_v38 = vpop.permute.xlu0 %5154  ;;  %5349 = vpow2.f32 %v3347_v37 }
 0xebd   :  { %v5156_v27 = vunpack.i.l.bf16 %v5155_v38  ;;  %v5157_v32 = vunpack.i.h.bf16 %v5155_v38 }
 0xebf   :  { %3033 = vmatpush.msra.mxu3 %v5156_v27  ;;  %5016 = vmatmul.msk.f32.vlgmr.msrb.gmra.mxu2 %vm488_vm14, %v3967_v9  ;;  %v3095_v27 = vmul.f32 1.442695, %v3092_v40 }
 0xec1   :  { %v7118_v17 = vpop.eup %5347  ;;  %3034 = vmatpush.msra.mxu3 %v5157_v32 }
 0xec2   :  { %v3349_v16 = vsel %vm528_vm1, %v7118_v17, 0.0  ;;  %v7122_v31 = vpop.eup %5349 }
 0xec3   :  { %3285 = vmatpush.msrb.mxu3 %v5166_v35  ;;  %3350 = vadd.xlane.f32.xlu1 %v3349_v16  ;;  %v3352_v39 = vsel %vm528_vm1, %v7122_v31, 0.0 }
 0xec4   :  { %v5160_v29 = vpop.permute.xlu0 %5159 }
 0xec5   :  { %3286 = vmatpush.msrb.mxu3 %v5167_v52  ;;  %v5161_v8 = vunpack.i.l.bf16 %v5160_v29  ;;  %v5162_v43 = vunpack.i.h.bf16 %v5160_v29 }
 0xec7   :  { %3159 = vmatpush.msra.mxu1 %v5161_v8  ;;  %5017 = vmatmul.msk.f32.gmra.mxu2 %vm488_vm14, %v7064_v2 }
 0xec9   :  { %3160 = vmatpush.msra.mxu1 %v5162_v43 }
 0xecb   :  { %3353 = vadd.xlane.f32.xlu1 %v3352_v39 }
 0xece   :  { %v5170_v50 = vpop.permute.xlu1 %5169 }
 0xecf   :  { %v5171_v4 = vunpack.i.l.bf16 %v5170_v50  ;;  %v5172_v37 = vunpack.i.h.bf16 %v5170_v50 }
 0xee2   :  { %v7134_v61 = vpop.f32.mrf.mxu2 }
 0xee7   :  { %v3873_v30 = vpop.f32.mrf.mxu0 }
 0xee8   :  { %v3879_v48 = vmul.f32 0.14433756, %v3873_v30 }
 0xeea   :  { %v7130_v15 = vsel %vm6037_vm15, %v3879_v48, -1e+30 }
 0xeeb   :  { %v3883_v6 = vsel %vm528_vm1, %v7130_v15, -inf }
 0xeec   :  { %3884 = vmax.xlane.f32.xlu2 %v3883_v6 }
 0xeef   :  { %v3876_v18 = vpop.f32.mrf.mxu0 }
 0xef0   :  { %v3880_v20 = vmul.f32 0.14433756, %v3876_v18 }
 0xef2   :  { %v7138_v62 = vsel %vm6044_vm2, %v3880_v20, -1e+30 }
 0xef3   :  { %v3886_v1 = vsel %vm528_vm1, %v7138_v62, -inf }
 0xef4   :  { %3887 = vmax.xlane.f32.xlu0 %v3886_v1 }
 0xef9   :  { %v2845_v44 = vpop.xlane.xlu1 %2844 }
 0xefa   :  { %5351 = vrcp.f32 %v2845_v44  ;;  %v7142_v9 = vpop.f32.mrf.mxu2  ;;  %v2860_v5 = vand.u32 2147483648, %v2845_v44  ;;  %v2858_v19 = vand.u32 2147483647, %v2845_v44  ;;  %vm2854_vm12 = vweird.f32 %v2845_v44 }
 0xefb   :  { %5353 = vpow2.f32 %v3093_v42 }
 0xefc   :  { %v2861_v60 = vor.u32 1.1754944e-38, %v2860_v5  ;;  %vm2859_vm7 = vcmp.eq.f32.partialorder %v2858_v19, 8.507059e+37  ;;  %5355 = vpow2.f32 %v3095_v27 }
 0xf00   :  { %v5352_v10 = vpop.eup %5351 }
 0xf01   :  { %v2850_v55 = vmul.f32 %v5352_v10, %v2845_v44  ;;  %v4125_v2 = vpop.f32.mrf.mxu0  ;;  %vm2855_vm11 = vweird.f32 %v5352_v10 }
 0xf02   :  { %v4131_v24 = vmul.f32 0.14433756, %v4125_v2  ;;  %v2949_v59 = vpop.f32.mrf.mxu2  ;;  %vm2856_vm3 = vmor %vm2854_vm12, %vm2855_vm11 }
 0xf03   :  { %v2851_v25 = vsub.f32 1.0, %v2850_v55  ;;  %v2955_v48 = vmul.f32 0.14433756, %v2949_v59 }
 0xf04   :  { %v7148_v7 = vsel %vm6037_vm15, %v4131_v24, -1e+30 }
 0xf05   :  { %v2852_v58 = vmul.f32 %v5352_v10, %v2851_v25  ;;  %v4135_v49 = vsel %vm528_vm1, %v7148_v7, -inf }
 0xf06   :  { %4136 = vmax.xlane.f32.xlu2 %v4135_v49 }
 0xf07   :  { %v2853_v12 = vadd.f32 %v5352_v10, %v2852_v58 }
 0xf09   :  { %v2857_v33 = vsel %vm2856_vm3, %v5352_v10, %v2853_v12  ;;  %v4128_v26 = vpop.f32.mrf.mxu0 }
 0xf0a   :  { %v2862_v11 = vsel %vm2859_vm7, %v2861_v60, %v2857_v33  ;;  %v4132_v34 = vmul.f32 0.14433756, %v4128_v26  ;;  %v7152_v47 = vpop.f32.mrf.mxu2 }
 0xf0b   :  { %v2863_v54 = vmul.f32 %v7066_v0, %v2862_v11  ;;  %v7164_v0 = vpop.eup %5353 }
 0xf0c   :  { %v7159_v21 = vsel %vm6044_vm2, %v4132_v34, -1e+30  ;;  %v3097_v53 = vsel %vm528_vm1, %v7164_v0, 0.0  ;;  %v7175_v43 = vpop.eup %5355 }
 0xf0d   :  { %4964 = vmatmul.msk.f32.vlgmr.msrb.gmra.mxu1 %vm528_vm1, %v2863_v54  ;;  %v4138_v38 = vsel %vm528_vm1, %v7159_v21, -inf  ;;  %v3100_v30 = vsel %vm528_vm1, %v7175_v43, 0.0 }
 0xf0e   :  { %3411 = vmatpush.msrb.mxu1 %v5171_v4  ;;  %4139 = vmax.xlane.f32.xlu0 %v4138_v38 }
 0xf10   :  { %3412 = vmatpush.msrb.mxu1 %v5172_v37 }
 0xf12   :  { %v3201_v32 = vpop.f32.mrf.mxu2 }
 0xf13   :  { %v3207_v35 = vmul.f32 0.14433756, %v3201_v32 }
 0xf15   :  { %v7168_v13 = vsel %vm6037_vm15, %v3207_v35, -1e+30 }
 0xf16   :  { %v3631_v52 = vpop.xlane.xlu0 %3630  ;;  %3098 = vadd.xlane.f32.xlu0 %v3097_v53  ;;  %v3211_v16 = vsel %vm528_vm1, %v7168_v13, -inf }
 0xf17   :  { %v3635_v29 = vsub.f32 %v7090_v45, %v3631_v52  ;;  %3212 = vmax.xlane.f32.xlu2 %v3211_v16  ;;  %v7184_v45 = vsel %vm6037_vm15, %v2955_v48, -1e+30  ;;  %v2956_v48 = vmul.f32 0.14433756, %v7152_v47 }
 0xf18   :  { %v2959_v10 = vsel %vm528_vm1, %v7184_v45, -inf }
 0xf19   :  { %v3637_v8 = vmul.f32 1.442695, %v3635_v29 }
 0xf1a   :  { %v3204_v39 = vpop.f32.mrf.mxu2 }
 0xf1b   :  { %5357 = vpow2.f32 %v3637_v8  ;;  %v3208_v25 = vmul.f32 0.14433756, %v3204_v39 }
 0xf1d   :  { %v7202_v58 = vsel %vm6044_vm2, %v3208_v25, -1e+30 }
 0xf1e   :  { %v3634_v6 = vpop.xlane.xlu0 %3633  ;;  %3101 = vadd.xlane.f32.xlu0 %v3100_v30  ;;  %v3214_v60 = vsel %vm528_vm1, %v7202_v58, -inf }
 0xf1f   :  { %v3636_v18 = vsub.f32 %v7100_v3, %v3634_v6 }
 0xf21   :  { %v7180_v20 = vpop.eup %5357  ;;  %v3639_v50 = vmul.f32 1.442695, %v3636_v18 }
 0xf22   :  { %v3499_v1 = vpop.f32.mrf.mxu2  ;;  %v3641_v44 = vsel %vm528_vm1, %v7180_v20, 0.0 }
 0xf23   :  { %3642 = vadd.xlane.f32.xlu1 %v3641_v44  ;;  %5359 = vpow2.f32 %v3639_v50  ;;  %v3505_v18 = vmul.f32 0.14433756, %v3499_v1 }
 0xf25   :  { %v7233_v47 = vsel %vm6037_vm15, %v3505_v18, -1e+30 }
 0xf26   :  { %2960 = vmax.xlane.f32.xlu0 %v2959_v10 }
 0xf29   :  { %v7190_v55 = vpop.eup %5359 }
 0xf2a   :  { %v3502_v3 = vpop.f32.mrf.mxu2  ;;  %v3644_v59 = vsel %vm528_vm1, %v7190_v55, 0.0 }
 0xf2b   :  { %v3506_v2 = vmul.f32 0.14433756, %v3502_v3  ;;  %v3509_v3 = vsel %vm528_vm1, %v7233_v47, -inf }
 0xf2d   :  { %v7194_v24 = vsel %vm6044_vm2, %v3506_v2, -1e+30 }
 0xf2e   :  { %3645 = vadd.xlane.f32.xlu0 %v3644_v59  ;;  %v2848_v46 = vpop.xlane.xlu1 %2847  ;;  %v3512_v5 = vsel %vm528_vm1, %v7194_v24, -inf }
 0xf2f   :  { %5361 = vrcp.f32 %v2848_v46  ;;  %3513 = vmax.xlane.f32.xlu2 %v3512_v5  ;;  %v2875_v54 = vand.u32 2147483648, %v2848_v46  ;;  %v2873_v40 = vand.u32 2147483647, %v2848_v46  ;;  %vm2869_vm9 = vweird.f32 %v2848_v46 }
 0xf31   :  { %v2876_v38 = vor.u32 1.1754944e-38, %v2875_v54  ;;  %vm2874_vm11 = vcmp.eq.f32.partialorder %v2873_v40, 8.507059e+37 }
 0xf32   :  { %v3747_v19 = vpop.f32.mrf.mxu2 }
 0xf33   :  { %v3753_v49 = vmul.f32 0.14433756, %v3747_v19 }
 0xf35   :  { %v5362_v12 = vpop.eup %5361  ;;  %v7206_v42 = vsel %vm6037_vm15, %v3753_v49, -1e+30 }
 0xf36   :  { %v2865_v33 = vmul.f32 %v5362_v12, %v2848_v46  ;;  %3215 = vmax.xlane.f32.xlu0 %v3214_v60  ;;  %v3757_v26 = vsel %vm528_vm1, %v7206_v42, -inf  ;;  %vm2870_vm8 = vweird.f32 %v5362_v12 }
 0xf37   :  { %3758 = vmax.xlane.f32.xlu2 %v3757_v26  ;;  %vm2871_vm10 = vmor %vm2869_vm9, %vm2870_vm8 }
 0xf38   :  { %v2866_v11 = vsub.f32 1.0, %v2865_v33 }
 0xf3a   :  { %v2867_v34 = vmul.f32 %v5362_v12, %v2866_v11  ;;  %v3750_v50 = vpop.f32.mrf.mxu2 }
 0xf3b   :  { %v3754_v2 = vmul.f32 0.14433756, %v3750_v50 }
 0xf3c   :  { %v2868_v4 = vadd.f32 %v5362_v12, %v2867_v34 }
 0xf3d   :  { %v7240_v1 = vsel %vm6044_vm2, %v3754_v2, -1e+30 }
 0xf3e   :  { %v2872_v37 = vsel %vm2871_vm10, %v5362_v12, %v2868_v4  ;;  %v3760_v5 = vsel %vm528_vm1, %v7240_v1, -inf  ;;  %v7250_v12 = vpop.xlane.xlu1 %3350 }
 0xf3f   :  { %v2877_v27 = vsel %vm2874_vm11, %v2876_v38, %v2872_v37 }
 0xf40   :  { %v2878_v32 = vmul.f32 %v7112_v51, %v2877_v27  ;;  %v7223_v51 = vsel %vm6044_vm2, %v2956_v48, -1e+30 }
 0xf42   :  { %4965 = vmatmul.msk.f32.gmra.mxu1 %vm528_vm1, %v2878_v32  ;;  %v3999_v25 = vpop.f32.mrf.mxu2 }
 0xf46   :  { %v7263_v57 = vpop.xlane.xlu1 %3353 }
 0xf4a   :  { %v4002_v33 = vpop.f32.mrf.mxu2 }
 0xf4b   :  { %v4006_v34 = vmul.f32 0.14433756, %v4002_v33 }
 0xf4d   :  { %v7261_v40 = vsel %vm6044_vm2, %v4006_v34, -1e+30 }
 0xf4e   :  { %v4012_v32 = vsel %vm528_vm1, %v7261_v40, -inf }
 0xf5f   :  { %v3885_v35 = vpop.xlane.xlu2 %3884 }
 0xf60   :  { %v3889_v53 = vsub.f32 %v7130_v15, %v3885_v35 }
 0xf62   :  { %v3891_v52 = vmul.f32 1.442695, %v3889_v53 }
 0xf64   :  { %5363 = vpow2.f32 %v3891_v52 }
 0xf67   :  { %v3888_v16 = vpop.xlane.xlu0 %3887 }
 0xf68   :  { %v3890_v29 = vsub.f32 %v7138_v62, %v3888_v16  ;;  %v2962_v62 = vsel %vm528_vm1, %v7223_v51, -inf }
 0xf6a   :  { %v7216_v8 = vpop.eup %5363  ;;  %v3893_v39 = vmul.f32 1.442695, %v3890_v29 }
 0xf6b   :  { %v3895_v30 = vsel %vm528_vm1, %v7216_v8, 0.0 }
 0xf6c   :  { %5365 = vpow2.f32 %v3893_v39  ;;  %3896 = vadd.xlane.f32.xlu1 %v3895_v30 }
 0xf72   :  { %v7225_v15 = vpop.eup %5365 }
 0xf73   :  { %v3898_v6 = vsel %vm528_vm1, %v7225_v15, 0.0 }
 0xf74   :  { %3899 = vadd.xlane.f32.xlu2 %v3898_v6  ;;  %2963 = vmax.xlane.f32.xlu1 %v2962_v62 }
 0xf79   :  { %v4137_v44 = vpop.xlane.xlu2 %4136 }
 0xf7a   :  { %v4141_v10 = vsub.f32 %v7148_v7, %v4137_v44  ;;  %v4005_v7 = vmul.f32 0.14433756, %v3999_v25 }
 0xf7c   :  { %v4143_v59 = vmul.f32 1.442695, %v4141_v10  ;;  %3510 = vmax.xlane.f32.xlu1 %v3509_v3  ;;  %v7254_v60 = vsel %vm6037_vm15, %v4005_v7, -1e+30 }
 0xf7d   :  { %v4009_v11 = vsel %vm528_vm1, %v7254_v60, -inf }
 0xf7e   :  { %5367 = vpow2.f32 %v4143_v59  ;;  %v7273_v59 = vpack.i.bf16 %v6952_v56, %v6956_v41 }
 0xf81   :  { %v7242_v46 = vpop.xlane.xlu0 %4139 }
 0xf84   :  { %v7246_v19 = vpop.eup %5367  ;;  %3761 = vmax.xlane.f32.xlu1 %v3760_v5 }
 0xf85   :  { %v4147_v49 = vsel %vm528_vm1, %v7246_v19, 0.0 }
 0xf86   :  { %4148 = vadd.xlane.f32.xlu2 %v4147_v49 }
 0xf89   :  { %v3099_v26 = vpop.xlane.xlu0 %3098 }
 0xf8a   :  { %5369 = vrcp.f32 %v3099_v26  ;;  %v3114_v35 = vand.u32 2147483648, %v3099_v26  ;;  %v3112_v52 = vand.u32 2147483647, %v3099_v26  ;;  %vm3108_vm2 = vweird.f32 %v3099_v26 }
 0xf8b   :  { %5371 = vrcp.f32 %v7250_v12 }
 0xf8c   :  { %4010 = vmax.xlane.f32.xlu1 %v4009_v11  ;;  %v3115_v39 = vor.u32 1.1754944e-38, %v3114_v35  ;;  %vm3113_vm3 = vcmp.eq.f32.partialorder %v3112_v52, 8.507059e+37 }
 0xf90   :  { %v5370_v54 = vpop.eup %5369 }
 0xf91   :  { %v3104_v4 = vmul.f32 %v5370_v54, %v3099_v26  ;;  %v3102_v38 = vpop.xlane.xlu0 %3101  ;;  %v5372_v37 = vpop.eup %5371  ;;  %vm3109_vm15 = vweird.f32 %v5370_v54 }
 0xf92   :  { %5373 = vrcp.f32 %v3102_v38  ;;  %v3356_v63 = vmul.f32 %v5372_v37, %v7250_v12  ;;  %vm3110_vm12 = vmor %vm3108_vm2, %vm3109_vm15  ;;  %v3129_v5 = vand.u32 2147483648, %v3102_v38  ;;  %v3127_v33 = vand.u32 2147483647, %v3102_v38 }
 0xf93   :  { %v3105_v27 = vsub.f32 1.0, %v3104_v4  ;;  %5375 = vrcp.f32 %v7263_v57  ;;  %vm3123_vm8 = vweird.f32 %v3102_v38  ;;  %vm3361_vm10 = vweird.f32 %v5372_v37 }
 0xf94   :  { %4013 = vmax.xlane.f32.xlu1 %v4012_v32  ;;  %v3357_v62 = vsub.f32 1.0, %v3356_v63  ;;  %vm3128_vm11 = vcmp.eq.f32.partialorder %v3127_v33, 8.507059e+37  ;;  %vm3360_vm15 = vweird.f32 %v7250_v12  ;;  %v3364_v32 = vand.u32 2147483647, %v7250_v12 }
 0xf95   :  { %v3106_v53 = vmul.f32 %v5370_v54, %v3105_v27  ;;  %vm3362_vm2 = vmor %vm3360_vm15, %vm3361_vm10 }
 0xf96   :  { %v3358_v7 = vmul.f32 %v5372_v37, %v3357_v62 }
 0xf97   :  { %v3107_v16 = vadd.f32 %v5370_v54, %v3106_v53 }
 0xf98   :  { %v5374_v29 = vpop.eup %5373  ;;  %v3359_v11 = vadd.f32 %v5372_v37, %v3358_v7 }
 0xf99   :  { %v3111_v30 = vsel %vm3110_vm12, %v5370_v54, %v3107_v16  ;;  %v3119_v48 = vmul.f32 %v5374_v29, %v3102_v38  ;;  %v2961_v6 = vpop.xlane.xlu0 %2960  ;;  %v5376_v44 = vpop.eup %5375  ;;  %vm3124_vm7 = vweird.f32 %v5374_v29  ;;  %v3366_v54 = vand.u32 2147483648, %v7250_v12 }
 0xf9a   :  { %v3116_v18 = vsel %vm3113_vm3, %v3115_v39, %v3111_v30  ;;  %v2965_v50 = vsub.f32 %v7184_v45, %v2961_v6  ;;  %v3371_v49 = vmul.f32 %v5376_v44, %v7263_v57  ;;  %vm3125_vm9 = vmor %vm3123_vm8, %vm3124_vm7  ;;  %v3130_v45 = vor.u32 1.1754944e-38, %v3129_v5  ;;  %v3213_v39 = vpop.xlane.xlu2 %3212 }
 0xf9b   :  { %v3117_v10 = vmul.f32 %v7164_v0, %v3116_v18  ;;  %v3120_v3 = vsub.f32 1.0, %v3119_v48  ;;  %v3363_v53 = vsel %vm3362_vm2, %v5372_v37, %v3359_v11  ;;  %v3367_v63 = vor.u32 1.1754944e-38, %v3366_v54 }
 0xf9c   :  { %v2967_v2 = vmul.f32 1.442695, %v2965_v50  ;;  %v3372_v34 = vsub.f32 1.0, %v3371_v49  ;;  %vm3365_vm12 = vcmp.eq.f32.partialorder %v3364_v32, 8.507059e+37  ;;  %vm3376_vm3 = vweird.f32 %v5376_v44 }
 0xf9d   :  { %v3121_v25 = vmul.f32 %v5374_v29, %v3120_v3  ;;  %4976 = vmatmul.msk.f32.vlgmr.msra.gmra.mxu1 %vm528_vm1, %v3117_v10  ;;  %v3368_v16 = vsel %vm3365_vm12, %v3367_v63, %v3363_v53  ;;  %v3381_v30 = vand.u32 2147483648, %v7263_v57  ;;  %vm3375_vm7 = vweird.f32 %v7263_v57 }
 0xf9e   :  { %5377 = vpow2.f32 %v2967_v2  ;;  %5184 = vrot.lane.b32.xlu2 %v7273_v59, %s5722_s21  ;;  %v3373_v52 = vmul.f32 %v5376_v44, %v3372_v34  ;;  %v3369_v12 = vmul.f32 %v7118_v17, %v3368_v16  ;;  %vm3377_vm8 = vmor %vm3375_vm7, %vm3376_vm3 }
 0xf9f   :  { %v3122_v0 = vadd.f32 %v5374_v29, %v3121_v25  ;;  %v3382_v48 = vor.u32 1.1754944e-38, %v3381_v30 }
 0xfa1   :  { %v3126_v26 = vsel %vm3125_vm9, %v5374_v29, %v3122_v0  ;;  %v3374_v29 = vadd.f32 %v5376_v44, %v3373_v52  ;;  %v7311_v7 = vpop.xlane.xlu0 %3645  ;;  %v3217_v0 = vsub.f32 %v7168_v13, %v3213_v39  ;;  %v4142_v13 = vsub.f32 %v7159_v21, %v7242_v46 }
 0xfa2   :  { %v3131_v4 = vsel %vm3128_vm11, %v3130_v45, %v3126_v26  ;;  %v3514_v62 = vpop.xlane.xlu2 %3513 }
 0xfa3   :  { %v3132_v35 = vmul.f32 %v7175_v43, %v3131_v4  ;;  %v3379_v43 = vand.u32 2147483647, %v7263_v57  ;;  %v3378_v37 = vsel %vm3377_vm8, %v5376_v44, %v3374_v29  ;;  %v3516_v50 = vsub.f32 %v7194_v24, %v3514_v62 }
 0xfa4   :  { %v7280_v27 = vpop.eup %5377  ;;  %v3219_v45 = vmul.f32 1.442695, %v3217_v0  ;;  %v4145_v63 = vmul.f32 1.442695, %v4142_v13 }
 0xfa5   :  { %v2971_v38 = vsel %vm528_vm1, %v7280_v27, 0.0  ;;  %4977 = vmatmul.msk.f32.gmra.mxu1 %vm528_vm1, %v3132_v35  ;;  %vm3380_vm9 = vcmp.eq.f32.partialorder %v3379_v43, 8.507059e+37  ;;  %v3519_v10 = vmul.f32 1.442695, %v3516_v50 }
 0xfa6   :  { %2972 = vadd.xlane.f32.xlu0 %v2971_v38  ;;  %v3383_v6 = vsel %vm3380_vm9, %v3382_v48, %v3378_v37  ;;  %v2910_v37 = vpop.f32.mrf.mxu1 }
 0xfa7   :  { %v3384_v18 = vmul.f32 %v7122_v31, %v3383_v6  ;;  %5379 = vpow2.f32 %v3519_v10  ;;  %v7303_v31 = vpop.xlane.xlu1 %3642 }
 0xfa8   :  { %vm3652_vm2 = vweird.f32 %v7303_v31 }
 0xfa9   :  { %v3216_v11 = vpop.xlane.xlu0 %3215 }
 0xfaa   :  { %v3759_v44 = vpop.xlane.xlu2 %3758  ;;  %v3218_v54 = vsub.f32 %v7202_v58, %v3216_v11 }
 0xfab   :  { %v3763_v3 = vsub.f32 %v7206_v42, %v3759_v44 }
 0xfac   :  { %v3221_v32 = vmul.f32 1.442695, %v3218_v54 }
 0xfad   :  { %4988 = vmatmul.msk.f32.vlgmr.msrb.gmra.mxu1 %vm528_vm1, %v3369_v12  ;;  %v7298_v17 = vpop.eup %5379  ;;  %v3765_v2 = vmul.f32 1.442695, %v3763_v3 }
 0xfae   :  { %v3524_v57 = vsel %vm528_vm1, %v7298_v17, 0.0 }
 0xfaf   :  { %5381 = vpow2.f32 %v3765_v2 }
 0xfb5   :  { %4989 = vmatmul.msk.f32.gmra.mxu1 %vm528_vm1, %v3384_v18  ;;  %v7307_v25 = vpop.eup %5381 }
 0xfb6   :  { %v3769_v5 = vsel %vm528_vm1, %v7307_v25, 0.0 }
 0xfba   :  { %5174 = vrot.lane.b32.xlu0 %v7273_v59, %s5721_s17  ;;  %s5659_s17 = scalar_lea.hbm %s5894_s30, 32 }
 0xfbf   :  { %v7350_v18 = vpop.f32.mrf.mxu1 }
 0xfc7   :  { %3525 = vadd.xlane.f32.xlu2 %v3524_v57 }
 0xfdf   :  { %v7305_v24 = vpop.xlane.xlu1 %3896 }
 0xfe4   :  { %3770 = vadd.xlane.f32.xlu0 %v3769_v5 }
 0xfe7   :  { %v2964_v49 = vpop.xlane.xlu1 %2963  ;;  %v7354_v3 = vpop.xlane.xlu2 %3899 }
 0xfe8   :  { %v2966_v33 = vsub.f32 %v7223_v51, %v2964_v49 }
 0xfea   :  { %v2969_v42 = vmul.f32 1.442695, %v2966_v33 }
 0xfec   :  { %5383 = vpow2.f32 %v2969_v42 }
 0xfed   :  { %5385 = vpow2.f32 %v3219_v45 }
 0xfee   :  { %5387 = vpow2.f32 %v3221_v32 }
 0xfef   :  { %v3511_v26 = vpop.xlane.xlu1 %3510 }
 0xff0   :  { %v3515_v52 = vsub.f32 %v7233_v47, %v3511_v26 }
 0xff2   :  { %v7315_v34 = vpop.eup %5383  ;;  %v3517_v16 = vmul.f32 1.442695, %v3515_v52 }
 0xff3   :  { %v2974_v4 = vsel %vm528_vm1, %v7315_v34, 0.0  ;;  %v7321_v38 = vpop.eup %5385 }
 0xff4   :  { %2975 = vadd.xlane.f32.xlu1 %v2974_v4  ;;  %v3223_v58 = vsel %vm528_vm1, %v7321_v38, 0.0 }
 0xff7   :  { %v3762_v35 = vpop.xlane.xlu1 %3761 }
 0xff8   :  { %v3764_v51 = vsub.f32 %v7240_v1, %v3762_v35  ;;  %v7329_v1 = vpop.eup %5387 }
 0xff9   :  { %v3226_v46 = vsel %vm528_vm1, %v7329_v1, 0.0  ;;  %v7363_v26 = vpop.xlane.xlu2 %4148 }
 0xffa   :  { %v3767_v53 = vmul.f32 1.442695, %v3764_v51 }
 0xffc   :  { %5389 = vpow2.f32 %v3767_v53  ;;  %3224 = vadd.xlane.f32.xlu1 %v3223_v58  ;;  %v3658_v53 = vand.u32 2147483648, %v7303_v31  ;;  %v3656_v58 = vand.u32 2147483647, %v7303_v31 }
 0xffd   :  { %5391 = vpow2.f32 %v4145_v63 }
 0xffe   :  { %5393 = vpow2.f32 %v3517_v16  ;;  %vm3657_vm8 = vcmp.eq.f32.partialorder %v3656_v58, 8.507059e+37 }
 0xfff   :  { %v4011_v29 = vpop.xlane.xlu1 %4010 }
0x1000   :  { %v4015_v39 = vsub.f32 %v7254_v60, %v4011_v29 }
0x1002   :  { %v7331_v30 = vpop.eup %5389  ;;  %v4017_v21 = vmul.f32 1.442695, %v4015_v39 }
0x1003   :  { %v3772_v47 = vsel %vm528_vm1, %v7331_v30, 0.0  ;;  %v7337_v12 = vpop.eup %5391 }
0x1004   :  { %5395 = vpow2.f32 %v4017_v21  ;;  %3773 = vadd.xlane.f32.xlu0 %v3772_v47  ;;  %3227 = vadd.xlane.f32.xlu1 %v3226_v46  ;;  %v7339_v43 = vpop.eup %5393  ;;  %v4150_v48 = vsel %vm528_vm1, %v7337_v12, 0.0  ;;  %v3659_v47 = vor.u32 1.1754944e-38, %v3658_v53 }
0x1005   :  { %v3521_v62 = vsel %vm528_vm1, %v7339_v43, 0.0  ;;  %5397 = vrcp.f32 %v7303_v31 }
0x1006   :  { %5399 = vrcp.f32 %v7311_v7 }
0x1007   :  { %v4014_v53 = vpop.xlane.xlu1 %4013 }
0x100a   :  { %v7341_v60 = vpop.eup %5395 }
0x100b   :  { %v4021_v6 = vsel %vm528_vm1, %v7341_v60, 0.0  ;;  %v5398_v50 = vpop.eup %5397 }
0x100c   :  { %4151 = vadd.xlane.f32.xlu0 %v4150_v48  ;;  %4022 = vadd.xlane.f32.xlu2 %v4021_v6  ;;  %v3648_v57 = vmul.f32 %v5398_v50, %v7303_v31  ;;  %v7356_v5 = vpop.eup %5399  ;;  %vm3653_vm11 = vweird.f32 %v5398_v50 }
0x100d   :  { %3522 = vadd.xlane.f32.xlu1 %v3521_v62  ;;  %v3663_v42 = vmul.f32 %v7356_v5, %v7311_v7  ;;  %vm3654_vm3 = vmor %vm3652_vm2, %vm3653_vm11  ;;  %vm3668_vm9 = vweird.f32 %v7356_v5 }
0x100e   :  { %v3649_v2 = vsub.f32 1.0, %v3648_v57 }
0x100f   :  { %v3664_v51 = vsub.f32 1.0, %v3663_v42 }
0x1010   :  { %v3650_v0 = vmul.f32 %v5398_v50, %v3649_v2 }
0x1011   :  { %v3665_v29 = vmul.f32 %v7356_v5, %v3664_v51 }
0x1012   :  { %v3651_v35 = vadd.f32 %v5398_v50, %v3650_v0 }
0x1013   :  { %v3666_v62 = vadd.f32 %v7356_v5, %v3665_v29 }
0x1019   :  { %v2973_v10 = vpop.xlane.xlu0 %2972 }
0x101a   :  { %5401 = vrcp.f32 %v2973_v10  ;;  %v3162_v44 = vpop.f32.mrf.mxu1  ;;  %v2988_v11 = vand.u32 2147483648, %v2973_v10  ;;  %v2986_v4 = vand.u32 2147483647, %v2973_v10  ;;  %vm2982_vm15 = vweird.f32 %v2973_v10 }
0x101b   :  { %5403 = vrcp.f32 %v7305_v24 }
0x101c   :  { %v2989_v63 = vor.u32 1.1754944e-38, %v2988_v11  ;;  %5405 = vrcp.f32 %v7354_v3  ;;  %vm2987_vm7 = vcmp.eq.f32.partialorder %v2986_v4, 8.507059e+37 }
0x1020   :  { %v5402_v49 = vpop.eup %5401  ;;  %5194 = vrot.lane.b32.xlu0 %v7273_v59, %s5724_s4 }
0x1021   :  { %v2978_v33 = vmul.f32 %v5402_v49, %v2973_v10  ;;  %vm2983_vm10 = vweird.f32 %v5402_v49  ;;  %v7371_v13 = vpop.eup %5403  ;;  %v5185_v10 = vpop.permute.xlu2 %5184 }
0x1022   :  { %v7367_v32 = vpop.f32.mrf.mxu1  ;;  %vm2984_vm12 = vmor %vm2982_vm15, %vm2983_vm10  ;;  %v3902_v39 = vmul.f32 %v7371_v13, %v7305_v24  ;;  %v5406_v57 = vpop.eup %5405  ;;  %vm3667_vm10 = vweird.f32 %v7311_v7  ;;  %vm3907_vm2 = vweird.f32 %v7371_v13 }
0x1023   :  { %v2979_v45 = vsub.f32 1.0, %v2978_v33  ;;  %vm3669_vm11 = vmor %vm3667_vm10, %vm3668_vm9  ;;  %v5186_v33 = vunpack.i.l.bf16 %v5185_v10  ;;  %v3917_v0 = vmul.f32 %v5406_v57, %v7354_v3  ;;  %vm3921_vm9 = vweird.f32 %v7354_v3 }
0x1024   :  { %5189 = vrot.lane.b32.xlu2 %v7273_v59, %s5725_s5  ;;  %v3670_v42 = vsel %vm3669_vm11, %v7356_v5, %v3666_v62  ;;  %v3910_v5 = vand.u32 2147483647, %v7305_v24 }
0x1025   :  { %v2980_v54 = vmul.f32 %v5402_v49, %v2979_v45  ;;  %v5187_v45 = vunpack.i.h.bf16 %v5185_v10  ;;  %v3918_v11 = vsub.f32 1.0, %v3917_v0 }
0x1026   :  { %5179 = vrot.lane.b32.xlu1 %v7273_v59, %s5723_s25  ;;  %v3655_v59 = vsel %vm3654_vm3, %v5398_v50, %v3651_v35  ;;  %v3903_v50 = vsub.f32 1.0, %v3902_v39 }
0x1027   :  { %v2981_v52 = vadd.f32 %v5402_v49, %v2980_v54  ;;  %v3660_v48 = vsel %vm3657_vm8, %v3659_v47, %v3655_v59  ;;  %v3912_v54 = vand.u32 2147483648, %v7305_v24  ;;  %v3919_v35 = vmul.f32 %v5406_v57, %v3918_v11 }
0x1028   :  { %3438 = vrot.lane.b32.xlu0 %v3162_v44, %s5728_s14  ;;  %v3673_v44 = vand.u32 2147483648, %v7311_v7  ;;  %vm3922_vm8 = vweird.f32 %v5406_v57 }
0x1029   :  { %v2985_v16 = vsel %vm2984_vm12, %v5402_v49, %v2981_v52  ;;  %v3671_v49 = vand.u32 2147483647, %v7311_v7  ;;  %vm3906_vm12 = vweird.f32 %v7305_v24  ;;  %v3913_v51 = vor.u32 1.1754944e-38, %v3912_v54  ;;  %vm3923_vm10 = vmor %vm3921_vm9, %vm3922_vm8 }
0x102a   :  { %v2990_v21 = vsel %vm2987_vm7, %v2989_v63, %v2985_v16  ;;  %vm3908_vm3 = vmor %vm3906_vm12, %vm3907_vm2  ;;  %vm3911_vm7 = vcmp.eq.f32.partialorder %v3910_v5, 8.507059e+37  ;;  %v3920_v58 = vadd.f32 %v5406_v57, %v3919_v35  ;;  %v4016_v63 = vsub.f32 %v7261_v40, %v4014_v53 }
0x102b   :  { %v2991_v46 = vmul.f32 %v7280_v27, %v2990_v21  ;;  %v3414_v27 = vpop.f32.mrf.mxu1  ;;  %vm3672_vm15 = vcmp.eq.f32.partialorder %v3671_v49, 8.507059e+37  ;;  %v3927_v24 = vand.u32 2147483648, %v7354_v3 }
0x102c   :  { %v5175_v31 = vpop.permute.xlu0 %5174  ;;  %3422 = vrot.lane.b32.xlu2 %v2910_v37, %s5714_s0  ;;  %v3661_v37 = vmul.f32 %v7180_v20, %v3660_v48  ;;  %v3674_v20 = vor.u32 1.1754944e-38, %v3673_v44  ;;  %v3924_v59 = vsel %vm3923_vm10, %v5406_v57, %v3920_v58 }
0x102d   :  { %v5176_v6 = vunpack.i.l.bf16 %v5175_v31  ;;  %4970 = vmatmul.msk.f32.vlgmr.msra.gmra.mxu3 %vm528_vm1, %v2991_v46  ;;  %v5177_v2 = vunpack.i.h.bf16 %v5175_v31  ;;  %v3928_v29 = vor.u32 1.1754944e-38, %v3927_v24 }
0x102e   :  { %3577 = vmatpush.msra.mxu3 %v6956_v41  ;;  %v3904_v41 = vmul.f32 %v7371_v13, %v3903_v50 }
0x102f   :  { %3705 = vmatpush.msra.mxu1 %v5176_v6 }
0x1030   :  { %3578 = vmatpush.msra.mxu3 %v6952_v56  ;;  %3454 = vrot.lane.b32.xlu0 %v3414_v27, %s5729_s2  ;;  %v3675_v56 = vsel %vm3672_vm15, %v3674_v20, %v3670_v42  ;;  %v3905_v7 = vadd.f32 %v7371_v13, %v3904_v41 }
0x1031   :  { %3706 = vmatpush.msra.mxu1 %v5177_v2  ;;  %v3676_v4 = vmul.f32 %v7190_v55, %v3675_v56  ;;  %v3925_v55 = vand.u32 2147483647, %v7354_v3 }
0x1032   :  { %5000 = vmatmul.msk.f32.vlgmr.msra.gmra.mxu1 %vm528_vm1, %v3661_v37 }
0x1033   :  { %3957 = vmatpush.msrb.mxu1 %v5186_v33  ;;  %v3417_v16 = vpop.f32.mrf.mxu1  ;;  %vm3926_vm11 = vcmp.eq.f32.partialorder %v3925_v55, 8.507059e+37 }
0x1034   :  { %3424 = vrot.lane.b32.xlu2 %v7350_v18, %s5714_s0  ;;  %v3909_v18 = vsel %vm3908_vm3, %v7371_v13, %v3905_v7  ;;  %v4019_v13 = vmul.f32 1.442695, %v4016_v63  ;;  %v3929_v39 = vsel %vm3926_vm11, %v3928_v29, %v3924_v59 }
0x1035   :  { %3958 = vmatpush.msrb.mxu1 %v5187_v45  ;;  %v3914_v52 = vsel %vm3911_vm7, %v3913_v51, %v3909_v18  ;;  %v3930_v40 = vmul.f32 %v7225_v15, %v3929_v39 }
0x1036   :  { %5407 = vpow2.f32 %v4019_v13 }
0x1038   :  { %3440 = vrot.lane.b32.xlu0 %v7367_v32, %s5728_s14  ;;  %v3915_v32 = vmul.f32 %v7216_v8, %v3914_v52 }
0x103a   :  { %5001 = vmatmul.msk.f32.gmra.mxu1 %vm528_vm1, %v3676_v4  ;;  %v7429_v33 = vpop.xlane.xlu2 %3525 }
0x103c   :  { %v7418_v8 = vpop.eup %5407 }
0x103d   :  { %v4024_v3 = vsel %vm528_vm1, %v7418_v8, 0.0 }
0x1040   :  { %3456 = vrot.lane.b32.xlu0 %v3417_v16, %s5729_s2 }
0x1042   :  { %5012 = vmatmul.msk.f32.vlgmr.msrb.gmra.mxu1 %vm528_vm1, %v3915_v32 }
0x104a   :  { %5013 = vmatmul.msk.f32.gmra.mxu1 %vm528_vm1, %v3930_v40 }
0x1050   :  { %4025 = vadd.xlane.f32.xlu1 %v4024_v3 }
0x1057   :  { %v7422_v46 = vpop.xlane.xlu0 %3770 }
0x1067   :  { %v2976_v21 = vpop.xlane.xlu1 %2975 }
0x1068   :  { %5409 = vrcp.f32 %v2976_v21  ;;  %v3003_v62 = vand.u32 2147483648, %v2976_v21  ;;  %v3001_v10 = vand.u32 2147483647, %v2976_v21  ;;  %vm2997_vm2 = vweird.f32 %v2976_v21 }
0x106a   :  { %v3004_v37 = vor.u32 1.1754944e-38, %v3003_v62  ;;  %vm3002_vm3 = vcmp.eq.f32.partialorder %v3001_v10, 8.507059e+37  ;;  %v4162_v10 = vand.u32 2147483647, %v7363_v26 }
0x106e   :  { %v5410_v47 = vpop.eup %5409 }
0x106f   :  { %v2993_v31 = vmul.f32 %v5410_v47, %v2976_v21  ;;  %v3225_v48 = vpop.xlane.xlu1 %3224  ;;  %vm2998_vm15 = vweird.f32 %v5410_v47  ;;  %v4164_v21 = vand.u32 2147483648, %v7363_v26 }
0x1070   :  { %5411 = vrcp.f32 %v3225_v48  ;;  %vm2999_vm12 = vmor %vm2997_vm2, %vm2998_vm15  ;;  %v3240_v42 = vand.u32 2147483648, %v3225_v48  ;;  %v3238_v56 = vand.u32 2147483647, %v3225_v48  ;;  %vm3234_vm8 = vweird.f32 %v3225_v48 }
0x1071   :  { %v2994_v6 = vsub.f32 1.0, %v2993_v31  ;;  %5413 = vrcp.f32 %v7363_v26 }
0x1072   :  { %v3241_v4 = vor.u32 1.1754944e-38, %v3240_v42  ;;  %vm3239_vm10 = vcmp.eq.f32.partialorder %v3238_v56, 8.507059e+37 }
0x1073   :  { %v2995_v15 = vmul.f32 %v5410_v47, %v2994_v6 }
0x1075   :  { %v2996_v50 = vadd.f32 %v5410_v47, %v2995_v15 }
0x1076   :  { %v5412_v57 = vpop.eup %5411 }
0x1077   :  { %v7425_v44 = vpop.xlane.xlu0 %3773  ;;  %v3230_v27 = vmul.f32 %v5412_v57, %v3225_v48  ;;  %v3228_v2 = vpop.xlane.xlu1 %3227  ;;  %v3000_v0 = vsel %vm2999_vm12, %v5410_v47, %v2996_v50  ;;  %vm3235_vm7 = vweird.f32 %v5412_v57 }
0x1078   :  { %5415 = vrcp.f32 %v3228_v2  ;;  %v7427_v49 = vpop.eup %5413  ;;  %v3005_v20 = vsel %vm3002_vm3, %v3004_v37, %v3000_v0  ;;  %vm3236_vm9 = vmor %vm3234_vm8, %vm3235_vm7  ;;  %v3255_v16 = vand.u32 2147483648, %v3228_v2  ;;  %v3253_v55 = vand.u32 2147483647, %v3228_v2 }
0x1079   :  { %v3231_v41 = vsub.f32 1.0, %v3230_v27  ;;  %v3006_v7 = vmul.f32 %v7315_v34, %v3005_v20  ;;  %v4154_v11 = vmul.f32 %v7427_v49, %v7363_v26  ;;  %5417 = vrcp.f32 %v7429_v33 }
0x107a   :  { %vm3249_vm15 = vweird.f32 %v3228_v2  ;;  %vm3254_vm12 = vcmp.eq.f32.partialorder %v3253_v55, 8.507059e+37  ;;  %vm4159_vm3 = vweird.f32 %v7427_v49  ;;  %vm4158_vm7 = vweird.f32 %v7363_v26 }
0x107b   :  { %v3232_v45 = vmul.f32 %v5412_v57, %v3231_v41  ;;  %4971 = vmatmul.msk.f32.gmra.mxu3 %vm528_vm1, %v3006_v7  ;;  %v4155_v34 = vsub.f32 1.0, %v4154_v11  ;;  %vm7459_vm8 = vmor %vm4158_vm7, %vm4159_vm3 }
0x107d   :  { %v3233_v54 = vadd.f32 %v5412_v57, %v3232_v45  ;;  %v4156_v13 = vmul.f32 %v7427_v49, %v4155_v34 }
0x107e   :  { %v5416_v5 = vpop.eup %5415 }
0x107f   :  { %v7436_v18 = vpop.xlane.xlu0 %4151  ;;  %v3237_v35 = vsel %vm3236_vm9, %v5412_v57, %v3233_v54  ;;  %v3245_v51 = vmul.f32 %v5416_v5, %v3228_v2  ;;  %v7440_v24 = vpop.eup %5417  ;;  %vm3250_vm11 = vweird.f32 %v5416_v5  ;;  %v4157_v48 = vadd.f32 %v7427_v49, %v4156_v13 }
0x1080   :  { %5419 = vrcp.f32 %v7436_v18  ;;  %v3242_v53 = vsel %vm3239_vm10, %v3241_v4, %v3237_v35  ;;  %v3523_v52 = vpop.xlane.xlu1 %3522  ;;  %v3543_v29 = vmul.f32 %v7440_v24, %v7429_v33  ;;  %vm3251_vm2 = vmor %vm3249_vm15, %vm3250_vm11  ;;  %v4165_v2 = vor.u32 1.1754944e-38, %v4164_v21  ;;  %v7471_v42 = vpop.xlane.xlu2 %4022 }
0x1081   :  { %v3243_v58 = vmul.f32 %v7321_v38, %v3242_v53  ;;  %v3246_v63 = vsub.f32 1.0, %v3245_v51  ;;  %5421 = vrcp.f32 %v3523_v52  ;;  %v3256_v38 = vor.u32 1.1754944e-38, %v3255_v16 }
0x1082   :  { %5423 = vrcp.f32 %v7422_v46  ;;  %v3544_v6 = vsub.f32 1.0, %v3543_v29  ;;  %v4161_v41 = vsel %vm7459_vm8, %v7427_v49, %v4157_v48  ;;  %v3538_v0 = vand.u32 2147483648, %v3523_v52 }
0x1083   :  { %v3247_v32 = vmul.f32 %v5416_v5, %v3246_v63  ;;  %4982 = vmatmul.msk.f32.vlgmr.msrb.gmra.mxu3 %vm528_vm1, %v3243_v58  ;;  %5425 = vrcp.f32 %v7425_v44  ;;  %v3536_v45 = vand.u32 2147483647, %v3523_v52  ;;  %vm4163_vm10 = vcmp.eq.f32.partialorder %v4162_v10, 8.507059e+37 }
0x1084   :  { %v4166_v7 = vsel %vm4163_vm10, %v4165_v2, %v4161_v41  ;;  %vm3532_vm11 = vweird.f32 %v3523_v52  ;;  %vm3547_vm15 = vweird.f32 %v7429_v33  ;;  %v3539_v54 = vor.u32 1.1754944e-38, %v3538_v0 }
0x1085   :  { %v3248_v39 = vadd.f32 %v5416_v5, %v3247_v32  ;;  %vm3537_vm3 = vcmp.eq.f32.partialorder %v3536_v45, 8.507059e+37  ;;  %v3553_v53 = vand.u32 2147483648, %v7429_v33  ;;  %v3551_v63 = vand.u32 2147483647, %v7429_v33 }
0x1086   :  { %v7443_v59 = vpop.eup %5419  ;;  %v4179_v16 = vand.u32 2147483648, %v7436_v18  ;;  %v4167_v13 = vmul.f32 %v7246_v19, %v4166_v7  ;;  %5427 = vrcp.f32 %v7471_v42 }
0x1087   :  { %v4169_v40 = vmul.f32 %v7443_v59, %v7436_v18  ;;  %v3252_v3 = vsel %vm3251_vm2, %v5416_v5, %v3248_v39  ;;  %v5422_v31 = vpop.eup %5421  ;;  %vm3548_vm2 = vweird.f32 %v7440_v24  ;;  %vm4174_vm7 = vweird.f32 %v7443_v59 }
0x1088   :  { %v3257_v47 = vsel %vm3254_vm12, %v3256_v38, %v3252_v3  ;;  %v3528_v62 = vmul.f32 %v5422_v31, %v3523_v52  ;;  %v7455_v50 = vpop.eup %5423  ;;  %vm3533_vm9 = vweird.f32 %v5422_v31  ;;  %vm7490_vm8 = vmor %vm3547_vm15, %vm3548_vm2  ;;  %v4177_v39 = vand.u32 2147483647, %v7436_v18 }
0x1089   :  { %v3258_v15 = vmul.f32 %v7329_v1, %v3257_v47  ;;  %v4170_v57 = vsub.f32 1.0, %v4169_v40  ;;  %v3545_v1 = vmul.f32 %v7440_v24, %v3544_v6  ;;  %v3776_v26 = vmul.f32 %v7455_v50, %v7422_v46  ;;  %vm3534_vm12 = vmor %vm3532_vm11, %vm3533_vm9  ;;  %v7477_v34 = vpop.eup %5425  ;;  %v5190_v47 = vpop.permute.xlu2 %5189 }
0x108a   :  { %v3529_v37 = vsub.f32 1.0, %v3528_v62  ;;  %vm4173_vm9 = vweird.f32 %v7436_v18  ;;  %v3791_v38 = vmul.f32 %v7477_v34, %v7425_v44  ;;  %v3554_v40 = vor.u32 1.1754944e-38, %v3553_v53 }
0x108b   :  { %4983 = vmatmul.msk.f32.gmra.mxu3 %vm528_vm1, %v3258_v15  ;;  %v4171_v56 = vmul.f32 %v7443_v59, %v4170_v57  ;;  %v3546_v11 = vadd.f32 %v7440_v24, %v3545_v1  ;;  %v3777_v4 = vsub.f32 1.0, %v3776_v26  ;;  %vm7500_vm10 = vmor %vm4173_vm9, %vm4174_vm7  ;;  %vm3552_vm11 = vcmp.eq.f32.partialorder %v3551_v63, 8.507059e+37 }
0x108c   :  { %v3530_v20 = vmul.f32 %v5422_v31, %v3529_v37  ;;  %v4180_v21 = vor.u32 1.1754944e-38, %v4179_v16  ;;  %vm3781_vm15 = vweird.f32 %v7455_v50  ;;  %vm4178_vm2 = vcmp.eq.f32.partialorder %v4177_v39, 8.507059e+37  ;;  %v5428_v10 = vpop.eup %5427 }
0x108d   :  { %v4172_v58 = vadd.f32 %v7443_v59, %v4171_v56  ;;  %v3550_v33 = vsel %vm7490_vm8, %v7440_v24, %v3546_v11  ;;  %v3792_v15 = vsub.f32 1.0, %v3791_v38  ;;  %v3786_v57 = vand.u32 2147483648, %v7422_v46 }
0x108e   :  { %v3531_v49 = vadd.f32 %v5422_v31, %v3530_v20  ;;  %v3555_v48 = vsel %vm3552_vm11, %v3554_v40, %v3550_v33  ;;  %v5191_v27 = vunpack.i.l.bf16 %v5190_v47  ;;  %v5192_v37 = vunpack.i.h.bf16 %v5190_v47 }
0x108f   :  { %v4176_v3 = vsel %vm7500_vm10, %v7443_v59, %v4172_v58  ;;  %v3784_v59 = vand.u32 2147483647, %v7422_v46  ;;  %v3556_v2 = vmul.f32 %v7298_v17, %v3555_v48  ;;  %v3793_v0 = vmul.f32 %v7477_v34, %v3792_v15 }
0x1090   :  { %v3535_v35 = vsel %vm3534_vm12, %v5422_v31, %v3531_v49  ;;  %v4181_v62 = vsel %vm4178_vm2, %v4180_v21, %v4176_v3  ;;  %vm3780_vm12 = vweird.f32 %v7422_v46  ;;  %v4028_v26 = vmul.f32 %v5428_v10, %v7471_v42 }
0x1091   :  { %v3540_v52 = vsel %vm3537_vm3, %v3539_v54, %v3535_v35  ;;  %vm3782_vm3 = vmor %vm3780_vm12, %vm3781_vm15  ;;  %v4182_v41 = vmul.f32 %v7337_v12, %v4181_v62  ;;  %v3787_v20 = vor.u32 1.1754944e-38, %v3786_v57  ;;  %vm3785_vm7 = vcmp.eq.f32.partialorder %v3784_v59, 8.507059e+37  ;;  %v4272_v59 = vld [vmem:[#allocation13 + $0x20] sm:$0xff] }
0x1092   :  { %v5195_v5 = vpop.permute.xlu0 %5194  ;;  %v3541_v32 = vmul.f32 %v7339_v43, %v3540_v52  ;;  %v3778_v43 = vmul.f32 %v7455_v50, %v3777_v4  ;;  %v3794_v46 = vadd.f32 %v7477_v34, %v3793_v0  ;;  %vm3796_vm8 = vweird.f32 %v7477_v34 }
0x1093   :  { %v5196_v51 = vunpack.i.l.bf16 %v5195_v5  ;;  %v5197_v55 = vunpack.i.h.bf16 %v5195_v5  ;;  %v4029_v45 = vsub.f32 1.0, %v4028_v26  ;;  %v3801_v12 = vand.u32 2147483648, %v7425_v44 }
0x1094   :  { %4994 = vmatmul.msk.f32.vlgmr.msra.gmra.mxu3 %vm528_vm1, %v3541_v32  ;;  %v3779_v6 = vadd.f32 %v7455_v50, %v3778_v43  ;;  %vm3795_vm9 = vweird.f32 %v7425_v44  ;;  %v3799_v56 = vand.u32 2147483647, %v7425_v44  ;;  %vm4033_vm15 = vweird.f32 %v5428_v10 }
0x1095   :  { %4209 = vmatpush.msra.mxu1 %v5196_v51  ;;  %vm3797_vm10 = vmor %vm3795_vm9, %vm3796_vm8  ;;  %v4030_v7 = vmul.f32 %v5428_v10, %v4029_v45  ;;  %v3802_v11 = vor.u32 1.1754944e-38, %v3801_v12  ;;  %v4038_v4 = vand.u32 2147483648, %v7471_v42  ;;  %vm4032_vm2 = vweird.f32 %v7471_v42 }
0x1096   :  { %v3783_v1 = vsel %vm3782_vm3, %v7455_v50, %v3779_v6  ;;  %v3798_v49 = vsel %vm3797_vm10, %v7477_v34, %v3794_v46  ;;  %vm3800_vm11 = vcmp.eq.f32.partialorder %v3799_v56, 8.507059e+37  ;;  %vm4034_vm12 = vmor %vm4032_vm2, %vm4033_vm15 }
0x1097   :  { %4210 = vmatpush.msra.mxu1 %v5197_v55  ;;  %v3788_v17 = vsel %vm3785_vm7, %v3787_v20, %v3783_v1  ;;  %v3803_v54 = vsel %vm3800_vm11, %v3802_v11, %v3798_v49  ;;  %v4031_v5 = vadd.f32 %v5428_v10, %v4030_v7  ;;  %v4039_v53 = vor.u32 1.1754944e-38, %v4038_v4  ;;  %v4268_v1 = vld [vmem:[#allocation13] sm:$0xff] }
0x1098   :  { %v5180_v18 = vpop.permute.xlu1 %5179  ;;  %5024 = vmatmul.msk.f32.vlgmr.msra.gmra.mxu1 %vm528_vm1, %v4167_v13  ;;  %v3789_v50 = vmul.f32 %v7307_v25, %v3788_v17  ;;  %v4036_v25 = vand.u32 2147483647, %v7471_v42  ;;  %v3804_v35 = vmul.f32 %v7331_v30, %v3803_v54 }
0x1099   :  { %v5181_v31 = vunpack.i.l.bf16 %v5180_v18  ;;  %v5182_v24 = vunpack.i.h.bf16 %v5180_v18  ;;  %v4035_v44 = vsel %vm4034_vm12, %v5428_v10, %v4031_v5  ;;  %v3423_v18 = vpop.permute.xlu2 %3422 }
0x109a   :  { %vm4037_vm3 = vcmp.eq.f32.partialorder %v4036_v25, 8.507059e+37  ;;  %v3439_v20 = vpop.permute.xlu0 %3438  ;;  %v3460_v45 = vsel %vm488_vm14, %v7134_v61, %v3423_v18 }
0x109b   :  { %3831 = vmatpush.msrb.mxu3 %v5181_v31  ;;  %v4040_v34 = vsel %vm4037_vm3, %v4039_v53, %v4035_v44 }
0x109c   :  { %4995 = vmatmul.msk.f32.gmra.mxu3 %vm528_vm1, %v3556_v2  ;;  %v4041_v58 = vmul.f32 %v7341_v60, %v4040_v34  ;;  %v4271_v2 = vld [vmem:[#allocation13 + $0x18] sm:$0xff] }
0x109d   :  { %3832 = vmatpush.msrb.mxu3 %v5182_v24 }
0x109f   :  { %4083 = vmatpush.msra.mxu3 %v5191_v27  ;;  %v4273_v27 = vld [vmem:[#allocation13 + $0x28] sm:$0xff] }
0x10a0   :  { %5025 = vmatmul.msk.f32.gmra.mxu1 %vm528_vm1, %v4182_v41  ;;  %4300 = vmatpush.msra.mxu2 %v4273_v27  ;;  %v4269_v41 = vld [vmem:[#allocation13 + $0x8] sm:$0xff] }
0x10a1   :  { %4084 = vmatpush.msra.mxu3 %v5192_v37  ;;  %v3425_v47 = vpop.permute.xlu2 %3424  ;;  %v4270_v37 = vld [vmem:[#allocation13 + $0x10] sm:$0xff] }
0x10a2   :  { %4301 = vmatpush.msra.mxu2 %v4272_v59  ;;  %v3461_v5 = vsel %vm488_vm14, %v7142_v9, %v3425_v47 }
0x10a4   :  { %5006 = vmatmul.msk.f32.vlgmr.msrb.gmra.mxu3 %vm528_vm1, %v3789_v50  ;;  %4302 = vmatpush.msra.mxu2 %v4271_v2  ;;  %v3455_v50 = vpop.permute.xlu0 %3454 }
0x10a6   :  { %4303 = vmatpush.msra.mxu2 %v4270_v37 }
0x10a8   :  { %4304 = vmatpush.msra.mxu2 %v4269_v41 }
0x10aa   :  { %4305 = vmatpush.msra.mxu2 %v4268_v1 }
0x10ac   :  { %5007 = vmatmul.msk.f32.gmra.mxu3 %vm528_vm1, %v3804_v35  ;;  %v3441_v54 = vpop.permute.xlu0 %3440 }
0x10af   :  { %v3708_v51 = vpop.f32.mrf.mxu1 }
0x10b0   :  { %4220 = vrot.lane.b32.xlu2 %v3708_v51, %s5714_s0  ;;  %v3036_v30 = vpop.f32.mrf.mxu3 }
0x10b4   :  { %5018 = vmatmul.msk.f32.vlgmr.msra.gmra.mxu3 %vm528_vm1, %v4041_v58  ;;  %v3457_v44 = vpop.permute.xlu0 %3456 }
0x10b7   :  { %v3711_v52 = vpop.f32.mrf.mxu1 }
0x10bf   :  { %v3960_v63 = vpop.f32.mrf.mxu1 }
0x10c0   :  { %4236 = vrot.lane.b32.xlu2 %v3960_v63, %s5728_s14 }
0x10c3   :  { %v4026_v42 = vpop.xlane.xlu1 %4025 }
0x10c4   :  { %5429 = vrcp.f32 %v4026_v42  ;;  %v4053_v13 = vand.u32 2147483648, %v4026_v42  ;;  %v4051_v39 = vand.u32 2147483647, %v4026_v42  ;;  %vm4047_vm8 = vweird.f32 %v4026_v42 }
0x10c6   :  { %v4054_v60 = vor.u32 1.1754944e-38, %v4053_v13  ;;  %vm4052_vm10 = vcmp.eq.f32.partialorder %v4051_v39, 8.507059e+37 }
0x10c7   :  { %v3963_v15 = vpop.f32.mrf.mxu1 }
0x10c8   :  { %3430 = vrot.lane.b32.xlu2 %v3036_v30, %s5726_s23 }
0x10ca   :  { %v5430_v16 = vpop.eup %5429 }
0x10cb   :  { %v4043_v32 = vmul.f32 %v5430_v16, %v4026_v42  ;;  %vm4048_vm7 = vweird.f32 %v5430_v16 }
0x10cc   :  { %vm4049_vm9 = vmor %vm4047_vm8, %vm4048_vm7 }
0x10cd   :  { %v4044_v55 = vsub.f32 1.0, %v4043_v32 }
0x10cf   :  { %v4045_v29 = vmul.f32 %v5430_v16, %v4044_v55 }
0x10d1   :  { %v4046_v43 = vadd.f32 %v5430_v16, %v4045_v29 }
0x10d3   :  { %v4050_v38 = vsel %vm4049_vm9, %v5430_v16, %v4046_v43 }
0x10d4   :  { %v4055_v19 = vsel %vm4052_vm10, %v4054_v60, %v4050_v38 }
0x10d5   :  { %v4056_v33 = vmul.f32 %v7418_v8, %v4055_v19 }
0x10d7   :  { %5019 = vmatmul.msk.f32.gmra.mxu3 %vm528_vm1, %v4056_v33  ;;  %v5206_v33 = vld [vmem:[%s7792_s13] ss:$0 sm:$0xff] }
0x10fe   :  { %v3039_v40 = vpop.f32.mrf.mxu3 }
0x10ff   :  { %3432 = vrot.lane.b32.xlu1 %v3039_v40, %s5726_s23 }
0x1106   :  { %v3288_v3 = vpop.f32.mrf.mxu3 }
0x1107   :  { %3446 = vrot.lane.b32.xlu2 %v3288_v3, %s5727_s1 }
0x110a   :  { %v4221_v31 = vpop.permute.xlu2 %4220 }
0x110e   :  { %v3291_v21 = vpop.f32.mrf.mxu3 }
0x110f   :  { %3448 = vrot.lane.b32.xlu2 %v3291_v21, %s5727_s1 }
0x1115   :  { %v4212_v62 = vpop.f32.mrf.mxu1 }
0x1117   :  { %v3580_v48 = vpop.f32.mrf.mxu3  ;;  %4222 = vrot.lane.b32.xlu2 %v3711_v52, %s5714_s0 }
0x1118   :  { %v4258_v6 = vsel %vm488_vm14, %v3580_v48, %v4221_v31 }
0x111a   :  { %v4237_v26 = vpop.permute.xlu2 %4236 }
0x111d   :  { %v4215_v0 = vpop.f32.mrf.mxu1 }
0x111f   :  { %v3583_v8 = vpop.f32.mrf.mxu3 }
0x1122   :  { %v3431_v46 = vpop.permute.xlu2 %3430 }
0x1123   :  { %v3462_v12 = vsel %vm528_vm1, %v3460_v45, %v3431_v46 }
0x1124   :  { %v3464_v56 = vsel %vm1282_vm4, %v3462_v12, %v3439_v20 }
0x1127   :  { %v3834_v24 = vpop.f32.mrf.mxu3 }
0x1128   :  { %4228 = vrot.lane.b32.xlu0 %v3834_v24, %s5726_s23 }
0x112f   :  { %v3837_v10 = vpop.f32.mrf.mxu3 }
0x1130   :  { %4252 = vrot.lane.b32.xlu0 %v4212_v62, %s5729_s2 }
0x1137   :  { %v4086_v57 = vpop.f32.mrf.mxu3 }
0x1138   :  { %4244 = vrot.lane.b32.xlu1 %v4086_v57, %s5727_s1  ;;  %4238 = vrot.lane.b32.xlu0 %v3963_v15, %s5728_s14 }
0x1140   :  { %4230 = vrot.lane.b32.xlu1 %v3837_v10, %s5726_s23 }
0x1148   :  { %4254 = vrot.lane.b32.xlu1 %v4215_v0, %s5729_s2 }
0x115a   :  { %v4089_v17 = vpop.f32.mrf.mxu3 }
0x115b   :  { %4246 = vrot.lane.b32.xlu2 %v4089_v17, %s5727_s1 }
0x1161   :  { %v3447_v7 = vpop.permute.xlu2 %3446 }
0x1162   :  { %v3466_v49 = vsel %vm1285_vm5, %v3464_v56, %v3447_v7 }
0x1163   :  { %v3468_v11 = vsel %vm1288_vm6, %v3466_v49, %v3455_v50 }
0x1164   :  { %5026 = vmatmul.msk.f32.vlgmr.msra.gmra.mxu2 %vm261_vm0, %v3468_v11 }
0x1169   :  { %v3449_v61 = vpop.permute.xlu2 %3448 }
0x1171   :  { %v3433_v4 = vpop.permute.xlu1 %3432  ;;  %v4223_v16 = vpop.permute.xlu2 %4222 }
0x1172   :  { %v3463_v25 = vsel %vm528_vm1, %v3461_v5, %v3433_v4  ;;  %v4259_v55 = vsel %vm488_vm14, %v3583_v8, %v4223_v16  ;;  %v4438_v5 = vld [vmem:[%s7793_s10 + $0x58] sm:$0xff]  ;;  %v4435_v4 = vld [vmem:[%s7793_s10 + $0x40] sm:$0xff] }
0x1173   :  { %v3465_v35 = vsel %vm1282_vm4, %v3463_v25, %v3441_v54  ;;  %v4437_v54 = vld [vmem:[%s7793_s10 + $0x50] sm:$0xff]  ;;  %4496 = vmatpush.msrb.mxu0 %v4438_v5  ;;  %v4436_v25 = vld [vmem:[%s7793_s10 + $0x48] sm:$0xff]  ;;  %v4534_v5 = vld [vmem:[%s7796_s9 + $0x58] sm:$0xff] }
0x1174   :  { %v3467_v51 = vsel %vm1285_vm5, %v3465_v35, %v3449_v61  ;;  %4467 = vmatpush.msrb.mxu3 %v4437_v54  ;;  %v4433_v61 = vld [vmem:[%s7793_s10 + $0x30] sm:$0xff]  ;;  %v4434_v35 = vld [vmem:[%s7793_s10 + $0x38] sm:$0xff] }
0x1175   :  { %v3469_v53 = vsel %vm1288_vm6, %v3467_v51, %v3457_v44  ;;  %4497 = vmatpush.msrb.mxu0 %v4436_v25  ;;  %v4431_v44 = vld [vmem:[%s7793_s10 + $0x20] sm:$0xff]  ;;  %v4432_v51 = vld [vmem:[%s7793_s10 + $0x28] sm:$0xff] }
0x1176   :  { %5027 = vmatmul.msk.f32.gmra.mxu2 %vm261_vm0, %v3469_v53  ;;  %4468 = vmatpush.msrb.mxu3 %v4435_v4  ;;  %v4429_v53 = vld [vmem:[%s7793_s10 + $0x10] sm:$0xff]  ;;  %v4543_v4 = vld [vmem:[%s7796_s9 + $0xa0] sm:$0xff] }
0x1177   :  { %4498 = vmatpush.msrb.mxu0 %v4434_v35  ;;  %v4542_v35 = vld [vmem:[%s7796_s9 + $0x98] sm:$0xff] }
0x1178   :  { %4469 = vmatpush.msrb.mxu3 %v4433_v61  ;;  %v4533_v61 = vld [vmem:[%s7796_s9 + $0x50] sm:$0xff] }
0x1179   :  { %4499 = vmatpush.msrb.mxu0 %v4432_v51  ;;  %v4532_v51 = vld [vmem:[%s7796_s9 + $0x48] sm:$0xff] }
0x117a   :  { %4470 = vmatpush.msrb.mxu3 %v4431_v44 }
0x117c   :  { %4471 = vmatpush.msrb.mxu3 %v4429_v53 }
0x119a   :  { %v4229_v34 = vpop.permute.xlu0 %4228 }
0x119b   :  { %v4260_v58 = vsel %vm528_vm1, %v4258_v6, %v4229_v34  ;;  %v4430_v34 = vld [vmem:[%s7793_s10 + $0x18] sm:$0xff] }
0x119c   :  { %v4262_v63 = vsel %vm1282_vm4, %v4260_v58, %v4237_v26  ;;  %4500 = vmatpush.msrb.mxu0 %v4430_v34  ;;  %v4427_v58 = vld [vmem:[%s7793_s10] sm:$0xff] }
0x119d   :  { %4472 = vmatpush.msrb.mxu3 %v4427_v58  ;;  %v4531_v34 = vld [vmem:[%s7796_s9 + $0x40] sm:$0xff] }
0x11a2   :  { %v4253_v9 = vpop.permute.xlu0 %4252 }
0x11aa   :  { %v4245_v52 = vpop.permute.xlu1 %4244  ;;  %v4239_v29 = vpop.permute.xlu0 %4238 }
0x11ab   :  { %v4264_v42 = vsel %vm1285_vm5, %v4262_v63, %v4245_v52  ;;  %v4428_v52 = vld [vmem:[%s7793_s10 + $0x8] sm:$0xff] }
0x11ac   :  { %v4266_v30 = vsel %vm1288_vm6, %v4264_v42, %v4253_v9  ;;  %4501 = vmatpush.msrb.mxu0 %v4428_v52 }
0x11ad   :  { %5028 = vmatmul.msk.f32.gmra.mxu2 %vm261_vm0, %v4266_v30 }
0x11b2   :  { %v4231_v32 = vpop.permute.xlu1 %4230 }
0x11b3   :  { %v4261_v13 = vsel %vm528_vm1, %v4259_v55, %v4231_v32 }
0x11b4   :  { %v4263_v43 = vsel %vm1282_vm4, %v4261_v13, %v4239_v29 }
0x11b5   :  { %v4247_v39 = vpop.permute.xlu2 %4246 }
0x11b6   :  { %v4265_v60 = vsel %vm1285_vm5, %v4263_v43, %v4247_v39 }
0x11ba   :  { %v4255_v38 = vpop.permute.xlu1 %4254 }
0x11bb   :  { %v4267_v19 = vsel %vm1288_vm6, %v4265_v60, %v4255_v38  ;;  %v7647_v60 = vld [vmem:[%s7794_s11] ss:$0 sm:$0xff] }
0x11bc   :  { %5029 = vmatmul.msk.f32.gmra.mxu2 %vm261_vm0, %v4267_v19 }
0x11e7   :  { %v4307_v40 = vpop.f32.mrf.mxu2 }
0x11e8   :  { %v4308_v18 = vadd.f32 %v5206_v33, %v4307_v40 }
0x11ea   :  { %v7585_v3 = vadd.f32 %v4308_v18, %v6734_v23 }
0x11ec   :  { %v4325_v21 = vsel %vm261_vm0, %v7585_v3, 0.0 }
0x11ed   :  { %4326 = vadd.xlane.f32.xlu0 %v4325_v21 }
0x11f9   :  { %v4310_v47 = vpop.f32.mrf.mxu2 }
0x11fa   :  { %v4311_v31 = vadd.f32 %v5206_v33, %v4310_v47 }
0x11fc   :  { %v7590_v48 = vadd.f32 %v4311_v31, %v6746_v28 }
0x11fe   :  { %v4328_v6 = vsel %vm261_vm0, %v7590_v48, 0.0 }
0x11ff   :  { %4329 = vadd.xlane.f32.xlu2 %v4328_v6 }
0x1230   :  { %v4313_v8 = vpop.f32.mrf.mxu2 }
0x1231   :  { %v4314_v15 = vadd.f32 %v5206_v33, %v4313_v8 }
0x1233   :  { %v7595_v24 = vadd.f32 %v4314_v15, %v6814_v36 }
0x1235   :  { %v4331_v23 = vsel %vm261_vm0, %v7595_v24, 0.0 }
0x1236   :  { %4332 = vadd.xlane.f32.xlu1 %v4331_v23 }
0x123f   :  { %v4316_v62 = vpop.f32.mrf.mxu2 }
0x1240   :  { %v4317_v10 = vadd.f32 %v5206_v33, %v4316_v62  ;;  %v7650_v33 = vld [vmem:[%s7795_s15] ss:$0 sm:$0xff] }
0x1242   :  { %v7600_v57 = vadd.f32 %v4317_v10, %v6820_v22 }
0x1244   :  { %v4334_v28 = vsel %vm261_vm0, %v7600_v57, 0.0 }
0x1245   :  { %4335 = vadd.xlane.f32.xlu0 %v4334_v28 }
0x1260   :  { %v4327_v27 = vpop.xlane.xlu0 %4326 }
0x1261   :  { %v4337_v59 = vmul.f32 %v4327_v27, %v5944_v14 }
0x1263   :  { %v7606_v2 = vsub.f32 %v7585_v3, %v4337_v59 }
0x1265   :  { %v4345_v36 = vmul.f32 %v7606_v2, %v7606_v2 }
0x1267   :  { %v4349_v37 = vsel %vm261_vm0, %v4345_v36, 0.0 }
0x1268   :  { %4350 = vadd.xlane.f32.xlu2 %v4349_v37 }
0x1272   :  { %v4330_v41 = vpop.xlane.xlu2 %4329 }
0x1273   :  { %v4338_v22 = vmul.f32 %v4330_v41, %v5944_v14 }
0x1275   :  { %v7613_v1 = vsub.f32 %v7590_v48, %v4338_v22  ;;  %v4538_v22 = vld [vmem:[%s7796_s9 + $0x78] sm:$0xff] }
0x1276   :  { %4559 = vmatpush.msrb.mxu1 %v4538_v22 }
0x1277   :  { %v4346_v0 = vmul.f32 %v7613_v1, %v7613_v1 }
0x1279   :  { %v4352_v26 = vsel %vm261_vm0, %v4346_v0, 0.0 }
0x127a   :  { %4353 = vadd.xlane.f32.xlu1 %v4352_v26  ;;  %v4536_v26 = vld [vmem:[%s7796_s9 + $0x68] sm:$0xff] }
0x12a9   :  { %v4333_v20 = vpop.xlane.xlu1 %4332 }
0x12aa   :  { %v4339_v17 = vmul.f32 %v4333_v20, %v5944_v14  ;;  %v4546_v20 = vld [vmem:[%s7796_s9 + $0xb8] sm:$0xff] }
0x12ab   :  { %4596 = vmatpush.msrb.mxu2 %v4546_v20 }
0x12ac   :  { %v7620_v46 = vsub.f32 %v7595_v24, %v4339_v17 }
0x12ae   :  { %v4347_v45 = vmul.f32 %v7620_v46, %v7620_v46 }
0x12b0   :  { %v4355_v12 = vsel %vm261_vm0, %v4347_v45, 0.0  ;;  %v4545_v45 = vld [vmem:[%s7796_s9 + $0xb0] sm:$0xff] }
0x12b1   :  { %4356 = vadd.xlane.f32.xlu0 %v4355_v12  ;;  %4597 = vmatpush.msrb.mxu2 %v4545_v45 }
0x12b8   :  { %v4336_v50 = vpop.xlane.xlu0 %4335 }
0x12b9   :  { %v4340_v56 = vmul.f32 %v4336_v50, %v5944_v14 }
0x12bb   :  { %v7627_v7 = vsub.f32 %v7600_v57, %v4340_v56  ;;  %v4535_v56 = vld [vmem:[%s7796_s9 + $0x60] sm:$0xff] }
0x12bd   :  { %v4348_v49 = vmul.f32 %v7627_v7, %v7627_v7 }
0x12bf   :  { %v4358_v11 = vsel %vm261_vm0, %v4348_v49, 0.0  ;;  %v4544_v49 = vld [vmem:[%s7796_s9 + $0xa8] sm:$0xff] }
0x12c0   :  { %4359 = vadd.xlane.f32.xlu2 %v4358_v11  ;;  %4598 = vmatpush.msrb.mxu2 %v4544_v49 }
0x12c2   :  { %4599 = vmatpush.msrb.mxu2 %v4543_v4 }
0x12c4   :  { %4600 = vmatpush.msrb.mxu2 %v4542_v35 }
0x12db   :  { %v4351_v63 = vpop.xlane.xlu2 %4350 }
0x12dc   :  { %v4361_v9 = vmul.f32 %v4351_v63, %v5944_v14 }
0x12de   :  { %v4365_v42 = vadd.f32 1e-05, %v4361_v9 }
0x12e0   :  { %5431 = vrsqrt.f32 %v4365_v42  ;;  %vm4375_vm1 = vweird.f32 %v4365_v42 }
0x12e6   :  { %v5432_v30 = vpop.eup %5431 }
0x12e7   :  { %v4370_v16 = vmul.f32 %v5432_v30, %v4365_v42  ;;  %vm4376_vm14 = vweird.f32 %v5432_v30  ;;  %v4530_v42 = vld [vmem:[%s7796_s9 + $0x38] sm:$0xff] }
0x12e8   :  { %vm4377_vm4 = vmor %vm4375_vm1, %vm4376_vm14 }
0x12e9   :  { %v4371_v32 = vmul.f32 %v5432_v30, %v4370_v16  ;;  %v4529_v16 = vld [vmem:[%s7796_s9 + $0x30] sm:$0xff] }
0x12eb   :  { %v4372_v55 = vmul.f32 0.5, %v4371_v32 }
0x12ed   :  { %v4373_v13 = vsub.f32 1.5, %v4372_v55  ;;  %v4354_v29 = vpop.xlane.xlu1 %4353 }
0x12ee   :  { %v4362_v39 = vmul.f32 %v4354_v29, %v5944_v14 }
0x12ef   :  { %v4374_v43 = vmul.f32 %v5432_v30, %v4373_v13 }
0x12f0   :  { %v4366_v38 = vadd.f32 1e-05, %v4362_v39 }
0x12f1   :  { %v4378_v19 = vsel %vm4377_vm4, %v5432_v30, %v4374_v43 }
0x12f2   :  { %v4409_v40 = vmul.f32 %v4378_v19, %v7606_v2  ;;  %5433 = vrsqrt.f32 %v4366_v38  ;;  %vm4385_vm6 = vweird.f32 %v4366_v38  ;;  %v4541_v19 = vld [vmem:[%s7796_s9 + $0x90] sm:$0xff] }
0x12f3   :  { %4601 = vmatpush.msrb.mxu2 %v4541_v19 }
0x12f4   :  { %v4416_v18 = vmul.f32 %v7647_v60, %v4409_v40  ;;  %v4527_v40 = vld [vmem:[%s7796_s9 + $0x20] sm:$0xff] }
0x12f6   :  { %v4423_v21 = vadd.f32 %v7650_v33, %v4416_v18  ;;  %v4540_v18 = vld [vmem:[%s7796_s9 + $0x88] sm:$0xff] }
0x12f7   :  { %4602 = vmatpush.msrb.mxu2 %v4540_v18 }
0x12f8   :  { %v5434_v47 = vpop.eup %5433  ;;  %5030 = vmatmul.msk.f32.vlgmr.msrb.gmra.mxu3 %vm261_vm0, %v4423_v21  ;;  %5034 = vmatmul.msk.f32.vlgmr.msrb.gmra.mxu0 %vm261_vm0, %v4423_v21  ;;  %v4526_v21 = vld [vmem:[%s7796_s9 + $0x18] sm:$0xff] }
0x12f9   :  { %v4380_v31 = vmul.f32 %v5434_v47, %v4366_v38  ;;  %vm4386_vm5 = vweird.f32 %v5434_v47  ;;  %v4528_v38 = vld [vmem:[%s7796_s9 + $0x28] sm:$0xff] }
0x12fa   :  { %vm4387_vm11 = vmor %vm4385_vm6, %vm4386_vm5 }
0x12fb   :  { %v4381_v6 = vmul.f32 %v5434_v47, %v4380_v31  ;;  %v4439_v31 = vld [vmem:[%s7797_s6] sm:$0x3] }
0x12fd   :  { %v4382_v8 = vmul.f32 0.5, %v4381_v6  ;;  %v4442_v6 = vperm.slane %v4439_v31, 1 }
0x12ff   :  { %v4383_v15 = vsub.f32 1.5, %v4382_v8 }
0x1301   :  { %v4384_v23 = vmul.f32 %v5434_v47, %v4383_v15 }
0x1303   :  { %v4388_v62 = vsel %vm4387_vm11, %v5434_v47, %v4384_v23  ;;  %v4523_v47 = vld [vmem:[%s7796_s9] sm:$0xff] }
0x1304   :  { %v4410_v10 = vmul.f32 %v4388_v62, %v7613_v1  ;;  %v4537_v1 = vld [vmem:[%s7796_s9 + $0x70] sm:$0xff]  ;;  %v4441_v62 = vperm.slane %v4439_v31, 0 }
0x1305   :  { %4560 = vmatpush.msrb.mxu1 %v4537_v1 }
0x1306   :  { %v4417_v28 = vmul.f32 %v7647_v60, %v4410_v10 }
0x1307   :  { %4561 = vmatpush.msrb.mxu1 %v4536_v26 }
0x1308   :  { %v4424_v27 = vadd.f32 %v7650_v33, %v4417_v28 }
0x1309   :  { %4562 = vmatpush.msrb.mxu1 %v4535_v56 }
0x130a   :  { %5031 = vmatmul.msk.f32.gmra.mxu3 %vm261_vm0, %v4424_v27  ;;  %5035 = vmatmul.msk.f32.gmra.mxu0 %vm261_vm0, %v4424_v27 }
0x130b   :  { %4563 = vmatpush.msrb.mxu1 %v4534_v5 }
0x130d   :  { %4564 = vmatpush.msrb.mxu1 %v4533_v61  ;;  %v5209_v61 = vld [vmem:[%s7798_s16] ss:$0 sm:$0xff] }
0x130f   :  { %4565 = vmatpush.msrb.mxu1 %v4532_v51 }
0x1311   :  { %4566 = vmatpush.msrb.mxu1 %v4531_v34 }
0x1313   :  { %4567 = vmatpush.msrb.mxu1 %v4530_v42 }
0x1315   :  { %4568 = vmatpush.msrb.mxu1 %v4529_v16 }
0x1317   :  { %4569 = vmatpush.msrb.mxu1 %v4528_v38 }
0x1319   :  { %4570 = vmatpush.msrb.mxu1 %v4527_v40 }
0x131b   :  { %4571 = vmatpush.msrb.mxu1 %v4526_v21 }
0x1324   :  { %v4357_v59 = vpop.xlane.xlu0 %4356 }
0x1325   :  { %v4363_v2 = vmul.f32 %v4357_v59, %v5944_v14 }
0x1327   :  { %v4367_v36 = vadd.f32 1e-05, %v4363_v2 }
0x1329   :  { %5435 = vrsqrt.f32 %v4367_v36  ;;  %vm4395_vm2 = vweird.f32 %v4367_v36 }
0x132f   :  { %v5436_v37 = vpop.eup %5435 }
0x1330   :  { %v4390_v41 = vmul.f32 %v5436_v37, %v4367_v36  ;;  %vm4396_vm15 = vweird.f32 %v5436_v37 }
0x1331   :  { %vm4397_vm12 = vmor %vm4395_vm2, %vm4396_vm15 }
0x1332   :  { %v4391_v0 = vmul.f32 %v5436_v37, %v4390_v41 }
0x1333   :  { %v4360_v17 = vpop.xlane.xlu2 %4359 }
0x1334   :  { %v4392_v12 = vmul.f32 0.5, %v4391_v0  ;;  %v4364_v50 = vmul.f32 %v4360_v17, %v5944_v14 }
0x1336   :  { %v4393_v11 = vsub.f32 1.5, %v4392_v12  ;;  %v4368_v54 = vadd.f32 1e-05, %v4364_v50 }
0x1338   :  { %v4394_v25 = vmul.f32 %v5436_v37, %v4393_v11  ;;  %5437 = vrsqrt.f32 %v4368_v54  ;;  %vm4405_vm7 = vweird.f32 %v4368_v54 }
0x133a   :  { %v4398_v44 = vsel %vm4397_vm12, %v5436_v37, %v4394_v25 }
0x133b   :  { %v4411_v53 = vmul.f32 %v4398_v44, %v7620_v46 }
0x133d   :  { %v4418_v58 = vmul.f32 %v7647_v60, %v4411_v53 }
0x133e   :  { %v5438_v52 = vpop.eup %5437 }
0x133f   :  { %v4400_v63 = vmul.f32 %v5438_v52, %v4368_v54  ;;  %v4425_v9 = vadd.f32 %v7650_v33, %v4418_v58  ;;  %vm4406_vm3 = vweird.f32 %v5438_v52 }
0x1340   :  { %vm4407_vm8 = vmor %vm4405_vm7, %vm4406_vm3 }
0x1341   :  { %v4401_v30 = vmul.f32 %v5438_v52, %v4400_v63  ;;  %5032 = vmatmul.msk.f32.gmra.mxu3 %vm261_vm0, %v4425_v9  ;;  %5036 = vmatmul.msk.f32.gmra.mxu0 %vm261_vm0, %v4425_v9 }
0x1343   :  { %v4402_v46 = vmul.f32 0.5, %v4401_v30 }
0x1345   :  { %v4403_v32 = vsub.f32 1.5, %v4402_v46 }
0x1347   :  { %v4404_v55 = vmul.f32 %v5438_v52, %v4403_v32 }
0x1349   :  { %v4408_v13 = vsel %vm4407_vm8, %v5438_v52, %v4404_v55 }
0x134a   :  { %v4412_v29 = vmul.f32 %v4408_v13, %v7627_v7  ;;  %v4539_v7 = vld [vmem:[%s7796_s9 + $0x80] sm:$0xff] }
0x134b   :  { %4603 = vmatpush.msrb.mxu2 %v4539_v7 }
0x134c   :  { %v4419_v39 = vmul.f32 %v7647_v60, %v4412_v29  ;;  %v4525_v60 = vld [vmem:[%s7796_s9 + $0x10] sm:$0xff] }
0x134d   :  { %4572 = vmatpush.msrb.mxu1 %v4525_v60 }
0x134e   :  { %v4426_v43 = vadd.f32 %v7650_v33, %v4419_v39  ;;  %v4524_v33 = vld [vmem:[%s7796_s9 + $0x8] sm:$0xff] }
0x134f   :  { %4573 = vmatpush.msrb.mxu1 %v4524_v33 }
0x1350   :  { %5033 = vmatmul.msk.f32.gmra.mxu3 %vm261_vm0, %v4426_v43  ;;  %5037 = vmatmul.msk.f32.gmra.mxu0 %vm261_vm0, %v4426_v43 }
0x1351   :  { %4574 = vmatpush.msrb.mxu1 %v4523_v47 }
0x1375   :  { %v4503_v8 = vpop.f32.mrf.mxu0 }
0x1376   :  { %v4504_v15 = vadd.f32 %v4503_v8, %v4442_v6 }
0x1378   :  { %v4516_v23 = vmax.f32 %v4504_v15, 0.0 }
0x137a   :  { %5038 = vmatmul.msk.f32.vlgmr.msrb.gmra.mxu2 %vm2368_vm13, %v4516_v23 }
0x137b   :  { %v4474_v10 = vpop.f32.mrf.mxu3 }
0x137c   :  { %v4475_v28 = vadd.f32 %v4474_v10, %v4441_v62 }
0x137e   :  { %v4515_v27 = vmax.f32 %v4475_v28, 0.0 }
0x1380   :  { %4575 = vmatmul.f32.vlgmr.msrb.gmra.mxu1 %v4515_v27 }
0x1387   :  { %v4506_v59 = vpop.f32.mrf.mxu0 }
0x1388   :  { %v4507_v2 = vadd.f32 %v4506_v59, %v4442_v6  ;;  %v4738_v59 = vld [vmem:[#allocation14 + $0x28] sm:$0xff] }
0x1389   :  { %4765 = vmatpush.msra.mxu3 %v4738_v59 }
0x138a   :  { %v4518_v36 = vmax.f32 %v4507_v2, 0.0  ;;  %v4737_v2 = vld [vmem:[#allocation14 + $0x20] sm:$0xff] }
0x138b   :  { %4766 = vmatpush.msra.mxu3 %v4737_v2 }
0x138c   :  { %5039 = vmatmul.msk.f32.gmra.mxu2 %vm2368_vm13, %v4518_v36  ;;  %v4736_v36 = vld [vmem:[#allocation14 + $0x18] sm:$0xff] }
0x138d   :  { %v4477_v37 = vpop.f32.mrf.mxu3  ;;  %4767 = vmatpush.msra.mxu3 %v4736_v36 }
0x138e   :  { %v4478_v41 = vadd.f32 %v4477_v37, %v4441_v62  ;;  %v4735_v37 = vld [vmem:[#allocation14 + $0x10] sm:$0xff] }
0x138f   :  { %4768 = vmatpush.msra.mxu3 %v4735_v37 }
0x1390   :  { %v4517_v22 = vmax.f32 %v4478_v41, 0.0  ;;  %v4734_v41 = vld [vmem:[#allocation14 + $0x8] sm:$0xff] }
0x1391   :  { %4769 = vmatpush.msra.mxu3 %v4734_v41 }
0x1392   :  { %4578 = vmatmul.f32.gmra.mxu1 %v4517_v22  ;;  %v4733_v22 = vld [vmem:[#allocation14] sm:$0xff] }
0x1393   :  { %4770 = vmatpush.msra.mxu3 %v4733_v22 }
0x13be   :  { %v4509_v1 = vpop.f32.mrf.mxu0 }
0x13bf   :  { %v4510_v0 = vadd.f32 %v4509_v1, %v4442_v6 }
0x13c1   :  { %v4520_v26 = vmax.f32 %v4510_v0, 0.0 }
0x13c3   :  { %5040 = vmatmul.msk.f32.gmra.mxu2 %vm2368_vm13, %v4520_v26 }
0x13c4   :  { %v4480_v20 = vpop.f32.mrf.mxu3 }
0x13c5   :  { %v4481_v17 = vadd.f32 %v4480_v20, %v4441_v62 }
0x13c7   :  { %v4519_v45 = vmax.f32 %v4481_v17, 0.0 }
0x13c9   :  { %4581 = vmatmul.f32.gmra.mxu1 %v4519_v45 }
0x13cd   :  { %v4512_v12 = vpop.f32.mrf.mxu0 }
0x13ce   :  { %v4513_v50 = vadd.f32 %v4512_v12, %v4442_v6 }
0x13d0   :  { %v4522_v56 = vmax.f32 %v4513_v50, 0.0 }
0x13d2   :  { %5041 = vmatmul.msk.f32.gmra.mxu2 %vm2368_vm13, %v4522_v56 }
0x13d3   :  { %v4483_v49 = vpop.f32.mrf.mxu3 }
0x13d4   :  { %v4484_v11 = vadd.f32 %v4483_v49, %v4441_v62 }
0x13d6   :  { %v4521_v54 = vmax.f32 %v4484_v11, 0.0 }
0x13d8   :  { %4584 = vmatmul.f32.gmra.mxu1 %v4521_v54  ;;  %v5210_v54 = vld [vmem:[%s7799_s18] ss:$0 sm:$0xff] }
0x13fd   :  { %v4576_v5 = vpop.f32.mrf.mxu1  ;;  %v4605_v4 = vpop.f32.mrf.mxu2 }
0x13fe   :  { %v4606_v25 = vadd.f32 %v4605_v4, %v4576_v5 }
0x1400   :  { %v4617_v35 = vadd.f32 %v4606_v25, %v7585_v3  ;;  %v5211_v25 = vld [vmem:[%s5879_s27] ss:$0 sm:$0xff]  ;;  %s5730_s27 = smov [#allocation16]  }
0x1401   :  { %s4792_s22 = sshll.u32 %s5730_s27, 4  ;;  %s4793_s22 = int_to_ptr.vmem [resolvable:$true] %s4792_s22 }
0x1402   :  { %v4625_v44 = vadd.f32 %v5209_v61, %v4617_v35 }
0x1404   :  { %v4631_v51 = vsel %vm261_vm0, %v4625_v44, 0.0 }
0x1405   :  { %4632 = vadd.xlane.f32.xlu1 %v4631_v51 }
0x140f   :  { %v4579_v53 = vpop.f32.mrf.mxu1  ;;  %v4608_v34 = vpop.f32.mrf.mxu2 }
0x1410   :  { %v4609_v58 = vadd.f32 %v4608_v34, %v4579_v53 }
0x1412   :  { %v4618_v52 = vadd.f32 %v4609_v58, %v7590_v48 }
0x1414   :  { %v4626_v63 = vadd.f32 %v5209_v61, %v4618_v52 }
0x1416   :  { %v4634_v9 = vsel %vm261_vm0, %v4626_v63, 0.0 }
0x1417   :  { %4635 = vadd.xlane.f32.xlu0 %v4634_v9 }
0x1446   :  { %v4582_v42 = vpop.f32.mrf.mxu1  ;;  %v4611_v30 = vpop.f32.mrf.mxu2 }
0x1447   :  { %v4612_v16 = vadd.f32 %v4611_v30, %v4582_v42 }
0x1449   :  { %v4619_v46 = vadd.f32 %v4612_v16, %v7595_v24 }
0x144b   :  { %v4627_v32 = vadd.f32 %v5209_v61, %v4619_v46 }
0x144d   :  { %v4637_v3 = vsel %vm261_vm0, %v4627_v32, 0.0 }
0x144e   :  { %4638 = vadd.xlane.f32.xlu2 %v4637_v3 }
0x1455   :  { %v4585_v55 = vpop.f32.mrf.mxu1  ;;  %v4614_v13 = vpop.f32.mrf.mxu2 }
0x1456   :  { %v4615_v29 = vadd.f32 %v4614_v13, %v4585_v55 }
0x1458   :  { %v4620_v39 = vadd.f32 %v4615_v29, %v7600_v57 }
0x145a   :  { %v4628_v43 = vadd.f32 %v5209_v61, %v4620_v39 }
0x145c   :  { %v4640_v48 = vsel %vm261_vm0, %v4628_v43, 0.0 }
0x145d   :  { %4641 = vadd.xlane.f32.xlu1 %v4640_v48 }
0x1478   :  { %v4633_v38 = vpop.xlane.xlu1 %4632 }
0x1479   :  { %v4643_v19 = vmul.f32 %v4633_v38, %v5944_v14 }
0x147b   :  { %v4647_v40 = vsub.f32 %v4625_v44, %v4643_v19 }
0x147d   :  { %v4651_v18 = vmul.f32 %v4647_v40, %v4647_v40 }
0x147f   :  { %v4655_v24 = vsel %vm261_vm0, %v4651_v18, 0.0 }
0x1480   :  { %4656 = vadd.xlane.f32.xlu0 %v4655_v24 }
0x148a   :  { %v4636_v21 = vpop.xlane.xlu0 %4635 }
0x148b   :  { %v4644_v7 = vmul.f32 %v4636_v21, %v5944_v14 }
0x148d   :  { %v7715_v60 = vsub.f32 %v4626_v63, %v4644_v7 }
0x148f   :  { %v4652_v57 = vmul.f32 %v7715_v60, %v7715_v60 }
0x1491   :  { %v4658_v33 = vsel %vm261_vm0, %v4652_v57, 0.0 }
0x1492   :  { %4659 = vadd.xlane.f32.xlu2 %v4658_v33 }
0x14c1   :  { %v4639_v47 = vpop.xlane.xlu2 %4638 }
0x14c2   :  { %v4645_v31 = vmul.f32 %v4639_v47, %v5944_v14 }
0x14c4   :  { %v7721_v6 = vsub.f32 %v4627_v32, %v4645_v31 }
0x14c6   :  { %v4653_v8 = vmul.f32 %v7721_v6, %v7721_v6 }
0x14c8   :  { %v4661_v15 = vsel %vm261_vm0, %v4653_v8, 0.0 }
0x14c9   :  { %4662 = vadd.xlane.f32.xlu1 %v4661_v15 }
0x14d0   :  { %v4642_v23 = vpop.xlane.xlu1 %4641 }
0x14d1   :  { %v4646_v62 = vmul.f32 %v4642_v23, %v5944_v14 }
0x14d3   :  { %v7727_v10 = vsub.f32 %v4628_v43, %v4646_v62  ;;  %v5212_v62 = vld [vmem:[%s5889_s24] ss:$0 sm:$0xff]  ;;  %s5655_s24 = sshra.s32 %s4795_s26, 4  ;;  %s5656_s24 = int_to_ptr.hbm [resolvable:$true] %s5655_s24 }
0x14d4   :  { %s5657_s20 = scalar_lea.hbm %s5656_s24, 32  ;;  %p5660_p13 = scmp.lt.s32.totalorder %s5656_s24, %s5894_s30 }
0x14d5   :  { %v4654_v28 = vmul.f32 %v7727_v10, %v7727_v10  ;;  %p5658_p12 = scmp.ne.s32.totalorder %s5656_s24, %s5657_s20  ;;  %p5661_p0 = scmp.lt.s32.totalorder %s5659_s17, %s5657_s20 }
0x14d7   :  { %v4664_v27 = vsel %vm261_vm0, %v4654_v28, 0.0  ;;  %p5662_p1 = por %p5661_p0, %p5660_p13 }
0x14d8   :  { %4665 = vadd.xlane.f32.xlu0 %v4664_v27 }
0x14d9   :  { %p5663_p2 = pnand %p5662_p1, %p5658_p12 }
0x14f3   :  { %v4657_v1 = vpop.xlane.xlu0 %4656 }
0x14f4   :  { %v4667_v0 = vmul.f32 %v4657_v1, %v5944_v14 }
0x14f6   :  { %v4671_v26 = vadd.f32 1e-05, %v4667_v0 }
0x14f8   :  { %5439 = vrsqrt.f32 %v4671_v26  ;;  %vm4681_vm9 = vweird.f32 %v4671_v26 }
0x14fe   :  { %v5440_v20 = vpop.eup %5439 }
0x14ff   :  { %v4676_v17 = vmul.f32 %v5440_v20, %v4671_v26  ;;  %vm4682_vm13 = vweird.f32 %v5440_v20 }
0x1500   :  { %vm4683_vm10 = vmor %vm4681_vm9, %vm4682_vm13 }
0x1501   :  { %v4677_v45 = vmul.f32 %v5440_v20, %v4676_v17 }
0x1503   :  { %v4678_v12 = vmul.f32 0.5, %v4677_v45 }
0x1505   :  { %v4679_v50 = vsub.f32 1.5, %v4678_v12  ;;  %v4660_v56 = vpop.xlane.xlu2 %4659 }
0x1506   :  { %v4668_v49 = vmul.f32 %v4660_v56, %v5944_v14 }
0x1507   :  { %v4680_v11 = vmul.f32 %v5440_v20, %v4679_v50 }
0x1508   :  { %v4672_v5 = vadd.f32 1e-05, %v4668_v49 }
0x1509   :  { %v4684_v4 = vsel %vm4683_vm10, %v5440_v20, %v4680_v11 }
0x150a   :  { %v4715_v61 = vmul.f32 %v4684_v4, %v4647_v40  ;;  %5441 = vrsqrt.f32 %v4672_v5  ;;  %vm4691_vm1 = vweird.f32 %v4672_v5 }
0x150c   :  { %v4722_v35 = vmul.f32 %v5210_v54, %v4715_v61 }
0x150e   :  { %v4729_v44 = vadd.f32 %v5211_v25, %v4722_v35 }
0x1510   :  { %v5442_v51 = vpop.eup %5441  ;;  %5042 = vmatmul.msk.f32.vlgmr.msra.gmra.mxu3 %vm261_vm0, %v4729_v44 }
0x1511   :  { %v4686_v53 = vmul.f32 %v5442_v51, %v4672_v5  ;;  %vm4692_vm14 = vweird.f32 %v5442_v51 }
0x1512   :  { %vm4693_vm4 = vmor %vm4691_vm1, %vm4692_vm14 }
0x1513   :  { %v4687_v34 = vmul.f32 %v5442_v51, %v4686_v53 }
0x1515   :  { %v4688_v58 = vmul.f32 0.5, %v4687_v34 }
0x1517   :  { %v4689_v52 = vsub.f32 1.5, %v4688_v58 }
0x1519   :  { %v4690_v63 = vmul.f32 %v5442_v51, %v4689_v52 }
0x151b   :  { %v4694_v9 = vsel %vm4693_vm4, %v5442_v51, %v4690_v63 }
0x151c   :  { %v4716_v42 = vmul.f32 %v4694_v9, %v7715_v60 }
0x151e   :  { %v4723_v30 = vmul.f32 %v5210_v54, %v4716_v42 }
0x1520   :  { %v4730_v16 = vadd.f32 %v5211_v25, %v4723_v30 }
0x1522   :  { %5043 = vmatmul.msk.f32.gmra.mxu3 %vm261_vm0, %v4730_v16 }
0x153c   :  { %v4663_v46 = vpop.xlane.xlu1 %4662 }
0x153d   :  { %v4669_v32 = vmul.f32 %v4663_v46, %v5944_v14 }
0x153f   :  { %v4673_v3 = vadd.f32 1e-05, %v4669_v32 }
0x1541   :  { %5443 = vrsqrt.f32 %v4673_v3  ;;  %vm4701_vm6 = vweird.f32 %v4673_v3 }
0x1547   :  { %v5444_v55 = vpop.eup %5443 }
0x1548   :  { %v4696_v13 = vmul.f32 %v5444_v55, %v4673_v3  ;;  %vm4702_vm5 = vweird.f32 %v5444_v55 }
0x1549   :  { %vm4703_vm11 = vmor %vm4701_vm6, %vm4702_vm5 }
0x154a   :  { %v4697_v29 = vmul.f32 %v5444_v55, %v4696_v13 }
0x154b   :  { %v4666_v39 = vpop.xlane.xlu0 %4665 }
0x154c   :  { %v4698_v43 = vmul.f32 0.5, %v4697_v29  ;;  %v4670_v48 = vmul.f32 %v4666_v39, %v5944_v14 }
0x154e   :  { %v4699_v38 = vsub.f32 1.5, %v4698_v43  ;;  %v4674_v19 = vadd.f32 1e-05, %v4670_v48 }
0x1550   :  { %v4700_v40 = vmul.f32 %v5444_v55, %v4699_v38  ;;  %5445 = vrsqrt.f32 %v4674_v19  ;;  %vm4711_vm2 = vweird.f32 %v4674_v19 }
0x1552   :  { %v4704_v18 = vsel %vm4703_vm11, %v5444_v55, %v4700_v40 }
0x1553   :  { %v4717_v24 = vmul.f32 %v4704_v18, %v7721_v6 }
0x1555   :  { %v4724_v21 = vmul.f32 %v5210_v54, %v4717_v24 }
0x1556   :  { %v5446_v7 = vpop.eup %5445 }
0x1557   :  { %v4706_v60 = vmul.f32 %v5446_v7, %v4674_v19  ;;  %v4731_v57 = vadd.f32 %v5211_v25, %v4724_v21  ;;  %vm4712_vm15 = vweird.f32 %v5446_v7 }
0x1558   :  { %vm4713_vm12 = vmor %vm4711_vm2, %vm4712_vm15 }
0x1559   :  { %v4707_v33 = vmul.f32 %v5446_v7, %v4706_v60  ;;  %5044 = vmatmul.msk.f32.gmra.mxu3 %vm261_vm0, %v4731_v57 }
0x155b   :  { %v4708_v47 = vmul.f32 0.5, %v4707_v33 }
0x155d   :  { %v4709_v14 = vsub.f32 1.5, %v4708_v47 }
0x155f   :  { %v4710_v31 = vmul.f32 %v5446_v7, %v4709_v14 }
0x1561   :  { %v4714_v8 = vsel %vm4713_vm12, %v5446_v7, %v4710_v31 }
0x1562   :  { %v4718_v15 = vmul.f32 %v4714_v8, %v7727_v10 }
0x1564   :  { %v4725_v23 = vmul.f32 %v5210_v54, %v4718_v15 }
0x1566   :  { %v4732_v6 = vadd.f32 %v5211_v25, %v4725_v23 }
0x1568   :  { %5045 = vmatmul.msk.f32.gmra.mxu3 %vm261_vm0, %v4732_v6 }
0x1593   :  { %v4772_v28 = vpop.f32.mrf.mxu3 }
0x1594   :  { %v4773_v27 = vadd.f32 %v5212_v62, %v4772_v28 }
0x1596   :  { %4784 = vst [vmem:[#allocation16] sm:$0xff] %v4773_v27 }
0x15a5   :  { %v4775_v59 = vpop.f32.mrf.mxu3 }
0x15a6   :  { %v4776_v2 = vadd.f32 %v5212_v62, %v4775_v59 }
0x15a8   :  { %4785 = vst [vmem:[#allocation16 + $0x8] sm:$0xff] %v4776_v2 }
0x15dc   :  { %v4778_v36 = vpop.f32.mrf.mxu3 }
0x15dd   :  { %v4779_v37 = vadd.f32 %v5212_v62, %v4778_v36 }
0x15df   :  { %4786 = vst [vmem:[#allocation16 + $0x10] sm:$0xff] %v4779_v37 }
0x15eb   :  { %v4781_v10 = vpop.f32.mrf.mxu3 }
0x15ec   :  { %v4782_v41 = vadd.f32 %v5212_v62, %v4781_v10 }
0x15ee   :  { %4787 = vst [vmem:[#allocation16 + $0x18] sm:$0xff] %v4782_v41 }
0x15ef   :  { %5666 = shalt.err (!%p5663_p2)
}
0x15f0   :  { %4800 = dma.vmem_to_hbm [thread:$0]  %s4793_s22, 512, %s4795_s26, [#allocation4], %s5713_s28, %s5713_s28, %s5714_s0  }
0x15f1   :  { %5677 = dma.done.wait [#allocation4], 512  }
0x15f2   :  { %5678 = vsyncadd [#allocation4], 4294966784 }
0x15f3   :  { %4805 = vsyncpa [#allocation3], 1 }
0x15f4   :  { %4806 = vsyncpa [#allocation6], 1 }
0x15f5   :  { %4807 = vsyncpa [#allocation9], 1 }
0x15f6   :  { %4808 = vsyncpa [#allocation12], 1 }
0x15f7   :  { %4809 = vsyncpa [#allocation15], 1 }
0x15f8   :  { %4810 = vsyncpa [#allocation4], 1 }

</bundles_post_ra>
